<compile_context>
chip_gen: v7x
topology: tpu7x:2x2x1
jax: 0.10.0
libtpu: 0.0.40
codegen_flags: <defaults>
</compile_context>

<pallas_src>
import functools

import jax
import jax.numpy as jnp
from jax.experimental import pallas as pl
from jax.experimental.pallas import tpu as pltpu

NUM_GROUPS = 16
EMBED_T = 256


# ----------------------------------------------------------------------------
# Helpers (wrapper-side, XLA)
# ----------------------------------------------------------------------------
def _group_pool_matrix(c):
    """(C, C) f32 matrix P with P[i,j] = 1 iff channels i, j share a group."""
    cpg = c // NUM_GROUPS
    gidx = jnp.arange(c) // cpg
    return (gidx[:, None] == gidx[None, :]).astype(jnp.float32)


def _conv_weight_2d(w):
    """(Cout, Cin, 3, 3) -> (Cout, 9*Cin) bf16, columns tap-major (ky, kx, cin)."""
    cout, cin = w.shape[0], w.shape[1]
    return jnp.transpose(w, (0, 2, 3, 1)).reshape(cout, 9 * cin).astype(jnp.bfloat16)


def _interior_mask(h, w):
    """(1, (H+2)*(W+2)) f32 mask, 1 at interior pixels of the padded grid."""
    ro = jnp.arange(h + 2)
    so = jnp.arange(w + 2)
    m2d = ((ro[:, None] >= 1) & (ro[:, None] <= h)
           & (so[None, :] >= 1) & (so[None, :] <= w))
    return m2d.reshape(1, (h + 2) * (w + 2)).astype(jnp.float32)


# ----------------------------------------------------------------------------
# Fused ResBlock kernel (one sample per grid step, channel-major / lane = L)
# ----------------------------------------------------------------------------
def _resblock_kernel(xsrc_ref, w1_ref, b1_ref, gamma_ref, bias_ref, w2_ref,
                     b2_ref, pool_ref, mask_ref, o_ref,
                     im1_ref, im2_ref, hsrc_ref,
                     *, H, W, Cin, Cout, cpg, eps, has_res_conv):
    L = (H + 2) * (W + 2)
    margin = W + 3
    row = W + 2

    # ---- im2col of the margin-extended flat input (shared by conv1 + res_conv)
    for ky in range(3):
        for kx in range(3):
            tap = 3 * ky + kx
            start = margin + (ky - 1) * row + (kx - 1)
            im1_ref[tap * Cin:(tap + 1) * Cin, :] = xsrc_ref[:, start:start + L]

    # ---- conv1 (+ fused res_conv rows): single deep-K MXU matmul, f32 acc
    hr = jnp.dot(w1_ref[...], im1_ref[...], preferred_element_type=jnp.float32)
    h = hr[0:Cout, :] + b1_ref[...]                               # (Cout, L)

    # ---- GroupNorm (+ fused beta + t_emb shift) + SiLU (border masked out)
    mask = mask_ref[...]                                          # (1, L)
    inv_n = 1.0 / float(H * W * cpg)
    hm = h * mask
    s1 = jnp.sum(hm, axis=1, keepdims=True)                       # (Cout, 1)
    s2 = jnp.sum(hm * h, axis=1, keepdims=True)
    mean = jnp.dot(pool_ref[...], s1, preferred_element_type=jnp.float32) * inv_n
    msq = jnp.dot(pool_ref[...], s2, preferred_element_type=jnp.float32) * inv_n
    inv_std = jax.lax.rsqrt(msq - mean * mean + eps)
    y = (h - mean) * inv_std * gamma_ref[...] + bias_ref[...]
    # SiLU (EUP exp + approx reciprocal).  Dropout(p=0.1) is identity in eval.
    # TODO(synk): training-mode dropout (stateful PRNG mask) not implemented.
    y = y * pl.reciprocal(1.0 + jnp.exp(-y), approx=True)
    y = y * mask                                # zero padded-grid border for conv2

    # ---- stage conv2 source: only the tiny flat margins are zero-filled
    hsrc_ref[:, 0:margin] = jnp.zeros((Cout, margin), jnp.bfloat16)
    hsrc_ref[:, margin:margin + L] = y.astype(jnp.bfloat16)
    hsrc_ref[:, margin + L:margin + L + margin] = jnp.zeros((Cout, margin),
                                                            jnp.bfloat16)

    # ---- im2col for conv2 + single deep-K matmul
    for ky in range(3):
        for kx in range(3):
            tap = 3 * ky + kx
            start = margin + (ky - 1) * row + (kx - 1)
            im2_ref[tap * Cout:(tap + 1) * Cout, :] = hsrc_ref[:, start:start + L]
    out = jnp.dot(w2_ref[...], im2_ref[...], preferred_element_type=jnp.float32)
    out = out + b2_ref[...]

    # ---- residual (res_conv rows came for free from the fused conv1 matmul)
    if has_res_conv:
        out = out + hr[Cout:2 * Cout, :]
    else:
        out = out + xsrc_ref[:, margin:margin + L].astype(jnp.float32)

    o_ref[...] = out.astype(o_ref.dtype)


def resblock(x_nchw, embeddings, p, *, eps=1e-6):
    """Fused ResBlock forward (eval mode). x_nchw: (B, Cin, H, W) float32."""
    B, Cin, H, W = x_nchw.shape
    Cout = p["w1"].shape[0]
    L = (H + 2) * (W + 2)
    margin = W + 3
    Lsrc = L + 2 * margin
    cpg = Cout // NUM_GROUPS
    has_res_conv = "wr" in p
    if not has_res_conv:
        assert Cin == Cout, "identity residual requires Cin == Cout"

    # bf16 activation tile: zero-pad spatially, flatten, add flat margins.
    xsrc = jnp.pad(x_nchw.astype(jnp.bfloat16),
                   ((0, 0), (0, 0), (1, 1), (1, 1))).reshape(B, Cin, L)
    xsrc = jnp.pad(xsrc, ((0, 0), (0, 0), (margin, margin)))

    # t_emb projection folded into the GN shift (tiny XLA matmul, no extra kernel).
    temb = embeddings @ p["wt"].T + p["bt"]                       # (B, Cout)
    fused_bias = (p["beta"][None, :] + temb).reshape(B, Cout, 1).astype(jnp.float32)

    if has_res_conv:
        w1 = jnp.concatenate([_conv_weight_2d(p["w1"]),
                              _conv_weight_2d(p["wr"])], axis=0)   # (2Cout, 9Cin)
        b2 = (p["b2"] + p["br"]).reshape(Cout, 1).astype(jnp.float32)
    else:
        w1 = _conv_weight_2d(p["w1"])                              # (Cout, 9Cin)
        b2 = p["b2"].reshape(Cout, 1).astype(jnp.float32)
    Cw1 = w1.shape[0]
    w2 = _conv_weight_2d(p["w2"])
    b1 = p["b1"].reshape(Cout, 1).astype(jnp.float32)
    gamma = p["gamma"].reshape(Cout, 1).astype(jnp.float32)
    pool = _group_pool_matrix(Cout)
    mask = _interior_mask(H, W)

    kernel = functools.partial(_resblock_kernel, H=H, W=W, Cin=Cin, Cout=Cout,
                               cpg=cpg, eps=eps, has_res_conv=has_res_conv)
    # TODO(synk): derive vmem_limit_bytes / spatial tiling per shape for v7x.
    out = pl.pallas_call(
        kernel,
        out_shape=jax.ShapeDtypeStruct((B, Cout, L), jnp.float32),
        grid_spec=pltpu.PrefetchScalarGridSpec(
            num_scalar_prefetch=0,
            grid=(B,),
            in_specs=[
                pl.BlockSpec((None, Cin, Lsrc), lambda i: (i, 0, 0)),   # xsrc
                pl.BlockSpec((Cw1, 9 * Cin), lambda i: (0, 0)),         # w1|wr
                pl.BlockSpec((Cout, 1), lambda i: (0, 0)),              # b1
                pl.BlockSpec((Cout, 1), lambda i: (0, 0)),              # gamma
                pl.BlockSpec((None, Cout, 1), lambda i: (i, 0, 0)),     # beta+temb
                pl.BlockSpec((Cout, 9 * Cout), lambda i: (0, 0)),       # w2
                pl.BlockSpec((Cout, 1), lambda i: (0, 0)),              # b2(+br)
                pl.BlockSpec((Cout, Cout), lambda i: (0, 0)),           # group pool
                pl.BlockSpec((1, L), lambda i: (0, 0)),                 # interior mask
            ],
            out_specs=pl.BlockSpec((None, Cout, L), lambda i: (i, 0, 0)),
            scratch_shapes=[
                pltpu.VMEM((9 * Cin, L), jnp.bfloat16),     # im2col (conv1/res)
                pltpu.VMEM((9 * Cout, L), jnp.bfloat16),    # im2col (conv2)
                pltpu.VMEM((Cout, Lsrc), jnp.bfloat16),     # conv2 source w/ margins
            ],
        ),
        compiler_params=pltpu.CompilerParams(dimension_semantics=("parallel",)),
    )(xsrc, w1, b1, gamma, fused_bias, w2, b2, pool, mask)

    out = out.reshape(B, Cout, H + 2, W + 2)[:, :, 1:H + 1, 1:W + 1]
    return out


# ----------------------------------------------------------------------------
# Fused AttnBlock kernel (one sample per grid step, channel-major / lane = HW)
# ----------------------------------------------------------------------------
def _attn_kernel(x_ref, gamma_ref, beta_ref, wqkv_ref, bqkv_ref, wp_ref, bp_ref,
                 pool_ref, o_ref, *, C, HW, cpg, eps, scale):
    x = x_ref[...]                                                 # (C, HW) f32
    inv_n = 1.0 / float(HW * cpg)
    s1 = jnp.sum(x, axis=1, keepdims=True)
    s2 = jnp.sum(x * x, axis=1, keepdims=True)
    mean = jnp.dot(pool_ref[...], s1, preferred_element_type=jnp.float32) * inv_n
    msq = jnp.dot(pool_ref[...], s2, preferred_element_type=jnp.float32) * inv_n
    inv_std = jax.lax.rsqrt(msq - mean * mean + eps)
    hn = ((x - mean) * inv_std * gamma_ref[...] + beta_ref[...]).astype(jnp.bfloat16)

    # Fused Q|K|V: one (3C, C) x (C, HW) matmul, f32 accumulation.
    qkv = (jnp.dot(wqkv_ref[...], hn, preferred_element_type=jnp.float32)
           + bqkv_ref[...])
    q = qkv[0:C, :]
    k = qkv[C:2 * C, :]
    v = qkv[2 * C:3 * C, :]

    # Scores (HW, HW): lane-dense on both axes.
    # TODO(synk): blocked online-softmax (flash) variant for production HW on v7x.
    q_t = jnp.transpose(q)                                         # (HW, C)
    s = jnp.dot(q_t.astype(jnp.bfloat16), k.astype(jnp.bfloat16),
                preferred_element_type=jnp.float32) * scale
    m = jnp.max(s, axis=-1, keepdims=True)
    e = jnp.exp(s - m)
    p = e / jnp.sum(e, axis=-1, keepdims=True)       # exact softmax normalization

    a = jax.lax.dot_general(v.astype(jnp.bfloat16), p.astype(jnp.bfloat16),
                            (((1,), (1,)), ((), ())),
                            preferred_element_type=jnp.float32)    # (C, HW)
    out = (jnp.dot(wp_ref[...], a.astype(jnp.bfloat16),
                   preferred_element_type=jnp.float32) + bp_ref[...])
    o_ref[...] = (x + out).astype(o_ref.dtype)


def attn_block(x_nchw, p, *, eps=1e-6):
    """Fused AttnBlock forward. x_nchw: (B, C, H, W) float32."""
    B, C, H, W = x_nchw.shape
    HW = H * W
    cpg = C // NUM_GROUPS
    xf = x_nchw.reshape(B, C, HW)

    wqkv = jnp.concatenate([p["wq"], p["wk"], p["wv"]], axis=0).astype(jnp.bfloat16)
    bqkv = jnp.concatenate([p["bq"], p["bk"], p["bv"]]).reshape(3 * C, 1)
    bqkv = bqkv.astype(jnp.float32)
    wp = p["wp"].astype(jnp.bfloat16)
    bp = p["bp"].reshape(C, 1).astype(jnp.float32)
    gamma = p["gn_gamma"].reshape(C, 1).astype(jnp.float32)
    beta = p["gn_beta"].reshape(C, 1).astype(jnp.float32)
    pool = _group_pool_matrix(C)

    kernel = functools.partial(_attn_kernel, C=C, HW=HW, cpg=cpg, eps=eps,
                               scale=1.0 / (C ** 0.5))
    out = pl.pallas_call(
        kernel,
        out_shape=jax.ShapeDtypeStruct((B, C, HW), jnp.float32),
        grid_spec=pltpu.PrefetchScalarGridSpec(
            num_scalar_prefetch=0,
            grid=(B,),
            in_specs=[
                pl.BlockSpec((None, C, HW), lambda i: (i, 0, 0)),
                pl.BlockSpec((C, 1), lambda i: (0, 0)),            # gamma
                pl.BlockSpec((C, 1), lambda i: (0, 0)),            # beta
                pl.BlockSpec((3 * C, C), lambda i: (0, 0)),        # wq|wk|wv
                pl.BlockSpec((3 * C, 1), lambda i: (0, 0)),        # bq|bk|bv
                pl.BlockSpec((C, C), lambda i: (0, 0)),            # wp
                pl.BlockSpec((C, 1), lambda i: (0, 0)),            # bp
                pl.BlockSpec((C, C), lambda i: (0, 0)),            # group pool
            ],
            out_specs=pl.BlockSpec((None, C, HW), lambda i: (i, 0, 0)),
        ),
        compiler_params=pltpu.CompilerParams(dimension_semantics=("parallel",)),
    )(xf, gamma, beta, wqkv, bqkv, wp, bp, pool)
    return out.reshape(B, C, H, W)


# ----------------------------------------------------------------------------
# UpBlock forward (everything stays NCHW; upsample/concat are XLA glue)
# ----------------------------------------------------------------------------
def upblock_forward(x_nchw, embeddings, skips_nchw, params):
    skips = list(skips_nchw)
    x = jnp.repeat(jnp.repeat(x_nchw, 2, axis=2), 2, axis=3)  # nearest x2
    x = jnp.concatenate([x, skips.pop()], axis=1)
    x = resblock(x, embeddings, params["res1"])
    x = jnp.concatenate([x, skips.pop()], axis=1)
    x = resblock(x, embeddings, params["res2"])
    if "attn" in params:
        x = attn_block(x, params["attn"])
    return x


# ----------------------------------------------------------------------------
# Pure-JAX reference (correctness check)
# ----------------------------------------------------------------------------
def ref_resblock(x, emb, p, eps=1e-6):
    dn = ("NCHW", "OIHW", "NCHW")

    def conv(h, w, b):
        y = jax.lax.conv_general_dilated(h, w, (1, 1), ((1, 1), (1, 1)),
                                         dimension_numbers=dn)
        return y + b[None, :, None, None]

    residual = x
    if "wr" in p:
        residual = conv(x, p["wr"], p["br"])
    h = conv(x, p["w1"], p["b1"])
    B, C, H, W = h.shape
    g = h.reshape(B, NUM_GROUPS, C // NUM_GROUPS, H, W)
    mean = g.mean(axis=(2, 3, 4), keepdims=True)
    var = g.var(axis=(2, 3, 4), keepdims=True)
    gn = ((g - mean) / jnp.sqrt(var + eps)).reshape(B, C, H, W)
    gn = gn * p["gamma"][None, :, None, None] + p["beta"][None, :, None, None]
    t = emb @ p["wt"].T + p["bt"]
    h = gn + t[:, :, None, None]
    h = h * jax.nn.sigmoid(h)
    h = conv(h, p["w2"], p["b2"])
    return h + residual


def ref_attn(x, p, eps=1e-6):
    B, C, H, W = x.shape
    g = x.reshape(B, NUM_GROUPS, C // NUM_GROUPS, H, W)
    mean = g.mean(axis=(2, 3, 4), keepdims=True)
    var = g.var(axis=(2, 3, 4), keepdims=True)
    hn = ((g - mean) / jnp.sqrt(var + eps)).reshape(B, C, H, W)
    hn = hn * p["gn_gamma"][None, :, None, None] + p["gn_beta"][None, :, None, None]

    def conv1x1(h, w, b):
        return jnp.einsum("bchw,oc->bohw", h, w) + b[None, :, None, None]

    q = conv1x1(hn, p["wq"], p["bq"]).reshape(B, C, H * W).swapaxes(1, 2)
    k = conv1x1(hn, p["wk"], p["bk"]).reshape(B, C, H * W)
    v = conv1x1(hn, p["wv"], p["bv"]).reshape(B, C, H * W)
    w_ = jnp.einsum("bic,bcj->bij", q, k) * (C ** -0.5)
    w_ = jax.nn.softmax(w_, axis=-1)
    h_ = jnp.einsum("bcj,bij->bci", v, w_).reshape(B, C, H, W)
    h_ = conv1x1(h_, p["wp"], p["bp"])
    return x + h_


def ref_upblock(x, emb, skips, params):
    skips = list(skips)
    x = jnp.repeat(jnp.repeat(x, 2, axis=2), 2, axis=3)
    x = jnp.concatenate([x, skips.pop()], axis=1)
    x = ref_resblock(x, emb, params["res1"])
    x = jnp.concatenate([x, skips.pop()], axis=1)
    x = ref_resblock(x, emb, params["res2"])
    if "attn" in params:
        x = ref_attn(x, params["attn"])
    return x


# ----------------------------------------------------------------------------
if __name__ == "__main__":
    B = 2
    in_channels, out_channels = 32, 32     # res1: 32->32 (identity residual)
    H0 = W0 = 8                            # spatial before nearest x2 upsample
    H, W = 2 * H0, 2 * W0

    key = jax.random.PRNGKey(0)
    kit = iter(jax.random.split(key, 48))

    def nrm(shape, scale=0.05):
        return scale * jax.random.normal(next(kit), shape, jnp.float32)

    x = jax.random.normal(next(kit), (B, in_channels // 2, H0, W0), jnp.float32)
    emb = jax.random.normal(next(kit), (B, EMBED_T), jnp.float32)
    skips = [jax.random.normal(next(kit), (B, in_channels // 2, H, W), jnp.float32),
             jax.random.normal(next(kit), (B, in_channels // 2, H, W), jnp.float32)]

    def res_params(cin, cout):
        p = {}
        if cin != cout:
            p["wr"] = nrm((cout, cin, 3, 3)); p["br"] = nrm((cout,))
        p["w1"] = nrm((cout, cin, 3, 3)); p["b1"] = nrm((cout,))
        p["gamma"] = 1.0 + nrm((cout,)); p["beta"] = nrm((cout,))
        p["wt"] = nrm((cout, EMBED_T)); p["bt"] = nrm((cout,))
        p["w2"] = nrm((cout, cout, 3, 3)); p["b2"] = nrm((cout,))
        return p

    def attn_params(c):
        p = {"gn_gamma": 1.0 + nrm((c,)), "gn_beta": nrm((c,))}
        for n in ("q", "k", "v", "p"):
            p["w" + n] = nrm((c, c)); p["b" + n] = nrm((c,))
        return p

    params = {
        "res1": res_params(in_channels, out_channels),                      # 32 -> 32
        "res2": res_params(in_channels // 2 + out_channels, out_channels),  # 48 -> 32
        "attn": attn_params(out_channels),
    }

    out = jax.jit(upblock_forward)(x, emb, skips, params)
    out = jax.block_until_ready(out)
    assert out.shape == (B, out_channels, H, W), out.shape

    ref = ref_upblock(x, emb, skips, params)
    max_err = float(jnp.max(jnp.abs(out - ref)))
    # bf16 activation tiles + bf16 MXU inputs (f32 accumulation) -> loose tolerance.
    if not bool(jnp.allclose(out, ref, atol=5e-2, rtol=5e-2)):
        raise AssertionError(
            f"Pallas UpBlock output mismatch vs JAX reference (max abs err = {max_err:.3e})")
    print("KERNEL_OK")
</pallas_src>

<mosaic_0001>
module attributes {stable_mosaic.version = 11 : i64} {
  func.func @_resblock_kernel(%arg0: i32, %arg1: memref<1x32x362xbf16, #tpu.memory_space<vmem>>, %arg2: memref<32x288xbf16, #tpu.memory_space<vmem>>, %arg3: memref<32x1xf32, #tpu.memory_space<vmem>>, %arg4: memref<32x1xf32, #tpu.memory_space<vmem>>, %arg5: memref<1x32x1xf32, #tpu.memory_space<vmem>>, %arg6: memref<32x288xbf16, #tpu.memory_space<vmem>>, %arg7: memref<32x1xf32, #tpu.memory_space<vmem>>, %arg8: memref<32x32xf32, #tpu.memory_space<vmem>>, %arg9: memref<1x324xf32, #tpu.memory_space<vmem>>, %arg10: memref<1x32x324xf32, #tpu.memory_space<vmem>>, %arg11: memref<288x324xbf16, #tpu.memory_space<vmem>>, %arg12: memref<288x324xbf16, #tpu.memory_space<vmem>>, %arg13: memref<32x362xbf16, #tpu.memory_space<vmem>>) attributes {dimension_semantics = [#tpu.dimension_semantics<parallel>], iteration_bounds = array<i64: 2>, scalar_prefetch = 0 : i64, scratch_operands = 3 : i64, tpu.core_type = #tpu.core_type<tc>, window_params = [{transform_indices = @transform_0, window_bounds = array<i64: 1, 32, 362>}, {pipeline_mode = #tpu.pipeline_mode<synchronous>, transform_indices = @transform_1, window_bounds = array<i64: 32, 288>}, {pipeline_mode = #tpu.pipeline_mode<synchronous>, transform_indices = @transform_2, window_bounds = array<i64: 32, 1>}, {pipeline_mode = #tpu.pipeline_mode<synchronous>, transform_indices = @transform_3, window_bounds = array<i64: 32, 1>}, {transform_indices = @transform_4, window_bounds = array<i64: 1, 32, 1>}, {pipeline_mode = #tpu.pipeline_mode<synchronous>, transform_indices = @transform_5, window_bounds = array<i64: 32, 288>}, {pipeline_mode = #tpu.pipeline_mode<synchronous>, transform_indices = @transform_6, window_bounds = array<i64: 32, 1>}, {pipeline_mode = #tpu.pipeline_mode<synchronous>, transform_indices = @transform_7, window_bounds = array<i64: 32, 32>}, {pipeline_mode = #tpu.pipeline_mode<synchronous>, transform_indices = @transform_8, window_bounds = array<i64: 1, 324>}, {transform_indices = @transform_9, window_bounds = array<i64: 1, 32, 324>}]} {
    %c0 = arith.constant 0 : index
    %c0_0 = arith.constant 0 : index
    %c0_1 = arith.constant 0 : index
    %0 = vector.load %arg1[%c0, %c0_0, %c0_1] : memref<1x32x362xbf16, #tpu.memory_space<vmem>>, vector<1x32x324xbf16>
    %1 = vector.shape_cast %0 : vector<1x32x324xbf16> to vector<32x324xbf16>
    %c0_2 = arith.constant 0 : index
    %c0_3 = arith.constant 0 : index
    %2 = vector.load %arg11[%c0_2, %c0_3] : memref<288x324xbf16, #tpu.memory_space<vmem>>, vector<32x324xbf16>
    tpu.vector_store %arg11[%c0_2, %c0_3], %1 {strides = array<i32>} : memref<288x324xbf16, #tpu.memory_space<vmem>>, vector<32x324xbf16>,
    %c0_4 = arith.constant 0 : index
    %c0_5 = arith.constant 0 : index
    %c1 = arith.constant 1 : index
    %3 = vector.load %arg1[%c0_4, %c0_5, %c1] : memref<1x32x362xbf16, #tpu.memory_space<vmem>>, vector<1x32x324xbf16>
    %4 = vector.shape_cast %3 : vector<1x32x324xbf16> to vector<32x324xbf16>
    %c32 = arith.constant 32 : index
    %c0_6 = arith.constant 0 : index
    %5 = vector.load %arg11[%c32, %c0_6] : memref<288x324xbf16, #tpu.memory_space<vmem>>, vector<32x324xbf16>
    tpu.vector_store %arg11[%c32, %c0_6], %4 {strides = array<i32>} : memref<288x324xbf16, #tpu.memory_space<vmem>>, vector<32x324xbf16>,
    %c0_7 = arith.constant 0 : index
    %c0_8 = arith.constant 0 : index
    %c2 = arith.constant 2 : index
    %6 = vector.load %arg1[%c0_7, %c0_8, %c2] : memref<1x32x362xbf16, #tpu.memory_space<vmem>>, vector<1x32x324xbf16>
    %7 = vector.shape_cast %6 : vector<1x32x324xbf16> to vector<32x324xbf16>
    %c64 = arith.constant 64 : index
    %c0_9 = arith.constant 0 : index
    %8 = vector.load %arg11[%c64, %c0_9] : memref<288x324xbf16, #tpu.memory_space<vmem>>, vector<32x324xbf16>
    tpu.vector_store %arg11[%c64, %c0_9], %7 {strides = array<i32>} : memref<288x324xbf16, #tpu.memory_space<vmem>>, vector<32x324xbf16>,
    %c0_10 = arith.constant 0 : index
    %c0_11 = arith.constant 0 : index
    %c18 = arith.constant 18 : index
    %9 = vector.load %arg1[%c0_10, %c0_11, %c18] : memref<1x32x362xbf16, #tpu.memory_space<vmem>>, vector<1x32x324xbf16>
    %10 = vector.shape_cast %9 : vector<1x32x324xbf16> to vector<32x324xbf16>
    %c96 = arith.constant 96 : index
    %c0_12 = arith.constant 0 : index
    %11 = vector.load %arg11[%c96, %c0_12] : memref<288x324xbf16, #tpu.memory_space<vmem>>, vector<32x324xbf16>
    tpu.vector_store %arg11[%c96, %c0_12], %10 {strides = array<i32>} : memref<288x324xbf16, #tpu.memory_space<vmem>>, vector<32x324xbf16>,
    %c0_13 = arith.constant 0 : index
    %c0_14 = arith.constant 0 : index
    %c19 = arith.constant 19 : index
    %12 = vector.load %arg1[%c0_13, %c0_14, %c19] : memref<1x32x362xbf16, #tpu.memory_space<vmem>>, vector<1x32x324xbf16>
    %13 = vector.shape_cast %12 : vector<1x32x324xbf16> to vector<32x324xbf16>
    %c128 = arith.constant 128 : index
    %c0_15 = arith.constant 0 : index
    %14 = vector.load %arg11[%c128, %c0_15] : memref<288x324xbf16, #tpu.memory_space<vmem>>, vector<32x324xbf16>
    tpu.vector_store %arg11[%c128, %c0_15], %13 {strides = array<i32>} : memref<288x324xbf16, #tpu.memory_space<vmem>>, vector<32x324xbf16>,
    %c0_16 = arith.constant 0 : index
    %c0_17 = arith.constant 0 : index
    %c20 = arith.constant 20 : index
    %15 = vector.load %arg1[%c0_16, %c0_17, %c20] : memref<1x32x362xbf16, #tpu.memory_space<vmem>>, vector<1x32x324xbf16>
    %16 = vector.shape_cast %15 : vector<1x32x324xbf16> to vector<32x324xbf16>
    %c160 = arith.constant 160 : index
    %c0_18 = arith.constant 0 : index
    %17 = vector.load %arg11[%c160, %c0_18] : memref<288x324xbf16, #tpu.memory_space<vmem>>, vector<32x324xbf16>
    tpu.vector_store %arg11[%c160, %c0_18], %16 {strides = array<i32>} : memref<288x324xbf16, #tpu.memory_space<vmem>>, vector<32x324xbf16>,
    %c0_19 = arith.constant 0 : index
    %c0_20 = arith.constant 0 : index
    %c36 = arith.constant 36 : index
    %18 = vector.load %arg1[%c0_19, %c0_20, %c36] : memref<1x32x362xbf16, #tpu.memory_space<vmem>>, vector<1x32x324xbf16>
    %19 = vector.shape_cast %18 : vector<1x32x324xbf16> to vector<32x324xbf16>
    %c192 = arith.constant 192 : index
    %c0_21 = arith.constant 0 : index
    %20 = vector.load %arg11[%c192, %c0_21] : memref<288x324xbf16, #tpu.memory_space<vmem>>, vector<32x324xbf16>
    tpu.vector_store %arg11[%c192, %c0_21], %19 {strides = array<i32>} : memref<288x324xbf16, #tpu.memory_space<vmem>>, vector<32x324xbf16>,
    %c0_22 = arith.constant 0 : index
    %c0_23 = arith.constant 0 : index
    %c37 = arith.constant 37 : index
    %21 = vector.load %arg1[%c0_22, %c0_23, %c37] : memref<1x32x362xbf16, #tpu.memory_space<vmem>>, vector<1x32x324xbf16>
    %22 = vector.shape_cast %21 : vector<1x32x324xbf16> to vector<32x324xbf16>
    %c224 = arith.constant 224 : index
    %c0_24 = arith.constant 0 : index
    %23 = vector.load %arg11[%c224, %c0_24] : memref<288x324xbf16, #tpu.memory_space<vmem>>, vector<32x324xbf16>
    tpu.vector_store %arg11[%c224, %c0_24], %22 {strides = array<i32>} : memref<288x324xbf16, #tpu.memory_space<vmem>>, vector<32x324xbf16>,
    %c0_25 = arith.constant 0 : index
    %c0_26 = arith.constant 0 : index
    %c38 = arith.constant 38 : index
    %24 = vector.load %arg1[%c0_25, %c0_26, %c38] : memref<1x32x362xbf16, #tpu.memory_space<vmem>>, vector<1x32x324xbf16>
    %25 = vector.shape_cast %24 : vector<1x32x324xbf16> to vector<32x324xbf16>
    %c256 = arith.constant 256 : index
    %c0_27 = arith.constant 0 : index
    %26 = vector.load %arg11[%c256, %c0_27] : memref<288x324xbf16, #tpu.memory_space<vmem>>, vector<32x324xbf16>
    tpu.vector_store %arg11[%c256, %c0_27], %25 {strides = array<i32>} : memref<288x324xbf16, #tpu.memory_space<vmem>>, vector<32x324xbf16>,
    %c0_28 = arith.constant 0 : index
    %c0_29 = arith.constant 0 : index
    %27 = vector.load %arg2[%c0_28, %c0_29] : memref<32x288xbf16, #tpu.memory_space<vmem>>, vector<32x288xbf16>
    %c0_30 = arith.constant 0 : index
    %c0_31 = arith.constant 0 : index
    %28 = vector.load %arg11[%c0_30, %c0_31] : memref<288x324xbf16, #tpu.memory_space<vmem>>, vector<288x324xbf16>
    %cst = arith.constant dense<0.000000e+00> : vector<32x324xf32>
    %29 = tpu.matmul %27, %28, %cst {dimension_numbers = #tpu.dot_dimension_numbers<[1], [0], [0], [1], [0, 0, 1, 1], [], []>} : vector<32x288xbf16>, vector<288x324xbf16>, vector<32x324xf32> -> vector<32x324xf32>
    %c0_32 = arith.constant 0 : index
    %c0_33 = arith.constant 0 : index
    %30 = vector.load %arg3[%c0_32, %c0_33] : memref<32x1xf32, #tpu.memory_space<vmem>>, vector<32x1xf32>
    %31 = vector.broadcast %30 : vector<32x1xf32> to vector<32x324xf32>
    %32 = arith.addf %29, %31 : vector<32x324xf32>
    %c0_34 = arith.constant 0 : index
    %c0_35 = arith.constant 0 : index
    %33 = vector.load %arg9[%c0_34, %c0_35] : memref<1x324xf32, #tpu.memory_space<vmem>>, vector<1x324xf32>
    %34 = vector.broadcast %33 : vector<1x324xf32> to vector<32x324xf32>
    %35 = arith.mulf %32, %34 : vector<32x324xf32>
    %cst_36 = arith.constant dense<0.000000e+00> : vector<32xf32>
    %36 = vector.multi_reduction <add>, %35, %cst_36 [1] : vector<32x324xf32> to vector<32xf32>
    %37 = vector.shape_cast %36 : vector<32xf32> to vector<32x1xf32>
    %38 = arith.mulf %35, %32 : vector<32x324xf32>
    %cst_37 = arith.constant dense<0.000000e+00> : vector<32xf32>
    %39 = vector.multi_reduction <add>, %38, %cst_37 [1] : vector<32x324xf32> to vector<32xf32>
    %40 = vector.shape_cast %39 : vector<32xf32> to vector<32x1xf32>
    %c0_38 = arith.constant 0 : index
    %c0_39 = arith.constant 0 : index
    %41 = vector.load %arg8[%c0_38, %c0_39] : memref<32x32xf32, #tpu.memory_space<vmem>>, vector<32x32xf32>
    %cst_40 = arith.constant dense<0.000000e+00> : vector<32x1xf32>
    %42 = tpu.matmul %41, %37, %cst_40 {dimension_numbers = #tpu.dot_dimension_numbers<[1], [0], [0], [1], [0, 0, 1, 1], [], []>} : vector<32x32xf32>, vector<32x1xf32>, vector<32x1xf32> -> vector<32x1xf32>
    %cst_41 = arith.constant 0.001953125 : f32
    %43 = vector.broadcast %cst_41 : f32 to vector<32x1xf32>
    %44 = arith.mulf %42, %43 : vector<32x1xf32>
    %c0_42 = arith.constant 0 : index
    %c0_43 = arith.constant 0 : index
    %45 = vector.load %arg8[%c0_42, %c0_43] : memref<32x32xf32, #tpu.memory_space<vmem>>, vector<32x32xf32>
    %cst_44 = arith.constant dense<0.000000e+00> : vector<32x1xf32>
    %46 = tpu.matmul %45, %40, %cst_44 {dimension_numbers = #tpu.dot_dimension_numbers<[1], [0], [0], [1], [0, 0, 1, 1], [], []>} : vector<32x32xf32>, vector<32x1xf32>, vector<32x1xf32> -> vector<32x1xf32>
    %cst_45 = arith.constant 0.001953125 : f32
    %47 = vector.broadcast %cst_45 : f32 to vector<32x1xf32>
    %48 = arith.mulf %46, %47 : vector<32x1xf32>
    %49 = arith.mulf %44, %44 : vector<32x1xf32>
    %50 = arith.subf %48, %49 : vector<32x1xf32>
    %cst_46 = arith.constant 9.99999997E-7 : f32
    %51 = vector.broadcast %cst_46 : f32 to vector<32x1xf32>
    %52 = arith.addf %50, %51 : vector<32x1xf32>
    %53 = math.rsqrt %52 : vector<32x1xf32>
    %54 = vector.broadcast %44 : vector<32x1xf32> to vector<32x324xf32>
    %55 = arith.subf %32, %54 : vector<32x324xf32>
    %56 = vector.broadcast %53 : vector<32x1xf32> to vector<32x324xf32>
    %57 = arith.mulf %55, %56 : vector<32x324xf32>
    %c0_47 = arith.constant 0 : index
    %c0_48 = arith.constant 0 : index
    %58 = vector.load %arg4[%c0_47, %c0_48] : memref<32x1xf32, #tpu.memory_space<vmem>>, vector<32x1xf32>
    %59 = vector.broadcast %58 : vector<32x1xf32> to vector<32x324xf32>
    %60 = arith.mulf %57, %59 : vector<32x324xf32>
    %c0_49 = arith.constant 0 : index
    %c0_50 = arith.constant 0 : index
    %c0_51 = arith.constant 0 : index
    %61 = vector.load %arg5[%c0_49, %c0_50, %c0_51] : memref<1x32x1xf32, #tpu.memory_space<vmem>>, vector<1x32x1xf32>
    %62 = vector.shape_cast %61 : vector<1x32x1xf32> to vector<32x1xf32>
    %63 = vector.broadcast %62 : vector<32x1xf32> to vector<32x324xf32>
    %64 = arith.addf %60, %63 : vector<32x324xf32>
    %cst_52 = arith.constant 0.000000e+00 : f32
    %65 = vector.broadcast %cst_52 : f32 to vector<32x324xf32>
    %66 = arith.subf %65, %64 : vector<32x324xf32>
    %67 = math.exp %66 : vector<32x324xf32>
    %cst_53 = arith.constant 1.000000e+00 : f32
    %68 = vector.broadcast %cst_53 : f32 to vector<32x324xf32>
    %69 = arith.addf %68, %67 : vector<32x324xf32>
    %70 = tpu.reciprocal %69 {approx = true} : vector<32x324xf32> -> vector<32x324xf32>
    %71 = arith.mulf %64, %70 : vector<32x324xf32>
    %72 = vector.broadcast %33 : vector<1x324xf32> to vector<32x324xf32>
    %73 = arith.mulf %71, %72 : vector<32x324xf32>
    %cst_54 = arith.constant 0.000000e+00 : bf16
    %74 = vector.broadcast %cst_54 : bf16 to vector<32x19xbf16>
    %c0_55 = arith.constant 0 : index
    %c0_56 = arith.constant 0 : index
    %75 = vector.load %arg13[%c0_55, %c0_56] : memref<32x362xbf16, #tpu.memory_space<vmem>>, vector<32x19xbf16>
    tpu.vector_store %arg13[%c0_55, %c0_56], %74 {strides = array<i32>} : memref<32x362xbf16, #tpu.memory_space<vmem>>, vector<32x19xbf16>,
    %76 = arith.truncf %73 : vector<32x324xf32> to vector<32x324xbf16>
    %c0_57 = arith.constant 0 : index
    %c19_58 = arith.constant 19 : index
    %77 = vector.load %arg13[%c0_57, %c19_58] : memref<32x362xbf16, #tpu.memory_space<vmem>>, vector<32x324xbf16>
    tpu.vector_store %arg13[%c0_57, %c19_58], %76 {strides = array<i32>} : memref<32x362xbf16, #tpu.memory_space<vmem>>, vector<32x324xbf16>,
    %cst_59 = arith.constant 0.000000e+00 : bf16
    %78 = vector.broadcast %cst_59 : bf16 to vector<32x19xbf16>
    %c0_60 = arith.constant 0 : index
    %c343 = arith.constant 343 : index
    %79 = vector.load %arg13[%c0_60, %c343] : memref<32x362xbf16, #tpu.memory_space<vmem>>, vector<32x19xbf16>
    tpu.vector_store %arg13[%c0_60, %c343], %78 {strides = array<i32>} : memref<32x362xbf16, #tpu.memory_space<vmem>>, vector<32x19xbf16>,
    %c0_61 = arith.constant 0 : index
    %c0_62 = arith.constant 0 : index
    %80 = vector.load %arg13[%c0_61, %c0_62] : memref<32x362xbf16, #tpu.memory_space<vmem>>, vector<32x324xbf16>
    %c0_63 = arith.constant 0 : index
    %c0_64 = arith.constant 0 : index
    %81 = vector.load %arg12[%c0_63, %c0_64] : memref<288x324xbf16, #tpu.memory_space<vmem>>, vector<32x324xbf16>
    tpu.vector_store %arg12[%c0_63, %c0_64], %80 {strides = array<i32>} : memref<288x324xbf16, #tpu.memory_space<vmem>>, vector<32x324xbf16>,
    %c0_65 = arith.constant 0 : index
    %c1_66 = arith.constant 1 : index
    %82 = vector.load %arg13[%c0_65, %c1_66] : memref<32x362xbf16, #tpu.memory_space<vmem>>, vector<32x324xbf16>
    %c32_67 = arith.constant 32 : index
    %c0_68 = arith.constant 0 : index
    %83 = vector.load %arg12[%c32_67, %c0_68] : memref<288x324xbf16, #tpu.memory_space<vmem>>, vector<32x324xbf16>
    tpu.vector_store %arg12[%c32_67, %c0_68], %82 {strides = array<i32>} : memref<288x324xbf16, #tpu.memory_space<vmem>>, vector<32x324xbf16>,
    %c0_69 = arith.constant 0 : index
    %c2_70 = arith.constant 2 : index
    %84 = vector.load %arg13[%c0_69, %c2_70] : memref<32x362xbf16, #tpu.memory_space<vmem>>, vector<32x324xbf16>
    %c64_71 = arith.constant 64 : index
    %c0_72 = arith.constant 0 : index
    %85 = vector.load %arg12[%c64_71, %c0_72] : memref<288x324xbf16, #tpu.memory_space<vmem>>, vector<32x324xbf16>
    tpu.vector_store %arg12[%c64_71, %c0_72], %84 {strides = array<i32>} : memref<288x324xbf16, #tpu.memory_space<vmem>>, vector<32x324xbf16>,
    %c0_73 = arith.constant 0 : index
    %c18_74 = arith.constant 18 : index
    %86 = vector.load %arg13[%c0_73, %c18_74] : memref<32x362xbf16, #tpu.memory_space<vmem>>, vector<32x324xbf16>
    %c96_75 = arith.constant 96 : index
    %c0_76 = arith.constant 0 : index
    %87 = vector.load %arg12[%c96_75, %c0_76] : memref<288x324xbf16, #tpu.memory_space<vmem>>, vector<32x324xbf16>
    tpu.vector_store %arg12[%c96_75, %c0_76], %86 {strides = array<i32>} : memref<288x324xbf16, #tpu.memory_space<vmem>>, vector<32x324xbf16>,
    %c0_77 = arith.constant 0 : index
    %c19_78 = arith.constant 19 : index
    %88 = vector.load %arg13[%c0_77, %c19_78] : memref<32x362xbf16, #tpu.memory_space<vmem>>, vector<32x324xbf16>
    %c128_79 = arith.constant 128 : index
    %c0_80 = arith.constant 0 : index
    %89 = vector.load %arg12[%c128_79, %c0_80] : memref<288x324xbf16, #tpu.memory_space<vmem>>, vector<32x324xbf16>
    tpu.vector_store %arg12[%c128_79, %c0_80], %88 {strides = array<i32>} : memref<288x324xbf16, #tpu.memory_space<vmem>>, vector<32x324xbf16>,
    %c0_81 = arith.constant 0 : index
    %c20_82 = arith.constant 20 : index
    %90 = vector.load %arg13[%c0_81, %c20_82] : memref<32x362xbf16, #tpu.memory_space<vmem>>, vector<32x324xbf16>
    %c160_83 = arith.constant 160 : index
    %c0_84 = arith.constant 0 : index
    %91 = vector.load %arg12[%c160_83, %c0_84] : memref<288x324xbf16, #tpu.memory_space<vmem>>, vector<32x324xbf16>
    tpu.vector_store %arg12[%c160_83, %c0_84], %90 {strides = array<i32>} : memref<288x324xbf16, #tpu.memory_space<vmem>>, vector<32x324xbf16>,
    %c0_85 = arith.constant 0 : index
    %c36_86 = arith.constant 36 : index
    %92 = vector.load %arg13[%c0_85, %c36_86] : memref<32x362xbf16, #tpu.memory_space<vmem>>, vector<32x324xbf16>
    %c192_87 = arith.constant 192 : index
    %c0_88 = arith.constant 0 : index
    %93 = vector.load %arg12[%c192_87, %c0_88] : memref<288x324xbf16, #tpu.memory_space<vmem>>, vector<32x324xbf16>
    tpu.vector_store %arg12[%c192_87, %c0_88], %92 {strides = array<i32>} : memref<288x324xbf16, #tpu.memory_space<vmem>>, vector<32x324xbf16>,
    %c0_89 = arith.constant 0 : index
    %c37_90 = arith.constant 37 : index
    %94 = vector.load %arg13[%c0_89, %c37_90] : memref<32x362xbf16, #tpu.memory_space<vmem>>, vector<32x324xbf16>
    %c224_91 = arith.constant 224 : index
    %c0_92 = arith.constant 0 : index
    %95 = vector.load %arg12[%c224_91, %c0_92] : memref<288x324xbf16, #tpu.memory_space<vmem>>, vector<32x324xbf16>
    tpu.vector_store %arg12[%c224_91, %c0_92], %94 {strides = array<i32>} : memref<288x324xbf16, #tpu.memory_space<vmem>>, vector<32x324xbf16>,
    %c0_93 = arith.constant 0 : index
    %c38_94 = arith.constant 38 : index
    %96 = vector.load %arg13[%c0_93, %c38_94] : memref<32x362xbf16, #tpu.memory_space<vmem>>, vector<32x324xbf16>
    %c256_95 = arith.constant 256 : index
    %c0_96 = arith.constant 0 : index
    %97 = vector.load %arg12[%c256_95, %c0_96] : memref<288x324xbf16, #tpu.memory_space<vmem>>, vector<32x324xbf16>
    tpu.vector_store %arg12[%c256_95, %c0_96], %96 {strides = array<i32>} : memref<288x324xbf16, #tpu.memory_space<vmem>>, vector<32x324xbf16>,
    %c0_97 = arith.constant 0 : index
    %c0_98 = arith.constant 0 : index
    %98 = vector.load %arg6[%c0_97, %c0_98] : memref<32x288xbf16, #tpu.memory_space<vmem>>, vector<32x288xbf16>
    %c0_99 = arith.constant 0 : index
    %c0_100 = arith.constant 0 : index
    %99 = vector.load %arg12[%c0_99, %c0_100] : memref<288x324xbf16, #tpu.memory_space<vmem>>, vector<288x324xbf16>
    %cst_101 = arith.constant dense<0.000000e+00> : vector<32x324xf32>
    %100 = tpu.matmul %98, %99, %cst_101 {dimension_numbers = #tpu.dot_dimension_numbers<[1], [0], [0], [1], [0, 0, 1, 1], [], []>} : vector<32x288xbf16>, vector<288x324xbf16>, vector<32x324xf32> -> vector<32x324xf32>
    %c0_102 = arith.constant 0 : index
    %c0_103 = arith.constant 0 : index
    %101 = vector.load %arg7[%c0_102, %c0_103] : memref<32x1xf32, #tpu.memory_space<vmem>>, vector<32x1xf32>
    %102 = vector.broadcast %101 : vector<32x1xf32> to vector<32x324xf32>
    %103 = arith.addf %100, %102 : vector<32x324xf32>
    %c0_104 = arith.constant 0 : index
    %c0_105 = arith.constant 0 : index
    %c19_106 = arith.constant 19 : index
    %104 = vector.load %arg1[%c0_104, %c0_105, %c19_106] : memref<1x32x362xbf16, #tpu.memory_space<vmem>>, vector<1x32x324xbf16>
    %105 = vector.shape_cast %104 : vector<1x32x324xbf16> to vector<32x324xbf16>
    %106 = arith.extf %105 : vector<32x324xbf16> to vector<32x324xf32>
    %107 = arith.addf %103, %106 : vector<32x324xf32>
    %c0_107 = arith.constant 0 : index
    %c0_108 = arith.constant 0 : index
    %c0_109 = arith.constant 0 : index
    %108 = vector.load %arg10[%c0_107, %c0_108, %c0_109] : memref<1x32x324xf32, #tpu.memory_space<vmem>>, vector<1x32x324xf32>
    %109 = vector.shape_cast %108 : vector<1x32x324xf32> to vector<32x324xf32>
    %110 = vector.shape_cast %107 : vector<32x324xf32> to vector<1x32x324xf32>
    tpu.vector_store %arg10[%c0_107, %c0_108, %c0_109], %110 {strides = array<i32>} : memref<1x32x324xf32, #tpu.memory_space<vmem>>, vector<1x32x324xf32>,
    return
  }
  func.func @transform_0(%arg0: i32) -> (i32, i32, i32) {
    %c0_i32 = arith.constant 0 : i32
    %c0_i32_0 = arith.constant 0 : i32
    %c0_i32_1 = arith.constant 0 : i32
    return %arg0, %c0_i32, %c0_i32_0 : i32, i32, i32
  }
  func.func @transform_1(%arg0: i32) -> (i32, i32) {
    %c0_i32 = arith.constant 0 : i32
    %c0_i32_0 = arith.constant 0 : i32
    %c0_i32_1 = arith.constant 0 : i32
    return %c0_i32, %c0_i32_0 : i32, i32
  }
  func.func @transform_2(%arg0: i32) -> (i32, i32) {
    %c0_i32 = arith.constant 0 : i32
    %c0_i32_0 = arith.constant 0 : i32
    %c0_i32_1 = arith.constant 0 : i32
    return %c0_i32, %c0_i32_0 : i32, i32
  }
  func.func @transform_3(%arg0: i32) -> (i32, i32) {
    %c0_i32 = arith.constant 0 : i32
    %c0_i32_0 = arith.constant 0 : i32
    %c0_i32_1 = arith.constant 0 : i32
    return %c0_i32, %c0_i32_0 : i32, i32
  }
  func.func @transform_4(%arg0: i32) -> (i32, i32, i32) {
    %c0_i32 = arith.constant 0 : i32
    %c0_i32_0 = arith.constant 0 : i32
    %c0_i32_1 = arith.constant 0 : i32
    return %arg0, %c0_i32, %c0_i32_0 : i32, i32, i32
  }
  func.func @transform_5(%arg0: i32) -> (i32, i32) {
    %c0_i32 = arith.constant 0 : i32
    %c0_i32_0 = arith.constant 0 : i32
    %c0_i32_1 = arith.constant 0 : i32
    return %c0_i32, %c0_i32_0 : i32, i32
  }
  func.func @transform_6(%arg0: i32) -> (i32, i32) {
    %c0_i32 = arith.constant 0 : i32
    %c0_i32_0 = arith.constant 0 : i32
    %c0_i32_1 = arith.constant 0 : i32
    return %c0_i32, %c0_i32_0 : i32, i32
  }
  func.func @transform_7(%arg0: i32) -> (i32, i32) {
    %c0_i32 = arith.constant 0 : i32
    %c0_i32_0 = arith.constant 0 : i32
    %c0_i32_1 = arith.constant 0 : i32
    return %c0_i32, %c0_i32_0 : i32, i32
  }
  func.func @transform_8(%arg0: i32) -> (i32, i32) {
    %c0_i32 = arith.constant 0 : i32
    %c0_i32_0 = arith.constant 0 : i32
    %c0_i32_1 = arith.constant 0 : i32
    return %c0_i32, %c0_i32_0 : i32, i32
  }
  func.func @transform_9(%arg0: i32) -> (i32, i32, i32) {
    %c0_i32 = arith.constant 0 : i32
    %c0_i32_0 = arith.constant 0 : i32
    %c0_i32_1 = arith.constant 0 : i32
    return %arg0, %c0_i32, %c0_i32_0 : i32, i32, i32
  }
}

module attributes {stable_mosaic.version = 11 : i64} {
  func.func @_resblock_kernel(%arg0: i32, %arg1: memref<1x48x362xbf16, #tpu.memory_space<vmem>>, %arg2: memref<64x432xbf16, #tpu.memory_space<vmem>>, %arg3: memref<32x1xf32, #tpu.memory_space<vmem>>, %arg4: memref<32x1xf32, #tpu.memory_space<vmem>>, %arg5: memref<1x32x1xf32, #tpu.memory_space<vmem>>, %arg6: memref<32x288xbf16, #tpu.memory_space<vmem>>, %arg7: memref<32x1xf32, #tpu.memory_space<vmem>>, %arg8: memref<32x32xf32, #tpu.memory_space<vmem>>, %arg9: memref<1x324xf32, #tpu.memory_space<vmem>>, %arg10: memref<1x32x324xf32, #tpu.memory_space<vmem>>, %arg11: memref<432x324xbf16, #tpu.memory_space<vmem>>, %arg12: memref<288x324xbf16, #tpu.memory_space<vmem>>, %arg13: memref<32x362xbf16, #tpu.memory_space<vmem>>) attributes {dimension_semantics = [#tpu.dimension_semantics<parallel>], iteration_bounds = array<i64: 2>, scalar_prefetch = 0 : i64, scratch_operands = 3 : i64, tpu.core_type = #tpu.core_type<tc>, window_params = [{transform_indices = @transform_0, window_bounds = array<i64: 1, 48, 362>}, {pipeline_mode = #tpu.pipeline_mode<synchronous>, transform_indices = @transform_1, window_bounds = array<i64: 64, 432>}, {pipeline_mode = #tpu.pipeline_mode<synchronous>, transform_indices = @transform_2, window_bounds = array<i64: 32, 1>}, {pipeline_mode = #tpu.pipeline_mode<synchronous>, transform_indices = @transform_3, window_bounds = array<i64: 32, 1>}, {transform_indices = @transform_4, window_bounds = array<i64: 1, 32, 1>}, {pipeline_mode = #tpu.pipeline_mode<synchronous>, transform_indices = @transform_5, window_bounds = array<i64: 32, 288>}, {pipeline_mode = #tpu.pipeline_mode<synchronous>, transform_indices = @transform_6, window_bounds = array<i64: 32, 1>}, {pipeline_mode = #tpu.pipeline_mode<synchronous>, transform_indices = @transform_7, window_bounds = array<i64: 32, 32>}, {pipeline_mode = #tpu.pipeline_mode<synchronous>, transform_indices = @transform_8, window_bounds = array<i64: 1, 324>}, {transform_indices = @transform_9, window_bounds = array<i64: 1, 32, 324>}]} {
    %c0 = arith.constant 0 : index
    %c0_0 = arith.constant 0 : index
    %c0_1 = arith.constant 0 : index
    %0 = vector.load %arg1[%c0, %c0_0, %c0_1] : memref<1x48x362xbf16, #tpu.memory_space<vmem>>, vector<1x48x324xbf16>
    %1 = vector.shape_cast %0 : vector<1x48x324xbf16> to vector<48x324xbf16>
    %c0_2 = arith.constant 0 : index
    %c0_3 = arith.constant 0 : index
    %2 = vector.load %arg11[%c0_2, %c0_3] : memref<432x324xbf16, #tpu.memory_space<vmem>>, vector<48x324xbf16>
    tpu.vector_store %arg11[%c0_2, %c0_3], %1 {strides = array<i32>} : memref<432x324xbf16, #tpu.memory_space<vmem>>, vector<48x324xbf16>,
    %c0_4 = arith.constant 0 : index
    %c0_5 = arith.constant 0 : index
    %c1 = arith.constant 1 : index
    %3 = vector.load %arg1[%c0_4, %c0_5, %c1] : memref<1x48x362xbf16, #tpu.memory_space<vmem>>, vector<1x48x324xbf16>
    %4 = vector.shape_cast %3 : vector<1x48x324xbf16> to vector<48x324xbf16>
    %c48 = arith.constant 48 : index
    %c0_6 = arith.constant 0 : index
    %5 = vector.load %arg11[%c48, %c0_6] : memref<432x324xbf16, #tpu.memory_space<vmem>>, vector<48x324xbf16>
    tpu.vector_store %arg11[%c48, %c0_6], %4 {strides = array<i32>} : memref<432x324xbf16, #tpu.memory_space<vmem>>, vector<48x324xbf16>,
    %c0_7 = arith.constant 0 : index
    %c0_8 = arith.constant 0 : index
    %c2 = arith.constant 2 : index
    %6 = vector.load %arg1[%c0_7, %c0_8, %c2] : memref<1x48x362xbf16, #tpu.memory_space<vmem>>, vector<1x48x324xbf16>
    %7 = vector.shape_cast %6 : vector<1x48x324xbf16> to vector<48x324xbf16>
    %c96 = arith.constant 96 : index
    %c0_9 = arith.constant 0 : index
    %8 = vector.load %arg11[%c96, %c0_9] : memref<432x324xbf16, #tpu.memory_space<vmem>>, vector<48x324xbf16>
    tpu.vector_store %arg11[%c96, %c0_9], %7 {strides = array<i32>} : memref<432x324xbf16, #tpu.memory_space<vmem>>, vector<48x324xbf16>,
    %c0_10 = arith.constant 0 : index
    %c0_11 = arith.constant 0 : index
    %c18 = arith.constant 18 : index
    %9 = vector.load %arg1[%c0_10, %c0_11, %c18] : memref<1x48x362xbf16, #tpu.memory_space<vmem>>, vector<1x48x324xbf16>
    %10 = vector.shape_cast %9 : vector<1x48x324xbf16> to vector<48x324xbf16>
    %c144 = arith.constant 144 : index
    %c0_12 = arith.constant 0 : index
    %11 = vector.load %arg11[%c144, %c0_12] : memref<432x324xbf16, #tpu.memory_space<vmem>>, vector<48x324xbf16>
    tpu.vector_store %arg11[%c144, %c0_12], %10 {strides = array<i32>} : memref<432x324xbf16, #tpu.memory_space<vmem>>, vector<48x324xbf16>,
    %c0_13 = arith.constant 0 : index
    %c0_14 = arith.constant 0 : index
    %c19 = arith.constant 19 : index
    %12 = vector.load %arg1[%c0_13, %c0_14, %c19] : memref<1x48x362xbf16, #tpu.memory_space<vmem>>, vector<1x48x324xbf16>
    %13 = vector.shape_cast %12 : vector<1x48x324xbf16> to vector<48x324xbf16>
    %c192 = arith.constant 192 : index
    %c0_15 = arith.constant 0 : index
    %14 = vector.load %arg11[%c192, %c0_15] : memref<432x324xbf16, #tpu.memory_space<vmem>>, vector<48x324xbf16>
    tpu.vector_store %arg11[%c192, %c0_15], %13 {strides = array<i32>} : memref<432x324xbf16, #tpu.memory_space<vmem>>, vector<48x324xbf16>,
    %c0_16 = arith.constant 0 : index
    %c0_17 = arith.constant 0 : index
    %c20 = arith.constant 20 : index
    %15 = vector.load %arg1[%c0_16, %c0_17, %c20] : memref<1x48x362xbf16, #tpu.memory_space<vmem>>, vector<1x48x324xbf16>
    %16 = vector.shape_cast %15 : vector<1x48x324xbf16> to vector<48x324xbf16>
    %c240 = arith.constant 240 : index
    %c0_18 = arith.constant 0 : index
    %17 = vector.load %arg11[%c240, %c0_18] : memref<432x324xbf16, #tpu.memory_space<vmem>>, vector<48x324xbf16>
    tpu.vector_store %arg11[%c240, %c0_18], %16 {strides = array<i32>} : memref<432x324xbf16, #tpu.memory_space<vmem>>, vector<48x324xbf16>,
    %c0_19 = arith.constant 0 : index
    %c0_20 = arith.constant 0 : index
    %c36 = arith.constant 36 : index
    %18 = vector.load %arg1[%c0_19, %c0_20, %c36] : memref<1x48x362xbf16, #tpu.memory_space<vmem>>, vector<1x48x324xbf16>
    %19 = vector.shape_cast %18 : vector<1x48x324xbf16> to vector<48x324xbf16>
    %c288 = arith.constant 288 : index
    %c0_21 = arith.constant 0 : index
    %20 = vector.load %arg11[%c288, %c0_21] : memref<432x324xbf16, #tpu.memory_space<vmem>>, vector<48x324xbf16>
    tpu.vector_store %arg11[%c288, %c0_21], %19 {strides = array<i32>} : memref<432x324xbf16, #tpu.memory_space<vmem>>, vector<48x324xbf16>,
    %c0_22 = arith.constant 0 : index
    %c0_23 = arith.constant 0 : index
    %c37 = arith.constant 37 : index
    %21 = vector.load %arg1[%c0_22, %c0_23, %c37] : memref<1x48x362xbf16, #tpu.memory_space<vmem>>, vector<1x48x324xbf16>
    %22 = vector.shape_cast %21 : vector<1x48x324xbf16> to vector<48x324xbf16>
    %c336 = arith.constant 336 : index
    %c0_24 = arith.constant 0 : index
    %23 = vector.load %arg11[%c336, %c0_24] : memref<432x324xbf16, #tpu.memory_space<vmem>>, vector<48x324xbf16>
    tpu.vector_store %arg11[%c336, %c0_24], %22 {strides = array<i32>} : memref<432x324xbf16, #tpu.memory_space<vmem>>, vector<48x324xbf16>,
    %c0_25 = arith.constant 0 : index
    %c0_26 = arith.constant 0 : index
    %c38 = arith.constant 38 : index
    %24 = vector.load %arg1[%c0_25, %c0_26, %c38] : memref<1x48x362xbf16, #tpu.memory_space<vmem>>, vector<1x48x324xbf16>
    %25 = vector.shape_cast %24 : vector<1x48x324xbf16> to vector<48x324xbf16>
    %c384 = arith.constant 384 : index
    %c0_27 = arith.constant 0 : index
    %26 = vector.load %arg11[%c384, %c0_27] : memref<432x324xbf16, #tpu.memory_space<vmem>>, vector<48x324xbf16>
    tpu.vector_store %arg11[%c384, %c0_27], %25 {strides = array<i32>} : memref<432x324xbf16, #tpu.memory_space<vmem>>, vector<48x324xbf16>,
    %c0_28 = arith.constant 0 : index
    %c0_29 = arith.constant 0 : index
    %27 = vector.load %arg2[%c0_28, %c0_29] : memref<64x432xbf16, #tpu.memory_space<vmem>>, vector<64x432xbf16>
    %c0_30 = arith.constant 0 : index
    %c0_31 = arith.constant 0 : index
    %28 = vector.load %arg11[%c0_30, %c0_31] : memref<432x324xbf16, #tpu.memory_space<vmem>>, vector<432x324xbf16>
    %cst = arith.constant dense<0.000000e+00> : vector<64x324xf32>
    %29 = tpu.matmul %27, %28, %cst {dimension_numbers = #tpu.dot_dimension_numbers<[1], [0], [0], [1], [0, 0, 1, 1], [], []>} : vector<64x432xbf16>, vector<432x324xbf16>, vector<64x324xf32> -> vector<64x324xf32>
    %30 = vector.extract_strided_slice %29 {offsets = [0, 0], sizes = [32, 324], strides = [1, 1]} : vector<64x324xf32> to vector<32x324xf32>
    %c0_32 = arith.constant 0 : index
    %c0_33 = arith.constant 0 : index
    %31 = vector.load %arg3[%c0_32, %c0_33] : memref<32x1xf32, #tpu.memory_space<vmem>>, vector<32x1xf32>
    %32 = vector.broadcast %31 : vector<32x1xf32> to vector<32x324xf32>
    %33 = arith.addf %30, %32 : vector<32x324xf32>
    %c0_34 = arith.constant 0 : index
    %c0_35 = arith.constant 0 : index
    %34 = vector.load %arg9[%c0_34, %c0_35] : memref<1x324xf32, #tpu.memory_space<vmem>>, vector<1x324xf32>
    %35 = vector.broadcast %34 : vector<1x324xf32> to vector<32x324xf32>
    %36 = arith.mulf %33, %35 : vector<32x324xf32>
    %cst_36 = arith.constant dense<0.000000e+00> : vector<32xf32>
    %37 = vector.multi_reduction <add>, %36, %cst_36 [1] : vector<32x324xf32> to vector<32xf32>
    %38 = vector.shape_cast %37 : vector<32xf32> to vector<32x1xf32>
    %39 = arith.mulf %36, %33 : vector<32x324xf32>
    %cst_37 = arith.constant dense<0.000000e+00> : vector<32xf32>
    %40 = vector.multi_reduction <add>, %39, %cst_37 [1] : vector<32x324xf32> to vector<32xf32>
    %41 = vector.shape_cast %40 : vector<32xf32> to vector<32x1xf32>
    %c0_38 = arith.constant 0 : index
    %c0_39 = arith.constant 0 : index
    %42 = vector.load %arg8[%c0_38, %c0_39] : memref<32x32xf32, #tpu.memory_space<vmem>>, vector<32x32xf32>
    %cst_40 = arith.constant dense<0.000000e+00> : vector<32x1xf32>
    %43 = tpu.matmul %42, %38, %cst_40 {dimension_numbers = #tpu.dot_dimension_numbers<[1], [0], [0], [1], [0, 0, 1, 1], [], []>} : vector<32x32xf32>, vector<32x1xf32>, vector<32x1xf32> -> vector<32x1xf32>
    %cst_41 = arith.constant 0.001953125 : f32
    %44 = vector.broadcast %cst_41 : f32 to vector<32x1xf32>
    %45 = arith.mulf %43, %44 : vector<32x1xf32>
    %c0_42 = arith.constant 0 : index
    %c0_43 = arith.constant 0 : index
    %46 = vector.load %arg8[%c0_42, %c0_43] : memref<32x32xf32, #tpu.memory_space<vmem>>, vector<32x32xf32>
    %cst_44 = arith.constant dense<0.000000e+00> : vector<32x1xf32>
    %47 = tpu.matmul %46, %41, %cst_44 {dimension_numbers = #tpu.dot_dimension_numbers<[1], [0], [0], [1], [0, 0, 1, 1], [], []>} : vector<32x32xf32>, vector<32x1xf32>, vector<32x1xf32> -> vector<32x1xf32>
    %cst_45 = arith.constant 0.001953125 : f32
    %48 = vector.broadcast %cst_45 : f32 to vector<32x1xf32>
    %49 = arith.mulf %47, %48 : vector<32x1xf32>
    %50 = arith.mulf %45, %45 : vector<32x1xf32>
    %51 = arith.subf %49, %50 : vector<32x1xf32>
    %cst_46 = arith.constant 9.99999997E-7 : f32
    %52 = vector.broadcast %cst_46 : f32 to vector<32x1xf32>
    %53 = arith.addf %51, %52 : vector<32x1xf32>
    %54 = math.rsqrt %53 : vector<32x1xf32>
    %55 = vector.broadcast %45 : vector<32x1xf32> to vector<32x324xf32>
    %56 = arith.subf %33, %55 : vector<32x324xf32>
    %57 = vector.broadcast %54 : vector<32x1xf32> to vector<32x324xf32>
    %58 = arith.mulf %56, %57 : vector<32x324xf32>
    %c0_47 = arith.constant 0 : index
    %c0_48 = arith.constant 0 : index
    %59 = vector.load %arg4[%c0_47, %c0_48] : memref<32x1xf32, #tpu.memory_space<vmem>>, vector<32x1xf32>
    %60 = vector.broadcast %59 : vector<32x1xf32> to vector<32x324xf32>
    %61 = arith.mulf %58, %60 : vector<32x324xf32>
    %c0_49 = arith.constant 0 : index
    %c0_50 = arith.constant 0 : index
    %c0_51 = arith.constant 0 : index
    %62 = vector.load %arg5[%c0_49, %c0_50, %c0_51] : memref<1x32x1xf32, #tpu.memory_space<vmem>>, vector<1x32x1xf32>
    %63 = vector.shape_cast %62 : vector<1x32x1xf32> to vector<32x1xf32>
    %64 = vector.broadcast %63 : vector<32x1xf32> to vector<32x324xf32>
    %65 = arith.addf %61, %64 : vector<32x324xf32>
    %cst_52 = arith.constant 0.000000e+00 : f32
    %66 = vector.broadcast %cst_52 : f32 to vector<32x324xf32>
    %67 = arith.subf %66, %65 : vector<32x324xf32>
    %68 = math.exp %67 : vector<32x324xf32>
    %cst_53 = arith.constant 1.000000e+00 : f32
    %69 = vector.broadcast %cst_53 : f32 to vector<32x324xf32>
    %70 = arith.addf %69, %68 : vector<32x324xf32>
    %71 = tpu.reciprocal %70 {approx = true} : vector<32x324xf32> -> vector<32x324xf32>
    %72 = arith.mulf %65, %71 : vector<32x324xf32>
    %73 = vector.broadcast %34 : vector<1x324xf32> to vector<32x324xf32>
    %74 = arith.mulf %72, %73 : vector<32x324xf32>
    %cst_54 = arith.constant 0.000000e+00 : bf16
    %75 = vector.broadcast %cst_54 : bf16 to vector<32x19xbf16>
    %c0_55 = arith.constant 0 : index
    %c0_56 = arith.constant 0 : index
    %76 = vector.load %arg13[%c0_55, %c0_56] : memref<32x362xbf16, #tpu.memory_space<vmem>>, vector<32x19xbf16>
    tpu.vector_store %arg13[%c0_55, %c0_56], %75 {strides = array<i32>} : memref<32x362xbf16, #tpu.memory_space<vmem>>, vector<32x19xbf16>,
    %77 = arith.truncf %74 : vector<32x324xf32> to vector<32x324xbf16>
    %c0_57 = arith.constant 0 : index
    %c19_58 = arith.constant 19 : index
    %78 = vector.load %arg13[%c0_57, %c19_58] : memref<32x362xbf16, #tpu.memory_space<vmem>>, vector<32x324xbf16>
    tpu.vector_store %arg13[%c0_57, %c19_58], %77 {strides = array<i32>} : memref<32x362xbf16, #tpu.memory_space<vmem>>, vector<32x324xbf16>,
    %cst_59 = arith.constant 0.000000e+00 : bf16
    %79 = vector.broadcast %cst_59 : bf16 to vector<32x19xbf16>
    %c0_60 = arith.constant 0 : index
    %c343 = arith.constant 343 : index
    %80 = vector.load %arg13[%c0_60, %c343] : memref<32x362xbf16, #tpu.memory_space<vmem>>, vector<32x19xbf16>
    tpu.vector_store %arg13[%c0_60, %c343], %79 {strides = array<i32>} : memref<32x362xbf16, #tpu.memory_space<vmem>>, vector<32x19xbf16>,
    %c0_61 = arith.constant 0 : index
    %c0_62 = arith.constant 0 : index
    %81 = vector.load %arg13[%c0_61, %c0_62] : memref<32x362xbf16, #tpu.memory_space<vmem>>, vector<32x324xbf16>
    %c0_63 = arith.constant 0 : index
    %c0_64 = arith.constant 0 : index
    %82 = vector.load %arg12[%c0_63, %c0_64] : memref<288x324xbf16, #tpu.memory_space<vmem>>, vector<32x324xbf16>
    tpu.vector_store %arg12[%c0_63, %c0_64], %81 {strides = array<i32>} : memref<288x324xbf16, #tpu.memory_space<vmem>>, vector<32x324xbf16>,
    %c0_65 = arith.constant 0 : index
    %c1_66 = arith.constant 1 : index
    %83 = vector.load %arg13[%c0_65, %c1_66] : memref<32x362xbf16, #tpu.memory_space<vmem>>, vector<32x324xbf16>
    %c32 = arith.constant 32 : index
    %c0_67 = arith.constant 0 : index
    %84 = vector.load %arg12[%c32, %c0_67] : memref<288x324xbf16, #tpu.memory_space<vmem>>, vector<32x324xbf16>
    tpu.vector_store %arg12[%c32, %c0_67], %83 {strides = array<i32>} : memref<288x324xbf16, #tpu.memory_space<vmem>>, vector<32x324xbf16>,
    %c0_68 = arith.constant 0 : index
    %c2_69 = arith.constant 2 : index
    %85 = vector.load %arg13[%c0_68, %c2_69] : memref<32x362xbf16, #tpu.memory_space<vmem>>, vector<32x324xbf16>
    %c64 = arith.constant 64 : index
    %c0_70 = arith.constant 0 : index
    %86 = vector.load %arg12[%c64, %c0_70] : memref<288x324xbf16, #tpu.memory_space<vmem>>, vector<32x324xbf16>
    tpu.vector_store %arg12[%c64, %c0_70], %85 {strides = array<i32>} : memref<288x324xbf16, #tpu.memory_space<vmem>>, vector<32x324xbf16>,
    %c0_71 = arith.constant 0 : index
    %c18_72 = arith.constant 18 : index
    %87 = vector.load %arg13[%c0_71, %c18_72] : memref<32x362xbf16, #tpu.memory_space<vmem>>, vector<32x324xbf16>
    %c96_73 = arith.constant 96 : index
    %c0_74 = arith.constant 0 : index
    %88 = vector.load %arg12[%c96_73, %c0_74] : memref<288x324xbf16, #tpu.memory_space<vmem>>, vector<32x324xbf16>
    tpu.vector_store %arg12[%c96_73, %c0_74], %87 {strides = array<i32>} : memref<288x324xbf16, #tpu.memory_space<vmem>>, vector<32x324xbf16>,
    %c0_75 = arith.constant 0 : index
    %c19_76 = arith.constant 19 : index
    %89 = vector.load %arg13[%c0_75, %c19_76] : memref<32x362xbf16, #tpu.memory_space<vmem>>, vector<32x324xbf16>
    %c128 = arith.constant 128 : index
    %c0_77 = arith.constant 0 : index
    %90 = vector.load %arg12[%c128, %c0_77] : memref<288x324xbf16, #tpu.memory_space<vmem>>, vector<32x324xbf16>
    tpu.vector_store %arg12[%c128, %c0_77], %89 {strides = array<i32>} : memref<288x324xbf16, #tpu.memory_space<vmem>>, vector<32x324xbf16>,
    %c0_78 = arith.constant 0 : index
    %c20_79 = arith.constant 20 : index
    %91 = vector.load %arg13[%c0_78, %c20_79] : memref<32x362xbf16, #tpu.memory_space<vmem>>, vector<32x324xbf16>
    %c160 = arith.constant 160 : index
    %c0_80 = arith.constant 0 : index
    %92 = vector.load %arg12[%c160, %c0_80] : memref<288x324xbf16, #tpu.memory_space<vmem>>, vector<32x324xbf16>
    tpu.vector_store %arg12[%c160, %c0_80], %91 {strides = array<i32>} : memref<288x324xbf16, #tpu.memory_space<vmem>>, vector<32x324xbf16>,
    %c0_81 = arith.constant 0 : index
    %c36_82 = arith.constant 36 : index
    %93 = vector.load %arg13[%c0_81, %c36_82] : memref<32x362xbf16, #tpu.memory_space<vmem>>, vector<32x324xbf16>
    %c192_83 = arith.constant 192 : index
    %c0_84 = arith.constant 0 : index
    %94 = vector.load %arg12[%c192_83, %c0_84] : memref<288x324xbf16, #tpu.memory_space<vmem>>, vector<32x324xbf16>
    tpu.vector_store %arg12[%c192_83, %c0_84], %93 {strides = array<i32>} : memref<288x324xbf16, #tpu.memory_space<vmem>>, vector<32x324xbf16>,
    %c0_85 = arith.constant 0 : index
    %c37_86 = arith.constant 37 : index
    %95 = vector.load %arg13[%c0_85, %c37_86] : memref<32x362xbf16, #tpu.memory_space<vmem>>, vector<32x324xbf16>
    %c224 = arith.constant 224 : index
    %c0_87 = arith.constant 0 : index
    %96 = vector.load %arg12[%c224, %c0_87] : memref<288x324xbf16, #tpu.memory_space<vmem>>, vector<32x324xbf16>
    tpu.vector_store %arg12[%c224, %c0_87], %95 {strides = array<i32>} : memref<288x324xbf16, #tpu.memory_space<vmem>>, vector<32x324xbf16>,
    %c0_88 = arith.constant 0 : index
    %c38_89 = arith.constant 38 : index
    %97 = vector.load %arg13[%c0_88, %c38_89] : memref<32x362xbf16, #tpu.memory_space<vmem>>, vector<32x324xbf16>
    %c256 = arith.constant 256 : index
    %c0_90 = arith.constant 0 : index
    %98 = vector.load %arg12[%c256, %c0_90] : memref<288x324xbf16, #tpu.memory_space<vmem>>, vector<32x324xbf16>
    tpu.vector_store %arg12[%c256, %c0_90], %97 {strides = array<i32>} : memref<288x324xbf16, #tpu.memory_space<vmem>>, vector<32x324xbf16>,
    %c0_91 = arith.constant 0 : index
    %c0_92 = arith.constant 0 : index
    %99 = vector.load %arg6[%c0_91, %c0_92] : memref<32x288xbf16, #tpu.memory_space<vmem>>, vector<32x288xbf16>
    %c0_93 = arith.constant 0 : index
    %c0_94 = arith.constant 0 : index
    %100 = vector.load %arg12[%c0_93, %c0_94] : memref<288x324xbf16, #tpu.memory_space<vmem>>, vector<288x324xbf16>
    %cst_95 = arith.constant dense<0.000000e+00> : vector<32x324xf32>
    %101 = tpu.matmul %99, %100, %cst_95 {dimension_numbers = #tpu.dot_dimension_numbers<[1], [0], [0], [1], [0, 0, 1, 1], [], []>} : vector<32x288xbf16>, vector<288x324xbf16>, vector<32x324xf32> -> vector<32x324xf32>
    %c0_96 = arith.constant 0 : index
    %c0_97 = arith.constant 0 : index
    %102 = vector.load %arg7[%c0_96, %c0_97] : memref<32x1xf32, #tpu.memory_space<vmem>>, vector<32x1xf32>
    %103 = vector.broadcast %102 : vector<32x1xf32> to vector<32x324xf32>
    %104 = arith.addf %101, %103 : vector<32x324xf32>
    %105 = vector.extract_strided_slice %29 {offsets = [32, 0], sizes = [32, 324], strides = [1, 1]} : vector<64x324xf32> to vector<32x324xf32>
    %106 = arith.addf %104, %105 : vector<32x324xf32>
    %c0_98 = arith.constant 0 : index
    %c0_99 = arith.constant 0 : index
    %c0_100 = arith.constant 0 : index
    %107 = vector.load %arg10[%c0_98, %c0_99, %c0_100] : memref<1x32x324xf32, #tpu.memory_space<vmem>>, vector<1x32x324xf32>
    %108 = vector.shape_cast %107 : vector<1x32x324xf32> to vector<32x324xf32>
    %109 = vector.shape_cast %106 : vector<32x324xf32> to vector<1x32x324xf32>
    tpu.vector_store %arg10[%c0_98, %c0_99, %c0_100], %109 {strides = array<i32>} : memref<1x32x324xf32, #tpu.memory_space<vmem>>, vector<1x32x324xf32>,
    return
  }
  func.func @transform_0(%arg0: i32) -> (i32, i32, i32) {
    %c0_i32 = arith.constant 0 : i32
    %c0_i32_0 = arith.constant 0 : i32
    %c0_i32_1 = arith.constant 0 : i32
    return %arg0, %c0_i32, %c0_i32_0 : i32, i32, i32
  }
  func.func @transform_1(%arg0: i32) -> (i32, i32) {
    %c0_i32 = arith.constant 0 : i32
    %c0_i32_0 = arith.constant 0 : i32
    %c0_i32_1 = arith.constant 0 : i32
    return %c0_i32, %c0_i32_0 : i32, i32
  }
  func.func @transform_2(%arg0: i32) -> (i32, i32) {
    %c0_i32 = arith.constant 0 : i32
    %c0_i32_0 = arith.constant 0 : i32
    %c0_i32_1 = arith.constant 0 : i32
    return %c0_i32, %c0_i32_0 : i32, i32
  }
  func.func @transform_3(%arg0: i32) -> (i32, i32) {
    %c0_i32 = arith.constant 0 : i32
    %c0_i32_0 = arith.constant 0 : i32
    %c0_i32_1 = arith.constant 0 : i32
    return %c0_i32, %c0_i32_0 : i32, i32
  }
  func.func @transform_4(%arg0: i32) -> (i32, i32, i32) {
    %c0_i32 = arith.constant 0 : i32
    %c0_i32_0 = arith.constant 0 : i32
    %c0_i32_1 = arith.constant 0 : i32
    return %arg0, %c0_i32, %c0_i32_0 : i32, i32, i32
  }
  func.func @transform_5(%arg0: i32) -> (i32, i32) {
    %c0_i32 = arith.constant 0 : i32
    %c0_i32_0 = arith.constant 0 : i32
    %c0_i32_1 = arith.constant 0 : i32
    return %c0_i32, %c0_i32_0 : i32, i32
  }
  func.func @transform_6(%arg0: i32) -> (i32, i32) {
    %c0_i32 = arith.constant 0 : i32
    %c0_i32_0 = arith.constant 0 : i32
    %c0_i32_1 = arith.constant 0 : i32
    return %c0_i32, %c0_i32_0 : i32, i32
  }
  func.func @transform_7(%arg0: i32) -> (i32, i32) {
    %c0_i32 = arith.constant 0 : i32
    %c0_i32_0 = arith.constant 0 : i32
    %c0_i32_1 = arith.constant 0 : i32
    return %c0_i32, %c0_i32_0 : i32, i32
  }
  func.func @transform_8(%arg0: i32) -> (i32, i32) {
    %c0_i32 = arith.constant 0 : i32
    %c0_i32_0 = arith.constant 0 : i32
    %c0_i32_1 = arith.constant 0 : i32
    return %c0_i32, %c0_i32_0 : i32, i32
  }
  func.func @transform_9(%arg0: i32) -> (i32, i32, i32) {
    %c0_i32 = arith.constant 0 : i32
    %c0_i32_0 = arith.constant 0 : i32
    %c0_i32_1 = arith.constant 0 : i32
    return %arg0, %c0_i32, %c0_i32_0 : i32, i32, i32
  }
}

module attributes {stable_mosaic.version = 11 : i64} {
  func.func @_attn_kernel(%arg0: i32, %arg1: memref<1x32x256xf32, #tpu.memory_space<vmem>>, %arg2: memref<32x1xf32, #tpu.memory_space<vmem>>, %arg3: memref<32x1xf32, #tpu.memory_space<vmem>>, %arg4: memref<96x32xbf16, #tpu.memory_space<vmem>>, %arg5: memref<96x1xf32, #tpu.memory_space<vmem>>, %arg6: memref<32x32xbf16, #tpu.memory_space<vmem>>, %arg7: memref<32x1xf32, #tpu.memory_space<vmem>>, %arg8: memref<32x32xf32, #tpu.memory_space<vmem>>, %arg9: memref<1x32x256xf32, #tpu.memory_space<vmem>>) attributes {dimension_semantics = [#tpu.dimension_semantics<parallel>], iteration_bounds = array<i64: 2>, scalar_prefetch = 0 : i64, scratch_operands = 0 : i64, tpu.core_type = #tpu.core_type<tc>, window_params = [{transform_indices = @transform_0, window_bounds = array<i64: 1, 32, 256>}, {pipeline_mode = #tpu.pipeline_mode<synchronous>, transform_indices = @transform_1, window_bounds = array<i64: 32, 1>}, {pipeline_mode = #tpu.pipeline_mode<synchronous>, transform_indices = @transform_2, window_bounds = array<i64: 32, 1>}, {pipeline_mode = #tpu.pipeline_mode<synchronous>, transform_indices = @transform_3, window_bounds = array<i64: 96, 32>}, {pipeline_mode = #tpu.pipeline_mode<synchronous>, transform_indices = @transform_4, window_bounds = array<i64: 96, 1>}, {pipeline_mode = #tpu.pipeline_mode<synchronous>, transform_indices = @transform_5, window_bounds = array<i64: 32, 32>}, {pipeline_mode = #tpu.pipeline_mode<synchronous>, transform_indices = @transform_6, window_bounds = array<i64: 32, 1>}, {pipeline_mode = #tpu.pipeline_mode<synchronous>, transform_indices = @transform_7, window_bounds = array<i64: 32, 32>}, {transform_indices = @transform_8, window_bounds = array<i64: 1, 32, 256>}]} {
    %c0 = arith.constant 0 : index
    %c0_0 = arith.constant 0 : index
    %c0_1 = arith.constant 0 : index
    %0 = vector.load %arg1[%c0, %c0_0, %c0_1] : memref<1x32x256xf32, #tpu.memory_space<vmem>>, vector<1x32x256xf32>
    %1 = vector.shape_cast %0 : vector<1x32x256xf32> to vector<32x256xf32>
    %cst = arith.constant dense<0.000000e+00> : vector<32xf32>
    %2 = vector.multi_reduction <add>, %1, %cst [1] : vector<32x256xf32> to vector<32xf32>
    %3 = vector.shape_cast %2 : vector<32xf32> to vector<32x1xf32>
    %4 = arith.mulf %1, %1 : vector<32x256xf32>
    %cst_2 = arith.constant dense<0.000000e+00> : vector<32xf32>
    %5 = vector.multi_reduction <add>, %4, %cst_2 [1] : vector<32x256xf32> to vector<32xf32>
    %6 = vector.shape_cast %5 : vector<32xf32> to vector<32x1xf32>
    %c0_3 = arith.constant 0 : index
    %c0_4 = arith.constant 0 : index
    %7 = vector.load %arg8[%c0_3, %c0_4] : memref<32x32xf32, #tpu.memory_space<vmem>>, vector<32x32xf32>
    %cst_5 = arith.constant dense<0.000000e+00> : vector<32x1xf32>
    %8 = tpu.matmul %7, %3, %cst_5 {dimension_numbers = #tpu.dot_dimension_numbers<[1], [0], [0], [1], [0, 0, 1, 1], [], []>} : vector<32x32xf32>, vector<32x1xf32>, vector<32x1xf32> -> vector<32x1xf32>
    %cst_6 = arith.constant 0.001953125 : f32
    %9 = vector.broadcast %cst_6 : f32 to vector<32x1xf32>
    %10 = arith.mulf %8, %9 : vector<32x1xf32>
    %c0_7 = arith.constant 0 : index
    %c0_8 = arith.constant 0 : index
    %11 = vector.load %arg8[%c0_7, %c0_8] : memref<32x32xf32, #tpu.memory_space<vmem>>, vector<32x32xf32>
    %cst_9 = arith.constant dense<0.000000e+00> : vector<32x1xf32>
    %12 = tpu.matmul %11, %6, %cst_9 {dimension_numbers = #tpu.dot_dimension_numbers<[1], [0], [0], [1], [0, 0, 1, 1], [], []>} : vector<32x32xf32>, vector<32x1xf32>, vector<32x1xf32> -> vector<32x1xf32>
    %cst_10 = arith.constant 0.001953125 : f32
    %13 = vector.broadcast %cst_10 : f32 to vector<32x1xf32>
    %14 = arith.mulf %12, %13 : vector<32x1xf32>
    %15 = arith.mulf %10, %10 : vector<32x1xf32>
    %16 = arith.subf %14, %15 : vector<32x1xf32>
    %cst_11 = arith.constant 9.99999997E-7 : f32
    %17 = vector.broadcast %cst_11 : f32 to vector<32x1xf32>
    %18 = arith.addf %16, %17 : vector<32x1xf32>
    %19 = math.rsqrt %18 : vector<32x1xf32>
    %20 = vector.broadcast %10 : vector<32x1xf32> to vector<32x256xf32>
    %21 = arith.subf %1, %20 : vector<32x256xf32>
    %22 = vector.broadcast %19 : vector<32x1xf32> to vector<32x256xf32>
    %23 = arith.mulf %21, %22 : vector<32x256xf32>
    %c0_12 = arith.constant 0 : index
    %c0_13 = arith.constant 0 : index
    %24 = vector.load %arg2[%c0_12, %c0_13] : memref<32x1xf32, #tpu.memory_space<vmem>>, vector<32x1xf32>
    %25 = vector.broadcast %24 : vector<32x1xf32> to vector<32x256xf32>
    %26 = arith.mulf %23, %25 : vector<32x256xf32>
    %c0_14 = arith.constant 0 : index
    %c0_15 = arith.constant 0 : index
    %27 = vector.load %arg3[%c0_14, %c0_15] : memref<32x1xf32, #tpu.memory_space<vmem>>, vector<32x1xf32>
    %28 = vector.broadcast %27 : vector<32x1xf32> to vector<32x256xf32>
    %29 = arith.addf %26, %28 : vector<32x256xf32>
    %30 = arith.truncf %29 : vector<32x256xf32> to vector<32x256xbf16>
    %c0_16 = arith.constant 0 : index
    %c0_17 = arith.constant 0 : index
    %31 = vector.load %arg4[%c0_16, %c0_17] : memref<96x32xbf16, #tpu.memory_space<vmem>>, vector<96x32xbf16>
    %cst_18 = arith.constant dense<0.000000e+00> : vector<96x256xf32>
    %32 = tpu.matmul %31, %30, %cst_18 {dimension_numbers = #tpu.dot_dimension_numbers<[1], [0], [0], [1], [0, 0, 1, 1], [], []>} : vector<96x32xbf16>, vector<32x256xbf16>, vector<96x256xf32> -> vector<96x256xf32>
    %c0_19 = arith.constant 0 : index
    %c0_20 = arith.constant 0 : index
    %33 = vector.load %arg5[%c0_19, %c0_20] : memref<96x1xf32, #tpu.memory_space<vmem>>, vector<96x1xf32>
    %34 = vector.broadcast %33 : vector<96x1xf32> to vector<96x256xf32>
    %35 = arith.addf %32, %34 : vector<96x256xf32>
    %36 = vector.extract_strided_slice %35 {offsets = [0, 0], sizes = [32, 256], strides = [1, 1]} : vector<96x256xf32> to vector<32x256xf32>
    %37 = vector.extract_strided_slice %35 {offsets = [32, 0], sizes = [32, 256], strides = [1, 1]} : vector<96x256xf32> to vector<32x256xf32>
    %38 = vector.extract_strided_slice %35 {offsets = [64, 0], sizes = [32, 256], strides = [1, 1]} : vector<96x256xf32> to vector<32x256xf32>
    %39 = tpu.transpose %36, [1, 0] : vector<32x256xf32> -> vector<256x32xf32>
    %40 = arith.truncf %39 : vector<256x32xf32> to vector<256x32xbf16>
    %41 = arith.truncf %37 : vector<32x256xf32> to vector<32x256xbf16>
    %cst_21 = arith.constant dense<0.000000e+00> : vector<256x256xf32>
    %42 = tpu.matmul %40, %41, %cst_21 {dimension_numbers = #tpu.dot_dimension_numbers<[1], [0], [0], [1], [0, 0, 1, 1], [], []>} : vector<256x32xbf16>, vector<32x256xbf16>, vector<256x256xf32> -> vector<256x256xf32>
    %cst_22 = arith.constant 0.176776692 : f32
    %43 = vector.broadcast %cst_22 : f32 to vector<256x256xf32>
    %44 = arith.mulf %42, %43 : vector<256x256xf32>
    %cst_23 = arith.constant dense<0xFF800000> : vector<256xf32>
    %45 = vector.multi_reduction <maximumf>, %44, %cst_23 [1] : vector<256x256xf32> to vector<256xf32>
    %46 = vector.shape_cast %45 : vector<256xf32> to vector<256x1xf32>
    %47 = vector.broadcast %46 : vector<256x1xf32> to vector<256x256xf32>
    %48 = arith.subf %44, %47 : vector<256x256xf32>
    %49 = math.exp %48 : vector<256x256xf32>
    %cst_24 = arith.constant dense<0.000000e+00> : vector<256xf32>
    %50 = vector.multi_reduction <add>, %49, %cst_24 [1] : vector<256x256xf32> to vector<256xf32>
    %51 = vector.shape_cast %50 : vector<256xf32> to vector<256x1xf32>
    %52 = vector.broadcast %51 : vector<256x1xf32> to vector<256x256xf32>
    %53 = arith.divf %49, %52 : vector<256x256xf32>
    %54 = arith.truncf %38 : vector<32x256xf32> to vector<32x256xbf16>
    %55 = arith.truncf %53 : vector<256x256xf32> to vector<256x256xbf16>
    %cst_25 = arith.constant dense<0.000000e+00> : vector<32x256xf32>
    %56 = tpu.matmul %54, %55, %cst_25 {dimension_numbers = #tpu.dot_dimension_numbers<[1], [1], [0], [0], [0, 0, 1, 0], [], []>} : vector<32x256xbf16>, vector<256x256xbf16>, vector<32x256xf32> -> vector<32x256xf32>
    %c0_26 = arith.constant 0 : index
    %c0_27 = arith.constant 0 : index
    %57 = vector.load %arg6[%c0_26, %c0_27] : memref<32x32xbf16, #tpu.memory_space<vmem>>, vector<32x32xbf16>
    %58 = arith.truncf %56 : vector<32x256xf32> to vector<32x256xbf16>
    %cst_28 = arith.constant dense<0.000000e+00> : vector<32x256xf32>
    %59 = tpu.matmul %57, %58, %cst_28 {dimension_numbers = #tpu.dot_dimension_numbers<[1], [0], [0], [1], [0, 0, 1, 1], [], []>} : vector<32x32xbf16>, vector<32x256xbf16>, vector<32x256xf32> -> vector<32x256xf32>
    %c0_29 = arith.constant 0 : index
    %c0_30 = arith.constant 0 : index
    %60 = vector.load %arg7[%c0_29, %c0_30] : memref<32x1xf32, #tpu.memory_space<vmem>>, vector<32x1xf32>
    %61 = vector.broadcast %60 : vector<32x1xf32> to vector<32x256xf32>
    %62 = arith.addf %59, %61 : vector<32x256xf32>
    %63 = arith.addf %1, %62 : vector<32x256xf32>
    %c0_31 = arith.constant 0 : index
    %c0_32 = arith.constant 0 : index
    %c0_33 = arith.constant 0 : index
    %64 = vector.load %arg9[%c0_31, %c0_32, %c0_33] : memref<1x32x256xf32, #tpu.memory_space<vmem>>, vector<1x32x256xf32>
    %65 = vector.shape_cast %64 : vector<1x32x256xf32> to vector<32x256xf32>
    %66 = vector.shape_cast %63 : vector<32x256xf32> to vector<1x32x256xf32>
    tpu.vector_store %arg9[%c0_31, %c0_32, %c0_33], %66 {strides = array<i32>} : memref<1x32x256xf32, #tpu.memory_space<vmem>>, vector<1x32x256xf32>,
    return
  }
  func.func @transform_0(%arg0: i32) -> (i32, i32, i32) {
    %c0_i32 = arith.constant 0 : i32
    %c0_i32_0 = arith.constant 0 : i32
    %c0_i32_1 = arith.constant 0 : i32
    return %arg0, %c0_i32, %c0_i32_0 : i32, i32, i32
  }
  func.func @transform_1(%arg0: i32) -> (i32, i32) {
    %c0_i32 = arith.constant 0 : i32
    %c0_i32_0 = arith.constant 0 : i32
    %c0_i32_1 = arith.constant 0 : i32
    return %c0_i32, %c0_i32_0 : i32, i32
  }
  func.func @transform_2(%arg0: i32) -> (i32, i32) {
    %c0_i32 = arith.constant 0 : i32
    %c0_i32_0 = arith.constant 0 : i32
    %c0_i32_1 = arith.constant 0 : i32
    return %c0_i32, %c0_i32_0 : i32, i32
  }
  func.func @transform_3(%arg0: i32) -> (i32, i32) {
    %c0_i32 = arith.constant 0 : i32
    %c0_i32_0 = arith.constant 0 : i32
    %c0_i32_1 = arith.constant 0 : i32
    return %c0_i32, %c0_i32_0 : i32, i32
  }
  func.func @transform_4(%arg0: i32) -> (i32, i32) {
    %c0_i32 = arith.constant 0 : i32
    %c0_i32_0 = arith.constant 0 : i32
    %c0_i32_1 = arith.constant 0 : i32
    return %c0_i32, %c0_i32_0 : i32, i32
  }
  func.func @transform_5(%arg0: i32) -> (i32, i32) {
    %c0_i32 = arith.constant 0 : i32
    %c0_i32_0 = arith.constant 0 : i32
    %c0_i32_1 = arith.constant 0 : i32
    return %c0_i32, %c0_i32_0 : i32, i32
  }
  func.func @transform_6(%arg0: i32) -> (i32, i32) {
    %c0_i32 = arith.constant 0 : i32
    %c0_i32_0 = arith.constant 0 : i32
    %c0_i32_1 = arith.constant 0 : i32
    return %c0_i32, %c0_i32_0 : i32, i32
  }
  func.func @transform_7(%arg0: i32) -> (i32, i32) {
    %c0_i32 = arith.constant 0 : i32
    %c0_i32_0 = arith.constant 0 : i32
    %c0_i32_1 = arith.constant 0 : i32
    return %c0_i32, %c0_i32_0 : i32, i32
  }
  func.func @transform_8(%arg0: i32) -> (i32, i32, i32) {
    %c0_i32 = arith.constant 0 : i32
    %c0_i32_0 = arith.constant 0 : i32
    %c0_i32_1 = arith.constant 0 : i32
    return %arg0, %c0_i32, %c0_i32_0 : i32, i32, i32
  }
}

</mosaic_0001>

<bundles_post_ra>
// kernel: upblock_forward.3
= control target key start
LH: loop header
LB: loop body
LE: loop exit
PB: predicated region body
PF: predicated region fallthrough
CT: control target
= control target key end

     0   :  { %s3100_s30 = smov 0   ;;  %s3740_s0 = inlined_call_operand.vmem [shape: bf16[2,32,362], index: 0, kind: input, shape index: {}]   ;;  %s3741_s1 = inlined_call_operand.vmem [shape: bf16[32,288], index: 1, kind: input, shape index: {}]   ;;  %s3742_s2 = inlined_call_operand.vmem [shape: f32[32,1], index: 2, kind: input, shape index: {}]   ;;  %s3743_s3 = inlined_call_operand.vmem [shape: f32[32,1], index: 3, kind: input, shape index: {}]   ;;  %s3744_s4 = inlined_call_operand.vmem [shape: f32[2,32,1], index: 4, kind: input, shape index: {}]   ;;  %s3745_s5 = inlined_call_operand.vmem [shape: bf16[32,288], index: 5, kind: input, shape index: {}]   ;;  %s3746_s6 = inlined_call_operand.vmem [shape: f32[32,1], index: 6, kind: input, shape index: {}]   ;;  %s3747_s7 = inlined_call_operand.vmem [shape: f32[32,32], index: 7, kind: input, shape index: {}]   ;;  %s3748_s8 = inlined_call_operand.vmem [shape: f32[1,324], index: 8, kind: input, shape index: {}]   ;;  %s3749_s9 = inlined_call_operand.vmem [shape: f32[2,32,324], index: 9, kind: output, shape index: {}]  }
   0x1 LB: > { %s2618_s10 = sadd.s32 4294967295, %s3038_s30   ;;  %p2622_p0 = scmp.ge.s32.totalorder %s3038_s30, 1  ;;  %s3038_s30 = sphi %s3100_s30, %s19_s30  }
   0x2   : > { %p297_p1 = scmp.lt.s32.totalorder %s3038_s30, 3 }
   0x4   : > { %p298_p2 = pnand %p2622_p0, %p297_p1 }
   0x5   : > { %p338_p3 = scmp.lt.s32.totalorder (!%p298_p2), %s2618_s10, 1  ;;  %s3040_s15 = smov (!%p298_p2), 127   ;;  %vm396_vm0 = vcmask (!%p298_p2), 556032   ;;  %v2962_v19 = vld [vmem:[%s3741_s1 + $0x4] ss:$12 sps:$4 sm:$0xff] (!%p298_p2)   ;;  %v3047_v22 = vmov (!%p298_p2), 0  }
   0x6   : > { %301 = sbr.rel (%p298_p2) target bundleno = 1605 (0x645), region = 56  ;;  %s3041_s16 = smov (!%p298_p2), 126   ;;  %1060 = vmatprep.mubr.bf16.mxu0 (!%p298_p2), %v2962_v19  ;;  %1166 = vmatprep.mubr.bf16.mxu1 (!%p298_p2), %v2962_v19  ;;  %v967_v24 = vld [vmem:[%s3742_s2] sm:$0xff] (!%p298_p2)  ;;  %v968_v25 = vld [vmem:[%s3742_s2 + $0x8] sm:$0xff] (!%p298_p2)  ;;  %v969_v26 = vld [vmem:[%s3742_s2 + $0x10] sm:$0xff] (!%p298_p2)  ;;  %vm447_vm1 = vcmask (!%p298_p2), 1039360  }
   0x7   : > { %s3042_s17 = smov (!%p298_p2), 110   ;;  %s3043_s18 = smov (!%p298_p2), 109   ;;  %2904 = vset.pattern.permute.xlu0 (!%p298_p2), %v3047_v22  ;;  %2905 = vset.pattern.permute.xlu1 (!%p298_p2), %v3047_v22  ;;  %v970_v27 = vld [vmem:[%s3742_s2 + $0x18] sm:$0xff] (!%p298_p2)  ;;  %vm510_vm2 = vcmask (!%p298_p2), 1031168   ;;  %vm573_vm3 = vcmask (!%p298_p2), 900096   ;;  %vm636_vm4 = vcmask (!%p298_p2), 891904  }
   0x8   : > { %s3044_s19 = smov (!%p298_p2), 108   ;;  %s3045_s20 = smov (!%p298_p2), 92   ;;  %vm699_vm5 = vcmask (!%p298_p2), 883712   ;;  %vm762_vm6 = vcmask (!%p298_p2), 752640   ;;  %vm825_vm7 = vcmask (!%p298_p2), 744448   ;;  %vm888_vm8 = vcmask (!%p298_p2), 736256  }
   0x9   : > { %s3046_s23 = smov (!%p298_p2), 91   ;;  %s3048_s24 = smov (!%p298_p2), 90   ;;  %vm1021_vm9 = vcmask (!%p298_p2), 261120   ;;  %vm1743_vm10 = vcmask (!%p298_p2), 154624   ;;  %vm1784_vm11 = vcmask (!%p298_p2), 711680   ;;  %vm1789_vm12 = vcmask (!%p298_p2), 868024  }
   0xa   : > { %1744 = vst.msk [vmem:[#allocation4] sm:$0xff] (!%p298_p2), %vm1743_vm10, %v3047_v22  ;;  %1745 = vst.msk [vmem:[#allocation4 + $0x18] sm:$0xff] (!%p298_p2), %vm1743_vm10, %v3047_v22  ;;  %vm1781_vm13 = vcmask (!%p298_p2), 1047704  }
   0xd   : > { %s3751_s10 = smov (!%p338_p3, %s2618_s10), 1 }
   0xe   : > { %s2884_s11 = smul.u32 48, %s3751_s10  ;;  %s2711_s25 = sshll.u32 %s3751_s10, 5 }
   0xf   : > { %s3406_s13 = scalar_lea.vmem %s3744_s4, %s2711_s25 }
  0x10   : > { %s3114_s14 = scalar_lea.vmem %s3740_s0, %s2884_s11 }
  0x11   : > { %v3117_v0 = vld [vmem:[%s3114_s14 + $0x4] ss:$12 sps:$4 sm:$0xff]   ;;  %v3120_v1 = vld [vmem:[%s3114_s14] ss:$12 sps:$4 sm:$0xff]   ;;  %v2939_v2 = vld [vmem:[%s3114_s14 + $0x8] ss:$12 sps:$4 sm:$0xff]  }
  0x12   : > { %437 = vrot.lane.b32.xlu0 %v3117_v0, %s3040_s15  ;;  %1028 = vmatprep.subr.bf16.mxu0 %v3117_v0  ;;  %v3129_v3 = vld [vmem:[%s3114_s14 + $0x1c] ss:$12 sps:$4 sm:$0xff]   ;;  %v3133_v4 = vld [vmem:[%s3114_s14 + $0x18] ss:$12 sps:$4 sm:$0xff]   ;;  %v2942_v5 = vld [vmem:[%s3114_s14 + $0x20] ss:$12 sps:$4 sm:$0xff]  }
  0x13   : > { %435 = vrot.lane.b32.xlu1 %v3120_v1, %s3040_s15  ;;  %1029 = vmatpush1.bf16.msra.mxu0 %v3120_v1  ;;  %v2944_v6 = vld [vmem:[%s3114_s14 + $0x8] ss:$12 sps:$4 sm:$0xff]   ;;  %v2945_v7 = vld [vmem:[%s3114_s14 + $0x20] ss:$12 sps:$4 sm:$0xff]  }
  0x14   : > { %1030 = vmatprep.subr.bf16.mxu0 %v3129_v3  ;;  %v2946_v8 = vld [vmem:[%s3114_s14 + $0x8] ss:$12 sps:$4 sm:$0xff]   ;;  %v2947_v10 = vld [vmem:[%s3114_s14 + $0x20] ss:$12 sps:$4 sm:$0xff]  }
  0x15   : > { %v2958_v9 = vld [vmem:[%s3114_s14 + $0x8] ss:$12 sps:$4 sm:$0xff]   ;;  %v2959_v11 = vld [vmem:[%s3114_s14 + $0x20] ss:$12 sps:$4 sm:$0xff]  }
  0x16   : > { %439 = vrot.lane.b32.xlu0 %v2939_v2, %s3040_s15  ;;  %397 = vst.msk [vmem:[#allocation2 + $0x10] sm:$0xff] %vm396_vm0, %v2958_v9  ;;  %v2948_v12 = vld [vmem:[%s3114_s14 + $0x8] ss:$12 sps:$4 sm:$0xff]   ;;  %400 = vst.msk [vmem:[#allocation2 + $0x28] sm:$0xff] %vm396_vm0, %v2959_v11  ;;  %v2949_v13 = vld [vmem:[%s3114_s14 + $0x20] ss:$12 sps:$4 sm:$0xff]  }
  0x17   : > { %443 = vrot.lane.b32.xlu1 %v3129_v3, %s3040_s15  ;;  %1031 = vmatpush1.bf16.msra.mxu0 %v3133_v4  ;;  %v2950_v14 = vld [vmem:[%s3114_s14 + $0x8] ss:$12 sps:$4 sm:$0xff]   ;;  %v2951_v15 = vld [vmem:[%s3114_s14 + $0x20] ss:$12 sps:$4 sm:$0xff]  }
  0x18   : > { %v2952_v16 = vld [vmem:[%s3114_s14 + $0x8] ss:$12 sps:$4 sm:$0xff]   ;;  %v2953_v17 = vld [vmem:[%s3114_s14 + $0x20] ss:$12 sps:$4 sm:$0xff]  }
  0x19   : > { %v2954_v18 = vld [vmem:[%s3114_s14 + $0x8] ss:$12 sps:$4 sm:$0xff]   ;;  %v2955_v20 = vld [vmem:[%s3114_s14 + $0x20] ss:$12 sps:$4 sm:$0xff]  }
  0x1a   : > { %445 = vrot.lane.b32.xlu0 %v2942_v5, %s3040_s15  ;;  %v2956_v21 = vld [vmem:[%s3114_s14 + $0x8] ss:$12 sps:$4 sm:$0xff]   ;;  %v2957_v23 = vld [vmem:[%s3114_s14 + $0x20] ss:$12 sps:$4 sm:$0xff]  }
  0x1b   : > { %441 = vrot.lane.b32.xlu1 %v3133_v4, %s3040_s15 }
  0x1d   : > { %v918_v9 = vld [vmem:[#allocation2 + $0x28] sm:$0xff] }
  0x1e   : > { %500 = vrot.lane.b32.xlu0 %v3117_v0, %s3041_s16 }
  0x1f   : > { %502 = vrot.lane.b32.xlu1 %v2944_v6, %s3041_s16 }
  0x22   : > { %498 = vrot.lane.b32.xlu0 %v3120_v1, %s3041_s16 }
  0x23   : > { %506 = vrot.lane.b32.xlu1 %v3129_v3, %s3041_s16 }
  0x26   : > { %508 = vrot.lane.b32.xlu0 %v2945_v7, %s3041_s16 }
  0x27   : > { %504 = vrot.lane.b32.xlu1 %v3133_v4, %s3041_s16 }
  0x2a   : > { %563 = vrot.lane.b32.xlu0 %v3117_v0, %s3042_s17 }
  0x2b   : > { %565 = vrot.lane.b32.xlu1 %v2946_v8, %s3042_s17 }
  0x2e   : > { %561 = vrot.lane.b32.xlu0 %v3120_v1, %s3042_s17 }
  0x2f   : > { %569 = vrot.lane.b32.xlu1 %v3129_v3, %s3042_s17 }
  0x32   : > { %571 = vrot.lane.b32.xlu0 %v2947_v10, %s3042_s17 }
  0x33   : > { %567 = vrot.lane.b32.xlu1 %v3133_v4, %s3042_s17 }
  0x36   : > { %626 = vrot.lane.b32.xlu0 %v3117_v0, %s3043_s18 }
  0x37   : > { %628 = vrot.lane.b32.xlu1 %v2948_v12, %s3043_s18 }
  0x3a   : > { %624 = vrot.lane.b32.xlu0 %v3120_v1, %s3043_s18 }
  0x3b   : > { %632 = vrot.lane.b32.xlu1 %v3129_v3, %s3043_s18 }
  0x3e   : > { %634 = vrot.lane.b32.xlu0 %v2949_v13, %s3043_s18 }
  0x3f   : > { %630 = vrot.lane.b32.xlu1 %v3133_v4, %s3043_s18 }
  0x42   : > { %689 = vrot.lane.b32.xlu0 %v3117_v0, %s3044_s19 }
  0x43   : > { %691 = vrot.lane.b32.xlu1 %v2950_v14, %s3044_s19 }
  0x46   : > { %687 = vrot.lane.b32.xlu0 %v3120_v1, %s3044_s19 }
  0x47   : > { %695 = vrot.lane.b32.xlu1 %v3129_v3, %s3044_s19 }
  0x4a   : > { %697 = vrot.lane.b32.xlu0 %v2951_v15, %s3044_s19 }
  0x4b   : > { %693 = vrot.lane.b32.xlu1 %v3133_v4, %s3044_s19 }
  0x4e   : > { %752 = vrot.lane.b32.xlu0 %v3117_v0, %s3045_s20 }
  0x4f   : > { %754 = vrot.lane.b32.xlu1 %v2952_v16, %s3045_s20 }
  0x52   : > { %750 = vrot.lane.b32.xlu0 %v3120_v1, %s3045_s20 }
  0x53   : > { %758 = vrot.lane.b32.xlu1 %v3129_v3, %s3045_s20 }
  0x56   : > { %760 = vrot.lane.b32.xlu0 %v2953_v17, %s3045_s20 }
  0x57   : > { %756 = vrot.lane.b32.xlu1 %v3133_v4, %s3045_s20 }
  0x5a   : > { %815 = vrot.lane.b32.xlu0 %v3117_v0, %s3046_s23 }
  0x5b   : > { %817 = vrot.lane.b32.xlu1 %v2954_v18, %s3046_s23 }
  0x5e   : > { %813 = vrot.lane.b32.xlu0 %v3120_v1, %s3046_s23 }
  0x5f   : > { %821 = vrot.lane.b32.xlu1 %v3129_v3, %s3046_s23 }
  0x62   : > { %823 = vrot.lane.b32.xlu0 %v2955_v20, %s3046_s23 }
  0x63   : > { %819 = vrot.lane.b32.xlu1 %v3133_v4, %s3046_s23 }
  0x66   : > { %878 = vrot.lane.b32.xlu0 %v3117_v0, %s3048_s24 }
  0x67   : > { %880 = vrot.lane.b32.xlu1 %v2956_v21, %s3048_s24 }
  0x6a   : > { %876 = vrot.lane.b32.xlu0 %v3120_v1, %s3048_s24  ;;  %v915_v1 = vld [vmem:[#allocation2 + $0x10] sm:$0xff] }
  0x6b   : > { %884 = vrot.lane.b32.xlu1 %v3129_v3, %s3048_s24 }
  0x6e   : > { %886 = vrot.lane.b32.xlu0 %v2957_v23, %s3048_s24 }
  0x6f   : > { %882 = vrot.lane.b32.xlu1 %v3133_v4, %s3048_s24 }
  0x72   : > { %973 = vperm.xlu0 %2904, %v967_v24  }
  0x73   : > { %978 = vperm.xlu1 %2905, %v968_v25  }
  0x76   : > { %988 = vperm.xlu0 %2904, %v970_v27  }
  0x77   : > { %983 = vperm.xlu1 %2905, %v969_v26  }
  0x84   : > { %v438_v28 = vpop.permute.xlu0 %437 }
  0x85   : > { %v436_v29 = vpop.permute.xlu1 %435 }
  0x86   : > { %v448_v30 = vsel %vm447_vm1, %v436_v29, %v438_v28 }
  0x88   : > { %v440_v31 = vpop.permute.xlu0 %439 }
  0x89   : > { %v449_v32 = vsel %vm447_vm1, %v438_v28, %v440_v31  ;;  %460 = vst.msk [vmem:[#allocation2 + $0x40] sm:$0xff] %vm396_vm0, %v440_v31  ;;  %v444_v33 = vpop.permute.xlu1 %443 }
  0x8a   : > { %1032 = vmatprep.subr.bf16.mxu0 %v449_v32 }
  0x8b   : > { %1033 = vmatpush1.bf16.msra.mxu0 %v448_v30 }
  0x8c   : > { %v446_v34 = vpop.permute.xlu0 %445 }
  0x8d   : > { %v451_v35 = vsel %vm447_vm1, %v444_v33, %v446_v34  ;;  %463 = vst.msk [vmem:[#allocation2 + $0x58] sm:$0xff] %vm396_vm0, %v446_v34  ;;  %v442_v36 = vpop.permute.xlu1 %441 }
  0x8e   : > { %v450_v37 = vsel %vm447_vm1, %v442_v36, %v444_v33  ;;  %1034 = vmatprep.subr.bf16.mxu0 %v451_v35 }
  0x8f   : > { %1035 = vmatpush1.bf16.msra.mxu0 %v450_v37 }
  0x90   : > { %v501_v38 = vpop.permute.xlu0 %500  ;;  %v921_v19 = vld [vmem:[#allocation2 + $0x40] sm:$0xff] }
  0x91   : > { %v503_v39 = vpop.permute.xlu1 %502 }
  0x92   : > { %v512_v40 = vsel %vm510_vm2, %v501_v38, %v503_v39  ;;  %523 = vst.msk [vmem:[#allocation2 + $0x70] sm:$0xff] %vm396_vm0, %v503_v39 }
  0x93   : > { %1036 = vmatprep.subr.bf16.mxu0 %v512_v40 }
  0x94   : > { %v499_v41 = vpop.permute.xlu0 %498  ;;  %v924_v28 = vld [vmem:[#allocation2 + $0x58] sm:$0xff] }
  0x95   : > { %v511_v42 = vsel %vm510_vm2, %v499_v41, %v501_v38  ;;  %v507_v43 = vpop.permute.xlu1 %506 }
  0x96   : > { %1037 = vmatpush1.bf16.msra.mxu0 %v511_v42 }
  0x98   : > { %v509_v44 = vpop.permute.xlu0 %508 }
  0x99   : > { %v514_v45 = vsel %vm510_vm2, %v507_v43, %v509_v44  ;;  %526 = vst.msk [vmem:[#allocation2 + $0x88] sm:$0xff] %vm396_vm0, %v509_v44  ;;  %v505_v46 = vpop.permute.xlu1 %504  ;;  %v927_v34 = vld [vmem:[#allocation2 + $0x70] sm:$0xff] }
  0x9a   : > { %v513_v47 = vsel %vm510_vm2, %v505_v46, %v507_v43  ;;  %1038 = vmatprep.subr.bf16.mxu0 %v514_v45 }
  0x9b   : > { %1039 = vmatpush1.bf16.msra.mxu0 %v513_v47 }
  0x9c   : > { %v564_v48 = vpop.permute.xlu0 %563 }
  0x9d   : > { %v566_v49 = vpop.permute.xlu1 %565 }
  0x9e   : > { %v575_v50 = vsel %vm573_vm3, %v564_v48, %v566_v49  ;;  %586 = vst.msk [vmem:[#allocation2 + $0xa0] sm:$0xff] %vm396_vm0, %v566_v49  ;;  %v2960_v49 = vld [vmem:[%s3741_s1] ss:$12 sps:$4 sm:$0xff]  }
  0x9f   : > { %1040 = vmatprep.subr.bf16.mxu0 %v575_v50  ;;  %v2963_v50 = vld [vmem:[%s3741_s1 + $0x1c] ss:$12 sps:$4 sm:$0xff]  }
  0xa0   : > { %v562_v51 = vpop.permute.xlu0 %561  ;;  %v930_v42 = vld [vmem:[#allocation2 + $0x88] sm:$0xff] }
  0xa1   : > { %v574_v52 = vsel %vm573_vm3, %v562_v51, %v564_v48  ;;  %v570_v53 = vpop.permute.xlu1 %569 }
  0xa2   : > { %1041 = vmatpush1.bf16.msra.mxu0 %v574_v52 }
  0xa4   : > { %v572_v54 = vpop.permute.xlu0 %571 }
  0xa5   : > { %v577_v55 = vsel %vm573_vm3, %v570_v53, %v572_v54  ;;  %589 = vst.msk [vmem:[#allocation2 + $0xb8] sm:$0xff] %vm396_vm0, %v572_v54  ;;  %v568_v56 = vpop.permute.xlu1 %567  ;;  %v933_v48 = vld [vmem:[#allocation2 + $0xa0] sm:$0xff] }
  0xa6   : > { %v576_v57 = vsel %vm573_vm3, %v568_v56, %v570_v53  ;;  %1042 = vmatprep.subr.bf16.mxu0 %v577_v55 }
  0xa7   : > { %1043 = vmatpush1.bf16.msra.mxu0 %v576_v57 }
  0xa8   : > { %v627_v58 = vpop.permute.xlu0 %626 }
  0xa9   : > { %v629_v59 = vpop.permute.xlu1 %628 }
  0xaa   : > { %v638_v60 = vsel %vm636_vm4, %v627_v58, %v629_v59  ;;  %649 = vst.msk [vmem:[#allocation2 + $0xd0] sm:$0xff] %vm396_vm0, %v629_v59  ;;  %v2965_v59 = vld [vmem:[%s3741_s1 + $0x18] ss:$12 sps:$4 sm:$0xff]  }
  0xab   : > { %1044 = vmatprep.subr.bf16.mxu0 %v638_v60 }
  0xac   : > { %v625_v61 = vpop.permute.xlu0 %624 }
  0xad   : > { %v637_v62 = vsel %vm636_vm4, %v625_v61, %v627_v58  ;;  %v633_v63 = vpop.permute.xlu1 %632  ;;  %v936_v58 = vld [vmem:[#allocation2 + $0xb8] sm:$0xff] }
  0xae   : > { %1045 = vmatpush1.bf16.msra.mxu0 %v637_v62 }
  0xb0   : > { %v635_v0 = vpop.permute.xlu0 %634 }
  0xb1   : > { %v640_v2 = vsel %vm636_vm4, %v633_v63, %v635_v0  ;;  %652 = vst.msk [vmem:[#allocation2 + $0xe8] sm:$0xff] %vm396_vm0, %v635_v0  ;;  %v631_v3 = vpop.permute.xlu1 %630  ;;  %v939_v4 = vld [vmem:[#allocation2 + $0xd0] sm:$0xff] }
  0xb2   : > { %v639_v5 = vsel %vm636_vm4, %v631_v3, %v633_v63  ;;  %2712 = vmatprep.subr.bf16.mxu1 %v939_v4  ;;  %1046 = vmatprep.subr.bf16.mxu0 %v640_v2  ;;  %v2967_v3 = vld [vmem:[%s3741_s1 + $0x20] ss:$12 sps:$4 sm:$0xff]  }
  0xb3   : > { %2713 = vmatpush3.bf16.msra.mxu1 %v915_v1  ;;  %1047 = vmatpush1.bf16.msra.mxu0 %v639_v5  ;;  %v2966_v1 = vld [vmem:[%s3741_s1 + $0x8] ss:$12 sps:$4 sm:$0xff]  }
  0xb4   : > { %v690_v6 = vpop.permute.xlu0 %689 }
  0xb5   : > { %v692_v7 = vpop.permute.xlu1 %691 }
  0xb6   : > { %v701_v8 = vsel %vm699_vm5, %v690_v6, %v692_v7  ;;  %712 = vst.msk [vmem:[#allocation2 + $0x100] sm:$0xff] %vm396_vm0, %v692_v7 }
  0xb7   : > { %1048 = vmatprep.subr.bf16.mxu0 %v701_v8 }
  0xb8   : > { %v688_v10 = vpop.permute.xlu0 %687  ;;  %v942_v11 = vld [vmem:[#allocation2 + $0xe8] sm:$0xff] }
  0xb9   : > { %v700_v12 = vsel %vm699_vm5, %v688_v10, %v690_v6  ;;  %v696_v13 = vpop.permute.xlu1 %695  ;;  %2714 = vmatprep.subr.bf16.mxu1 %v942_v11 }
  0xba   : > { %2715 = vmatpush3.bf16.msra.mxu1 %v918_v9  ;;  %1049 = vmatpush1.bf16.msra.mxu0 %v700_v12  ;;  %v1234_v12 = vlaneseq }
  0xbc   : > { %v698_v14 = vpop.permute.xlu0 %697 }
  0xbd   : > { %v703_v15 = vsel %vm699_vm5, %v696_v13, %v698_v14  ;;  %715 = vst.msk [vmem:[#allocation2 + $0x118] sm:$0xff] %vm396_vm0, %v698_v14  ;;  %v694_v16 = vpop.permute.xlu1 %693  ;;  %v945_v17 = vld [vmem:[#allocation2 + $0x100] sm:$0xff] }
  0xbe   : > { %v702_v18 = vsel %vm699_vm5, %v694_v16, %v696_v13  ;;  %2716 = vmatprep.subr.bf16.mxu1 %v945_v17  ;;  %1050 = vmatprep.subr.bf16.mxu0 %v703_v15 }
  0xbf   : > { %2717 = vmatpush3.bf16.msra.mxu1 %v921_v19  ;;  %1051 = vmatpush1.bf16.msra.mxu0 %v702_v18 }
  0xc0   : > { %v753_v20 = vpop.permute.xlu0 %752 }
  0xc1   : > { %v755_v21 = vpop.permute.xlu1 %754 }
  0xc2   : > { %v764_v23 = vsel %vm762_vm6, %v753_v20, %v755_v21  ;;  %775 = vst.msk [vmem:[#allocation2 + $0x130] sm:$0xff] %vm396_vm0, %v755_v21  ;;  %v1235_v21 = vshrl.u32 %v1234_v12, 7 }
  0xc3   : > { %1052 = vmatprep.subr.bf16.mxu0 %v764_v23 }
  0xc4   : > { %v751_v24 = vpop.permute.xlu0 %750  ;;  %v948_v25 = vld [vmem:[#allocation2 + $0x118] sm:$0xff]  ;;  %v1236_v23 = vsub.s32 0, %v1235_v21 }
  0xc5   : > { %v763_v26 = vsel %vm762_vm6, %v751_v24, %v753_v20  ;;  %v759_v27 = vpop.permute.xlu1 %758  ;;  %2718 = vmatprep.subr.bf16.mxu1 %v948_v25 }
  0xc6   : > { %2719 = vmatpush3.bf16.msra.mxu1 %v924_v28  ;;  %1053 = vmatpush1.bf16.msra.mxu0 %v763_v26  ;;  %v1240_v28 = vsub.s32 1, %v1235_v21 }
  0xc8   : > { %v761_v29 = vpop.permute.xlu0 %760 }
  0xc9   : > { %v766_v30 = vsel %vm762_vm6, %v759_v27, %v761_v29  ;;  %778 = vst.msk [vmem:[#allocation2 + $0x148] sm:$0xff] %vm396_vm0, %v761_v29  ;;  %v757_v31 = vpop.permute.xlu1 %756  ;;  %v951_v32 = vld [vmem:[#allocation2 + $0x130] sm:$0xff] }
  0xca   : > { %v765_v33 = vsel %vm762_vm6, %v757_v31, %v759_v27  ;;  %2720 = vmatprep.subr.bf16.mxu1 %v951_v32  ;;  %1054 = vmatprep.subr.bf16.mxu0 %v766_v30  ;;  %v1232_v27 = vld [vmem:[%s3748_s8] sm:$0x7] }
  0xcb   : > { %2721 = vmatpush3.bf16.msra.mxu1 %v927_v34  ;;  %1055 = vmatpush1.bf16.msra.mxu0 %v765_v33  ;;  %v3323_v33 = vrot.slane %v1232_v27, %v1236_v23 }
  0xcc   : > { %v816_v35 = vpop.permute.xlu0 %815 }
  0xcd   : > { %v818_v36 = vpop.permute.xlu1 %817 }
  0xce   : > { %v827_v37 = vsel %vm825_vm7, %v816_v35, %v818_v36  ;;  %838 = vst.msk [vmem:[#allocation2 + $0x160] sm:$0xff] %vm396_vm0, %v818_v36 }
  0xcf   : > { %1056 = vmatprep.subr.bf16.mxu0 %v827_v37  ;;  %v3327_v37 = vrot.slane %v1232_v27, %v1240_v28 }
  0xd0   : > { %v814_v38 = vpop.permute.xlu0 %813  ;;  %v954_v39 = vld [vmem:[#allocation2 + $0x148] sm:$0xff] }
  0xd1   : > { %v826_v40 = vsel %vm825_vm7, %v814_v38, %v816_v35  ;;  %v822_v41 = vpop.permute.xlu1 %821  ;;  %2722 = vmatprep.subr.bf16.mxu1 %v954_v39  ;;  %v1244_v35 = vsub.s32 2, %v1235_v21 }
  0xd2   : > { %2723 = vmatpush3.bf16.msra.mxu1 %v930_v42  ;;  %1057 = vmatpush1.bf16.msra.mxu0 %v826_v40 }
  0xd4   : > { %v824_v43 = vpop.permute.xlu0 %823 }
  0xd5   : > { %v829_v44 = vsel %vm825_vm7, %v822_v41, %v824_v43  ;;  %841 = vst.msk [vmem:[#allocation2 + $0x178] sm:$0xff] %vm396_vm0, %v824_v43  ;;  %v820_v45 = vpop.permute.xlu1 %819  ;;  %v957_v46 = vld [vmem:[#allocation2 + $0x160] sm:$0xff] }
  0xd6   : > { %v828_v47 = vsel %vm825_vm7, %v820_v45, %v822_v41  ;;  %2724 = vmatprep.subr.bf16.mxu1 %v957_v46  ;;  %1058 = vmatprep.subr.bf16.mxu0 %v829_v44  ;;  %v3335_v46 = vrot.slane %v1232_v27, %v1244_v35 }
  0xd7   : > { %2725 = vmatpush3.bf16.msra.mxu1 %v933_v48  ;;  %1059 = vmatpush1.bf16.msra.mxu0 %v828_v47 }
  0xd8   : > { %v879_v51 = vpop.permute.xlu0 %878 }
  0xd9   : > { %v881_v52 = vpop.permute.xlu1 %880 }
  0xda   : > { %v890_v53 = vsel %vm888_vm8, %v879_v51, %v881_v52  ;;  %901 = vst.msk [vmem:[#allocation2 + $0x190] sm:$0xff] %vm396_vm0, %v881_v52  ;;  %1061 = vmatmul.mubr.bf16.vlgmr.msra.gmra.mrb[0].mxu0 %v2960_v49 }
  0xdb   : > { %1081 = vmatprep.subr.bf16.mxu0 %v890_v53  ;;  %1070 = vmatprep.mubr.bf16.mxu0 %v2963_v50 }
  0xdc   : > { %v877_v54 = vpop.permute.xlu0 %876  ;;  %v960_v55 = vld [vmem:[#allocation2 + $0x178] sm:$0xff] }
  0xdd   : > { %v889_v56 = vsel %vm888_vm8, %v877_v54, %v879_v51  ;;  %v885_v57 = vpop.permute.xlu1 %884  ;;  %2726 = vmatprep.subr.bf16.mxu1 %v960_v55 }
  0xde   : > { %2727 = vmatpush3.bf16.msra.mxu1 %v936_v58  ;;  %1082 = vmatpush1.bf16.msra.mxu0 %v889_v56 }
  0xe0   : > { %v887_v60 = vpop.permute.xlu0 %886 }
  0xe1   : > { %v892_v61 = vsel %vm888_vm8, %v885_v57, %v887_v60  ;;  %904 = vst.msk [vmem:[#allocation2 + $0x1a8] sm:$0xff] %vm396_vm0, %v887_v60  ;;  %v883_v62 = vpop.permute.xlu1 %882  ;;  %v963_v63 = vld [vmem:[#allocation2 + $0x190] sm:$0xff]  ;;  %1167 = vmatmul.mubr.bf16.vlgmr.msra.gmra.mrb[0].mxu1 %v2960_v49 }
  0xe2   : > { %v891_v0 = vsel %vm888_vm8, %v883_v62, %v885_v57  ;;  %1071 = vmatmul.mubr.bf16.gmra.mrb[4].mxu0 %v2965_v59  ;;  %1083 = vmatprep.subr.bf16.mxu0 %v892_v61 }
  0xe3   : > { %1084 = vmatpush1.bf16.msra.mxu0 %v891_v0  ;;  %1113 = vmatprep.mubr.bf16.mxu0 %v3047_v22 }
  0xe4   : > { %2792 = vmatprep.subr.bf16.mxu0 %v963_v63  ;;  %1174 = vmatprep.mubr.bf16.mxu1 %v2963_v50 }
  0xe8   : > { %v966_v2 = vld [vmem:[#allocation2 + $0x1a8] sm:$0xff] }
  0xe9   : > { %1175 = vmatmul.mubr.bf16.gmra.mrb[4].mxu1 %v2965_v59 }
  0xea   : > { %2687 = vmatmul.mubr.msk.bf16.vlgmr.msra.gmra.mrb[0].mxu0 %vm1021_vm9, %v2966_v1 }
  0xeb   : > { %2793 = vmatpush3.bf16.msra.mxu0 %v963_v63  ;;  %1123 = vmatprep.mubr.bf16.mxu0 %v3047_v22 }
  0xec   : > { %2794 = vmatprep.subr.bf16.mxu0 %v966_v2 }
  0xef   : > { %2795 = vmatpush3.bf16.msra.mxu0 %v966_v2 }
  0xf1   : > { %v974_v26 = vpop.permute.xlu0 %973 }
  0xf2   : > { %2688 = vmatmul.mubr.msk.bf16.gmra.mrb[4].mxu0 %vm1021_vm9, %v2967_v3  ;;  %v979_v24 = vpop.permute.xlu1 %978 }
  0xf3   : > { %2796 = vmatprep.mubr.msk.bf16.mxu0 %vm1021_vm9, %v2966_v1 }
  0xf5   : > { %v989_v40 = vpop.permute.xlu0 %988 }
  0xf6   : > { %v984_v34 = vpop.permute.xlu1 %983 }
  0xfa   : > { %2797 = vmatmul.mubr.msk.bf16.vlgmr.msra.gmra.mrb[8].mxu0 %vm1021_vm9, %v2967_v3 }
 0x1b4   : > { %v2728_v4 = vpop.f32.mrb[0].mxu1 }
 0x1b5   : > { %v2729_v5 = vpop.f32.mrb[1].mxu1 }
 0x1b6   : > { %v2730_v6 = vadd.f32 %v2729_v5, %v2728_v4  ;;  %v2731_v7 = vpop.f32.mrb[2].mxu1 }
 0x1b7   : > { %v2732_v8 = vpop.f32.mrb[3].mxu1 }
 0x1b8   : > { %v2733_v9 = vadd.f32 %v2732_v8, %v2731_v7  ;;  %v1169_v45 = vadd.f32 %v2730_v6, %v974_v26 }
 0x1ba   : > { %v1172_v55 = vadd.f32 %v2733_v9, %v979_v24 }
 0x1bc   : > { %v2734_v10 = vpop.f32.mrb[4].mxu1 }
 0x1bd   : > { %v1115_v11 = vpop.f32.mrb[0].mxu0  ;;  %v2735_v13 = vpop.f32.mrb[5].mxu1 }
 0x1be   : > { %v1117_v14 = vpop.f32.mrb[1].mxu0  ;;  %v2736_v15 = vadd.f32 %v2735_v13, %v2734_v10  ;;  %v2737_v16 = vpop.f32.mrb[6].mxu1  ;;  %v3321_v32 = vadd.f32 %v1115_v11, %v974_v26 }
 0x1bf   : > { %v1119_v17 = vpop.f32.mrb[2].mxu0  ;;  %v2738_v18 = vpop.f32.mrb[7].mxu1  ;;  %v3325_v36 = vadd.f32 %v1117_v14, %v974_v26 }
 0x1c0   : > { %v1121_v19 = vpop.f32.mrb[3].mxu0  ;;  %v2739_v20 = vadd.f32 %v2738_v18, %v2737_v16  ;;  %v1177_v38 = vadd.f32 %v2736_v15, %v984_v34  ;;  %v3329_v39 = vadd.f32 %v1119_v17, %v979_v24  ;;  %v1249_v43 = vmul.f32 %v3321_v32, %v3323_v33 }
 0x1c1   : > { %v3331_v41 = vadd.f32 %v1121_v19, %v979_v24  ;;  %v1250_v47 = vmul.f32 %v3325_v36, %v3327_v37 }
 0x1c2   : > { %v1180_v42 = vadd.f32 %v2739_v20, %v989_v40  ;;  %v1252_v52 = vmul.f32 %v3329_v39, %v3323_v33  ;;  %v1281_v19 = vmul.f32 %v3321_v32, %v1249_v43 }
 0x1c3   : > { %v1253_v56 = vmul.f32 %v3331_v41, %v3327_v37  ;;  %v1261_v1 = vadd.f32 %v1250_v47, %v1249_v43  ;;  %v1282_v20 = vmul.f32 %v3325_v36, %v1250_v47 }
 0x1c4   : > { %v1284_v13 = vmul.f32 %v3329_v39, %v1252_v52 }
 0x1c5   : > { %v1125_v25 = vpop.f32.mrb[4].mxu0  ;;  %v1266_v9 = vadd.f32 %v1253_v56, %v1252_v52  ;;  %v1285_v14 = vmul.f32 %v3331_v41, %v1253_v56  ;;  %v1623_v56 = vld [vmem:[%s3406_s13] sm:$0xff] }
 0x1c6   : > { %v1127_v29 = vpop.f32.mrb[5].mxu0  ;;  %v3351_v57 = vadd.f32 %v1125_v25, %v984_v34 }
 0x1c7   : > { %v1129_v30 = vpop.f32.mrb[6].mxu0  ;;  %v3353_v58 = vadd.f32 %v1127_v29, %v984_v34  ;;  %v1298_v29 = vadd.f32 %v1285_v14, %v1284_v13  ;;  %v1316_v14 = vld [vmem:[%s3747_s7 + $0x18] sm:$0xff] }
 0x1c8   : > { %v1131_v31 = vpop.f32.mrb[7].mxu0  ;;  %v3339_v48 = vadd.f32 %v1129_v30, %v989_v40  ;;  %v1255_v6 = vmul.f32 %v3351_v57, %v3323_v33 }
 0x1c9   : > { %v3341_v49 = vadd.f32 %v1131_v31, %v989_v40  ;;  %v1256_v7 = vmul.f32 %v3353_v58, %v3327_v37  ;;  %v1293_v40 = vadd.f32 %v1282_v20, %v1281_v19 }
 0x1ca   : > { %v1258_v63 = vmul.f32 %v3339_v48, %v3323_v33  ;;  %v1287_v34 = vmul.f32 %v3351_v57, %v1255_v6 }
 0x1cb   : > { %v1259_v0 = vmul.f32 %v3341_v49, %v3327_v37  ;;  %v1271_v23 = vadd.f32 %v1256_v7, %v1255_v6  ;;  %v1288_v35 = vmul.f32 %v3353_v58, %v1256_v7 }
 0x1cc   : > { %v1290_v26 = vmul.f32 %v3339_v48, %v1258_v63 }
 0x1cd   : > { %v2798_v44 = vpop.f32.mrb[8].mxu0  ;;  %v1276_v16 = vadd.f32 %v1259_v0, %v1258_v63  ;;  %v1291_v27 = vmul.f32 %v3341_v49, %v1259_v0  ;;  %v1624_v63 = vld [vmem:[%s3406_s13 + $0x8] sm:$0xff]  ;;  %v1590_v0 = vld [vmem:[%s3743_s3 + $0x18] sm:$0xff] }
 0x1ce   : > { %v3343_v50 = vadd.f32 %v2798_v44, %v1177_v38  ;;  %v1217_v51 = vpop.f32.mrb[9].mxu0 }
 0x1cf   : > { %v3347_v53 = vadd.f32 %v1217_v51, %v1169_v45  ;;  %v2799_v54 = vpop.f32.mrb[10].mxu0  ;;  %v1308_v44 = vadd.f32 %v1291_v27, %v1290_v26  ;;  %v1303_v51 = vadd.f32 %v1288_v35, %v1287_v34 }
 0x1d0   : > { %v3355_v59 = vadd.f32 %v2799_v54, %v1180_v42  ;;  %v1220_v60 = vpop.f32.mrb[11].mxu0  ;;  %v1257_v5 = vmul.f32 %v3335_v46, %v3343_v50  ;;  %v1313_v54 = vld [vmem:[%s3747_s7] sm:$0xff] }
 0x1d1   : > { %v3357_v61 = vadd.f32 %v1220_v60, %v1172_v55  ;;  %v1251_v62 = vmul.f32 %v3335_v46, %v3347_v53  ;;  %2808 = vmatprep.mubr.msk.f32.mxu1 %vm1021_vm9, %v1313_v54  ;;  %v1587_v55 = vld [vmem:[%s3743_s3] sm:$0xff]  ;;  %v1588_v60 = vld [vmem:[%s3743_s3 + $0x8] sm:$0xff] }
 0x1d2   : > { %v1260_v2 = vmul.f32 %v3335_v46, %v3355_v59  ;;  %v1272_v17 = vsel %vm396_vm0, %v1257_v5, 0.0  ;;  %v1289_v31 = vmul.f32 %v1257_v5, %v3343_v50 }
 0x1d3   : > { %v1262_v3 = vsel %vm396_vm0, %v1251_v62, 0.0  ;;  %v1254_v4 = vmul.f32 %v3335_v46, %v3357_v61  ;;  %v1283_v18 = vmul.f32 %v1251_v62, %v3347_v53  ;;  %v1273_v28 = vadd.f32 %v1272_v17, %v1271_v23  ;;  %v1589_v62 = vld [vmem:[%s3743_s3 + $0x10] sm:$0xff] }
 0x1d4   : > { %v1263_v8 = vadd.f32 %v1262_v3, %v1261_v1  ;;  %v1277_v11 = vsel %vm396_vm0, %v1260_v2, 0.0  ;;  %v1292_v25 = vmul.f32 %v1260_v2, %v3355_v59  ;;  %v1304_v45 = vsel %vm396_vm0, %v1289_v31, 0.0 }
 0x1d5   : > { %v1267_v10 = vsel %vm396_vm0, %v1254_v4, 0.0  ;;  %v1286_v12 = vmul.f32 %v1254_v4, %v3357_v61  ;;  %v1278_v21 = vadd.f32 %v1277_v11, %v1276_v16  ;;  %v1294_v30 = vsel %vm396_vm0, %v1283_v18, 0.0  ;;  %v1315_v11 = vld [vmem:[%s3747_s7 + $0x10] sm:$0xff] }
 0x1d6   : > { %1264 = vadd.xlane.f32.xlu1 %v1263_v8  ;;  %v1268_v15 = vadd.f32 %v1267_v10, %v1266_v9  ;;  %v1309_v42 = vsel %vm396_vm0, %v1292_v25, 0.0  ;;  %v1295_v43 = vadd.f32 %v1294_v30, %v1293_v40  ;;  %v1305_v52 = vadd.f32 %v1304_v45, %v1303_v51  ;;  %v1314_v9 = vld [vmem:[%s3747_s7 + $0x8] sm:$0xff] }
 0x1d7   : > { %v1299_v24 = vsel %vm396_vm0, %v1286_v12, 0.0  ;;  %v1310_v47 = vadd.f32 %v1309_v42, %v1308_v44 }
 0x1d8   : > { %1269 = vadd.xlane.f32.xlu0 %v1268_v15  ;;  %v1300_v38 = vadd.f32 %v1299_v24, %v1298_v29 }
 0x1da   : > { %1279 = vadd.xlane.f32.xlu1 %v1278_v21 }
 0x1dc   : > { %1274 = vadd.xlane.f32.xlu0 %v1273_v28 }
 0x1de   : > { %1301 = vadd.xlane.f32.xlu1 %v1300_v38 }
 0x1e0   : > { %1296 = vadd.xlane.f32.xlu0 %v1295_v43 }
 0x1e2   : > { %1311 = vadd.xlane.f32.xlu1 %v1310_v47 }
 0x1e4   : > { %1306 = vadd.xlane.f32.xlu0 %v1305_v52 }
 0x1f3   : > { %1593 = vperm.xlu1 %2905, %v1587_v55  }
 0x1f7   : > { %1629 = vperm.xlu1 %2905, %v1623_v56  }
 0x1fa   : > { %1598 = vperm.xlu0 %2904, %v1588_v60  }
 0x1fb   : > { %1603 = vperm.xlu1 %2905, %v1589_v62  }
 0x1fe   : > { %1634 = vperm.xlu0 %2904, %v1624_v63  }
 0x202   : > { %1608 = vperm.xlu0 %2904, %v1590_v0   ;;  %v1626_v0 = vld [vmem:[%s3406_s13 + $0x18] sm:$0xff] }
 0x263   : > { %v1265_v1 = vpop.xlane.xlu1 %1264 }
 0x265   : > { %v1270_v2 = vpop.xlane.xlu0 %1269 }
 0x266   : > { %v2836_v3 = vpack.c.bf16 %v1270_v2, %v1265_v1  ;;  %v1625_v1 = vld [vmem:[%s3406_s13 + $0x10] sm:$0xff]  ;;  %s3049_s13 = smov 19  }
 0x267   : > { %v1280_v4 = vpop.xlane.xlu1 %1279 }
 0x268   : > { %2837 = vmatprep.subr.bf16.mxu1 %v2836_v3 }
 0x269   : > { %v1275_v5 = vpop.xlane.xlu0 %1274  ;;  %2839 = vmatpush3.bf16.msra.mxu1 %v2836_v3 }
 0x26a   : > { %v2840_v6 = vpack.c.bf16 %v1280_v4, %v1275_v5 }
 0x26b   : > { %v1302_v7 = vpop.xlane.xlu1 %1301 }
 0x26c   : > { %2841 = vmatprep.subr.bf16.mxu1 %v2840_v6 }
 0x26d   : > { %v1297_v8 = vpop.xlane.xlu0 %1296  ;;  %2843 = vmatpush3.bf16.msra.mxu1 %v2840_v6 }
 0x26e   : > { %v2844_v10 = vpack.c.bf16 %v1302_v7, %v1297_v8 }
 0x26f   : > { %v1312_v12 = vpop.xlane.xlu1 %1311 }
 0x270   : > { %2809 = vmatmul.mubr.msk.f32.vlgmr.msra.gmra.mrb[8].mxu1 %vm1021_vm9, %v1314_v9  ;;  %2845 = vmatprep.subr.bf16.mxu1 %v2844_v10 }
 0x271   : > { %v1307_v13 = vpop.xlane.xlu0 %1306  ;;  %2847 = vmatpush3.bf16.msra.mxu1 %v2844_v10  ;;  %2811 = vmatprep.mubr.msk.f32.mxu1 %vm1021_vm9, %v1315_v11 }
 0x272   : > { %v2848_v15 = vpack.c.bf16 %v1312_v12, %v1307_v13 }
 0x273   : > { %v1594_v3 = vpop.permute.xlu1 %1593 }
 0x274   : > { %2812 = vmatmul.mubr.msk.f32.gmra.mrb[10].mxu1 %vm1021_vm9, %v1316_v14  ;;  %2849 = vmatprep.subr.bf16.mxu1 %v2848_v15 }
 0x275   : > { %2851 = vmatpush3.bf16.msra.mxu1 %v2848_v15  ;;  %2822 = vmatprep.mubr.msk.f32.mxu1 %vm1021_vm9, %v1313_v54 }
 0x277   : > { %v1630_v5 = vpop.permute.xlu1 %1629 }
 0x278   : > { %2823 = vmatmul.mubr.msk.f32.vlgmr.msra.gmra.mrb[12].mxu1 %vm1021_vm9, %v1314_v9 }
 0x279   : > { %2825 = vmatprep.mubr.msk.f32.mxu1 %vm1021_vm9, %v1315_v11  ;;  %v1599_v2 = vpop.permute.xlu0 %1598 }
 0x27b   : > { %v3437_v7 = vpop.permute.xlu1 %1603 }
 0x27c   : > { %2826 = vmatmul.mubr.msk.f32.gmra.mrb[14].mxu1 %vm1021_vm9, %v1316_v14 }
 0x27d   : > { %v1635_v4 = vpop.permute.xlu0 %1634 }
 0x281   : > { %v1609_v6 = vpop.permute.xlu0 %1608 }
 0x343   : > { %v2810_v16 = vpop.f32.mrb[8].mxu1 }
 0x344   : > { %v1415_v17 = vmul.f32 0.001953125, %v2810_v16  ;;  %v1395_v18 = vpop.f32.mrb[9].mxu1 }
 0x345   : > { %v1414_v19 = vmul.f32 0.001953125, %v1395_v18 }
 0x346   : > { %1530 = vperm.xlu1 %2905, %v1415_v17   ;;  %v1508_v26 = vmul.f32 %v1415_v17, %v1415_v17 }
 0x347   : > { %1525 = vperm.xlu0 %2904, %v1414_v19   ;;  %v2813_v20 = vpop.f32.mrb[10].mxu1  ;;  %v1507_v29 = vmul.f32 %v1414_v19, %v1414_v19 }
 0x348   : > { %v1417_v21 = vmul.f32 0.001953125, %v2813_v20  ;;  %v1405_v23 = vpop.f32.mrb[11].mxu1 }
 0x349   : > { %v1416_v24 = vmul.f32 0.001953125, %v1405_v23 }
 0x34a   : > { %v1510_v38 = vmul.f32 %v1417_v21, %v1417_v21 }
 0x34b   : > { %1540 = vperm.xlu0 %2904, %v1417_v21   ;;  %1535 = vperm.xlu1 %2905, %v1416_v24   ;;  %v2824_v25 = vpop.f32.mrb[12].mxu1  ;;  %v1509_v44 = vmul.f32 %v1416_v24, %v1416_v24 }
 0x34c   : > { %v1504_v27 = vmul.f32 0.001953125, %v2824_v25  ;;  %v1484_v28 = vpop.f32.mrb[13].mxu1 }
 0x34d   : > { %v1503_v30 = vmul.f32 0.001953125, %v1484_v28 }
 0x34e   : > { %v1512_v31 = vsub.f32 %v1504_v27, %v1508_v26 }
 0x34f   : > { %v1511_v34 = vsub.f32 %v1503_v30, %v1507_v29  ;;  %v2827_v35 = vpop.f32.mrb[14].mxu1 }
 0x350   : > { %v1516_v40 = vadd.f32 1e-06, %v1512_v31  ;;  %v1506_v42 = vmul.f32 0.001953125, %v2827_v35  ;;  %v1494_v43 = vpop.f32.mrb[15].mxu1 }
 0x351   : > { %v1515_v45 = vadd.f32 1e-06, %v1511_v34  ;;  %v1505_v47 = vmul.f32 0.001953125, %v1494_v43 }
 0x352   : > { %2976 = vrsqrt.f32 %v1516_v40  ;;  %v1514_v51 = vsub.f32 %v1506_v42, %v1510_v38 }
 0x353   : > { %2978 = vrsqrt.f32 %v1515_v45  ;;  %v1513_v52 = vsub.f32 %v1505_v47, %v1509_v44 }
 0x354   : > { %v1518_v54 = vadd.f32 1e-06, %v1514_v51 }
 0x355   : > { %v1517_v55 = vadd.f32 1e-06, %v1513_v52 }
 0x356   : > { %2980 = vrsqrt.f32 %v1518_v54 }
 0x357   : > { %2982 = vrsqrt.f32 %v1517_v55 }
 0x35c   : > { %v2977_v56 = vpop.eup %2976 }
 0x35d   : > { %v2979_v60 = vpop.eup %2978  ;;  %1562 = vperm.xlu0 %2904, %v2977_v56  }
 0x35e   : > { %1557 = vperm.xlu1 %2905, %v2979_v60  }
 0x360   : > { %v2981_v62 = vpop.eup %2980 }
 0x361   : > { %v2983_v63 = vpop.eup %2982  ;;  %1572 = vperm.xlu0 %2904, %v2981_v62  }
 0x362   : > { %1567 = vperm.xlu1 %2905, %v2983_v63  }
 0x365   : > { %1644 = vperm.xlu0 %2904, %v1626_v0  }
 0x366   : > { %1639 = vperm.xlu1 %2905, %v1625_v1  }
 0x3c5   : > { %v1531_v9 = vpop.permute.xlu1 %1530 }
 0x3c6   : > { %v1526_v8 = vpop.permute.xlu0 %1525  ;;  %v1546_v12 = vsub.f32 %v3329_v39, %v1531_v9  ;;  %v1547_v13 = vsub.f32 %v3331_v41, %v1531_v9  ;;  %v1548_v14 = vsub.f32 %v3357_v61, %v1531_v9 }
 0x3c7   : > { %v1543_v15 = vsub.f32 %v3321_v32, %v1526_v8  ;;  %v1544_v16 = vsub.f32 %v3325_v36, %v1526_v8  ;;  %v1545_v17 = vsub.f32 %v3347_v53, %v1526_v8 }
 0x3ca   : > { %v1541_v10 = vpop.permute.xlu0 %1540  ;;  %v1536_v11 = vpop.permute.xlu1 %1535 }
 0x3cb   : > { %v1552_v18 = vsub.f32 %v3339_v48, %v1541_v10  ;;  %v1553_v19 = vsub.f32 %v3341_v49, %v1541_v10  ;;  %v1554_v21 = vsub.f32 %v3355_v59, %v1541_v10  ;;  %v1549_v41 = vsub.f32 %v3351_v57, %v1536_v11 }
 0x3cc   : > { %v1550_v36 = vsub.f32 %v3353_v58, %v1536_v11  ;;  %v1551_v48 = vsub.f32 %v3343_v50, %v1536_v11 }
 0x3dc   : > { %v1563_v20 = vpop.permute.xlu0 %1562 }
 0x3dd   : > { %v1578_v23 = vmul.f32 %v1563_v20, %v1546_v12  ;;  %v1579_v24 = vmul.f32 %v1563_v20, %v1547_v13  ;;  %v1580_v39 = vmul.f32 %v1563_v20, %v1548_v14  ;;  %v1558_v25 = vpop.permute.xlu1 %1557 }
 0x3de   : > { %v1575_v61 = vmul.f32 %v1558_v25, %v1543_v15  ;;  %v1576_v26 = vmul.f32 %v1558_v25, %v1544_v16  ;;  %v1577_v32 = vmul.f32 %v1558_v25, %v1545_v17 }
 0x3df   : > { %v1614_v27 = vmul.f32 %v1599_v2, %v1578_v23  ;;  %v1615_v53 = vmul.f32 %v1599_v2, %v1579_v24  ;;  %v1616_v28 = vmul.f32 %v1599_v2, %v1580_v39 }
 0x3e0   : > { %v1611_v49 = vmul.f32 %v1594_v3, %v1575_v61  ;;  %v1612_v29 = vmul.f32 %v1594_v3, %v1576_v26  ;;  %v1613_v30 = vmul.f32 %v1594_v3, %v1577_v32  ;;  %v1573_v59 = vpop.permute.xlu0 %1572 }
 0x3e1   : > { %v3451_v31 = vadd.f32 %v1635_v4, %v1614_v27  ;;  %v3453_v34 = vadd.f32 %v1635_v4, %v1615_v53  ;;  %v3455_v35 = vadd.f32 %v1635_v4, %v1616_v28  ;;  %v1584_v57 = vmul.f32 %v1573_v59, %v1552_v18  ;;  %v1568_v38 = vpop.permute.xlu1 %1567 }
 0x3e2   : > { %v3457_v40 = vadd.f32 %v1630_v5, %v1611_v49  ;;  %v3459_v58 = vadd.f32 %v1630_v5, %v1612_v29  ;;  %v3461_v42 = vadd.f32 %v1630_v5, %v1613_v30  ;;  %v1585_v43 = vmul.f32 %v1573_v59, %v1553_v19 }
 0x3e3   : > { %v1662_v50 = vsub.f32 0.0, %v3451_v31  ;;  %v1663_v44 = vsub.f32 0.0, %v3453_v34  ;;  %v1664_v45 = vsub.f32 0.0, %v3455_v35  ;;  %v1586_v47 = vmul.f32 %v1573_v59, %v1554_v21 }
 0x3e4   : > { %v1659_v51 = vsub.f32 0.0, %v3457_v40  ;;  %v1660_v52 = vsub.f32 0.0, %v3459_v58  ;;  %v1661_v54 = vsub.f32 0.0, %v3461_v42  ;;  %v1581_v55 = vmul.f32 %v1568_v38, %v1549_v41  ;;  %v1645_v3 = vpop.permute.xlu0 %1644 }
 0x3e5   : > { %v1677_v56 = vmul.f32 1.442695, %v1662_v50  ;;  %v1679_v60 = vmul.f32 1.442695, %v1663_v44  ;;  %v1681_v62 = vmul.f32 1.442695, %v1664_v45  ;;  %v1582_v63 = vmul.f32 %v1568_v38, %v1550_v36  ;;  %v1640_v9 = vpop.permute.xlu1 %1639 }
 0x3e6   : > { %v1671_v0 = vmul.f32 1.442695, %v1659_v51  ;;  %v1673_v1 = vmul.f32 1.442695, %v1660_v52  ;;  %v1583_v2 = vmul.f32 %v1568_v38, %v1551_v48  ;;  %v1620_v4 = vmul.f32 %v1609_v6, %v1584_v57 }
 0x3e7   : > { %2984 = vpow2.f32 %v1677_v56  ;;  %v1621_v5 = vmul.f32 %v1609_v6, %v1585_v43  ;;  %v1622_v8 = vmul.f32 %v1609_v6, %v1586_v47  ;;  %v1675_v10 = vmul.f32 1.442695, %v1661_v54 }
 0x3e8   : > { %2986 = vpow2.f32 %v1679_v60  ;;  %v1617_v11 = vmul.f32 %v3437_v7, %v1581_v55  ;;  %v1618_v12 = vmul.f32 %v3437_v7, %v1582_v63  ;;  %v3471_v13 = vadd.f32 %v1645_v3, %v1620_v4 }
 0x3e9   : > { %2988 = vpow2.f32 %v1681_v62  ;;  %v3473_v14 = vadd.f32 %v1645_v3, %v1621_v5  ;;  %v3475_v15 = vadd.f32 %v1645_v3, %v1622_v8  ;;  %v1619_v16 = vmul.f32 %v3437_v7, %v1583_v2 }
 0x3ea   : > { %2990 = vpow2.f32 %v1671_v0  ;;  %v3478_v17 = vadd.f32 %v1640_v9, %v1617_v11  ;;  %v3480_v6 = vadd.f32 %v1640_v9, %v1618_v12  ;;  %v1668_v18 = vsub.f32 0.0, %v3471_v13 }
 0x3eb   : > { %2992 = vpow2.f32 %v1673_v1  ;;  %v1669_v19 = vsub.f32 0.0, %v3473_v14  ;;  %v1670_v20 = vsub.f32 0.0, %v3475_v15  ;;  %v3487_v7 = vadd.f32 %v1640_v9, %v1619_v16 }
 0x3ec   : > { %2994 = vpow2.f32 %v1675_v10  ;;  %v1665_v21 = vsub.f32 0.0, %v3478_v17  ;;  %v1666_v23 = vsub.f32 0.0, %v3480_v6  ;;  %v1689_v24 = vmul.f32 1.442695, %v1668_v18 }
 0x3ed   : > { %v1691_v39 = vmul.f32 1.442695, %v1669_v19  ;;  %v1693_v25 = vmul.f32 1.442695, %v1670_v20  ;;  %v1667_v27 = vsub.f32 0.0, %v3487_v7 }
 0x3ee   : > { %v1683_v41 = vmul.f32 1.442695, %v1665_v21  ;;  %2996 = vpow2.f32 %v1689_v24  ;;  %v1685_v61 = vmul.f32 1.442695, %v1666_v23 }
 0x3ef   : > { %2998 = vpow2.f32 %v1691_v39  ;;  %v1687_v38 = vmul.f32 1.442695, %v1667_v27 }
 0x3f0   : > { %3000 = vpow2.f32 %v1693_v25 }
 0x3f1   : > { %v2985_v26 = vpop.eup %2984  ;;  %3002 = vpow2.f32 %v1683_v41 }
 0x3f2   : > { %v2987_v32 = vpop.eup %2986  ;;  %v1698_v36 = vadd.f32 1.0, %v2985_v26  ;;  %3004 = vpow2.f32 %v1685_v61 }
 0x3f3   : > { %v2989_v53 = vpop.eup %2988  ;;  %v1699_v28 = vadd.f32 1.0, %v2987_v32 }
 0x3f4   : > { %v2991_v48 = vpop.eup %2990  ;;  %v1700_v49 = vadd.f32 1.0, %v2989_v53  ;;  %3006 = vrcp.f32 %v1698_v36 }
 0x3f5   : > { %v2993_v29 = vpop.eup %2992  ;;  %3008 = vrcp.f32 %v1699_v28  ;;  %v1695_v30 = vadd.f32 1.0, %v2991_v48 }
 0x3f6   : > { %v2995_v59 = vpop.eup %2994  ;;  %3010 = vrcp.f32 %v1700_v49  ;;  %v1696_v57 = vadd.f32 1.0, %v2993_v29 }
 0x3f7   : > { %v1697_v43 = vadd.f32 1.0, %v2995_v59  ;;  %3012 = vrcp.f32 %v1695_v30 }
 0x3f8   : > { %3014 = vrcp.f32 %v1696_v57  ;;  %v2997_v50 = vpop.eup %2996 }
 0x3f9   : > { %3016 = vrcp.f32 %v1697_v43  ;;  %v2999_v44 = vpop.eup %2998  ;;  %v1704_v45 = vadd.f32 1.0, %v2997_v50 }
 0x3fa   : > { %3018 = vpow2.f32 %v1687_v38  ;;  %v3001_v47 = vpop.eup %3000  ;;  %v1705_v51 = vadd.f32 1.0, %v2999_v44 }
 0x3fb   : > { %v3003_v52 = vpop.eup %3002  ;;  %v1706_v55 = vadd.f32 1.0, %v3001_v47 }
 0x3fc   : > { %v3005_v54 = vpop.eup %3004  ;;  %3020 = vrcp.f32 %v1705_v51  ;;  %v1701_v56 = vadd.f32 1.0, %v3003_v52  ;;  %v2970_v52 = vld [vmem:[%s3745_s5 + $0x4] ss:$12 sps:$4 sm:$0xff]  }
 0x3fd   : > { %3022 = vrcp.f32 %v1704_v45  ;;  %v1702_v62 = vadd.f32 1.0, %v3005_v54  ;;  %2384 = vmatprep.mubr.bf16.mxu0 %v2970_v52  ;;  %2278 = vmatprep.mubr.bf16.mxu1 %v2970_v52  ;;  %v2187_v54 = vld [vmem:[%s3746_s6 + $0x8] sm:$0xff] }
 0x3fe   : > { %v3007_v60 = vpop.eup %3006  ;;  %3024 = vrcp.f32 %v1701_v56  ;;  %v2189_v56 = vld [vmem:[%s3746_s6 + $0x18] sm:$0xff] }
 0x3ff   : > { %v3009_v63 = vpop.eup %3008  ;;  %3026 = vrcp.f32 %v1702_v62  ;;  %v1722_v8 = vmul.f32 %v3007_v60, %v3451_v31  ;;  %v2188_v60 = vld [vmem:[%s3746_s6 + $0x10] sm:$0xff]  ;;  %v2450_v62 = vld [vmem:[%s3114_s14] sm:$0xff] }
 0x400   : > { %v3011_v0 = vpop.eup %3010  ;;  %v1723_v1 = vmul.f32 %v3009_v63, %v3453_v34  ;;  %3028 = vrcp.f32 %v1706_v55  ;;  %v2186_v55 = vld [vmem:[%s3746_s6] sm:$0xff]  ;;  %v2451_v63 = vld [vmem:[%s3114_s14 + $0x8] ss:$12 sps:$4 sm:$0xff]  }
 0x401   : > { %v3013_v2 = vpop.eup %3012  ;;  %v1724_v3 = vmul.f32 %v3011_v0, %v3455_v35  ;;  %v2452_v0 = vld [vmem:[%s3114_s14 + $0xc] sm:$0xff] }
 0x402   : > { %v3015_v4 = vpop.eup %3014  ;;  %v1719_v5 = vmul.f32 %v3013_v2, %v3457_v40  ;;  %v1735_v11 = vmul.f32 %v1723_v1, %v3327_v37  ;;  %v1734_v40 = vmul.f32 %v1722_v8, %v3323_v33  ;;  %v2458_v1 = vunpack.c.l.bf16 %v2450_v62  ;;  %v2455_v8 = vld [vmem:[%s3114_s14 + $0x20] ss:$12 sps:$4 sm:$0xff]  }
 0x403   : > { %v3017_v9 = vpop.eup %3016  ;;  %v1720_v10 = vmul.f32 %v3015_v4, %v3459_v58  ;;  %v1736_v18 = vmul.f32 %v1724_v3, %v3335_v46  ;;  %v2459_v2 = vunpack.c.h.bf16 %v2450_v62  ;;  %v2460_v3 = vunpack.c.l.bf16 %v2451_v63 }
 0x404   : > { %v3019_v12 = vpop.eup %3018  ;;  %v1721_v16 = vmul.f32 %v3017_v9, %v3461_v42  ;;  %v1731_v20 = vmul.f32 %v1719_v5, %v3323_v33  ;;  %v2461_v4 = vunpack.c.l.bf16 %v2452_v0  ;;  %v2454_v5 = vld [vmem:[%s3114_s14 + $0x18] sm:$0xff]  ;;  %v2456_v9 = vld [vmem:[%s3114_s14 + $0x24] sm:$0xff] }
 0x405   : > { %v1703_v34 = vadd.f32 1.0, %v3019_v12  ;;  %v1732_v19 = vmul.f32 %v1720_v10, %v3327_v37  ;;  %v2462_v10 = vunpack.c.h.bf16 %v2452_v0  ;;  %v2464_v12 = vunpack.c.l.bf16 %v2454_v5 }
 0x406   : > { %v1733_v35 = vmul.f32 %v1721_v16, %v3335_v46  ;;  %v3021_v31 = vpop.eup %3020  ;;  %v1746_v25 = vpack.c.bf16 %v1734_v40, %v1731_v20  ;;  %v2465_v16 = vunpack.c.h.bf16 %v2454_v5 }
 0x407   : > { %3030 = vrcp.f32 %v1703_v34  ;;  %v1747_v21 = vpack.c.bf16 %v1735_v11, %v1732_v19  ;;  %v3023_v58 = vpop.eup %3022  ;;  %v1729_v23 = vmul.f32 %v3021_v31, %v3473_v14  ;;  %v2463_v11 = vunpack.c.h.bf16 %v2451_v63 }
 0x408   : > { %v1748_v24 = vpack.c.bf16 %v1736_v18, %v1733_v35  ;;  %v3025_v39 = vpop.eup %3024  ;;  %v1728_v61 = vmul.f32 %v3023_v58, %v3471_v13  ;;  %v2906_v18 = vpack.i.bf16 %v2459_v2, %v2458_v1  ;;  %v2911_v34 = vpack.i.bf16 %v2461_v4, %v2460_v3 }
 0x409   : > { %1760 = vrot.lane.b32.xlu1 %v1747_v21, %s3049_s13  ;;  %v3027_v42 = vpop.eup %3026  ;;  %v1725_v26 = vmul.f32 %v3025_v39, %v3478_v17  ;;  %v1741_v36 = vmul.f32 %v1729_v23, %v3327_v37  ;;  %v2466_v19 = vunpack.c.l.bf16 %v2455_v8  ;;  %v2467_v35 = vunpack.c.l.bf16 %v2456_v9 }
 0x40a   : > { %1762 = vrot.lane.b32.xlu0 %v1748_v24, %s3049_s13  ;;  %v3029_v41 = vpop.eup %3028  ;;  %v1726_v32 = vmul.f32 %v3027_v42, %v3480_v6  ;;  %v1740_v48 = vmul.f32 %v1728_v61, %v3323_v33  ;;  %v2916_v20 = vpack.i.bf16 %v2463_v11, %v2462_v10  ;;  %v2921_v40 = vpack.i.bf16 %v2465_v16, %v2464_v12 }
 0x40b   : > { %v1730_v14 = vmul.f32 %v3029_v41, %v3475_v15  ;;  %v1737_v28 = vmul.f32 %v1725_v26, %v3323_v33  ;;  %v2468_v31 = vunpack.c.h.bf16 %v2456_v9  ;;  %v2469_v21 = vunpack.c.h.bf16 %v2455_v8 }
 0x40c   : > { %v1738_v27 = vmul.f32 %v1726_v32, %v3327_v37  ;;  %v2926_v58 = vpack.i.bf16 %v2467_v35, %v2466_v19 }
 0x40d   : > { %1758 = vrot.lane.b32.xlu1 %v1746_v25, %s3049_s13  ;;  %v1742_v17 = vmul.f32 %v1730_v14, %v3335_v46  ;;  %v1749_v29 = vpack.c.bf16 %v1740_v48, %v1737_v28  ;;  %v2931_v23 = vpack.i.bf16 %v2469_v21, %v2468_v31 }
 0x40e   : > { %v1750_v53 = vpack.c.bf16 %v1741_v36, %v1738_v27 }
 0x410   : > { %1766 = vrot.lane.b32.xlu0 %v1750_v53, %s3049_s13 }
 0x411   : > { %v3031_v49 = vpop.eup %3030 }
 0x412   : > { %v1727_v13 = vmul.f32 %v3031_v49, %v3487_v7 }
 0x414   : > { %v1739_v6 = vmul.f32 %v1727_v13, %v3335_v46  ;;  %1764 = vrot.lane.b32.xlu0 %v1749_v29, %s3049_s13 }
 0x416   : > { %v1751_v30 = vpack.c.bf16 %v1742_v17, %v1739_v6 }
 0x418   : > { %1768 = vrot.lane.b32.xlu1 %v1751_v30, %s3049_s13 }
 0x47b   : > { %v1761_v37 = vpop.permute.xlu1 %1760 }
 0x47c   : > { %v1763_v15 = vpop.permute.xlu0 %1762 }
 0x47d   : > { %v1772_v59 = vsel %vm1743_vm10, %v1761_v37, %v1763_v15 }
 0x47e   : > { %1785 = vst.msk [vmem:[#allocation4 + $0x10] sm:$0xff] %vm1784_vm11, %v1772_v59 }
 0x47f   : > { %1790 = vst.msk [vmem:[#allocation4 + $0x10] sm:$0xff] %vm1789_vm12, %v3047_v22  ;;  %v1759_v33 = vpop.permute.xlu1 %1758 }
 0x480   : > { %v3523_v7 = vsel %vm1743_vm10, %v1759_v33, %v1761_v37  ;;  %1782 = vst.msk [vmem:[#allocation4] sm:$0xff] %vm1781_vm13, %v1759_v33 }
 0x481   : > { %2246 = vmatprep.subr.bf16.mxu1 %v3523_v7 }
 0x482   : > { %v1767_v46 = vpop.permute.xlu0 %1766 }
 0x486   : > { %v1806_v57 = vld [vmem:[#allocation4 + $0x10] sm:$0xff]  ;;  %v1765_v43 = vpop.permute.xlu0 %1764 }
 0x487   : > { %v1792_v38 = vld [vmem:[#allocation4] sm:$0xff]  ;;  %1820 = vrot.lane.b32.xlu0 %v1806_v57, %s3040_s15  ;;  %1800 = vst.msk [vmem:[#allocation3 + $0x10] sm:$0xff] %vm396_vm0, %v1806_v57  ;;  %v1773_v50 = vsel %vm1743_vm10, %v1765_v43, %v1767_v46 }
 0x488   : > { %1786 = vst.msk [vmem:[#allocation4 + $0x18] sm:$0xff] %vm1781_vm13, %v1765_v43  ;;  %1816 = vrot.lane.b32.xlu1 %v1792_v38, %s3040_s15  ;;  %2247 = vmatpush1.bf16.msra.mxu1 %v1792_v38 }
 0x489   : > { %2248 = vmatprep.subr.bf16.mxu1 %v1773_v50 }
 0x48a   : > { %v1769_v44 = vpop.permute.xlu1 %1768 }
 0x48b   : > { %v1774_v45 = vsel %vm1743_vm10, %v1767_v46, %v1769_v44  ;;  %1860 = vrot.lane.b32.xlu0 %v1806_v57, %s3041_s16 }
 0x48c   : > { %1788 = vst.msk [vmem:[#allocation4 + $0x28] sm:$0xff] %vm1784_vm11, %v1774_v45  ;;  %1856 = vrot.lane.b32.xlu1 %v1792_v38, %s3041_s16 }
 0x48d   : > { %1791 = vst.msk [vmem:[#allocation4 + $0x28] sm:$0xff] %vm1789_vm12, %v3047_v22 }
 0x48e   : > { %v2134_v28 = vld [vmem:[#allocation3 + $0x10] sm:$0xff] }
 0x48f   : > { %v1795_v47 = vld [vmem:[#allocation4 + $0x18] sm:$0xff]  ;;  %1900 = vrot.lane.b32.xlu0 %v1806_v57, %s3042_s17 }
 0x490   : > { %1896 = vrot.lane.b32.xlu1 %v1792_v38, %s3042_s17  ;;  %2249 = vmatpush1.bf16.msra.mxu1 %v1795_v47 }
 0x493   : > { %1940 = vrot.lane.b32.xlu0 %v1806_v57, %s3043_s18 }
 0x494   : > { %1936 = vrot.lane.b32.xlu1 %v1792_v38, %s3043_s18  ;;  %v1809_v51 = vld [vmem:[#allocation4 + $0x28] sm:$0xff] }
 0x495   : > { %1803 = vst.msk [vmem:[#allocation3 + $0x28] sm:$0xff] %vm396_vm0, %v1809_v51 }
 0x497   : > { %1822 = vrot.lane.b32.xlu0 %v1795_v47, %s3040_s15 }
 0x498   : > { %1818 = vrot.lane.b32.xlu1 %v3523_v7, %s3040_s15 }
 0x49b   : > { %1862 = vrot.lane.b32.xlu0 %v1795_v47, %s3041_s16 }
 0x49c   : > { %1858 = vrot.lane.b32.xlu1 %v3523_v7, %s3041_s16  ;;  %v2137_v35 = vld [vmem:[#allocation3 + $0x28] sm:$0xff] }
 0x49f   : > { %1902 = vrot.lane.b32.xlu0 %v1795_v47, %s3042_s17 }
 0x4a0   : > { %1898 = vrot.lane.b32.xlu1 %v3523_v7, %s3042_s17 }
 0x4a3   : > { %1824 = vrot.lane.b32.xlu0 %v1773_v50, %s3040_s15 }
 0x4a4   : > { %1938 = vrot.lane.b32.xlu1 %v3523_v7, %s3043_s18 }
 0x4a7   : > { %1942 = vrot.lane.b32.xlu0 %v1795_v47, %s3043_s18 }
 0x4a8   : > { %1826 = vrot.lane.b32.xlu1 %v1809_v51, %s3040_s15 }
 0x4ab   : > { %1864 = vrot.lane.b32.xlu0 %v1773_v50, %s3041_s16 }
 0x4ac   : > { %1978 = vrot.lane.b32.xlu1 %v3523_v7, %s3044_s19 }
 0x4af   : > { %1904 = vrot.lane.b32.xlu0 %v1773_v50, %s3042_s17 }
 0x4b0   : > { %1866 = vrot.lane.b32.xlu1 %v1809_v51, %s3041_s16  ;;  %s2885_s16 = smul.u32 96, %s3751_s10 }
 0x4b3   : > { %1944 = vrot.lane.b32.xlu0 %v1773_v50, %s3043_s18 }
 0x4b4   : > { %1976 = vrot.lane.b32.xlu1 %v1792_v38, %s3044_s19 }
 0x4b7   : > { %1980 = vrot.lane.b32.xlu0 %v1806_v57, %s3044_s19 }
 0x4b8   : > { %1906 = vrot.lane.b32.xlu1 %v1809_v51, %s3042_s17 }
 0x4bb   : > { %1984 = vrot.lane.b32.xlu0 %v1773_v50, %s3044_s19 }
 0x4bc   : > { %2018 = vrot.lane.b32.xlu1 %v3523_v7, %s3045_s20 }
 0x4bf   : > { %1982 = vrot.lane.b32.xlu0 %v1795_v47, %s3044_s19 }
 0x4c0   : > { %1946 = vrot.lane.b32.xlu1 %v1809_v51, %s3043_s18 }
 0x4c3   : > { %2020 = vrot.lane.b32.xlu0 %v1806_v57, %s3045_s20 }
 0x4c4   : > { %2016 = vrot.lane.b32.xlu1 %v1792_v38, %s3045_s20 }
 0x4c7   : > { %2024 = vrot.lane.b32.xlu0 %v1773_v50, %s3045_s20 }
 0x4c8   : > { %1986 = vrot.lane.b32.xlu1 %v1809_v51, %s3044_s19 }
 0x4cb   : > { %2022 = vrot.lane.b32.xlu0 %v1795_v47, %s3045_s20 }
 0x4cc   : > { %2058 = vrot.lane.b32.xlu1 %v3523_v7, %s3046_s23 }
 0x4cf   : > { %2060 = vrot.lane.b32.xlu0 %v1806_v57, %s3046_s23 }
 0x4d0   : > { %2026 = vrot.lane.b32.xlu1 %v1809_v51, %s3045_s20  ;;  %s3703_s20 = scalar_lea.vmem %s3749_s9, %s2885_s16 }
 0x4d3   : > { %2064 = vrot.lane.b32.xlu0 %v1773_v50, %s3046_s23 }
 0x4d4   : > { %2056 = vrot.lane.b32.xlu1 %v1792_v38, %s3046_s23 }
 0x4d7   : > { %2062 = vrot.lane.b32.xlu0 %v1795_v47, %s3046_s23 }
 0x4d8   : > { %2066 = vrot.lane.b32.xlu1 %v1809_v51, %s3046_s23 }
 0x4db   : > { %2100 = vrot.lane.b32.xlu0 %v1806_v57, %s3048_s24 }
 0x4dc   : > { %2098 = vrot.lane.b32.xlu1 %v3523_v7, %s3048_s24 }
 0x4df   : > { %2104 = vrot.lane.b32.xlu0 %v1773_v50, %s3048_s24 }
 0x4e0   : > { %2096 = vrot.lane.b32.xlu1 %v1792_v38, %s3048_s24 }
 0x4e3   : > { %2102 = vrot.lane.b32.xlu0 %v1795_v47, %s3048_s24 }
 0x4e4   : > { %2106 = vrot.lane.b32.xlu1 %v1809_v51, %s3048_s24 }
 0x4e7   : > { %2197 = vperm.xlu0 %2904, %v2187_v54  }
 0x4e8   : > { %2192 = vperm.xlu1 %2905, %v2186_v55  }
 0x4eb   : > { %2207 = vperm.xlu0 %2904, %v2189_v56  }
 0x4ec   : > { %2202 = vperm.xlu1 %2905, %v2188_v60  }
 0x4ef   : > { %2912 = vrot.lane.b32.xlu0 %v2911_v34, %s3043_s18 }
 0x4f0   : > { %2907 = vrot.lane.b32.xlu1 %v2906_v18, %s3043_s18 }
 0x4f3   : > { %2922 = vrot.lane.b32.xlu0 %v2921_v40, %s3043_s18 }
 0x4f4   : > { %2917 = vrot.lane.b32.xlu1 %v2916_v20, %s3043_s18 }
 0x4f7   : > { %2932 = vrot.lane.b32.xlu0 %v2931_v23, %s3043_s18 }
 0x4f8   : > { %2927 = vrot.lane.b32.xlu1 %v2926_v58, %s3043_s18 }
 0x4f9   : > { %v1821_v24 = vpop.permute.xlu0 %1820 }
 0x4fa   : > { %1840 = vst.msk [vmem:[#allocation3 + $0x40] sm:$0xff] %vm396_vm0, %v1821_v24  ;;  %v1817_v39 = vpop.permute.xlu1 %1816 }
 0x4fd   : > { %v1861_v42 = vpop.permute.xlu0 %1860 }
 0x4fe   : > { %1880 = vst.msk [vmem:[#allocation3 + $0x70] sm:$0xff] %vm396_vm0, %v1861_v42  ;;  %v1857_v25 = vpop.permute.xlu1 %1856 }
 0x501   : > { %v1901_v41 = vpop.permute.xlu0 %1900 }
 0x502   : > { %1920 = vst.msk [vmem:[#allocation3 + $0xa0] sm:$0xff] %vm396_vm0, %v1901_v41  ;;  %v1897_v61 = vpop.permute.xlu1 %1896 }
 0x505   : > { %v1941_v26 = vpop.permute.xlu0 %1940 }
 0x506   : > { %1960 = vst.msk [vmem:[#allocation3 + $0xd0] sm:$0xff] %vm396_vm0, %v1941_v26  ;;  %v1937_v32 = vpop.permute.xlu1 %1936 }
 0x509   : > { %v1823_v36 = vpop.permute.xlu0 %1822 }
 0x50a   : > { %v1819_v27 = vpop.permute.xlu1 %1818 }
 0x50b   : > { %v1828_v14 = vsel %vm447_vm1, %v1817_v39, %v1819_v27  ;;  %v1829_v53 = vsel %vm447_vm1, %v1819_v27, %v1821_v24  ;;  %v2140_v39 = vld [vmem:[#allocation3 + $0x40] sm:$0xff] }
 0x50c   : > { %2250 = vmatprep.subr.bf16.mxu1 %v1829_v53 }
 0x50d   : > { %v1863_v48 = vpop.permute.xlu0 %1862  ;;  %2251 = vmatpush1.bf16.msra.mxu1 %v1828_v14  ;;  %v2158_v49 = vld [vmem:[#allocation3 + $0xd0] sm:$0xff] }
 0x50e   : > { %v1859_v13 = vpop.permute.xlu1 %1858  ;;  %2760 = vmatprep.subr.bf16.mxu0 %v2158_v49 }
 0x50f   : > { %v1868_v17 = vsel %vm510_vm2, %v1857_v25, %v1859_v13  ;;  %v1869_v29 = vsel %vm510_vm2, %v1859_v13, %v1861_v42  ;;  %2761 = vmatpush3.bf16.msra.mxu0 %v2134_v28  ;;  %v2146_v28 = vld [vmem:[#allocation3 + $0x70] sm:$0xff] }
 0x511   : > { %v1903_v6 = vpop.permute.xlu0 %1902 }
 0x512   : > { %v1899_v30 = vpop.permute.xlu1 %1898 }
 0x513   : > { %v1908_v37 = vsel %vm573_vm3, %v1897_v61, %v1899_v30  ;;  %v1909_v15 = vsel %vm573_vm3, %v1899_v30, %v1901_v41 }
 0x515   : > { %v1825_v59 = vpop.permute.xlu0 %1824 }
 0x516   : > { %v1830_v33 = vsel %vm447_vm1, %v1823_v36, %v1825_v59  ;;  %v1939_v7 = vpop.permute.xlu1 %1938 }
 0x517   : > { %v1948_v46 = vsel %vm636_vm4, %v1937_v32, %v1939_v7  ;;  %v1949_v57 = vsel %vm636_vm4, %v1939_v7, %v1941_v26 }
 0x519   : > { %v1943_v38 = vpop.permute.xlu0 %1942 }
 0x51a   : > { %v1827_v43 = vpop.permute.xlu1 %1826 }
 0x51b   : > { %v1831_v50 = vsel %vm447_vm1, %v1825_v59, %v1827_v43  ;;  %1843 = vst.msk [vmem:[#allocation3 + $0x58] sm:$0xff] %vm396_vm0, %v1827_v43  ;;  %v2971_v59 = vld [vmem:[%s3745_s5 + $0x1c] ss:$12 sps:$4 sm:$0xff]  }
 0x51c   : > { %2252 = vmatprep.subr.bf16.mxu1 %v1831_v50 }
 0x51d   : > { %v1865_v44 = vpop.permute.xlu0 %1864  ;;  %2253 = vmatpush1.bf16.msra.mxu1 %v1830_v33 }
 0x51e   : > { %v1870_v45 = vsel %vm510_vm2, %v1863_v48, %v1865_v44  ;;  %v1979_v47 = vpop.permute.xlu1 %1978  ;;  %2254 = vmatprep.subr.bf16.mxu1 %v1869_v29 }
 0x521   : > { %v1905_v51 = vpop.permute.xlu0 %1904  ;;  %2255 = vmatpush1.bf16.msra.mxu1 %v1868_v17 }
 0x522   : > { %v1910_v52 = vsel %vm573_vm3, %v1903_v6, %v1905_v51  ;;  %v1867_v54 = vpop.permute.xlu1 %1866  ;;  %v2143_v32 = vld [vmem:[#allocation3 + $0x58] sm:$0xff] }
 0x523   : > { %v1871_v55 = vsel %vm510_vm2, %v1865_v44, %v1867_v54  ;;  %1883 = vst.msk [vmem:[#allocation3 + $0x88] sm:$0xff] %vm396_vm0, %v1867_v54 }
 0x524   : > { %2256 = vmatprep.subr.bf16.mxu1 %v1871_v55 }
 0x525   : > { %v1945_v56 = vpop.permute.xlu0 %1944  ;;  %2257 = vmatpush1.bf16.msra.mxu1 %v1870_v45 }
 0x526   : > { %v1950_v60 = vsel %vm636_vm4, %v1943_v38, %v1945_v56  ;;  %v1977_v62 = vpop.permute.xlu1 %1976  ;;  %2258 = vmatprep.subr.bf16.mxu1 %v1909_v15 }
 0x527   : > { %v1988_v63 = vsel %vm699_vm5, %v1977_v62, %v1979_v47  ;;  %v2975_v62 = vld [vmem:[%s3745_s5 + $0x20] ss:$12 sps:$4 sm:$0xff]  }
 0x529   : > { %v1981_v0 = vpop.permute.xlu0 %1980  ;;  %2259 = vmatpush1.bf16.msra.mxu1 %v1908_v37  ;;  %v2968_v37 = vld [vmem:[%s3745_s5] ss:$12 sps:$4 sm:$0xff]  }
 0x52a   : > { %v1989_v1 = vsel %vm699_vm5, %v1979_v47, %v1981_v0  ;;  %2000 = vst.msk [vmem:[#allocation3 + $0x100] sm:$0xff] %vm396_vm0, %v1981_v0  ;;  %v1907_v2 = vpop.permute.xlu1 %1906  ;;  %v2149_v30 = vld [vmem:[#allocation3 + $0x88] sm:$0xff] }
 0x52b   : > { %v1911_v3 = vsel %vm573_vm3, %v1905_v51, %v1907_v2  ;;  %1923 = vst.msk [vmem:[#allocation3 + $0xb8] sm:$0xff] %vm396_vm0, %v1907_v2  ;;  %v2973_v51 = vld [vmem:[%s3745_s5 + $0x18] ss:$12 sps:$4 sm:$0xff]  }
 0x52c   : > { %2260 = vmatprep.subr.bf16.mxu1 %v1911_v3 }
 0x52d   : > { %v1985_v4 = vpop.permute.xlu0 %1984  ;;  %2261 = vmatpush1.bf16.msra.mxu1 %v1910_v52 }
 0x52e   : > { %v2019_v5 = vpop.permute.xlu1 %2018  ;;  %2262 = vmatprep.subr.bf16.mxu1 %v1949_v57 }
 0x531   : > { %v1983_v8 = vpop.permute.xlu0 %1982  ;;  %2263 = vmatpush1.bf16.msra.mxu1 %v1948_v46  ;;  %v2164_v21 = vld [vmem:[#allocation3 + $0x100] sm:$0xff] }
 0x532   : > { %v1990_v9 = vsel %vm699_vm5, %v1983_v8, %v1985_v4  ;;  %v1947_v10 = vpop.permute.xlu1 %1946  ;;  %v2152_v46 = vld [vmem:[#allocation3 + $0xa0] sm:$0xff]  ;;  %v2155_v44 = vld [vmem:[#allocation3 + $0xb8] sm:$0xff] }
 0x533   : > { %v1951_v11 = vsel %vm636_vm4, %v1945_v56, %v1947_v10  ;;  %1963 = vst.msk [vmem:[#allocation3 + $0xe8] sm:$0xff] %vm396_vm0, %v1947_v10  ;;  %v2974_v56 = vld [vmem:[%s3745_s5 + $0x8] ss:$12 sps:$4 sm:$0xff]  }
 0x534   : > { %2264 = vmatprep.subr.bf16.mxu1 %v1951_v11 }
 0x535   : > { %v2021_v12 = vpop.permute.xlu0 %2020  ;;  %2265 = vmatpush1.bf16.msra.mxu1 %v1950_v60 }
 0x536   : > { %v2029_v16 = vsel %vm762_vm6, %v2019_v5, %v2021_v12  ;;  %2040 = vst.msk [vmem:[#allocation3 + $0x130] sm:$0xff] %vm396_vm0, %v2021_v12  ;;  %v2017_v18 = vpop.permute.xlu1 %2016  ;;  %2266 = vmatprep.subr.bf16.mxu1 %v1989_v1 }
 0x537   : > { %v2028_v34 = vsel %vm762_vm6, %v2017_v18, %v2019_v5 }
 0x539   : > { %v2025_v19 = vpop.permute.xlu0 %2024  ;;  %2267 = vmatpush1.bf16.msra.mxu1 %v1988_v63 }
 0x53a   : > { %v1987_v20 = vpop.permute.xlu1 %1986  ;;  %v2161_v40 = vld [vmem:[#allocation3 + $0xe8] sm:$0xff] }
 0x53b   : > { %v1991_v31 = vsel %vm699_vm5, %v1985_v4, %v1987_v20  ;;  %2003 = vst.msk [vmem:[#allocation3 + $0x118] sm:$0xff] %vm396_vm0, %v1987_v20  ;;  %2762 = vmatprep.subr.bf16.mxu0 %v2161_v40 }
 0x53c   : > { %2763 = vmatpush3.bf16.msra.mxu0 %v2137_v35  ;;  %2268 = vmatprep.subr.bf16.mxu1 %v1991_v31 }
 0x53d   : > { %v2023_v58 = vpop.permute.xlu0 %2022  ;;  %2764 = vmatprep.subr.bf16.mxu0 %v2164_v21  ;;  %2269 = vmatpush1.bf16.msra.mxu1 %v1990_v9  ;;  %v2170_v36 = vld [vmem:[#allocation3 + $0x130] sm:$0xff] }
 0x53e   : > { %v2030_v23 = vsel %vm762_vm6, %v2023_v58, %v2025_v19  ;;  %v2059_v24 = vpop.permute.xlu1 %2058  ;;  %2270 = vmatprep.subr.bf16.mxu1 %v2029_v16 }
 0x540   : > { %2765 = vmatpush3.bf16.msra.mxu0 %v2140_v39 }
 0x541   : > { %v2061_v42 = vpop.permute.xlu0 %2060  ;;  %2271 = vmatpush1.bf16.msra.mxu1 %v2028_v34 }
 0x542   : > { %v2069_v25 = vsel %vm825_vm7, %v2059_v24, %v2061_v42  ;;  %2080 = vst.msk [vmem:[#allocation3 + $0x160] sm:$0xff] %vm396_vm0, %v2061_v42  ;;  %v2027_v41 = vpop.permute.xlu1 %2026  ;;  %v2167_v61 = vld [vmem:[#allocation3 + $0x118] sm:$0xff] }
 0x543   : > { %v2031_v26 = vsel %vm762_vm6, %v2025_v19, %v2027_v41  ;;  %2043 = vst.msk [vmem:[#allocation3 + $0x148] sm:$0xff] %vm396_vm0, %v2027_v41  ;;  %2766 = vmatprep.subr.bf16.mxu0 %v2167_v61 }
 0x544   : > { %2767 = vmatpush3.bf16.msra.mxu0 %v2143_v32  ;;  %2272 = vmatprep.subr.bf16.mxu1 %v2031_v26 }
 0x545   : > { %v2065_v27 = vpop.permute.xlu0 %2064  ;;  %2768 = vmatprep.subr.bf16.mxu0 %v2170_v36  ;;  %2273 = vmatpush1.bf16.msra.mxu1 %v2030_v23 }
 0x546   : > { %v2057_v14 = vpop.permute.xlu1 %2056  ;;  %2274 = vmatprep.subr.bf16.mxu1 %v2069_v25 }
 0x547   : > { %v2068_v53 = vsel %vm825_vm7, %v2057_v14, %v2059_v24 }
 0x548   : > { %2769 = vmatpush3.bf16.msra.mxu0 %v2146_v28 }
 0x549   : > { %v2063_v48 = vpop.permute.xlu0 %2062  ;;  %2275 = vmatpush1.bf16.msra.mxu1 %v2068_v53  ;;  %v2176_v29 = vld [vmem:[#allocation3 + $0x160] sm:$0xff] }
 0x54a   : > { %v2070_v49 = vsel %vm825_vm7, %v2063_v48, %v2065_v27  ;;  %v2067_v13 = vpop.permute.xlu1 %2066  ;;  %v2173_v17 = vld [vmem:[#allocation3 + $0x148] sm:$0xff] }
 0x54b   : > { %v2071_v6 = vsel %vm825_vm7, %v2065_v27, %v2067_v13  ;;  %2083 = vst.msk [vmem:[#allocation3 + $0x178] sm:$0xff] %vm396_vm0, %v2067_v13  ;;  %2770 = vmatprep.subr.bf16.mxu0 %v2173_v17 }
 0x54c   : > { %2771 = vmatpush3.bf16.msra.mxu0 %v2149_v30  ;;  %2276 = vmatprep.subr.bf16.mxu1 %v2071_v6 }
 0x54d   : > { %v2101_v15 = vpop.permute.xlu0 %2100  ;;  %2772 = vmatprep.subr.bf16.mxu0 %v2176_v29  ;;  %2277 = vmatpush1.bf16.msra.mxu1 %v2070_v49 }
 0x54e   : > { %2120 = vst.msk [vmem:[#allocation3 + $0x190] sm:$0xff] %vm396_vm0, %v2101_v15  ;;  %v2099_v33 = vpop.permute.xlu1 %2098 }
 0x54f   : > { %v2109_v7 = vsel %vm888_vm8, %v2099_v33, %v2101_v15 }
 0x550   : > { %2773 = vmatpush3.bf16.msra.mxu0 %v2152_v46  ;;  %2279 = vmatmul.mubr.bf16.vlgmr.msra.gmra.mrb[16].mxu1 %v2968_v37 }
 0x551   : > { %v2105_v57 = vpop.permute.xlu0 %2104  ;;  %2299 = vmatprep.subr.bf16.mxu1 %v2109_v7  ;;  %2288 = vmatprep.mubr.bf16.mxu1 %v2971_v59 }
 0x552   : > { %v2097_v38 = vpop.permute.xlu1 %2096  ;;  %v2179_v43 = vld [vmem:[#allocation3 + $0x178] sm:$0xff] }
 0x553   : > { %v2108_v50 = vsel %vm888_vm8, %v2097_v38, %v2099_v33  ;;  %2774 = vmatprep.subr.bf16.mxu0 %v2179_v43 }
 0x554   : > { %2775 = vmatpush3.bf16.msra.mxu0 %v2155_v44  ;;  %2300 = vmatpush1.bf16.msra.mxu1 %v2108_v50 }
 0x555   : > { %v2103_v45 = vpop.permute.xlu0 %2102  ;;  %v2182_v47 = vld [vmem:[#allocation3 + $0x190] sm:$0xff] }
 0x556   : > { %v2110_v52 = vsel %vm888_vm8, %v2103_v45, %v2105_v57  ;;  %v2107_v54 = vpop.permute.xlu1 %2106  ;;  %2828 = vmatprep.subr.bf16.mxu0 %v2182_v47 }
 0x557   : > { %v2111_v55 = vsel %vm888_vm8, %v2105_v57, %v2107_v54  ;;  %2123 = vst.msk [vmem:[#allocation3 + $0x1a8] sm:$0xff] %vm396_vm0, %v2107_v54  ;;  %2385 = vmatmul.mubr.bf16.vlgmr.msra.gmra.mrb[12].mxu0 %v2968_v37 }
 0x558   : > { %2392 = vmatprep.mubr.bf16.mxu0 %v2971_v59  ;;  %2829 = vmatpush3.bf16.msra.mxu0 %v2182_v47 }
 0x559   : > { %2289 = vmatmul.mubr.bf16.gmra.mrb[20].mxu1 %v2973_v51  ;;  %2301 = vmatprep.subr.bf16.mxu1 %v2111_v55 }
 0x55a   : > { %2302 = vmatpush1.bf16.msra.mxu1 %v2110_v52  ;;  %2331 = vmatprep.mubr.bf16.mxu1 %v3047_v22 }
 0x55e   : > { %v2185_v60 = vld [vmem:[#allocation3 + $0x1a8] sm:$0xff] }
 0x55f   : > { %2393 = vmatmul.mubr.bf16.gmra.mrb[16].mxu0 %v2973_v51  ;;  %2830 = vmatprep.subr.bf16.mxu0 %v2185_v60 }
 0x560   : > { %2831 = vmatpush3.bf16.msra.mxu0 %v2185_v60  ;;  %2832 = vmatprep.mubr.msk.bf16.mxu0 %vm1021_vm9, %v2974_v56 }
 0x561   : > { %2705 = vmatmul.mubr.msk.bf16.vlgmr.msra.gmra.mrb[16].mxu1 %vm1021_vm9, %v2974_v56 }
 0x562   : > { %2341 = vmatprep.mubr.bf16.mxu1 %v3047_v22 }
 0x566   : > { %v2198_v0 = vpop.permute.xlu0 %2197 }
 0x567   : > { %2833 = vmatmul.mubr.msk.bf16.vlgmr.msra.gmra.mrb[20].mxu0 %vm1021_vm9, %v2975_v62  ;;  %v2193_v63 = vpop.permute.xlu1 %2192 }
 0x569   : > { %2706 = vmatmul.mubr.msk.bf16.gmra.mrb[20].mxu1 %vm1021_vm9, %v2975_v62 }
 0x56a   : > { %v3687_v2 = vpop.permute.xlu0 %2207 }
 0x56b   : > { %v3685_v1 = vpop.permute.xlu1 %2202 }
 0x56e   : > { %v3689_v8 = vpop.permute.xlu0 %2912 }
 0x56f   : > { %v2908_v3 = vpop.permute.xlu1 %2907  ;;  %v2914_v34 = vunpack.i.l.bf16 %v3689_v8  ;;  %v2915_v20 = vunpack.i.h.bf16 %v3689_v8 }
 0x570   : > { %v2910_v16 = vunpack.i.h.bf16 %v2908_v3  ;;  %v2909_v18 = vunpack.i.l.bf16 %v2908_v3 }
 0x572   : > { %v2923_v19 = vpop.permute.xlu0 %2922  ;;  %v2507_v39 = vsel %vm636_vm4, %v2909_v18, %v2910_v16  ;;  %v2508_v61 = vsel %vm636_vm4, %v2910_v16, %v2914_v34 }
 0x573   : > { %v3691_v12 = vpop.permute.xlu1 %2917  ;;  %v2925_v17 = vunpack.i.h.bf16 %v2923_v19  ;;  %v2924_v29 = vunpack.i.l.bf16 %v2923_v19 }
 0x574   : > { %v2919_v40 = vunpack.i.l.bf16 %v3691_v12  ;;  %v2920_v21 = vunpack.i.h.bf16 %v3691_v12 }
 0x575   : > { %v2511_v55 = vsel %vm636_vm4, %v2924_v29, %v2925_v17 }
 0x576   : > { %v2509_v14 = vsel %vm636_vm4, %v2915_v20, %v2919_v40  ;;  %v2933_v28 = vpop.permute.xlu0 %2932  ;;  %v2510_v13 = vsel %vm636_vm4, %v2919_v40, %v2920_v21 }
 0x577   : > { %v2928_v32 = vpop.permute.xlu1 %2927  ;;  %v2934_v57 = vunpack.i.l.bf16 %v2933_v28  ;;  %v2935_v44 = vunpack.i.h.bf16 %v2933_v28 }
 0x578   : > { %v2929_v15 = vunpack.i.l.bf16 %v2928_v32  ;;  %v2930_v7 = vunpack.i.h.bf16 %v2928_v32 }
 0x62a   : > { %v2776_v4 = vpop.f32.mrb[12].mxu0 }
 0x62b   : > { %v2777_v5 = vpop.f32.mrb[13].mxu0 }
 0x62c   : > { %v2778_v22 = vadd.f32 %v2777_v5, %v2776_v4  ;;  %v2779_v9 = vpop.f32.mrb[14].mxu0  ;;  %v2512_v4 = vsel %vm636_vm4, %v2925_v17, %v2929_v15 }
 0x62d   : > { %v2780_v10 = vpop.f32.mrb[15].mxu0 }
 0x62e   : > { %v2781_v11 = vadd.f32 %v2780_v10, %v2779_v9  ;;  %v2387_v46 = vadd.f32 %v2778_v22, %v2193_v63  ;;  %v2513_v9 = vsel %vm636_vm4, %v2930_v7, %v2934_v57 }
 0x630   : > { %v2390_v52 = vadd.f32 %v2781_v11, %v2198_v0 }
 0x632   : > { %v2782_v35 = vpop.f32.mrb[16].mxu0 }
 0x633   : > { %v2783_v31 = vpop.f32.mrb[17].mxu0 }
 0x634   : > { %v2784_v58 = vadd.f32 %v2783_v31, %v2782_v35  ;;  %v2785_v23 = vpop.f32.mrb[18].mxu0  ;;  %v2333_v24 = vpop.f32.mrb[16].mxu1 }
 0x635   : > { %v2786_v42 = vpop.f32.mrb[19].mxu0  ;;  %v2860_v25 = vadd.f32 %v2333_v24, %v2193_v63  ;;  %v2335_v41 = vpop.f32.mrb[17].mxu1 }
 0x636   : > { %v2787_v26 = vadd.f32 %v2786_v42, %v2785_v23  ;;  %v2861_v36 = vadd.f32 %v2335_v41, %v2193_v63  ;;  %v2337_v27 = vpop.f32.mrb[18].mxu1  ;;  %v2395_v37 = vadd.f32 %v2784_v58, %v3685_v1 }
 0x637   : > { %v2527_v53 = vadd.f32 %v2860_v25, %v2507_v39  ;;  %v2862_v48 = vadd.f32 %v2337_v27, %v2198_v0  ;;  %v2339_v49 = vpop.f32.mrb[19].mxu1 }
 0x638   : > { %v2528_v6 = vadd.f32 %v2861_v36, %v2508_v61  ;;  %v2863_v30 = vadd.f32 %v2339_v49, %v2198_v0  ;;  %v2398_v45 = vadd.f32 %v2787_v26, %v3687_v2 }
 0x639   : > { %2539 = vst [vmem:[%s3703_s20] sm:$0xff] %v2527_v53  ;;  %v2530_v59 = vadd.f32 %v2862_v48, %v2509_v14 }
 0x63a   : > { %v2834_v33 = vpop.f32.mrb[20].mxu0  ;;  %2540 = vst [vmem:[%s3703_s20 + $0x8] sm:$0xff] %v2528_v6  ;;  %v2531_v38 = vadd.f32 %v2863_v30, %v2510_v13 }
 0x63b   : > { %v2444_v43 = vadd.f32 %v2834_v33, %v2395_v37  ;;  %v2435_v50 = vpop.f32.mrb[21].mxu0  ;;  %2542 = vst [vmem:[%s3703_s20 + $0x18] sm:$0xff] %v2530_v59 }
 0x63c   : > { %v2436_v47 = vadd.f32 %v2435_v50, %v2387_v46  ;;  %v2835_v51 = vpop.f32.mrb[22].mxu0  ;;  %2543 = vst [vmem:[%s3703_s20 + $0x20] sm:$0xff] %v2531_v38  ;;  %v2343_v54 = vpop.f32.mrb[20].mxu1 }
 0x63d   : > { %v2535_v56 = vadd.f32 %v2929_v15, %v2444_v43  ;;  %v2447_v60 = vadd.f32 %v2835_v51, %v2398_v45  ;;  %v2438_v62 = vpop.f32.mrb[23].mxu0  ;;  %v2864_v63 = vadd.f32 %v2343_v54, %v3685_v1  ;;  %v2345_v3 = vpop.f32.mrb[21].mxu1 }
 0x63e   : > { %v2529_v5 = vadd.f32 %v2914_v34, %v2436_v47  ;;  %v2439_v8 = vadd.f32 %v2438_v62, %v2390_v52  ;;  %v2865_v22 = vadd.f32 %v2345_v3, %v3685_v1  ;;  %v2347_v0 = vpop.f32.mrb[22].mxu1  ;;  %v2514_v34 = vsel %vm636_vm4, %v2934_v57, %v2935_v44 }
 0x63f   : > { %2547 = vst.msk [vmem:[%s3703_s20 + $0x40] sm:$0xff] %vm396_vm0, %v2535_v56  ;;  %v2538_v10 = vadd.f32 %v2935_v44, %v2447_v60  ;;  %v2533_v11 = vadd.f32 %v2864_v63, %v2511_v55  ;;  %v2866_v16 = vadd.f32 %v2347_v0, %v3687_v2  ;;  %v2349_v18 = vpop.f32.mrb[23].mxu1 }
 0x640   : > { %2541 = vst.msk [vmem:[%s3703_s20 + $0x10] sm:$0xff] %vm396_vm0, %v2529_v5  ;;  %v2532_v1 = vadd.f32 %v2920_v21, %v2439_v8  ;;  %v2534_v19 = vadd.f32 %v2865_v22, %v2512_v4  ;;  %v2867_v35 = vadd.f32 %v2349_v18, %v3687_v2 }
 0x641   : > { %2550 = vst.msk [vmem:[%s3703_s20 + $0x58] sm:$0xff] %vm396_vm0, %v2538_v10  ;;  %2545 = vst [vmem:[%s3703_s20 + $0x30] sm:$0xff] %v2533_v11  ;;  %v2536_v20 = vadd.f32 %v2866_v16, %v2513_v9 }
 0x642   : > { %2544 = vst.msk [vmem:[%s3703_s20 + $0x28] sm:$0xff] %vm396_vm0, %v2532_v1  ;;  %2546 = vst [vmem:[%s3703_s20 + $0x38] sm:$0xff] %v2534_v19  ;;  %v2537_v40 = vadd.f32 %v2867_v35, %v2514_v34 }
 0x643   : > { %2548 = vst [vmem:[%s3703_s20 + $0x48] sm:$0xff] %v2536_v20 }
 0x644   : > { %2549 = vst [vmem:[%s3703_s20 + $0x50] sm:$0xff] %v2537_v40 }
 0x645 PF: > { %s19_s30 = sadd.s32 1, %s3038_s30  }
 0x646   : > { %p16_p4 = scmp.ge.s32.totalorder %s19_s30, 4  }
 0x648   :  { %18 = sbr.rel (!%p16_p4) target bundleno = 1 (0x1), region = 89 }

// kernel: upblock_forward.5
= control target key start
LH: loop header
LB: loop body
LE: loop exit
PB: predicated region body
PF: predicated region fallthrough
CT: control target
= control target key end

     0   :  { %s2432_s27 = smov 0   ;;  %s3268_s0 = inlined_call_operand.vmem [shape: f32[2,32,256], index: 0, kind: input, shape index: {}]   ;;  %s3269_s1 = inlined_call_operand.vmem [shape: f32[32,1], index: 1, kind: input, shape index: {}]   ;;  %s3270_s2 = inlined_call_operand.vmem [shape: f32[32,1], index: 2, kind: input, shape index: {}]   ;;  %s3271_s3 = inlined_call_operand.vmem [shape: bf16[96,32], index: 3, kind: input, shape index: {}]   ;;  %s3272_s4 = inlined_call_operand.vmem [shape: f32[96,1], index: 4, kind: input, shape index: {}]   ;;  %s3273_s5 = inlined_call_operand.vmem [shape: bf16[32,32], index: 5, kind: input, shape index: {}]   ;;  %s3274_s6 = inlined_call_operand.vmem [shape: f32[32,1], index: 6, kind: input, shape index: {}]   ;;  %s3275_s7 = inlined_call_operand.vmem [shape: f32[32,32], index: 7, kind: input, shape index: {}]   ;;  %s3276_s8 = inlined_call_operand.vmem [shape: f32[2,32,256], index: 8, kind: output, shape index: {}]  }
   0x1 LB: > { %s2037_s28 = sadd.s32 4294967295, %s2384_s27   ;;  %p2041_p0 = scmp.ge.s32.totalorder %s2384_s27, 1  ;;  %s2384_s27 = sphi %s2432_s27, %s18_s27  }
   0x2   : > { %p262_p1 = scmp.lt.s32.totalorder %s2384_s27, 3 }
   0x4   : > { %p263_p2 = pnand %p2041_p0, %p262_p1 }
   0x6   : > { %266 = sbr.rel (%p263_p2) target bundleno = 2135 (0x857), region = 52 }
   0xd   : > { %p296_p3 = scmp.lt.s32.totalorder %s2037_s28, 1  ;;  %v347_v24 = vld [vmem:[%s3275_s7] sm:$0xff]  ;;  %vm351_vm0 = vcmask 261120   ;;  %v3277_v26 = vmov 0   ;;  %v615_v27 = vld [vmem:[%s3269_s1 + $0x8] sm:$0xff]  ;;  %v616_v29 = vld [vmem:[%s3269_s1 + $0x10] sm:$0xff] }
   0xe   : > { %2114 = vmatprep.mubr.msk.f32.mxu0 %vm351_vm0, %v347_v24  ;;  %2128 = vmatprep.mubr.msk.f32.mxu1 %vm351_vm0, %v347_v24  ;;  %v614_v25 = vld [vmem:[%s3269_s1] sm:$0xff]  ;;  %v348_v41 = vld [vmem:[%s3275_s7 + $0x8] sm:$0xff]  ;;  %v349_v43 = vld [vmem:[%s3275_s7 + $0x10] sm:$0xff] }
   0xf   : > { %s3363_s28 = smov (!%p296_p3, %s2037_s28), 1  ;;  %2160 = vset.pattern.permute.xlu1 %v3277_v26  ;;  %2161 = vset.pattern.permute.xlu0 %v3277_v26  ;;  %v646_v28 = vld [vmem:[%s3270_s2] sm:$0xff]  ;;  %v350_v44 = vld [vmem:[%s3275_s7 + $0x18] sm:$0xff]  ;;  %v647_v45 = vld [vmem:[%s3270_s2 + $0x8] sm:$0xff] }
  0x10   : > { %s2088_s29 = sshll.u32 %s3363_s28, 6  ;;  %v617_v58 = vld [vmem:[%s3269_s1 + $0x18] sm:$0xff]  ;;  %v695_v24 = vld [vmem:[%s3272_s4 + $0x8] sm:$0xff] }
  0x11   : > { %s2448_s10 = scalar_lea.vmem %s3268_s0, %s2088_s29  ;;  %s3247_s13 = scalar_lea.vmem %s3276_s8, %s2088_s29 }
  0x12   : > { %v2451_v0 = vld [vmem:[%s2448_s10 + $0x30] sm:$0xff]  ;;  %v2454_v1 = vld [vmem:[%s2448_s10 + $0x38] sm:$0xff]  ;;  %v2457_v2 = vld [vmem:[%s2448_s10] sm:$0xff] }
  0x13   : > { %v324_v3 = vadd.f32 %v2454_v1, %v2451_v0  ;;  %v2462_v4 = vld [vmem:[%s2448_s10 + $0x8] sm:$0xff]  ;;  %v327_v5 = vmul.f32 %v2457_v2, %v2457_v2  ;;  %v2467_v6 = vld [vmem:[%s2448_s10 + $0x10] sm:$0xff]  ;;  %v2470_v7 = vld [vmem:[%s2448_s10 + $0x18] sm:$0xff]  ;;  %v333_v17 = vmul.f32 %v2451_v0, %v2451_v0  ;;  %v334_v18 = vmul.f32 %v2454_v1, %v2454_v1 }
  0x14   : > { %v315_v8 = vadd.f32 %v2462_v4, %v2457_v2  ;;  %v328_v9 = vmul.f32 %v2462_v4, %v2462_v4  ;;  %v329_v10 = vmul.f32 %v2467_v6, %v2467_v6  ;;  %v330_v11 = vmul.f32 %v2470_v7, %v2470_v7  ;;  %v2483_v14 = vld [vmem:[%s2448_s10 + $0x20] sm:$0xff]  ;;  %v2486_v15 = vld [vmem:[%s2448_s10 + $0x28] sm:$0xff] }
  0x15   : > { %325 = vadd.xlane.f32.xlu1 %v324_v3  ;;  %v318_v13 = vadd.f32 %v2470_v7, %v2467_v6  ;;  %v321_v19 = vadd.f32 %v2486_v15, %v2483_v14  ;;  %v331_v20 = vmul.f32 %v2483_v14, %v2483_v14  ;;  %v332_v21 = vmul.f32 %v2486_v15, %v2486_v15 }
  0x16   : > { %316 = vadd.xlane.f32.xlu0 %v315_v8  ;;  %v335_v12 = vadd.f32 %v328_v9, %v327_v5  ;;  %v338_v16 = vadd.f32 %v330_v11, %v329_v10  ;;  %v344_v22 = vadd.f32 %v334_v18, %v333_v17 }
  0x17   : > { %v341_v23 = vadd.f32 %v332_v21, %v331_v20 }
  0x19   : > { %336 = vadd.xlane.f32.xlu1 %v335_v12 }
  0x1a   : > { %319 = vadd.xlane.f32.xlu0 %v318_v13 }
  0x1d   : > { %339 = vadd.xlane.f32.xlu1 %v338_v16 }
  0x1e   : > { %322 = vadd.xlane.f32.xlu0 %v321_v19 }
  0x21   : > { %345 = vadd.xlane.f32.xlu1 %v344_v22 }
  0x22   : > { %342 = vadd.xlane.f32.xlu0 %v341_v23  ;;  %v649_v23 = vld [vmem:[%s3270_s2 + $0x18] sm:$0xff] }
  0x32   : > { %620 = vperm.xlu1 %2160, %v614_v25   ;;  %v648_v25 = vld [vmem:[%s3270_s2 + $0x10] sm:$0xff] }
  0x36   : > { %625 = vperm.xlu1 %2160, %v615_v27   ;;  %v697_v27 = vld [vmem:[%s3272_s4 + $0x18] sm:$0xff] }
  0x38   : > { %657 = vperm.xlu0 %2161, %v647_v45  }
  0x3a   : > { %652 = vperm.xlu1 %2160, %v646_v28   ;;  %v694_v28 = vld [vmem:[%s3272_s4] sm:$0xff] }
  0x3e   : > { %630 = vperm.xlu1 %2160, %v616_v29   ;;  %v699_v29 = vld [vmem:[%s3272_s4 + $0x28] sm:$0xff] }
  0xa2   : > { %v326_v30 = vpop.xlane.xlu1 %325 }
  0xa3   : > { %v317_v31 = vpop.xlane.xlu0 %316 }
  0xa6   : > { %v337_v32 = vpop.xlane.xlu1 %336 }
  0xa7   : > { %v320_v33 = vpop.xlane.xlu0 %319 }
  0xa8   : > { %v2134_v34 = vpack.c.bf16 %v320_v33, %v317_v31  ;;  %v701_v31 = vld [vmem:[%s3272_s4 + $0x38] sm:$0xff]  ;;  %v700_v33 = vld [vmem:[%s3272_s4 + $0x30] sm:$0xff] }
  0xaa   : > { %2135 = vmatprep.subr.bf16.mxu0 %v2134_v34  ;;  %v340_v35 = vpop.xlane.xlu1 %339 }
  0xab   : > { %2137 = vmatpush3.bf16.msra.mxu0 %v2134_v34  ;;  %v323_v36 = vpop.xlane.xlu0 %322  ;;  %v2142_v37 = vpack.c.bf16 %v340_v35, %v337_v32  ;;  %v698_v32 = vld [vmem:[%s3272_s4 + $0x20] sm:$0xff] }
  0xac   : > { %v2138_v38 = vpack.c.bf16 %v326_v30, %v323_v36  ;;  %v696_v30 = vld [vmem:[%s3272_s4 + $0x10] sm:$0xff] }
  0xad   : > { %2143 = vmatprep.subr.bf16.mxu1 %v2142_v37 }
  0xae   : > { %2139 = vmatprep.subr.bf16.mxu0 %v2138_v38  ;;  %2145 = vmatpush3.bf16.msra.mxu1 %v2142_v37  ;;  %v346_v39 = vpop.xlane.xlu1 %345 }
  0xaf   : > { %2141 = vmatpush3.bf16.msra.mxu0 %v2138_v38  ;;  %v343_v40 = vpop.xlane.xlu0 %342 }
  0xb0   : > { %v2146_v42 = vpack.c.bf16 %v346_v39, %v343_v40 }
  0xb2   : > { %2115 = vmatmul.mubr.msk.f32.vlgmr.msra.gmra.mrb[0].mxu0 %vm351_vm0, %v348_v41  ;;  %2147 = vmatprep.subr.bf16.mxu1 %v2146_v42  ;;  %v621_v34 = vpop.permute.xlu1 %620 }
  0xb3   : > { %2149 = vmatpush3.bf16.msra.mxu1 %v2146_v42  ;;  %2117 = vmatprep.mubr.msk.f32.mxu0 %vm351_vm0, %v349_v43 }
  0xb6   : > { %2118 = vmatmul.mubr.msk.f32.gmra.mrb[2].mxu0 %vm351_vm0, %v350_v44  ;;  %2129 = vmatmul.mubr.msk.f32.vlgmr.msra.gmra.mrb[0].mxu1 %vm351_vm0, %v348_v41  ;;  %v626_v35 = vpop.permute.xlu1 %625 }
  0xb7   : > { %2131 = vmatprep.mubr.msk.f32.mxu1 %vm351_vm0, %v349_v43  ;;  %846 = vmatprep.mubr.bf16.mxu0 %v3277_v26  ;;  %v658_v39 = vpop.permute.xlu0 %657 }
  0xba   : > { %2132 = vmatmul.mubr.msk.f32.gmra.mrb[2].mxu1 %vm351_vm0, %v350_v44  ;;  %v653_v36 = vpop.permute.xlu1 %652 }
  0xbb   : > { %1071 = vmatprep.mubr.bf16.mxu1 %v3277_v26 }
  0xbe   : > { %v631_v37 = vpop.permute.xlu1 %630 }
 0x185   : > { %v2116_v46 = vpop.f32.mrb[0].mxu0 }
 0x186   : > { %v450_v47 = vmul.f32 0.001953125, %v2116_v46  ;;  %v430_v48 = vpop.f32.mrb[1].mxu0 }
 0x187   : > { %v449_v49 = vmul.f32 0.001953125, %v430_v48 }
 0x188   : > { %v543_v50 = vmul.f32 %v450_v47, %v450_v47  ;;  %565 = vperm.xlu1 %2160, %v450_v47  }
 0x189   : > { %v542_v51 = vmul.f32 %v449_v49, %v449_v49  ;;  %v2119_v52 = vpop.f32.mrb[2].mxu0  ;;  %v2130_v53 = vpop.f32.mrb[0].mxu1  ;;  %560 = vperm.xlu0 %2161, %v449_v49  }
 0x18a   : > { %v452_v54 = vmul.f32 0.001953125, %v2119_v52  ;;  %v539_v55 = vmul.f32 0.001953125, %v2130_v53  ;;  %v519_v56 = vpop.f32.mrb[1].mxu1  ;;  %v440_v57 = vpop.f32.mrb[3].mxu0 }
 0x18b   : > { %v538_v59 = vmul.f32 0.001953125, %v519_v56  ;;  %v451_v60 = vmul.f32 0.001953125, %v440_v57 }
 0x18c   : > { %v545_v61 = vmul.f32 %v452_v54, %v452_v54  ;;  %v547_v62 = vsub.f32 %v539_v55, %v543_v50  ;;  %575 = vperm.xlu1 %2160, %v452_v54  }
 0x18d   : > { %v546_v63 = vsub.f32 %v538_v59, %v542_v51  ;;  %v544_v3 = vmul.f32 %v451_v60, %v451_v60  ;;  %v2133_v5 = vpop.f32.mrb[2].mxu1  ;;  %635 = vperm.xlu0 %2161, %v617_v58  }
 0x18e   : > { %v551_v8 = vadd.f32 1e-06, %v547_v62  ;;  %v541_v9 = vmul.f32 0.001953125, %v2133_v5  ;;  %v529_v10 = vpop.f32.mrb[3].mxu1 }
 0x18f   : > { %v550_v11 = vadd.f32 1e-06, %v546_v63  ;;  %v540_v12 = vmul.f32 0.001953125, %v529_v10 }
 0x190   : > { %2170 = vrsqrt.f32 %v551_v8  ;;  %v549_v13 = vsub.f32 %v541_v9, %v545_v61  ;;  %570 = vperm.xlu1 %2160, %v451_v60  }
 0x191   : > { %v548_v16 = vsub.f32 %v540_v12, %v544_v3  ;;  %2172 = vrsqrt.f32 %v550_v11 }
 0x192   : > { %v553_v17 = vadd.f32 1e-06, %v549_v13 }
 0x193   : > { %v552_v18 = vadd.f32 1e-06, %v548_v16 }
 0x194   : > { %2174 = vrsqrt.f32 %v553_v17 }
 0x195   : > { %2176 = vrsqrt.f32 %v552_v18 }
 0x19a   : > { %v2171_v19 = vpop.eup %2170 }
 0x19b   : > { %593 = vperm.xlu1 %2160, %v2171_v19   ;;  %v2173_v20 = vpop.eup %2172 }
 0x19e   : > { %v2175_v21 = vpop.eup %2174 }
 0x19f   : > { %588 = vperm.xlu1 %2160, %v2173_v20   ;;  %603 = vperm.xlu0 %2161, %v2175_v21   ;;  %v2177_v22 = vpop.eup %2176 }
 0x1a3   : > { %667 = vperm.xlu0 %2161, %v649_v23   ;;  %598 = vperm.xlu1 %2160, %v2177_v22   ;;  %v2162_v22 = vld [vmem:[%s3271_s3] sm:$0xff]   ;;  %v2163_v23 = vld [vmem:[%s3271_s3 + $0x8] sm:$0xff]  }
 0x1a7   : > { %713 = vperm.xlu0 %2161, %v695_v24   ;;  %662 = vperm.xlu1 %2160, %v648_v25   ;;  %v2164_v24 = vld [vmem:[%s3271_s3 + $0x10] sm:$0xff]   ;;  %v2165_v25 = vld [vmem:[%s3271_s3 + $0x18] sm:$0xff]  }
 0x1ab   : > { %723 = vperm.xlu0 %2161, %v697_v27   ;;  %708 = vperm.xlu1 %2160, %v694_v28  }
 0x1af   : > { %733 = vperm.xlu0 %2161, %v699_v29   ;;  %718 = vperm.xlu1 %2160, %v696_v30  }
 0x1b3   : > { %743 = vperm.xlu0 %2161, %v701_v31   ;;  %728 = vperm.xlu1 %2160, %v698_v32  }
 0x1b7   : > { %738 = vperm.xlu1 %2160, %v700_v33  }
 0x207   : > { %v566_v38 = vpop.permute.xlu1 %565 }
 0x208   : > { %v561_v41 = vpop.permute.xlu0 %560  ;;  %v580_v43 = vsub.f32 %v2467_v6, %v566_v38  ;;  %v581_v44 = vsub.f32 %v2470_v7, %v566_v38 }
 0x209   : > { %v578_v49 = vsub.f32 %v2457_v2, %v561_v41  ;;  %v579_v50 = vsub.f32 %v2462_v4, %v561_v41 }
 0x20b   : > { %v576_v40 = vpop.permute.xlu1 %575 }
 0x20c   : > { %v636_v45 = vpop.permute.xlu0 %635  ;;  %v584_v51 = vsub.f32 %v2451_v0, %v576_v40  ;;  %v585_v52 = vsub.f32 %v2454_v1, %v576_v40 }
 0x20f   : > { %v571_v42 = vpop.permute.xlu1 %570 }
 0x210   : > { %v582_v59 = vsub.f32 %v2483_v14, %v571_v42  ;;  %v583_v60 = vsub.f32 %v2486_v15, %v571_v42 }
 0x21a   : > { %v594_v46 = vpop.permute.xlu1 %593 }
 0x21b   : > { %v608_v47 = vmul.f32 %v594_v46, %v580_v43  ;;  %v609_v48 = vmul.f32 %v594_v46, %v581_v44 }
 0x21d   : > { %v640_v53 = vmul.f32 %v626_v35, %v608_v47  ;;  %v641_v58 = vmul.f32 %v626_v35, %v609_v48 }
 0x21e   : > { %v589_v54 = vpop.permute.xlu1 %588  ;;  %v604_v55 = vpop.permute.xlu0 %603 }
 0x21f   : > { %v606_v56 = vmul.f32 %v589_v54, %v578_v49  ;;  %v607_v57 = vmul.f32 %v589_v54, %v579_v50  ;;  %v612_v6 = vmul.f32 %v604_v55, %v584_v51  ;;  %v613_v7 = vmul.f32 %v604_v55, %v585_v52 }
 0x220   : > { %v672_v62 = vadd.f32 %v658_v39, %v640_v53  ;;  %v673_v10 = vadd.f32 %v658_v39, %v641_v58 }
 0x221   : > { %v638_v61 = vmul.f32 %v621_v34, %v606_v56  ;;  %v639_v2 = vmul.f32 %v621_v34, %v607_v57  ;;  %v644_v63 = vmul.f32 %v636_v45, %v612_v6  ;;  %v645_v5 = vmul.f32 %v636_v45, %v613_v7 }
 0x222   : > { %v599_v4 = vpop.permute.xlu1 %598  ;;  %v668_v8 = vpop.permute.xlu0 %667 }
 0x223   : > { %v670_v0 = vadd.f32 %v653_v36, %v638_v61  ;;  %v610_v3 = vmul.f32 %v599_v4, %v582_v59  ;;  %v611_v1 = vmul.f32 %v599_v4, %v583_v60  ;;  %v671_v9 = vadd.f32 %v653_v36, %v639_v2 }
 0x224   : > { %v676_v14 = vadd.f32 %v668_v8, %v644_v63  ;;  %v677_v18 = vadd.f32 %v668_v8, %v645_v5 }
 0x225   : > { %v642_v11 = vmul.f32 %v631_v37, %v610_v3  ;;  %v643_v12 = vmul.f32 %v631_v37, %v611_v1  ;;  %v678_v13 = vpack.c.bf16 %v672_v62, %v670_v0  ;;  %v679_v17 = vpack.c.bf16 %v673_v10, %v671_v9 }
 0x226   : > { %v663_v16 = vpop.permute.xlu1 %662  ;;  %v714_v34 = vpop.permute.xlu0 %713 }
 0x227   : > { %v674_v15 = vadd.f32 %v663_v16, %v642_v11  ;;  %v675_v19 = vadd.f32 %v663_v16, %v643_v12  ;;  %814 = vmatprep.subr.bf16.mxu0 %v679_v17 }
 0x228   : > { %815 = vmatpush1.bf16.msra.mxu0 %v678_v13 }
 0x229   : > { %v680_v20 = vpack.c.bf16 %v676_v14, %v674_v15  ;;  %v681_v21 = vpack.c.bf16 %v677_v18, %v675_v19 }
 0x22a   : > { %v709_v27 = vpop.permute.xlu1 %708  ;;  %v724_v43 = vpop.permute.xlu0 %723 }
 0x22b   : > { %816 = vmatprep.subr.bf16.mxu0 %v681_v21 }
 0x22c   : > { %817 = vmatpush1.bf16.msra.mxu0 %v680_v20 }
 0x22e   : > { %v719_v37 = vpop.permute.xlu1 %718  ;;  %v734_v48 = vpop.permute.xlu0 %733 }
 0x22f   : > { %2060 = vmatmul.mubr.msk.bf16.vlgmr.msra.gmra.mrb[4].mxu0 %vm351_vm0, %v2162_v22 }
 0x230   : > { %856 = vmatprep.mubr.bf16.mxu0 %v3277_v26 }
 0x232   : > { %v729_v50 = vpop.permute.xlu1 %728  ;;  %v744_v7 = vpop.permute.xlu0 %743 }
 0x236   : > { %v739_v60 = vpop.permute.xlu1 %738 }
 0x237   : > { %2061 = vmatmul.mubr.msk.bf16.gmra.mrb[8].mxu0 %vm351_vm0, %v2163_v23 }
 0x238   : > { %866 = vmatprep.mubr.bf16.mxu0 %v3277_v26 }
 0x23f   : > { %2062 = vmatmul.mubr.msk.bf16.gmra.mrb[12].mxu0 %vm351_vm0, %v2164_v24 }
 0x240   : > { %876 = vmatprep.mubr.bf16.mxu0 %v3277_v26 }
 0x247   : > { %2063 = vmatmul.mubr.msk.bf16.gmra.mrb[16].mxu0 %vm351_vm0, %v2165_v25 }
 0x248   : > { %886 = vmatprep.mubr.bf16.mxu0 %v3277_v26 }
 0x302   : > { %v848_v28 = vpop.f32.mrb[4].mxu0 }
 0x303   : > { %v849_v29 = vadd.f32 %v848_v28, %v709_v27  ;;  %v850_v30 = vpop.f32.mrb[5].mxu0 }
 0x304   : > { %v851_v31 = vadd.f32 %v850_v30, %v709_v27  ;;  %v852_v32 = vpop.f32.mrb[6].mxu0 }
 0x305   : > { %v854_v33 = vpop.f32.mrb[7].mxu0  ;;  %907 = vxpose.xlu1.b32.start [1/4] (short) %v849_v29, 128  ;;  %v853_v35 = vadd.f32 %v852_v32, %v714_v34 }
 0x306   : > { %939 = vxpose.xlu0.b32.start [1/4] (short) %v851_v31, 128  ;;  %v855_v36 = vadd.f32 %v854_v33, %v714_v34 }
 0x309   : > { %908 = vxpose.xlu1.b32.cont [2/4] (short) %v853_v35, 128 }
 0x30a   : > { %v858_v38 = vpop.f32.mrb[8].mxu0  ;;  %940 = vxpose.xlu0.b32.cont [2/4] (short) %v855_v36, 128 }
 0x30b   : > { %v859_v39 = vadd.f32 %v858_v38, %v719_v37  ;;  %v860_v40 = vpop.f32.mrb[9].mxu0 }
 0x30c   : > { %v861_v41 = vadd.f32 %v860_v40, %v719_v37  ;;  %v862_v42 = vpop.f32.mrb[10].mxu0 }
 0x30d   : > { %v864_v44 = vpop.f32.mrb[11].mxu0  ;;  %909 = vxpose.xlu1.b32.cont [3/4] (short) %v859_v39, 128  ;;  %v863_v45 = vadd.f32 %v862_v42, %v724_v43 }
 0x30e   : > { %941 = vxpose.xlu0.b32.cont [3/4] (short) %v861_v41, 128  ;;  %v865_v46 = vadd.f32 %v864_v44, %v724_v43 }
 0x311   : > { %910 = vxpose.xlu1.b32.end [4/4] (short) %v863_v45, 128 }
 0x312   : > { %v868_v47 = vpop.f32.mrb[12].mxu0  ;;  %942 = vxpose.xlu0.b32.end [4/4] (short) %v865_v46, 128 }
 0x313   : > { %v870_v49 = vpop.f32.mrb[13].mxu0  ;;  %v869_v52 = vadd.f32 %v868_v47, %v729_v50 }
 0x314   : > { %v872_v51 = vpop.f32.mrb[14].mxu0  ;;  %v871_v55 = vadd.f32 %v870_v49, %v729_v50 }
 0x315   : > { %v873_v53 = vadd.f32 %v872_v51, %v734_v48  ;;  %v874_v54 = vpop.f32.mrb[15].mxu0 }
 0x316   : > { %v875_v56 = vadd.f32 %v874_v54, %v734_v48 }
 0x317   : > { %v987_v57 = vpack.c.bf16 %v873_v53, %v869_v52 }
 0x318   : > { %v988_v6 = vpack.c.bf16 %v875_v56, %v871_v55 }
 0x31a   : > { %v878_v58 = vpop.f32.mrb[16].mxu0  ;;  %1039 = vmatprep.subr.bf16.mxu1 %v988_v6 }
 0x31b   : > { %v880_v59 = vpop.f32.mrb[17].mxu0  ;;  %1040 = vmatpush1.bf16.msra.mxu1 %v987_v57  ;;  %v879_v2 = vadd.f32 %v878_v58, %v739_v60 }
 0x31c   : > { %v882_v61 = vpop.f32.mrb[18].mxu0  ;;  %v881_v63 = vadd.f32 %v880_v59, %v739_v60 }
 0x31d   : > { %v883_v62 = vadd.f32 %v882_v61, %v744_v7  ;;  %v884_v4 = vpop.f32.mrb[19].mxu0 }
 0x31e   : > { %v885_v0 = vadd.f32 %v884_v4, %v744_v7 }
 0x31f   : > { %v989_v3 = vpack.c.bf16 %v883_v62, %v879_v2 }
 0x320   : > { %v990_v1 = vpack.c.bf16 %v885_v0, %v881_v63 }
 0x322   : > { %1041 = vmatprep.subr.bf16.mxu1 %v990_v1 }
 0x323   : > { %1042 = vmatpush1.bf16.msra.mxu1 %v989_v3 }
 0x385   : > { %v923_v5 = vpop.trf.xlu1 }
 0x386   : > { %v955_v20 = vpop.trf.xlu0 }
 0x389   : > { %v924_v8 = vpop.trf.xlu1 }
 0x38a   : > { %v971_v9 = vpack.c.bf16 %v924_v8, %v923_v5  ;;  %v956_v24 = vpop.trf.xlu0 }
 0x38b   : > { %v979_v38 = vpack.c.bf16 %v956_v24, %v955_v20 }
 0x38c   : > { %2066 = vmatmul.mubr.msk.bf16.vlgmr.msra.gmra.mrb[4].mxu1 %vm351_vm0, %v971_v9 }
 0x38d   : > { %v925_v10 = vpop.trf.xlu1  ;;  %1081 = vmatprep.mubr.bf16.mxu1 %v3277_v26 }
 0x38e   : > { %v957_v28 = vpop.trf.xlu0 }
 0x391   : > { %v926_v11 = vpop.trf.xlu1 }
 0x392   : > { %v972_v12 = vpack.c.bf16 %v926_v11, %v925_v10  ;;  %v958_v31 = vpop.trf.xlu0 }
 0x393   : > { %v980_v40 = vpack.c.bf16 %v958_v31, %v957_v28 }
 0x394   : > { %2067 = vmatmul.mubr.msk.bf16.gmra.mrb[8].mxu1 %vm351_vm0, %v972_v12 }
 0x395   : > { %v927_v13 = vpop.trf.xlu1  ;;  %1091 = vmatprep.mubr.bf16.mxu1 %v3277_v26 }
 0x396   : > { %v959_v34 = vpop.trf.xlu0 }
 0x399   : > { %v928_v16 = vpop.trf.xlu1 }
 0x39a   : > { %v973_v17 = vpack.c.bf16 %v928_v16, %v927_v13  ;;  %v960_v37 = vpop.trf.xlu0 }
 0x39b   : > { %v981_v43 = vpack.c.bf16 %v960_v37, %v959_v34 }
 0x39c   : > { %2068 = vmatmul.mubr.msk.bf16.gmra.mrb[12].mxu1 %vm351_vm0, %v973_v17 }
 0x39d   : > { %v929_v14 = vpop.trf.xlu1  ;;  %1101 = vmatprep.mubr.bf16.mxu1 %v3277_v26 }
 0x39e   : > { %v961_v39 = vpop.trf.xlu0 }
 0x3a1   : > { %v930_v18 = vpop.trf.xlu1 }
 0x3a2   : > { %v974_v15 = vpack.c.bf16 %v930_v18, %v929_v14  ;;  %v962_v41 = vpop.trf.xlu0 }
 0x3a3   : > { %v982_v45 = vpack.c.bf16 %v962_v41, %v961_v39 }
 0x3a4   : > { %2069 = vmatmul.mubr.msk.bf16.gmra.mrb[16].mxu1 %vm351_vm0, %v974_v15 }
 0x3a5   : > { %v931_v19 = vpop.trf.xlu1  ;;  %1111 = vmatprep.mubr.bf16.mxu1 %v3277_v26 }
 0x3a6   : > { %v963_v42 = vpop.trf.xlu0 }
 0x3a9   : > { %v932_v21 = vpop.trf.xlu1 }
 0x3aa   : > { %v975_v22 = vpack.c.bf16 %v932_v21, %v931_v19  ;;  %v964_v44 = vpop.trf.xlu0 }
 0x3ab   : > { %v983_v48 = vpack.c.bf16 %v964_v44, %v963_v42 }
 0x3ac   : > { %2070 = vmatmul.mubr.msk.bf16.gmra.mrb[20].mxu1 %vm351_vm0, %v975_v22 }
 0x3ad   : > { %v933_v23 = vpop.trf.xlu1  ;;  %1121 = vmatprep.mubr.bf16.mxu1 %v3277_v26 }
 0x3ae   : > { %v965_v46 = vpop.trf.xlu0 }
 0x3b1   : > { %v934_v25 = vpop.trf.xlu1 }
 0x3b2   : > { %v976_v27 = vpack.c.bf16 %v934_v25, %v933_v23  ;;  %v966_v47 = vpop.trf.xlu0 }
 0x3b3   : > { %v984_v50 = vpack.c.bf16 %v966_v47, %v965_v46 }
 0x3b4   : > { %2071 = vmatmul.mubr.msk.bf16.gmra.mrb[24].mxu1 %vm351_vm0, %v976_v27 }
 0x3b5   : > { %v935_v29 = vpop.trf.xlu1  ;;  %1131 = vmatprep.mubr.bf16.mxu1 %v3277_v26 }
 0x3b6   : > { %v967_v49 = vpop.trf.xlu0 }
 0x3b9   : > { %v936_v30 = vpop.trf.xlu1 }
 0x3ba   : > { %v977_v32 = vpack.c.bf16 %v936_v30, %v935_v29  ;;  %v968_v51 = vpop.trf.xlu0 }
 0x3bb   : > { %v985_v53 = vpack.c.bf16 %v968_v51, %v967_v49 }
 0x3bc   : > { %2072 = vmatmul.mubr.msk.bf16.gmra.mrb[28].mxu1 %vm351_vm0, %v977_v32 }
 0x3bd   : > { %v937_v33 = vpop.trf.xlu1  ;;  %1141 = vmatprep.mubr.bf16.mxu1 %v3277_v26 }
 0x3be   : > { %v969_v52 = vpop.trf.xlu0 }
 0x3c1   : > { %v938_v35 = vpop.trf.xlu1 }
 0x3c2   : > { %v978_v36 = vpack.c.bf16 %v938_v35, %v937_v33  ;;  %v970_v54 = vpop.trf.xlu0 }
 0x3c3   : > { %v986_v55 = vpack.c.bf16 %v970_v54, %v969_v52 }
 0x3c4   : > { %2073 = vmatmul.mubr.msk.bf16.gmra.mrb[32].mxu1 %vm351_vm0, %v978_v36 }
 0x3c5   : > { %1151 = vmatprep.mubr.bf16.mxu1 %v3277_v26 }
 0x3cc   : > { %2074 = vmatmul.mubr.msk.bf16.gmra.mrb[36].mxu1 %vm351_vm0, %v979_v38 }
 0x3cd   : > { %1161 = vmatprep.mubr.bf16.mxu1 %v3277_v26 }
 0x3d4   : > { %2075 = vmatmul.mubr.msk.bf16.gmra.mrb[40].mxu1 %vm351_vm0, %v980_v40 }
 0x3d5   : > { %1171 = vmatprep.mubr.bf16.mxu1 %v3277_v26 }
 0x3dc   : > { %2076 = vmatmul.mubr.msk.bf16.gmra.mrb[44].mxu1 %vm351_vm0, %v981_v43 }
 0x3dd   : > { %1181 = vmatprep.mubr.bf16.mxu1 %v3277_v26 }
 0x3e4   : > { %2077 = vmatmul.mubr.msk.bf16.gmra.mrb[48].mxu1 %vm351_vm0, %v982_v45 }
 0x3e5   : > { %1191 = vmatprep.mubr.bf16.mxu1 %v3277_v26 }
 0x3ec   : > { %2078 = vmatmul.mubr.msk.bf16.gmra.mrb[52].mxu1 %vm351_vm0, %v983_v48 }
 0x3ed   : > { %1201 = vmatprep.mubr.bf16.mxu1 %v3277_v26 }
 0x3f4   : > { %2079 = vmatmul.mubr.msk.bf16.gmra.mrb[56].mxu1 %vm351_vm0, %v984_v50 }
 0x3f5   : > { %1211 = vmatprep.mubr.bf16.mxu1 %v3277_v26 }
 0x3fc   : > { %2080 = vmatmul.mubr.msk.bf16.gmra.mrb[60].mxu1 %vm351_vm0, %v985_v53 }
 0x3fd   : > { %1221 = vmatprep.mubr.bf16.mxu1 %v3277_v26 }
 0x404   : > { %2081 = vmatmul.mubr.msk.bf16.gmra.mrb[64].mxu1 %vm351_vm0, %v986_v55 }
 0x405   : > { %1945 = vmatprep.mubr.bf16.mxu1 %v3277_v26 }
 0x45f   : > { %v1073_v56 = vpop.f32.mrb[4].mxu1 }
 0x460   : > { %v2630_v57 = vmul.f32 0.17677669, %v1073_v56  ;;  %v1075_v6 = vpop.f32.mrb[5].mxu1 }
 0x461   : > { %v2632_v58 = vmul.f32 0.17677669, %v1075_v6  ;;  %v1077_v7 = vpop.f32.mrb[6].mxu1 }
 0x462   : > { %v2634_v59 = vmul.f32 0.17677669, %v1077_v7  ;;  %v1079_v60 = vpop.f32.mrb[7].mxu1 }
 0x463   : > { %v2636_v61 = vmul.f32 0.17677669, %v1079_v60  ;;  %v1296_v2 = vmax.f32 %v2630_v57, %v2632_v58 }
 0x465   : > { %1297 = vmax.xlane.f32.xlu0 %v1296_v2  ;;  %v1299_v62 = vmax.f32 %v2634_v59, %v2636_v61 }
 0x467   : > { %1300 = vmax.xlane.f32.xlu1 %v1299_v62  ;;  %v1083_v4 = vpop.f32.mrb[8].mxu1 }
 0x468   : > { %v2642_v63 = vmul.f32 0.17677669, %v1083_v4  ;;  %v1085_v0 = vpop.f32.mrb[9].mxu1 }
 0x469   : > { %v2644_v3 = vmul.f32 0.17677669, %v1085_v0  ;;  %v1087_v1 = vpop.f32.mrb[10].mxu1 }
 0x46a   : > { %v2646_v5 = vmul.f32 0.17677669, %v1087_v1  ;;  %v1089_v8 = vpop.f32.mrb[11].mxu1 }
 0x46b   : > { %v2648_v9 = vmul.f32 0.17677669, %v1089_v8  ;;  %v1302_v10 = vmax.f32 %v2642_v63, %v2644_v3 }
 0x46d   : > { %1303 = vmax.xlane.f32.xlu0 %v1302_v10  ;;  %v1305_v11 = vmax.f32 %v2646_v5, %v2648_v9 }
 0x46f   : > { %1306 = vmax.xlane.f32.xlu1 %v1305_v11  ;;  %v1093_v12 = vpop.f32.mrb[12].mxu1 }
 0x470   : > { %v2654_v13 = vmul.f32 0.17677669, %v1093_v12  ;;  %v1095_v16 = vpop.f32.mrb[13].mxu1 }
 0x471   : > { %v2656_v17 = vmul.f32 0.17677669, %v1095_v16  ;;  %v1097_v14 = vpop.f32.mrb[14].mxu1 }
 0x472   : > { %v2658_v18 = vmul.f32 0.17677669, %v1097_v14  ;;  %v1099_v15 = vpop.f32.mrb[15].mxu1 }
 0x473   : > { %v2660_v19 = vmul.f32 0.17677669, %v1099_v15  ;;  %v1308_v20 = vmax.f32 %v2654_v13, %v2656_v17 }
 0x475   : > { %1309 = vmax.xlane.f32.xlu0 %v1308_v20  ;;  %v1311_v21 = vmax.f32 %v2658_v18, %v2660_v19 }
 0x477   : > { %1312 = vmax.xlane.f32.xlu1 %v1311_v21  ;;  %v1103_v22 = vpop.f32.mrb[16].mxu1 }
 0x478   : > { %v2666_v23 = vmul.f32 0.17677669, %v1103_v22  ;;  %v1105_v24 = vpop.f32.mrb[17].mxu1 }
 0x479   : > { %v2668_v25 = vmul.f32 0.17677669, %v1105_v24  ;;  %v1107_v27 = vpop.f32.mrb[18].mxu1 }
 0x47a   : > { %v2670_v28 = vmul.f32 0.17677669, %v1107_v27  ;;  %v1109_v29 = vpop.f32.mrb[19].mxu1 }
 0x47b   : > { %v2672_v30 = vmul.f32 0.17677669, %v1109_v29  ;;  %v1314_v31 = vmax.f32 %v2666_v23, %v2668_v25 }
 0x47d   : > { %1315 = vmax.xlane.f32.xlu0 %v1314_v31  ;;  %v1317_v32 = vmax.f32 %v2670_v28, %v2672_v30 }
 0x47f   : > { %1318 = vmax.xlane.f32.xlu1 %v1317_v32  ;;  %v1113_v33 = vpop.f32.mrb[20].mxu1 }
 0x480   : > { %v2678_v34 = vmul.f32 0.17677669, %v1113_v33  ;;  %v1115_v35 = vpop.f32.mrb[21].mxu1 }
 0x481   : > { %v2680_v36 = vmul.f32 0.17677669, %v1115_v35  ;;  %v1117_v37 = vpop.f32.mrb[22].mxu1 }
 0x482   : > { %v2682_v38 = vmul.f32 0.17677669, %v1117_v37  ;;  %v1119_v39 = vpop.f32.mrb[23].mxu1 }
 0x483   : > { %v2684_v40 = vmul.f32 0.17677669, %v1119_v39  ;;  %v1320_v41 = vmax.f32 %v2678_v34, %v2680_v36 }
 0x485   : > { %1321 = vmax.xlane.f32.xlu0 %v1320_v41  ;;  %v1323_v42 = vmax.f32 %v2682_v38, %v2684_v40 }
 0x487   : > { %1324 = vmax.xlane.f32.xlu1 %v1323_v42  ;;  %v1123_v43 = vpop.f32.mrb[24].mxu1 }
 0x488   : > { %v2690_v44 = vmul.f32 0.17677669, %v1123_v43  ;;  %v1125_v45 = vpop.f32.mrb[25].mxu1 }
 0x489   : > { %v2692_v46 = vmul.f32 0.17677669, %v1125_v45  ;;  %v1127_v47 = vpop.f32.mrb[26].mxu1 }
 0x48a   : > { %v2694_v48 = vmul.f32 0.17677669, %v1127_v47  ;;  %v1129_v49 = vpop.f32.mrb[27].mxu1 }
 0x48b   : > { %v2696_v50 = vmul.f32 0.17677669, %v1129_v49  ;;  %v1326_v51 = vmax.f32 %v2690_v44, %v2692_v46 }
 0x48d   : > { %1327 = vmax.xlane.f32.xlu0 %v1326_v51  ;;  %v1329_v52 = vmax.f32 %v2694_v48, %v2696_v50 }
 0x48f   : > { %1330 = vmax.xlane.f32.xlu1 %v1329_v52  ;;  %v1133_v53 = vpop.f32.mrb[28].mxu1 }
 0x490   : > { %v2702_v54 = vmul.f32 0.17677669, %v1133_v53  ;;  %v1135_v55 = vpop.f32.mrb[29].mxu1 }
 0x491   : > { %v2704_v56 = vmul.f32 0.17677669, %v1135_v55  ;;  %v1137_v6 = vpop.f32.mrb[30].mxu1 }
 0x492   : > { %v2706_v7 = vmul.f32 0.17677669, %v1137_v6  ;;  %v1139_v60 = vpop.f32.mrb[31].mxu1 }
 0x493   : > { %v2708_v2 = vmul.f32 0.17677669, %v1139_v60  ;;  %v1332_v62 = vmax.f32 %v2702_v54, %v2704_v56 }
 0x495   : > { %1333 = vmax.xlane.f32.xlu0 %v1332_v62  ;;  %v1335_v4 = vmax.f32 %v2706_v7, %v2708_v2 }
 0x497   : > { %1336 = vmax.xlane.f32.xlu1 %v1335_v4  ;;  %v1143_v0 = vpop.f32.mrb[32].mxu1 }
 0x498   : > { %v2714_v1 = vmul.f32 0.17677669, %v1143_v0  ;;  %v1145_v8 = vpop.f32.mrb[33].mxu1 }
 0x499   : > { %v2716_v10 = vmul.f32 0.17677669, %v1145_v8  ;;  %v1147_v11 = vpop.f32.mrb[34].mxu1 }
 0x49a   : > { %v2718_v12 = vmul.f32 0.17677669, %v1147_v11  ;;  %v1149_v16 = vpop.f32.mrb[35].mxu1 }
 0x49b   : > { %v2720_v14 = vmul.f32 0.17677669, %v1149_v16  ;;  %v1338_v15 = vmax.f32 %v2714_v1, %v2716_v10 }
 0x49d   : > { %1339 = vmax.xlane.f32.xlu0 %v1338_v15  ;;  %v1341_v20 = vmax.f32 %v2718_v12, %v2720_v14 }
 0x49f   : > { %1342 = vmax.xlane.f32.xlu1 %v1341_v20  ;;  %v1153_v21 = vpop.f32.mrb[36].mxu1 }
 0x4a0   : > { %v2726_v22 = vmul.f32 0.17677669, %v1153_v21  ;;  %v1155_v24 = vpop.f32.mrb[37].mxu1 }
 0x4a1   : > { %v2728_v27 = vmul.f32 0.17677669, %v1155_v24  ;;  %v1157_v29 = vpop.f32.mrb[38].mxu1 }
 0x4a2   : > { %v2730_v31 = vmul.f32 0.17677669, %v1157_v29  ;;  %v1159_v32 = vpop.f32.mrb[39].mxu1 }
 0x4a3   : > { %v2732_v33 = vmul.f32 0.17677669, %v1159_v32  ;;  %v1344_v35 = vmax.f32 %v2726_v22, %v2728_v27 }
 0x4a5   : > { %1345 = vmax.xlane.f32.xlu0 %v1344_v35  ;;  %v1347_v37 = vmax.f32 %v2730_v31, %v2732_v33 }
 0x4a7   : > { %1348 = vmax.xlane.f32.xlu1 %v1347_v37  ;;  %v1163_v39 = vpop.f32.mrb[40].mxu1 }
 0x4a8   : > { %v2738_v41 = vmul.f32 0.17677669, %v1163_v39  ;;  %v1165_v42 = vpop.f32.mrb[41].mxu1 }
 0x4a9   : > { %v2740_v43 = vmul.f32 0.17677669, %v1165_v42  ;;  %v1167_v45 = vpop.f32.mrb[42].mxu1 }
 0x4aa   : > { %v2742_v47 = vmul.f32 0.17677669, %v1167_v45  ;;  %v1169_v49 = vpop.f32.mrb[43].mxu1 }
 0x4ab   : > { %3306 = vst [vmem:[#allocation2_spill] sm:$0xff] %v2740_v43  ;;  %v2744_v51 = vmul.f32 0.17677669, %v1169_v49  ;;  %v1350_v52 = vmax.f32 %v2738_v41, %v2740_v43 }
 0x4ac   : > { %3307 = vst [vmem:[#allocation3_spill] sm:$0xff] %v2742_v47 }
 0x4ad   : > { %3308 = vst [vmem:[#allocation4_spill] sm:$0xff] %v2744_v51  ;;  %1351 = vmax.xlane.f32.xlu0 %v1350_v52  ;;  %v1353_v53 = vmax.f32 %v2742_v47, %v2744_v51 }
 0x4af   : > { %1354 = vmax.xlane.f32.xlu1 %v1353_v53  ;;  %v1173_v55 = vpop.f32.mrb[44].mxu1 }
 0x4b0   : > { %v2750_v6 = vmul.f32 0.17677669, %v1173_v55  ;;  %v1175_v60 = vpop.f32.mrb[45].mxu1 }
 0x4b1   : > { %v2752_v62 = vmul.f32 0.17677669, %v1175_v60  ;;  %v1177_v4 = vpop.f32.mrb[46].mxu1 }
 0x4b2   : > { %3309 = vst [vmem:[#allocation5_spill] sm:$0xff] %v2750_v6  ;;  %v2754_v0 = vmul.f32 0.17677669, %v1177_v4  ;;  %v1179_v8 = vpop.f32.mrb[47].mxu1 }
 0x4b3   : > { %3310 = vst [vmem:[#allocation6_spill] sm:$0xff] %v2752_v62  ;;  %v2756_v11 = vmul.f32 0.17677669, %v1179_v8  ;;  %v1356_v16 = vmax.f32 %v2750_v6, %v2752_v62 }
 0x4b4   : > { %3311 = vst [vmem:[#allocation7_spill] sm:$0xff] %v2754_v0 }
 0x4b5   : > { %3312 = vst [vmem:[#allocation8_spill] sm:$0xff] %v2756_v11  ;;  %1357 = vmax.xlane.f32.xlu0 %v1356_v16  ;;  %v1359_v15 = vmax.f32 %v2754_v0, %v2756_v11 }
 0x4b7   : > { %1360 = vmax.xlane.f32.xlu1 %v1359_v15  ;;  %v1183_v20 = vpop.f32.mrb[48].mxu1 }
 0x4b8   : > { %v2762_v21 = vmul.f32 0.17677669, %v1183_v20  ;;  %v1185_v24 = vpop.f32.mrb[49].mxu1 }
 0x4b9   : > { %v2764_v29 = vmul.f32 0.17677669, %v1185_v24  ;;  %v1187_v32 = vpop.f32.mrb[50].mxu1 }
 0x4ba   : > { %3313 = vst [vmem:[#allocation9_spill] sm:$0xff] %v2762_v21  ;;  %v2766_v35 = vmul.f32 0.17677669, %v1187_v32  ;;  %v1189_v37 = vpop.f32.mrb[51].mxu1 }
 0x4bb   : > { %3314 = vst [vmem:[#allocation10_spill] sm:$0xff] %v2764_v29  ;;  %v2768_v39 = vmul.f32 0.17677669, %v1189_v37  ;;  %v1362_v42 = vmax.f32 %v2762_v21, %v2764_v29 }
 0x4bc   : > { %3315 = vst [vmem:[#allocation11_spill] sm:$0xff] %v2766_v35 }
 0x4bd   : > { %3316 = vst [vmem:[#allocation12_spill] sm:$0xff] %v2768_v39  ;;  %1363 = vmax.xlane.f32.xlu0 %v1362_v42  ;;  %v1365_v45 = vmax.f32 %v2766_v35, %v2768_v39  ;;  %v2167_v39 = vld [vmem:[%s3271_s3 + $0x28] sm:$0xff]  }
 0x4bf   : > { %1366 = vmax.xlane.f32.xlu1 %v1365_v45  ;;  %v1193_v49 = vpop.f32.mrb[52].mxu1 }
 0x4c0   : > { %v1195_v52 = vpop.f32.mrb[53].mxu1 }
 0x4c1   : > { %v1197_v53 = vpop.f32.mrb[54].mxu1 }
 0x4c2   : > { %v2774_v55 = vmul.f32 0.17677669, %v1197_v53  ;;  %v1199_v60 = vpop.f32.mrb[55].mxu1 }
 0x4c3   : > { %v2776_v4 = vmul.f32 0.17677669, %v1199_v60 }
 0x4c4   : > { %3317 = vst [vmem:[#allocation13_spill] sm:$0xff] %v2774_v55 }
 0x4c5   : > { %3318 = vst [vmem:[#allocation14_spill] sm:$0xff] %v2776_v4  ;;  %v1371_v8 = vmax.f32 %v2774_v55, %v2776_v4  ;;  %v2166_v4 = vld [vmem:[%s3271_s3 + $0x20] sm:$0xff]   ;;  %v3319_v55 = vmov 0  }
 0x4c6   : > { %2064 = vmatmul.mubr.msk.bf16.gmra.mrb[20].mxu0 %vm351_vm0, %v2166_v4 }
 0x4c7   : > { %1372 = vmax.xlane.f32.xlu1 %v1371_v8  ;;  %v2780_v16 = vpop.f32.mrb[56].mxu1  ;;  %896 = vmatprep.mubr.bf16.mxu0 %v3319_v55 }
 0x4c8   : > { %v2782_v15 = vpop.f32.mrb[57].mxu1 }
 0x4c9   : > { %v1207_v20 = vpop.f32.mrb[58].mxu1 }
 0x4ca   : > { %v1209_v24 = vpop.f32.mrb[59].mxu1 }
 0x4ce   : > { %2065 = vmatmul.mubr.msk.bf16.gmra.mrb[24].mxu0 %vm351_vm0, %v2167_v39 }
 0x4cf   : > { %v2784_v32 = vpop.f32.mrb[60].mxu1 }
 0x4d0   : > { %v2786_v37 = vpop.f32.mrb[61].mxu1 }
 0x4d1   : > { %v2788_v42 = vpop.f32.mrb[62].mxu1 }
 0x4d2   : > { %v2790_v45 = vpop.f32.mrb[63].mxu1 }
 0x4d7   : > { %v2792_v53 = vpop.f32.mrb[64].mxu1 }
 0x4d8   : > { %v2794_v60 = vpop.f32.mrb[65].mxu1 }
 0x4d9   : > { %v2796_v26 = vpop.f32.mrb[66].mxu1 }
 0x4da   : > { %v2798_v8 = vpop.f32.mrb[67].mxu1 }
 0x4f2   : > { %v1298_v35 = vpop.xlane.xlu0 %1297 }
 0x4f3   : > { %v1392_v29 = vsub.f32 %v2630_v57, %v1298_v35  ;;  %v1393_v21 = vsub.f32 %v2632_v58, %v1298_v35 }
 0x4f4   : > { %v1301_v11 = vpop.xlane.xlu1 %1300 }
 0x4f5   : > { %v1456_v0 = vmul.f32 1.442695, %v1392_v29  ;;  %v1458_v62 = vmul.f32 1.442695, %v1393_v21  ;;  %v1394_v6 = vsub.f32 %v2634_v59, %v1301_v11  ;;  %v1395_v4 = vsub.f32 %v2636_v61, %v1301_v11 }
 0x4f7   : > { %2178 = vpow2.f32 %v1456_v0  ;;  %v1460_v55 = vmul.f32 1.442695, %v1394_v6  ;;  %v1462_v51 = vmul.f32 1.442695, %v1395_v4 }
 0x4f8   : > { %2180 = vpow2.f32 %v1458_v62  ;;  %v2821_v62 = vmul.f32 0.17677669, %v1193_v49 }
 0x4f9   : > { %2182 = vpow2.f32 %v1460_v55 }
 0x4fa   : > { %2184 = vpow2.f32 %v1462_v51  ;;  %v1304_v47 = vpop.xlane.xlu0 %1303 }
 0x4fb   : > { %v1396_v39 = vsub.f32 %v2642_v63, %v1304_v47  ;;  %v1397_v57 = vsub.f32 %v2644_v3, %v1304_v47  ;;  %v2825_v47 = vmul.f32 0.17677669, %v1195_v52  ;;  %v2837_v52 = vmul.f32 0.17677669, %v1209_v24 }
 0x4fc   : > { %v1307_v43 = vpop.xlane.xlu1 %1306 }
 0x4fd   : > { %v1464_v58 = vmul.f32 1.442695, %v1396_v39  ;;  %v1466_v35 = vmul.f32 1.442695, %v1397_v57  ;;  %v1398_v21 = vsub.f32 %v2646_v5, %v1307_v43  ;;  %v1399_v59 = vsub.f32 %v2648_v9, %v1307_v43 }
 0x4fe   : > { %v2835_v57 = vmul.f32 0.17677669, %v1207_v20 }
 0x4ff   : > { %2186 = vpow2.f32 %v1464_v58  ;;  %v1468_v61 = vmul.f32 1.442695, %v1398_v21  ;;  %v1470_v0 = vmul.f32 1.442695, %v1399_v59 }
 0x500   : > { %2188 = vpow2.f32 %v1466_v35  ;;  %v1368_v35 = vmax.f32 %v2821_v62, %v2825_v47  ;;  %v1377_v20 = vmax.f32 %v2835_v57, %v2837_v52 }
 0x501   : > { %v2817_v6 = vpop.eup %2178  ;;  %2190 = vpow2.f32 %v1468_v61  ;;  %v2855_v61 = vmul.f32 0.17677669, %v2782_v15  ;;  %v2866_v15 = vmul.f32 0.17677669, %v2788_v42  ;;  %v2880_v42 = vmul.f32 0.17677669, %v2784_v32 }
 0x502   : > { %v2819_v51 = vpop.eup %2180  ;;  %2192 = vpow2.f32 %v1470_v0  ;;  %v1310_v63 = vpop.xlane.xlu0 %1309 }
 0x503   : > { %v2823_v3 = vpop.eup %2182  ;;  %v1400_v5 = vsub.f32 %v2654_v13, %v1310_v63  ;;  %v1401_v9 = vsub.f32 %v2656_v17, %v1310_v63  ;;  %v1584_v43 = vadd.f32 %v2819_v51, %v2817_v6 }
 0x504   : > { %v2831_v11 = vpop.eup %2184  ;;  %v1313_v29 = vpop.xlane.xlu1 %1312 }
 0x505   : > { %v1472_v55 = vmul.f32 1.442695, %v1400_v5  ;;  %v1474_v4 = vmul.f32 1.442695, %v1401_v9  ;;  %v1402_v49 = vsub.f32 %v2658_v18, %v1313_v29  ;;  %v1403_v39 = vsub.f32 %v2660_v19, %v1313_v29  ;;  %1585 = vadd.xlane.f32.xlu0 %v1584_v43 }
 0x506   : > { %v1587_v13 = vadd.f32 %v2831_v11, %v2823_v3  ;;  %v2848_v19 = vmul.f32 0.17677669, %v2780_v16 }
 0x507   : > { %2194 = vpow2.f32 %v1472_v55  ;;  %v1476_v17 = vmul.f32 1.442695, %v1402_v49  ;;  %v1478_v58 = vmul.f32 1.442695, %v1403_v39 }
 0x508   : > { %2196 = vpow2.f32 %v1474_v4  ;;  %1588 = vadd.xlane.f32.xlu1 %v1587_v13  ;;  %v1374_v13 = vmax.f32 %v2848_v19, %v2855_v61 }
 0x509   : > { %v2843_v21 = vpop.eup %2186  ;;  %2198 = vpow2.f32 %v1476_v17  ;;  %1369 = vmax.xlane.f32.xlu0 %v1368_v35  ;;  %v2887_v35 = vmul.f32 0.17677669, %v2786_v37 }
 0x50a   : > { %v2845_v18 = vpop.eup %2188  ;;  %2200 = vpow2.f32 %v1478_v58  ;;  %v1316_v24 = vpop.xlane.xlu0 %1315 }
 0x50b   : > { %v2852_v59 = vpop.eup %2190  ;;  %v1404_v0 = vsub.f32 %v2666_v23, %v1316_v24  ;;  %v1405_v63 = vsub.f32 %v2668_v25, %v1316_v24  ;;  %v1590_v5 = vadd.f32 %v2845_v18, %v2843_v21  ;;  %v2869_v23 = vmul.f32 0.17677669, %v2790_v45 }
 0x50c   : > { %v2861_v9 = vpop.eup %2192  ;;  %1378 = vmax.xlane.f32.xlu1 %v1377_v20  ;;  %v1319_v16 = vpop.xlane.xlu1 %1318 }
 0x50d   : > { %v1480_v43 = vmul.f32 1.442695, %v1404_v0  ;;  %v1482_v29 = vmul.f32 1.442695, %v1405_v63  ;;  %v1406_v55 = vsub.f32 %v2670_v28, %v1319_v16  ;;  %v1407_v4 = vsub.f32 %v2672_v30, %v1319_v16  ;;  %1591 = vadd.xlane.f32.xlu0 %v1590_v5 }
 0x50e   : > { %v1593_v25 = vadd.f32 %v2861_v9, %v2852_v59  ;;  %v1383_v45 = vmax.f32 %v2866_v15, %v2869_v23  ;;  %v2896_v5 = vmul.f32 0.17677669, %v2796_v26  ;;  %v2899_v16 = vmul.f32 0.17677669, %v2798_v8 }
 0x50f   : > { %2202 = vpow2.f32 %v1480_v43  ;;  %v1484_v49 = vmul.f32 1.442695, %v1406_v55  ;;  %v1486_v39 = vmul.f32 1.442695, %v1407_v4  ;;  %v1380_v26 = vmax.f32 %v2880_v42, %v2887_v35 }
 0x510   : > { %2204 = vpow2.f32 %v1482_v29  ;;  %1594 = vadd.xlane.f32.xlu1 %v1593_v25  ;;  %v2908_v25 = vmul.f32 0.17677669, %v2792_v53  ;;  %v2911_v8 = vmul.f32 0.17677669, %v2794_v60 }
 0x511   : > { %v2875_v28 = vpop.eup %2194  ;;  %2206 = vpow2.f32 %v1484_v49  ;;  %1375 = vmax.xlane.f32.xlu0 %v1374_v13 }
 0x512   : > { %v2877_v30 = vpop.eup %2196  ;;  %2208 = vpow2.f32 %v1486_v39  ;;  %v1322_v17 = vpop.xlane.xlu0 %1321 }
 0x513   : > { %v2884_v58 = vpop.eup %2198  ;;  %v1408_v20 = vsub.f32 %v2678_v34, %v1322_v17  ;;  %v1409_v24 = vsub.f32 %v2680_v36, %v1322_v17  ;;  %v1596_v0 = vadd.f32 %v2877_v30, %v2875_v28 }
 0x514   : > { %v2893_v63 = vpop.eup %2200  ;;  %1384 = vmax.xlane.f32.xlu1 %v1383_v45  ;;  %v1325_v32 = vpop.xlane.xlu1 %1324 }
 0x515   : > { %v1488_v43 = vmul.f32 1.442695, %v1408_v20  ;;  %v1490_v37 = vmul.f32 1.442695, %v1409_v24  ;;  %v1410_v29 = vsub.f32 %v2682_v38, %v1325_v32  ;;  %v1411_v34 = vsub.f32 %v2684_v40, %v1325_v32  ;;  %1597 = vadd.xlane.f32.xlu0 %v1596_v0 }
 0x516   : > { %v1599_v36 = vadd.f32 %v2893_v63, %v2884_v58  ;;  %v1389_v38 = vmax.f32 %v2896_v5, %v2899_v16  ;;  %v1386_v24 = vmax.f32 %v2908_v25, %v2911_v8 }
 0x517   : > { %2210 = vpow2.f32 %v1488_v43  ;;  %v1492_v55 = vmul.f32 1.442695, %v1410_v29  ;;  %v1494_v4 = vmul.f32 1.442695, %v1411_v34 }
 0x518   : > { %2212 = vpow2.f32 %v1490_v37  ;;  %1600 = vadd.xlane.f32.xlu1 %v1599_v36 }
 0x519   : > { %v2915_v40 = vpop.eup %2202  ;;  %2214 = vpow2.f32 %v1492_v55  ;;  %1381 = vmax.xlane.f32.xlu0 %v1380_v26 }
 0x51a   : > { %v2917_v49 = vpop.eup %2204  ;;  %2216 = vpow2.f32 %v1494_v4  ;;  %v1328_v39 = vpop.xlane.xlu0 %1327 }
 0x51b   : > { %v2919_v13 = vpop.eup %2206  ;;  %v1412_v53 = vsub.f32 %v2690_v44, %v1328_v39  ;;  %v1413_v45 = vsub.f32 %v2692_v46, %v1328_v39  ;;  %v1602_v60 = vadd.f32 %v2917_v49, %v2915_v40 }
 0x51c   : > { %v2925_v17 = vpop.eup %2208  ;;  %1390 = vmax.xlane.f32.xlu1 %v1389_v38  ;;  %v1331_v20 = vpop.xlane.xlu1 %1330 }
 0x51d   : > { %v1496_v0 = vmul.f32 1.442695, %v1412_v53  ;;  %v1498_v32 = vmul.f32 1.442695, %v1413_v45  ;;  %v1414_v43 = vsub.f32 %v2694_v48, %v1331_v20  ;;  %v1415_v37 = vsub.f32 %v2696_v50, %v1331_v20  ;;  %1603 = vadd.xlane.f32.xlu0 %v1602_v60 }
 0x51e   : > { %v1605_v44 = vadd.f32 %v2925_v17, %v2919_v13 }
 0x51f   : > { %2218 = vpow2.f32 %v1496_v0  ;;  %v1500_v46 = vmul.f32 1.442695, %v1414_v43  ;;  %v1502_v29 = vmul.f32 1.442695, %v1415_v37 }
 0x520   : > { %2220 = vpow2.f32 %v1498_v32  ;;  %1606 = vadd.xlane.f32.xlu1 %v1605_v44 }
 0x521   : > { %v2933_v34 = vpop.eup %2210  ;;  %2222 = vpow2.f32 %v1500_v46  ;;  %1387 = vmax.xlane.f32.xlu0 %v1386_v24 }
 0x522   : > { %v2935_v36 = vpop.eup %2212  ;;  %2224 = vpow2.f32 %v1502_v29  ;;  %v1334_v55 = vpop.xlane.xlu0 %1333 }
 0x523   : > { %v2937_v48 = vpop.eup %2214  ;;  %v1416_v50 = vsub.f32 %v2702_v54, %v1334_v55  ;;  %v1417_v4 = vsub.f32 %v2704_v56, %v1334_v55  ;;  %v1608_v26 = vadd.f32 %v2935_v36, %v2933_v34 }
 0x524   : > { %v2943_v38 = vpop.eup %2216  ;;  %v1337_v39 = vpop.xlane.xlu1 %1336 }
 0x525   : > { %v1504_v53 = vmul.f32 1.442695, %v1416_v50  ;;  %v1506_v45 = vmul.f32 1.442695, %v1417_v4  ;;  %v1418_v60 = vsub.f32 %v2706_v7, %v1337_v39  ;;  %v1419_v20 = vsub.f32 %v2708_v2, %v1337_v39  ;;  %1609 = vadd.xlane.f32.xlu0 %v1608_v26 }
 0x526   : > { %v1611_v24 = vadd.f32 %v2943_v38, %v2937_v48 }
 0x527   : > { %2226 = vpow2.f32 %v1504_v53  ;;  %v1508_v54 = vmul.f32 1.442695, %v1418_v60  ;;  %v1510_v0 = vmul.f32 1.442695, %v1419_v20 }
 0x528   : > { %2228 = vpow2.f32 %v1506_v45  ;;  %1612 = vadd.xlane.f32.xlu1 %v1611_v24 }
 0x529   : > { %v2949_v56 = vpop.eup %2218  ;;  %2230 = vpow2.f32 %v1508_v54 }
 0x52a   : > { %v2951_v32 = vpop.eup %2220  ;;  %2232 = vpow2.f32 %v1510_v0  ;;  %v1340_v43 = vpop.xlane.xlu0 %1339 }
 0x52b   : > { %v2953_v37 = vpop.eup %2222  ;;  %v1420_v7 = vsub.f32 %v2714_v1, %v1340_v43  ;;  %v1421_v2 = vsub.f32 %v2716_v10, %v1340_v43  ;;  %v1614_v44 = vadd.f32 %v2951_v32, %v2949_v56 }
 0x52c   : > { %v2959_v46 = vpop.eup %2224  ;;  %v1343_v29 = vpop.xlane.xlu1 %1342 }
 0x52d   : > { %v1512_v55 = vmul.f32 1.442695, %v1420_v7  ;;  %v1514_v50 = vmul.f32 1.442695, %v1421_v2  ;;  %v1422_v4 = vsub.f32 %v2718_v12, %v1343_v29  ;;  %v1423_v26 = vsub.f32 %v2720_v14, %v1343_v29  ;;  %1615 = vadd.xlane.f32.xlu0 %v1614_v44 }
 0x52e   : > { %v1617_v39 = vadd.f32 %v2959_v46, %v2953_v37 }
 0x52f   : > { %2234 = vpow2.f32 %v1512_v55  ;;  %v1516_v1 = vmul.f32 1.442695, %v1422_v4  ;;  %v1518_v53 = vmul.f32 1.442695, %v1423_v26 }
 0x530   : > { %2236 = vpow2.f32 %v1514_v50  ;;  %1618 = vadd.xlane.f32.xlu1 %v1617_v39 }
 0x531   : > { %v2965_v10 = vpop.eup %2226  ;;  %2238 = vpow2.f32 %v1516_v1 }
 0x532   : > { %v2967_v45 = vpop.eup %2228  ;;  %2240 = vpow2.f32 %v1518_v53  ;;  %v1346_v60 = vpop.xlane.xlu0 %1345 }
 0x533   : > { %v2969_v20 = vpop.eup %2230  ;;  %v1424_v12 = vsub.f32 %v2726_v22, %v1346_v60  ;;  %v1425_v14 = vsub.f32 %v2728_v27, %v1346_v60  ;;  %v1620_v24 = vadd.f32 %v2967_v45, %v2965_v10 }
 0x534   : > { %v2975_v54 = vpop.eup %2232  ;;  %v1349_v0 = vpop.xlane.xlu1 %1348 }
 0x535   : > { %v1520_v43 = vmul.f32 1.442695, %v1424_v12  ;;  %v1522_v7 = vmul.f32 1.442695, %v1425_v14  ;;  %v1426_v2 = vsub.f32 %v2730_v31, %v1349_v0  ;;  %v1427_v44 = vsub.f32 %v2732_v33, %v1349_v0  ;;  %1621 = vadd.xlane.f32.xlu0 %v1620_v24  ;;  %v3321_v33 = vld [vmem:[#allocation2_spill] sm:$0xff]  ;;  %v3322_v24 = vld [vmem:[#allocation3_spill] sm:$0xff] }
 0x536   : > { %v1623_v29 = vadd.f32 %v2975_v54, %v2969_v20 }
 0x537   : > { %2242 = vpow2.f32 %v1520_v43  ;;  %v1524_v22 = vmul.f32 1.442695, %v1426_v2  ;;  %v1526_v55 = vmul.f32 1.442695, %v1427_v44  ;;  %v3323_v43 = vld [vmem:[#allocation4_spill] sm:$0xff] }
 0x538   : > { %2244 = vpow2.f32 %v1522_v7  ;;  %1624 = vadd.xlane.f32.xlu1 %v1623_v29 }
 0x539   : > { %v2981_v27 = vpop.eup %2234  ;;  %2246 = vpow2.f32 %v1524_v22 }
 0x53a   : > { %3320 = vst [vmem:[#allocation15_spill] sm:$0xff] %v2981_v27  ;;  %v2983_v50 = vpop.eup %2236  ;;  %2248 = vpow2.f32 %v1526_v55  ;;  %v1352_v4 = vpop.xlane.xlu0 %1351 }
 0x53b   : > { %v2985_v26 = vpop.eup %2238  ;;  %v1428_v31 = vsub.f32 %v2738_v41, %v1352_v4  ;;  %v1429_v39 = vsub.f32 %v3321_v33, %v1352_v4  ;;  %v1626_v1 = vadd.f32 %v2983_v50, %v2981_v27 }
 0x53c   : > { %v2991_v53 = vpop.eup %2240  ;;  %v1355_v60 = vpop.xlane.xlu1 %1354 }
 0x53d   : > { %v1528_v12 = vmul.f32 1.442695, %v1428_v31  ;;  %v1530_v14 = vmul.f32 1.442695, %v1429_v39  ;;  %v1430_v0 = vsub.f32 %v3322_v24, %v1355_v60  ;;  %v1431_v7 = vsub.f32 %v3323_v43, %v1355_v60  ;;  %1627 = vadd.xlane.f32.xlu0 %v1626_v1  ;;  %v3327_v31 = vld [vmem:[#allocation5_spill] sm:$0xff]  ;;  %v3328_v39 = vld [vmem:[#allocation6_spill] sm:$0xff] }
 0x53e   : > { %v1629_v2 = vadd.f32 %v2991_v53, %v2985_v26  ;;  %v3330_v43 = vld [vmem:[#allocation7_spill] sm:$0xff] }
 0x53f   : > { %2250 = vpow2.f32 %v1528_v12  ;;  %v1532_v41 = vmul.f32 1.442695, %v1430_v0  ;;  %v1534_v44 = vmul.f32 1.442695, %v1431_v7 }
 0x540   : > { %2252 = vpow2.f32 %v1530_v14  ;;  %1630 = vadd.xlane.f32.xlu1 %v1629_v2  ;;  %v3331_v2 = vld [vmem:[#allocation8_spill] sm:$0xff] }
 0x541   : > { %v2997_v29 = vpop.eup %2242  ;;  %2254 = vpow2.f32 %v1532_v41 }
 0x542   : > { %3324 = vst [vmem:[#allocation2_spill] sm:$0xff] %v2997_v29  ;;  %v2999_v22 = vpop.eup %2244  ;;  %2256 = vpow2.f32 %v1534_v44  ;;  %v1358_v55 = vpop.xlane.xlu0 %1357 }
 0x543   : > { %3325 = vst [vmem:[#allocation3_spill] sm:$0xff] %v2999_v22  ;;  %v3001_v4 = vpop.eup %2246  ;;  %v1432_v33 = vsub.f32 %v3327_v31, %v1358_v55  ;;  %v1433_v1 = vsub.f32 %v3328_v39, %v1358_v55  ;;  %v1632_v60 = vadd.f32 %v2999_v22, %v2997_v29  ;;  %v3334_v29 = vld [vmem:[#allocation11_spill] sm:$0xff] }
 0x544   : > { %3326 = vst [vmem:[#allocation4_spill] sm:$0xff] %v3001_v4  ;;  %v3007_v12 = vpop.eup %2248  ;;  %v1361_v14 = vpop.xlane.xlu1 %1360 }
 0x545   : > { %3329 = vst [vmem:[#allocation5_spill] sm:$0xff] %v3007_v12  ;;  %v1536_v24 = vmul.f32 1.442695, %v1432_v33  ;;  %v1538_v0 = vmul.f32 1.442695, %v1433_v1  ;;  %v1434_v7 = vsub.f32 %v3330_v43, %v1361_v14  ;;  %v1435_v41 = vsub.f32 %v3331_v2, %v1361_v14  ;;  %1633 = vadd.xlane.f32.xlu0 %v1632_v60  ;;  %v3332_v43 = vld [vmem:[#allocation9_spill] sm:$0xff] }
 0x546   : > { %v1635_v44 = vadd.f32 %v3007_v12, %v3001_v4  ;;  %v3333_v60 = vld [vmem:[#allocation10_spill] sm:$0xff]  ;;  %v3335_v4 = vld [vmem:[#allocation12_spill] sm:$0xff] }
 0x547   : > { %2258 = vpow2.f32 %v1536_v24  ;;  %v1540_v31 = vmul.f32 1.442695, %v1434_v7  ;;  %v1542_v27 = vmul.f32 1.442695, %v1435_v41 }
 0x548   : > { %2260 = vpow2.f32 %v1538_v0  ;;  %1636 = vadd.xlane.f32.xlu1 %v1635_v44 }
 0x549   : > { %v3013_v55 = vpop.eup %2250  ;;  %2262 = vpow2.f32 %v1540_v31 }
 0x54a   : > { %v3015_v39 = vpop.eup %2252  ;;  %2264 = vpow2.f32 %v1542_v27  ;;  %v1364_v33 = vpop.xlane.xlu0 %1363 }
 0x54b   : > { %v3017_v1 = vpop.eup %2254  ;;  %v1436_v14 = vsub.f32 %v3332_v43, %v1364_v33  ;;  %v1437_v2 = vsub.f32 %v3333_v60, %v1364_v33  ;;  %v1638_v24 = vadd.f32 %v3015_v39, %v3013_v55 }
 0x54c   : > { %v3023_v7 = vpop.eup %2256  ;;  %v1367_v0 = vpop.xlane.xlu1 %1366 }
 0x54d   : > { %v1544_v41 = vmul.f32 1.442695, %v1436_v14  ;;  %v1546_v44 = vmul.f32 1.442695, %v1437_v2  ;;  %v1438_v31 = vsub.f32 %v3334_v29, %v1367_v0  ;;  %v1439_v12 = vsub.f32 %v3335_v4, %v1367_v0  ;;  %1639 = vadd.xlane.f32.xlu0 %v1638_v24  ;;  %v3339_v24 = vld [vmem:[#allocation13_spill] sm:$0xff] }
 0x54e   : > { %v1641_v27 = vadd.f32 %v3023_v7, %v3017_v1 }
 0x54f   : > { %2266 = vpow2.f32 %v1544_v41  ;;  %v1548_v43 = vmul.f32 1.442695, %v1438_v31  ;;  %v1550_v22 = vmul.f32 1.442695, %v1439_v12  ;;  %v3340_v41 = vld [vmem:[#allocation14_spill] sm:$0xff] }
 0x550   : > { %2268 = vpow2.f32 %v1546_v44  ;;  %1642 = vadd.xlane.f32.xlu1 %v1641_v27 }
 0x551   : > { %v3029_v33 = vpop.eup %2258  ;;  %2270 = vpow2.f32 %v1548_v43 }
 0x552   : > { %3336 = vst [vmem:[#allocation6_spill] sm:$0xff] %v3029_v33  ;;  %v3031_v60 = vpop.eup %2260  ;;  %2272 = vpow2.f32 %v1550_v22 }
 0x553   : > { %3337 = vst [vmem:[#allocation7_spill] sm:$0xff] %v3031_v60  ;;  %v3033_v14 = vpop.eup %2262  ;;  %v1644_v29 = vadd.f32 %v3031_v60, %v3029_v33 }
 0x554   : > { %3338 = vst [vmem:[#allocation8_spill] sm:$0xff] %v3033_v14  ;;  %v3037_v4 = vpop.eup %2264  ;;  %v1373_v2 = vpop.xlane.xlu1 %1372 }
 0x555   : > { %v1442_v0 = vsub.f32 %v3339_v24, %v1373_v2  ;;  %v1443_v12 = vsub.f32 %v3340_v41, %v1373_v2  ;;  %1645 = vadd.xlane.f32.xlu0 %v1644_v29  ;;  %v1647_v44 = vadd.f32 %v3037_v4, %v3033_v14 }
 0x557   : > { %v1556_v31 = vmul.f32 1.442695, %v1442_v0  ;;  %v1558_v27 = vmul.f32 1.442695, %v1443_v12  ;;  %1648 = vadd.xlane.f32.xlu1 %v1647_v44 }
 0x559   : > { %v3043_v22 = vpop.eup %2266  ;;  %2274 = vpow2.f32 %v1556_v31 }
 0x55a   : > { %3341 = vst [vmem:[#allocation9_spill] sm:$0xff] %v3043_v22  ;;  %v3045_v43 = vpop.eup %2268  ;;  %2276 = vpow2.f32 %v1558_v27 }
 0x55b   : > { %3342 = vst [vmem:[#allocation10_spill] sm:$0xff] %v3045_v43  ;;  %v3047_v33 = vpop.eup %2270  ;;  %v1650_v24 = vadd.f32 %v3045_v43, %v3043_v22 }
 0x55c   : > { %3343 = vst [vmem:[#allocation11_spill] sm:$0xff] %v3047_v33  ;;  %v3051_v60 = vpop.eup %2272 }
 0x55d   : > { %3344 = vst [vmem:[#allocation12_spill] sm:$0xff] %v3051_v60  ;;  %1651 = vadd.xlane.f32.xlu0 %v1650_v24  ;;  %v1653_v29 = vadd.f32 %v3051_v60, %v3047_v33 }
 0x55f   : > { %1654 = vadd.xlane.f32.xlu1 %v1653_v29 }
 0x563   : > { %v3055_v2 = vpop.eup %2274 }
 0x564   : > { %3345 = vst [vmem:[#allocation13_spill] sm:$0xff] %v3055_v2  ;;  %v3057_v0 = vpop.eup %2276 }
 0x565   : > { %3346 = vst [vmem:[#allocation14_spill] sm:$0xff] %v3057_v0  ;;  %v1659_v41 = vadd.f32 %v3057_v0, %v3055_v2 }
 0x567   : > { %1660 = vadd.xlane.f32.xlu1 %v1659_v41 }
 0x592   : > { %v1586_v12 = vpop.xlane.xlu0 %1585 }
 0x593   : > { %2278 = vrcp.f32 %v1586_v12 }
 0x595   : > { %v1589_v44 = vpop.xlane.xlu1 %1588 }
 0x596   : > { %2280 = vrcp.f32 %v1589_v44  ;;  %v1370_v31 = vpop.xlane.xlu0 %1369 }
 0x597   : > { %v1440_v27 = vsub.f32 %v2821_v62, %v1370_v31  ;;  %v1441_v24 = vsub.f32 %v2825_v47, %v1370_v31 }
 0x599   : > { %v1552_v22 = vmul.f32 1.442695, %v1440_v27  ;;  %v1554_v33 = vmul.f32 1.442695, %v1441_v24  ;;  %v1379_v29 = vpop.xlane.xlu1 %1378 }
 0x59a   : > { %v1446_v60 = vsub.f32 %v2835_v57, %v1379_v29  ;;  %v1447_v43 = vsub.f32 %v2837_v52, %v1379_v29  ;;  %v1592_v14 = vpop.xlane.xlu0 %1591 }
 0x59b   : > { %2282 = vpow2.f32 %v1552_v22 }
 0x59c   : > { %2284 = vpow2.f32 %v1554_v33  ;;  %v1564_v41 = vmul.f32 1.442695, %v1446_v60  ;;  %v1566_v2 = vmul.f32 1.442695, %v1447_v43 }
 0x59d   : > { %v2279_v12 = vpop.eup %2278  ;;  %2286 = vrcp.f32 %v1592_v14  ;;  %v1595_v44 = vpop.xlane.xlu1 %1594 }
 0x59e   : > { %2288 = vpow2.f32 %v1564_v41  ;;  %v1376_v0 = vpop.xlane.xlu0 %1375  ;;  %v1682_v57 = vmul.f32 %v2279_v12, %v2819_v51  ;;  %v1681_v52 = vmul.f32 %v2279_v12, %v2817_v6 }
 0x59f   : > { %2290 = vpow2.f32 %v1566_v2  ;;  %v1444_v62 = vsub.f32 %v2848_v19, %v1376_v0  ;;  %v1445_v47 = vsub.f32 %v2855_v61, %v1376_v0 }
 0x5a0   : > { %v2281_v31 = vpop.eup %2280  ;;  %2292 = vrcp.f32 %v1595_v44 }
 0x5a1   : > { %v1560_v22 = vmul.f32 1.442695, %v1444_v62  ;;  %v1562_v33 = vmul.f32 1.442695, %v1445_v47  ;;  %v1385_v60 = vpop.xlane.xlu1 %1384  ;;  %v1685_v43 = vmul.f32 %v2281_v31, %v2831_v11  ;;  %v1684_v14 = vmul.f32 %v2281_v31, %v2823_v3 }
 0x5a2   : > { %v1450_v27 = vsub.f32 %v2866_v15, %v1385_v60  ;;  %v1451_v2 = vsub.f32 %v2869_v23, %v1385_v60  ;;  %v1598_v19 = vpop.xlane.xlu0 %1597 }
 0x5a3   : > { %2294 = vpow2.f32 %v1560_v22  ;;  %v1781_v61 = vpack.c.bf16 %v1685_v43, %v1682_v57  ;;  %v1780_v0 = vpack.c.bf16 %v1684_v14, %v1681_v52 }
 0x5a4   : > { %2296 = vpow2.f32 %v1562_v33  ;;  %v1572_v24 = vmul.f32 1.442695, %v1450_v27  ;;  %v1574_v51 = vmul.f32 1.442695, %v1451_v2 }
 0x5a5   : > { %v3073_v29 = vpop.eup %2282  ;;  %2298 = vrcp.f32 %v1598_v19  ;;  %v1601_v6 = vpop.xlane.xlu1 %1600  ;;  %1812 = vmatprep.subr.bf16.mxu0 %v1781_v61 }
 0x5a6   : > { %v3075_v41 = vpop.eup %2284  ;;  %2300 = vpow2.f32 %v1572_v24  ;;  %1813 = vmatpush1.bf16.xpose.msra.mxu0 %v1780_v0  ;;  %v1382_v3 = vpop.xlane.xlu0 %1381 }
 0x5a7   : > { %v2287_v11 = vpop.eup %2286  ;;  %2302 = vpow2.f32 %v1574_v51  ;;  %v1448_v15 = vsub.f32 %v2880_v42, %v1382_v3  ;;  %v1449_v23 = vsub.f32 %v2887_v35, %v1382_v3  ;;  %v1656_v12 = vadd.f32 %v3075_v41, %v3073_v29 }
 0x5a8   : > { %v3081_v44 = vpop.eup %2288  ;;  %2304 = vrcp.f32 %v1601_v6  ;;  %v1688_v35 = vmul.f32 %v2287_v11, %v2845_v18  ;;  %v1687_v60 = vmul.f32 %v2287_v11, %v2843_v21 }
 0x5a9   : > { %v3083_v62 = vpop.eup %2290  ;;  %v1568_v47 = vmul.f32 1.442695, %v1448_v15  ;;  %v1570_v31 = vmul.f32 1.442695, %v1449_v23  ;;  %v3085_v57 = vpop.xlane.xlu1 %1390  ;;  %1657 = vadd.xlane.f32.xlu0 %v1656_v12 }
 0x5aa   : > { %v2293_v52 = vpop.eup %2292  ;;  %v1665_v22 = vadd.f32 %v3083_v62, %v3081_v44  ;;  %v1604_v42 = vpop.xlane.xlu0 %1603 }
 0x5ab   : > { %2306 = vpow2.f32 %v1568_v47  ;;  %v1691_v33 = vmul.f32 %v2293_v52, %v2861_v9  ;;  %v1690_v43 = vmul.f32 %v2293_v52, %v2852_v59 }
 0x5ac   : > { %2308 = vpow2.f32 %v1570_v31  ;;  %1666 = vadd.xlane.f32.xlu1 %v1665_v22 }
 0x5ad   : > { %v3093_v14 = vpop.eup %2294  ;;  %v1607_v27 = vpop.xlane.xlu1 %1606  ;;  %v1783_v2 = vpack.c.bf16 %v1691_v33, %v1688_v35  ;;  %v1782_v19 = vpack.c.bf16 %v1690_v43, %v1687_v60  ;;  %2310 = vrcp.f32 %v1604_v42 }
 0x5ae   : > { %v3095_v61 = vpop.eup %2296  ;;  %v1388_v0 = vpop.xlane.xlu0 %1387  ;;  %2312 = vrcp.f32 %v1607_v27 }
 0x5af   : > { %v2299_v24 = vpop.eup %2298  ;;  %1814 = vmatprep.subr.bf16.mxu0 %v1783_v2  ;;  %v1452_v18 = vsub.f32 %v2908_v25, %v1388_v0  ;;  %v1453_v9 = vsub.f32 %v2911_v8, %v1388_v0  ;;  %v1662_v21 = vadd.f32 %v3095_v61, %v3093_v14 }
 0x5b0   : > { %v3101_v59 = vpop.eup %2300  ;;  %1815 = vmatpush1.bf16.xpose.msra.mxu0 %v1782_v19  ;;  %v1694_v25 = vmul.f32 %v2299_v24, %v2877_v30  ;;  %v1693_v12 = vmul.f32 %v2299_v24, %v2875_v28 }
 0x5b1   : > { %v3103_v51 = vpop.eup %2302  ;;  %v1576_v6 = vmul.f32 1.442695, %v1452_v18  ;;  %v1578_v3 = vmul.f32 1.442695, %v1453_v9  ;;  %1663 = vadd.xlane.f32.xlu0 %v1662_v21 }
 0x5b2   : > { %v2305_v11 = vpop.eup %2304  ;;  %v1671_v15 = vadd.f32 %v3103_v51, %v3101_v59  ;;  %v1610_v23 = vpop.xlane.xlu0 %1609 }
 0x5b3   : > { %2314 = vpow2.f32 %v1576_v6  ;;  %v1697_v8 = vmul.f32 %v2305_v11, %v2893_v63  ;;  %v1696_v47 = vmul.f32 %v2305_v11, %v2884_v58 }
 0x5b4   : > { %2316 = vpow2.f32 %v1578_v3  ;;  %1672 = vadd.xlane.f32.xlu1 %v1671_v15  ;;  %v703_v3 = vld [vmem:[%s3272_s4 + $0x48] sm:$0xff]  ;;  %v3134_v15 = vpop.f32.mrb[20].mxu0 }
 0x5b5   : > { %v3111_v31 = vpop.eup %2306  ;;  %2318 = vrcp.f32 %v1610_v23  ;;  %v1613_v52 = vpop.xlane.xlu1 %1612  ;;  %v1785_v22 = vpack.c.bf16 %v1697_v8, %v1694_v25  ;;  %v1784_v42 = vpack.c.bf16 %v1696_v47, %v1693_v12 }
 0x5b6   : > { %v3113_v35 = vpop.eup %2308  ;;  %2320 = vrcp.f32 %v1613_v52  ;;  %v3136_v25 = vpop.f32.mrb[21].mxu0 }
 0x5b7   : > { %1816 = vmatprep.subr.bf16.mxu0 %v1785_v22  ;;  %v1668_v30 = vadd.f32 %v3113_v35, %v3111_v31  ;;  %v2311_v63 = vpop.eup %2310  ;;  %v3138_v12 = vpop.f32.mrb[22].mxu0 }
 0x5b8   : > { %1817 = vmatpush1.bf16.xpose.msra.mxu0 %v1784_v42  ;;  %v2313_v28 = vpop.eup %2312  ;;  %v1700_v33 = vmul.f32 %v2311_v63, %v2917_v49  ;;  %v1699_v43 = vmul.f32 %v2311_v63, %v2915_v40 }
 0x5b9   : > { %1669 = vadd.xlane.f32.xlu0 %v1668_v30  ;;  %v1703_v60 = vmul.f32 %v2313_v28, %v2925_v17  ;;  %v1702_v27 = vmul.f32 %v2313_v28, %v2919_v13 }
 0x5ba   : > { %v1616_v58 = vpop.xlane.xlu0 %1615 }
 0x5bb   : > { %2322 = vrcp.f32 %v1616_v58  ;;  %v1787_v0 = vpack.c.bf16 %v1703_v60, %v1700_v33  ;;  %v1786_v24 = vpack.c.bf16 %v1702_v27, %v1699_v43  ;;  %v1454_v43 = vsub.f32 %v2896_v5, %v3085_v57 }
 0x5bd   : > { %v3121_v2 = vpop.eup %2314  ;;  %v1619_v19 = vpop.xlane.xlu1 %1618  ;;  %1818 = vmatprep.subr.bf16.mxu0 %v1787_v0  ;;  %v1580_v5 = vmul.f32 1.442695, %v1454_v43 }
 0x5be   : > { %v3123_v18 = vpop.eup %2316  ;;  %2324 = vrcp.f32 %v1619_v19 }
 0x5bf   : > { %v2319_v9 = vpop.eup %2318  ;;  %v1674_v49 = vadd.f32 %v3123_v18, %v3121_v2 }
 0x5c0   : > { %v2321_v21 = vpop.eup %2320  ;;  %1819 = vmatpush1.bf16.xpose.msra.mxu0 %v1786_v24  ;;  %v1706_v40 = vmul.f32 %v2319_v9, %v2935_v36  ;;  %v1705_v11 = vmul.f32 %v2319_v9, %v2933_v34  ;;  %v702_v9 = vld [vmem:[%s3272_s4 + $0x40] sm:$0xff] }
 0x5c1   : > { %1675 = vadd.xlane.f32.xlu0 %v1674_v49  ;;  %v1709_v13 = vmul.f32 %v2321_v21, %v2943_v38  ;;  %v1708_v17 = vmul.f32 %v2321_v21, %v2937_v48  ;;  %v3140_v48 = vpop.f32.mrb[23].mxu0 }
 0x5c2   : > { %v1622_v6 = vpop.xlane.xlu0 %1621 }
 0x5c3   : > { %v1789_v23 = vpack.c.bf16 %v1709_v13, %v1706_v40  ;;  %2326 = vrcp.f32 %v1622_v6  ;;  %v1788_v8 = vpack.c.bf16 %v1708_v17, %v1705_v11  ;;  %v3163_v40 = vpop.f32.mrb[24].mxu0  ;;  %v3347_v17 = vld [vmem:[#allocation15_spill] sm:$0xff] }
 0x5c5   : > { %753 = vperm.xlu1 %2160, %v703_v3   ;;  %v1625_v36 = vpop.xlane.xlu1 %1624  ;;  %1820 = vmatprep.subr.bf16.mxu0 %v1789_v23  ;;  %v2323_v38 = vpop.eup %2322 }
 0x5c6   : > { %2328 = vrcp.f32 %v1625_v36  ;;  %v1712_v34 = vmul.f32 %v2323_v38, %v2951_v32  ;;  %v1711_v30 = vmul.f32 %v2323_v38, %v2949_v56  ;;  %v1455_v56 = vsub.f32 %v2899_v16, %v3085_v57  ;;  %v705_v16 = vld [vmem:[%s3272_s4 + $0x58] sm:$0xff]  ;;  %v3166_v3 = vpop.f32.mrb[25].mxu0 }
 0x5c7   : > { %v3168_v23 = vpop.f32.mrb[26].mxu0 }
 0x5c8   : > { %v2325_v47 = vpop.eup %2324  ;;  %1821 = vmatpush1.bf16.xpose.msra.mxu0 %v1788_v8 }
 0x5c9   : > { %v1715_v52 = vmul.f32 %v2325_v47, %v2959_v46  ;;  %v1714_v22 = vmul.f32 %v2325_v47, %v2953_v37  ;;  %v1876_v47 = vld [vmem:[%s3274_s6 + $0x18] sm:$0xff] }
 0x5ca   : > { %v1628_v42 = vpop.xlane.xlu0 %1627 }
 0x5cb   : > { %v1791_v63 = vpack.c.bf16 %v1715_v52, %v1712_v34  ;;  %2330 = vrcp.f32 %v1628_v42  ;;  %v1790_v28 = vpack.c.bf16 %v1714_v22, %v1711_v30  ;;  %v3348_v34 = vld [vmem:[#allocation3_spill] sm:$0xff]  ;;  %v3349_v22 = vld [vmem:[#allocation5_spill] sm:$0xff]  ;;  %v3350_v30 = vld [vmem:[#allocation4_spill] sm:$0xff] }
 0x5cd   : > { %v1631_v58 = vpop.xlane.xlu1 %1630  ;;  %1822 = vmatprep.subr.bf16.mxu0 %v1791_v63  ;;  %v2327_v33 = vpop.eup %2326 }
 0x5ce   : > { %2332 = vrcp.f32 %v1631_v58  ;;  %v1718_v32 = vmul.f32 %v2327_v33, %v2967_v45  ;;  %v1717_v19 = vmul.f32 %v2327_v33, %v2965_v10  ;;  %v3351_v58 = vld [vmem:[#allocation2_spill] sm:$0xff] }
 0x5d0   : > { %v2329_v60 = vpop.eup %2328  ;;  %1823 = vmatpush1.bf16.xpose.msra.mxu0 %v1790_v28 }
 0x5d1   : > { %v1721_v46 = vmul.f32 %v2329_v60, %v2975_v54  ;;  %v1720_v37 = vmul.f32 %v2329_v60, %v2969_v20  ;;  %v1582_v54 = vmul.f32 1.442695, %v1455_v56 }
 0x5d2   : > { %v1634_v27 = vpop.xlane.xlu0 %1633 }
 0x5d3   : > { %v1793_v0 = vpack.c.bf16 %v1721_v46, %v1718_v32  ;;  %2334 = vrcp.f32 %v1634_v27  ;;  %v1792_v24 = vpack.c.bf16 %v1720_v37, %v1717_v19 }
 0x5d5   : > { %v1637_v49 = vpop.xlane.xlu1 %1636  ;;  %1824 = vmatprep.subr.bf16.mxu0 %v1793_v0  ;;  %v2331_v45 = vpop.eup %2330 }
 0x5d6   : > { %2336 = vrcp.f32 %v1637_v49  ;;  %v1724_v10 = vmul.f32 %v2331_v45, %v2983_v50  ;;  %v1723_v6 = vmul.f32 %v2331_v45, %v3347_v17  ;;  %v1874_v50 = vld [vmem:[%s3274_s6 + $0x8] sm:$0xff] }
 0x5d7   : > { %748 = vperm.xlu0 %2161, %v702_v9   ;;  %2338 = vpow2.f32 %v1580_v5 }
 0x5d8   : > { %v2333_v20 = vpop.eup %2332  ;;  %1825 = vmatpush1.bf16.xpose.msra.mxu0 %v1792_v24  ;;  %2340 = vpow2.f32 %v1582_v54 }
 0x5d9   : > { %v1727_v57 = vmul.f32 %v2333_v20, %v2991_v53  ;;  %v1726_v21 = vmul.f32 %v2333_v20, %v2985_v26  ;;  %v3173_v53 = vpop.f32.mrb[27].mxu0 }
 0x5da   : > { %v1640_v13 = vpop.xlane.xlu0 %1639 }
 0x5db   : > { %763 = vperm.xlu0 %2161, %v705_v16   ;;  %v1795_v11 = vpack.c.bf16 %v1727_v57, %v1724_v10  ;;  %2342 = vrcp.f32 %v1640_v13  ;;  %v1794_v8 = vpack.c.bf16 %v1726_v21, %v1723_v6  ;;  %v3352_v57 = vld [vmem:[#allocation7_spill] sm:$0xff]  ;;  %v3353_v13 = vld [vmem:[#allocation8_spill] sm:$0xff] }
 0x5dd   : > { %v1643_v26 = vpop.xlane.xlu1 %1642  ;;  %1826 = vmatprep.subr.bf16.mxu0 %v1795_v11  ;;  %v2335_v36 = vpop.eup %2334 }
 0x5de   : > { %2344 = vrcp.f32 %v1643_v26  ;;  %v1730_v52 = vmul.f32 %v2335_v36, %v3348_v34  ;;  %v1729_v33 = vmul.f32 %v2335_v36, %v3351_v58  ;;  %v3355_v26 = vld [vmem:[#allocation10_spill] sm:$0xff]  ;;  %v3357_v34 = vld [vmem:[#allocation11_spill] sm:$0xff] }
 0x5df   : > { %1884 = vperm.xlu0 %2161, %v1874_v50   ;;  %v704_v50 = vld [vmem:[%s3272_s4 + $0x50] sm:$0xff] }
 0x5e0   : > { %v2337_v38 = vpop.eup %2336  ;;  %1827 = vmatpush1.bf16.xpose.msra.mxu0 %v1794_v8 }
 0x5e1   : > { %v1733_v42 = vmul.f32 %v2337_v38, %v3349_v22  ;;  %v1732_v63 = vmul.f32 %v2337_v38, %v3350_v30  ;;  %v3182_v60 = vpop.eup %2338  ;;  %v3356_v38 = vld [vmem:[#allocation12_spill] sm:$0xff]  ;;  %v3358_v22 = vld [vmem:[#allocation9_spill] sm:$0xff]  ;;  %v1873_v30 = vld [vmem:[%s3274_s6] sm:$0xff] }
 0x5e2   : > { %v1646_v28 = vpop.xlane.xlu0 %1645  ;;  %v3184_v32 = vpop.eup %2340 }
 0x5e3   : > { %1894 = vperm.xlu0 %2161, %v1876_v47   ;;  %2346 = vrcp.f32 %v1646_v28  ;;  %v1797_v43 = vpack.c.bf16 %v1733_v42, %v1730_v52  ;;  %v1796_v37 = vpack.c.bf16 %v1732_v63, %v1729_v33  ;;  %v1677_v27 = vadd.f32 %v3184_v32, %v3182_v60  ;;  %v1875_v28 = vld [vmem:[%s3274_s6 + $0x10] sm:$0xff] }
 0x5e4   : > { %v1649_v46 = vpop.xlane.xlu1 %1648 }
 0x5e5   : > { %2348 = vrcp.f32 %v1649_v46  ;;  %1828 = vmatprep.subr.bf16.mxu0 %v1797_v43  ;;  %v2343_v56 = vpop.eup %2342 }
 0x5e6   : > { %v1736_v0 = vmul.f32 %v2343_v56, %v3015_v39  ;;  %v1735_v49 = vmul.f32 %v2343_v56, %v3013_v55 }
 0x5e8   : > { %v2345_v19 = vpop.eup %2344  ;;  %1829 = vmatpush1.bf16.xpose.msra.mxu0 %v1796_v37 }
 0x5e9   : > { %1678 = vadd.xlane.f32.xlu1 %v1677_v27  ;;  %v1739_v24 = vmul.f32 %v2345_v19, %v3023_v7  ;;  %v1738_v9 = vmul.f32 %v2345_v19, %v3017_v1  ;;  %v3354_v1 = vld [vmem:[#allocation6_spill] sm:$0xff] }
 0x5ea   : > { %v1652_v5 = vpop.xlane.xlu0 %1651 }
 0x5eb   : > { %2350 = vrcp.f32 %v1652_v5  ;;  %v1799_v45 = vpack.c.bf16 %v1739_v24, %v1736_v0  ;;  %v1798_v20 = vpack.c.bf16 %v1738_v9, %v1735_v49  ;;  %v3359_v0 = vld [vmem:[#allocation14_spill] sm:$0xff]  ;;  %v3360_v5 = vld [vmem:[#allocation13_spill] sm:$0xff] }
 0x5ec   : > { %v1655_v54 = vpop.xlane.xlu1 %1654 }
 0x5ed   : > { %v2347_v16 = vpop.eup %2346  ;;  %2352 = vrcp.f32 %v1655_v54  ;;  %1830 = vmatprep.subr.bf16.mxu0 %v1799_v45 }
 0x5ee   : > { %v1742_v21 = vmul.f32 %v2347_v16, %v3352_v57  ;;  %v1741_v6 = vmul.f32 %v2347_v16, %v3354_v1 }
 0x5ef   : > { %v2349_v10 = vpop.eup %2348 }
 0x5f0   : > { %1831 = vmatpush1.bf16.xpose.msra.mxu0 %v1798_v20  ;;  %v1745_v39 = vmul.f32 %v2349_v10, %v3037_v4  ;;  %v1744_v7 = vmul.f32 %v2349_v10, %v3353_v13 }
 0x5f2   : > { %v1801_v17 = vpack.c.bf16 %v1745_v39, %v1742_v21  ;;  %v1800_v55 = vpack.c.bf16 %v1744_v7, %v1741_v6 }
 0x5f4   : > { %1832 = vmatprep.subr.bf16.mxu0 %v1801_v17  ;;  %v1661_v58 = vpop.xlane.xlu1 %1660 }
 0x5f5   : > { %v2351_v11 = vpop.eup %2350  ;;  %2354 = vrcp.f32 %v1661_v58 }
 0x5f6   : > { %v1748_v36 = vmul.f32 %v2351_v11, %v3355_v26  ;;  %v1747_v42 = vmul.f32 %v2351_v11, %v3358_v22 }
 0x5f7   : > { %v2353_v8 = vpop.eup %2352 }
 0x5f8   : > { %1833 = vmatpush1.bf16.xpose.msra.mxu0 %v1800_v55  ;;  %v1751_v47 = vmul.f32 %v2353_v8, %v3356_v38  ;;  %v1750_v4 = vmul.f32 %v2353_v8, %v3357_v34 }
 0x5fa   : > { %758 = vperm.xlu1 %2160, %v704_v50   ;;  %v1803_v52 = vpack.c.bf16 %v1751_v47, %v1748_v36  ;;  %v1802_v63 = vpack.c.bf16 %v1750_v4, %v1747_v42 }
 0x5fc   : > { %1834 = vmatprep.subr.bf16.mxu0 %v1803_v52 }
 0x5fe   : > { %1879 = vperm.xlu1 %2160, %v1873_v30  }
 0x5ff   : > { %v2355_v37 = vpop.eup %2354 }
 0x600   : > { %1835 = vmatpush1.bf16.xpose.msra.mxu0 %v1802_v63  ;;  %v1757_v24 = vmul.f32 %v2355_v37, %v3359_v0  ;;  %v1756_v49 = vmul.f32 %v2355_v37, %v3360_v5  ;;  %v2169_v0 = vld [vmem:[%s3273_s5 + $0x8] sm:$0xff]  }
 0x602   : > { %1889 = vperm.xlu1 %2160, %v1875_v28  }
 0x636   : > { %v1658_v33 = vpop.xlane.xlu0 %1657 }
 0x637   : > { %2356 = vrcp.f32 %v1658_v33 }
 0x639   : > { %v1667_v43 = vpop.xlane.xlu1 %1666 }
 0x63a   : > { %2358 = vrcp.f32 %v1667_v43 }
 0x63e   : > { %v1664_v46 = vpop.xlane.xlu0 %1663 }
 0x63f   : > { %2360 = vrcp.f32 %v1664_v46 }
 0x641   : > { %v2357_v56 = vpop.eup %2356  ;;  %v1673_v27 = vpop.xlane.xlu1 %1672 }
 0x642   : > { %v1754_v19 = vmul.f32 %v2357_v56, %v3075_v41  ;;  %v1753_v9 = vmul.f32 %v2357_v56, %v3073_v29  ;;  %2362 = vrcp.f32 %v1673_v27  ;;  %v2168_v27 = vld [vmem:[%s3273_s5] sm:$0xff]  }
 0x644   : > { %v1805_v45 = vpack.c.bf16 %v1757_v24, %v1754_v19  ;;  %v1804_v54 = vpack.c.bf16 %v1756_v49, %v1753_v9  ;;  %v2359_v16 = vpop.eup %2358  ;;  %v3361_v19 = vmov 0  }
 0x645   : > { %v1763_v21 = vmul.f32 %v2359_v16, %v3083_v62  ;;  %v1762_v39 = vmul.f32 %v2359_v16, %v3081_v44  ;;  %v754_v62 = vpop.permute.xlu1 %753  ;;  %v2370_v16 = vld [vmem:[%s2448_s10] sm:$0xff] }
 0x646   : > { %1836 = vmatprep.subr.bf16.mxu0 %v1805_v45  ;;  %v1670_v20 = vpop.xlane.xlu0 %1669  ;;  %v893_v50 = vadd.f32 %v3138_v12, %v754_v62  ;;  %v895_v26 = vadd.f32 %v3140_v48, %v754_v62 }
 0x647   : > { %2364 = vrcp.f32 %v1670_v20  ;;  %1837 = vmatpush1.bf16.xpose.msra.mxu0 %v1804_v54 }
 0x649   : > { %v2361_v10 = vpop.eup %2360 }
 0x64a   : > { %v1760_v57 = vmul.f32 %v2361_v10, %v3095_v61  ;;  %v1759_v41 = vmul.f32 %v2361_v10, %v3093_v14 }
 0x64c   : > { %v1807_v29 = vpack.c.bf16 %v1763_v21, %v1760_v57  ;;  %v1806_v13 = vpack.c.bf16 %v1762_v39, %v1759_v41  ;;  %v2363_v7 = vpop.eup %2362  ;;  %v2371_v41 = vld [vmem:[%s2448_s10 + $0x8] sm:$0xff] }
 0x64d   : > { %v1769_v55 = vmul.f32 %v2363_v7, %v3103_v51  ;;  %v1768_v61 = vmul.f32 %v2363_v7, %v3101_v59 }
 0x64e   : > { %1838 = vmatprep.subr.bf16.mxu0 %v1807_v29  ;;  %v1676_v1 = vpop.xlane.xlu0 %1675 }
 0x64f   : > { %1839 = vmatpush1.bf16.xpose.msra.mxu0 %v1806_v13  ;;  %2366 = vrcp.f32 %v1676_v1  ;;  %v2372_v13 = vld [vmem:[%s2448_s10 + $0x10] sm:$0xff] }
 0x651   : > { %v2365_v17 = vpop.eup %2364 }
 0x652   : > { %v1766_v6 = vmul.f32 %v2365_v17, %v3113_v35  ;;  %v1765_v11 = vmul.f32 %v2365_v17, %v3111_v31  ;;  %v2373_v17 = vld [vmem:[%s2448_s10 + $0x18] sm:$0xff] }
 0x654   : > { %v1809_v8 = vpack.c.bf16 %v1769_v55, %v1766_v6  ;;  %v1808_v14 = vpack.c.bf16 %v1768_v61, %v1765_v11 }
 0x656   : > { %1840 = vmatprep.subr.bf16.mxu0 %v1809_v8  ;;  %v749_v44 = vpop.permute.xlu0 %748 }
 0x657   : > { %v889_v36 = vadd.f32 %v3134_v15, %v749_v44  ;;  %v891_v38 = vadd.f32 %v3136_v25, %v749_v44  ;;  %1841 = vmatpush1.bf16.xpose.msra.mxu0 %v1808_v14  ;;  %v2374_v44 = vld [vmem:[%s2448_s10 + $0x20] sm:$0xff] }
 0x659   : > { %v1776_v35 = vpack.c.bf16 %v893_v50, %v889_v36  ;;  %v1777_v51 = vpack.c.bf16 %v895_v26, %v891_v38  ;;  %v2367_v25 = vpop.eup %2366  ;;  %v2375_v38 = vld [vmem:[%s2448_s10 + $0x28] sm:$0xff] }
 0x65a   : > { %v764_v59 = vpop.permute.xlu0 %763  ;;  %v1772_v42 = vmul.f32 %v2367_v25, %v3123_v18  ;;  %v1771_v63 = vmul.f32 %v2367_v25, %v3121_v2 }
 0x65b   : > { %1844 = vmatprep.mubr.bf16.mxu0 %v1777_v51  ;;  %v903_v34 = vadd.f32 %v3168_v23, %v764_v59  ;;  %v905_v4 = vadd.f32 %v3173_v53, %v764_v59 }
 0x65e   : > { %v1885_v45 = vpop.permute.xlu0 %1884 }
 0x662   : > { %v1895_v62 = vpop.permute.xlu0 %1894 }
 0x676   : > { %v1679_v31 = vpop.xlane.xlu1 %1678 }
 0x677   : > { %2368 = vrcp.f32 %v1679_v31  ;;  %v2376_v31 = vld [vmem:[%s2448_s10 + $0x30] sm:$0xff] }
 0x67a   : > { %v759_v47 = vpop.permute.xlu1 %758 }
 0x67b   : > { %v899_v12 = vadd.f32 %v3163_v40, %v759_v47  ;;  %v901_v48 = vadd.f32 %v3166_v3, %v759_v47  ;;  %v2377_v47 = vld [vmem:[%s2448_s10 + $0x38] sm:$0xff] }
 0x67d   : > { %v1778_v15 = vpack.c.bf16 %v903_v34, %v899_v12  ;;  %v1779_v52 = vpack.c.bf16 %v905_v4, %v901_v48 }
 0x67e   : > { %v1880_v24 = vpop.permute.xlu1 %1879 }
 0x681   : > { %v2369_v22 = vpop.eup %2368 }
 0x682   : > { %v1775_v30 = vmul.f32 %v2369_v22, %v3184_v32  ;;  %v1774_v28 = vmul.f32 %v2369_v22, %v3182_v60  ;;  %v1890_v6 = vpop.permute.xlu1 %1889 }
 0x684   : > { %v1811_v58 = vpack.c.bf16 %v1775_v30, %v1772_v42  ;;  %v1810_v23 = vpack.c.bf16 %v1774_v28, %v1771_v63 }
 0x686   : > { %1842 = vmatprep.subr.bf16.mxu0 %v1811_v58 }
 0x687   : > { %1843 = vmatpush1.bf16.xpose.msra.mxu0 %v1810_v23 }
 0x68e   : > { %1845 = vmatmul.mubr.bf16.vlgmr.msra.gmra.mrb[28].mxu0 %v1776_v35 }
 0x68f   : > { %1854 = vmatprep.mubr.bf16.mxu0 %v1779_v52 }
 0x696   : > { %1855 = vmatmul.mubr.bf16.gmra.mrb[32].mxu0 %v1778_v15 }
 0x761   : > { %v1846_v40 = vpop.f32.mrb[28].mxu0 }
 0x762   : > { %v1848_v3 = vpop.f32.mrb[29].mxu0 }
 0x763   : > { %v1850_v53 = vpop.f32.mrb[30].mxu0 }
 0x764   : > { %v1869_v33 = vpack.c.bf16 %v1850_v53, %v1846_v40  ;;  %v1852_v43 = vpop.f32.mrb[31].mxu0 }
 0x765   : > { %v1870_v46 = vpack.c.bf16 %v1852_v43, %v1848_v3 }
 0x767   : > { %1913 = vmatprep.subr.bf16.mxu1 %v1870_v46 }
 0x768   : > { %1914 = vmatpush1.bf16.msra.mxu1 %v1869_v33 }
 0x769   : > { %v1856_v18 = vpop.f32.mrb[32].mxu0 }
 0x76a   : > { %v1858_v32 = vpop.f32.mrb[33].mxu0 }
 0x76b   : > { %v1860_v2 = vpop.f32.mrb[34].mxu0 }
 0x76c   : > { %v1871_v60 = vpack.c.bf16 %v1860_v2, %v1856_v18  ;;  %v1862_v37 = vpop.f32.mrb[35].mxu0 }
 0x76d   : > { %v1872_v56 = vpack.c.bf16 %v1862_v37, %v1858_v32 }
 0x76f   : > { %1915 = vmatprep.subr.bf16.mxu1 %v1872_v56 }
 0x770   : > { %1916 = vmatpush1.bf16.msra.mxu1 %v1871_v60 }
 0x773   : > { %2084 = vmatmul.mubr.msk.bf16.vlgmr.msra.gmra.mrb[68].mxu1 %vm351_vm0, %v2168_v27 }
 0x774   : > { %1955 = vmatprep.mubr.bf16.mxu1 %v3361_v19 }
 0x77b   : > { %2085 = vmatmul.mubr.msk.bf16.gmra.mrb[72].mxu1 %vm351_vm0, %v2169_v0 }
 0x846   : > { %v1947_v9 = vpop.f32.mrb[68].mxu1 }
 0x847   : > { %v1948_v5 = vadd.f32 %v1947_v9, %v1880_v24  ;;  %v1949_v49 = vpop.f32.mrb[69].mxu1 }
 0x848   : > { %v1950_v54 = vadd.f32 %v1949_v49, %v1880_v24  ;;  %v1951_v20 = vpop.f32.mrb[70].mxu1 }
 0x849   : > { %v1966_v10 = vadd.f32 %v2370_v16, %v1948_v5  ;;  %v1952_v57 = vadd.f32 %v1951_v20, %v1885_v45  ;;  %v1953_v21 = vpop.f32.mrb[71].mxu1 }
 0x84a   : > { %v1967_v39 = vadd.f32 %v2371_v41, %v1950_v54  ;;  %v1954_v29 = vadd.f32 %v1953_v21, %v1885_v45 }
 0x84b   : > { %1974 = vst [vmem:[%s3247_s13] sm:$0xff] %v1966_v10  ;;  %v1968_v7 = vadd.f32 %v2372_v13, %v1952_v57 }
 0x84c   : > { %1975 = vst [vmem:[%s3247_s13 + $0x8] sm:$0xff] %v1967_v39  ;;  %v1969_v1 = vadd.f32 %v2373_v17, %v1954_v29 }
 0x84d   : > { %1976 = vst [vmem:[%s3247_s13 + $0x10] sm:$0xff] %v1968_v7 }
 0x84e   : > { %1977 = vst [vmem:[%s3247_s13 + $0x18] sm:$0xff] %v1969_v1  ;;  %v1957_v55 = vpop.f32.mrb[72].mxu1 }
 0x84f   : > { %v1958_v11 = vadd.f32 %v1957_v55, %v1890_v6  ;;  %v1959_v61 = vpop.f32.mrb[73].mxu1 }
 0x850   : > { %v1960_v8 = vadd.f32 %v1959_v61, %v1890_v6  ;;  %v1961_v14 = vpop.f32.mrb[74].mxu1 }
 0x851   : > { %v1970_v50 = vadd.f32 %v2374_v44, %v1958_v11  ;;  %v1962_v26 = vadd.f32 %v1961_v14, %v1895_v62  ;;  %v1963_v36 = vpop.f32.mrb[75].mxu1 }
 0x852   : > { %v1971_v35 = vadd.f32 %v2375_v38, %v1960_v8  ;;  %v1964_v51 = vadd.f32 %v1963_v36, %v1895_v62 }
 0x853   : > { %1978 = vst [vmem:[%s3247_s13 + $0x20] sm:$0xff] %v1970_v50  ;;  %v1972_v59 = vadd.f32 %v2376_v31, %v1962_v26 }
 0x854   : > { %1979 = vst [vmem:[%s3247_s13 + $0x28] sm:$0xff] %v1971_v35  ;;  %v1973_v34 = vadd.f32 %v2377_v47, %v1964_v51 }
 0x855   : > { %1980 = vst [vmem:[%s3247_s13 + $0x30] sm:$0xff] %v1972_v59 }
 0x856   : > { %1981 = vst [vmem:[%s3247_s13 + $0x38] sm:$0xff] %v1973_v34 }
 0x857 PF: > { %s18_s27 = sadd.s32 1, %s2384_s27  }
 0x858   : > { %p15_p4 = scmp.ge.s32.totalorder %s18_s27, 4  }
 0x85a   :  { %17 = sbr.rel (!%p15_p4) target bundleno = 1 (0x1), region = 82 }

// kernel: upblock_forward.4
= control target key start
LH: loop header
LB: loop body
LE: loop exit
PB: predicated region body
PF: predicated region fallthrough
CT: control target
= control target key end

     0   :  { %s3513_s30 = smov 0   ;;  %s4278_s0 = inlined_call_operand.vmem [shape: bf16[2,48,362], index: 0, kind: input, shape index: {}]   ;;  %s4279_s1 = inlined_call_operand.vmem [shape: bf16[64,432], index: 1, kind: input, shape index: {}]   ;;  %s4280_s2 = inlined_call_operand.vmem [shape: f32[32,1], index: 2, kind: input, shape index: {}]   ;;  %s4281_s3 = inlined_call_operand.vmem [shape: f32[32,1], index: 3, kind: input, shape index: {}]   ;;  %s4282_s4 = inlined_call_operand.vmem [shape: f32[2,32,1], index: 4, kind: input, shape index: {}]   ;;  %s4283_s5 = inlined_call_operand.vmem [shape: bf16[32,288], index: 5, kind: input, shape index: {}]   ;;  %s4284_s6 = inlined_call_operand.vmem [shape: f32[32,1], index: 6, kind: input, shape index: {}]   ;;  %s4285_s7 = inlined_call_operand.vmem [shape: f32[32,32], index: 7, kind: input, shape index: {}]   ;;  %s4286_s8 = inlined_call_operand.vmem [shape: f32[1,324], index: 8, kind: input, shape index: {}]   ;;  %s4287_s9 = inlined_call_operand.vmem [shape: f32[2,32,324], index: 9, kind: output, shape index: {}]  }
   0x1 LB: > { %s2984_s10 = sadd.s32 4294967295, %s3451_s30   ;;  %p2988_p0 = scmp.ge.s32.totalorder %s3451_s30, 1  ;;  %s3451_s30 = sphi %s3513_s30, %s19_s30  }
   0x2   : > { %p297_p1 = scmp.lt.s32.totalorder %s3451_s30, 3 }
   0x4   : > { %p298_p2 = pnand %p2988_p0, %p297_p1 }
   0x5   : > { %p338_p3 = scmp.lt.s32.totalorder (!%p298_p2), %s2984_s10, 1  ;;  %s3453_s15 = smov (!%p298_p2), 127   ;;  %vm416_vm0 = vcmask (!%p298_p2), 556032   ;;  %v3359_v21 = vld [vmem:[%s4279_s1 + $0x4] ss:$16 sps:$4 sm:$0xff] (!%p298_p2)   ;;  %v3458_v23 = vmov (!%p298_p2), 0  }
   0x6   : > { %301 = sbr.rel (%p298_p2) target bundleno = 1646 (0x66e), region = 56  ;;  %s3454_s16 = smov (!%p298_p2), 126   ;;  %1540 = vmatprep.mubr.bf16.mxu1 (!%p298_p2), %v3359_v21  ;;  %1394 = vmatprep.mubr.bf16.mxu0 (!%p298_p2), %v3359_v21  ;;  %vm493_vm1 = vcmask (!%p298_p2), 1039360   ;;  %vm587_vm2 = vcmask (!%p298_p2), 1031168   ;;  %vm681_vm3 = vcmask (!%p298_p2), 900096   ;;  %vm775_vm4 = vcmask (!%p298_p2), 891904  }
   0x7   : > { %s3455_s17 = smov (!%p298_p2), 110   ;;  %s3456_s18 = smov (!%p298_p2), 109   ;;  %3320 = vset.pattern.permute.xlu1 (!%p298_p2), %v3458_v23  ;;  %3319 = vset.pattern.permute.xlu0 (!%p298_p2), %v3458_v23  ;;  %vm869_vm5 = vcmask (!%p298_p2), 883712   ;;  %vm963_vm6 = vcmask (!%p298_p2), 752640   ;;  %vm1349_vm7 = vcmask (!%p298_p2), 392192   ;;  %vm1057_vm8 = vcmask (!%p298_p2), 744448  }
   0x8   : > { %s3457_s21 = smov (!%p298_p2), 108   ;;  %s3459_s22 = smov (!%p298_p2), 92   ;;  %vm1151_vm9 = vcmask (!%p298_p2), 736256   ;;  %vm1759_vm10 = vcmask (!%p298_p2), 261120   ;;  %vm2186_vm11 = vcmask (!%p298_p2), 154624   ;;  %vm2227_vm12 = vcmask (!%p298_p2), 711680  }
   0x9   : > { %s3460_s23 = smov (!%p298_p2), 91   ;;  %s3461_s24 = smov (!%p298_p2), 90   ;;  %2187 = vst.msk [vmem:[#allocation4] sm:$0xff] (!%p298_p2), %vm2186_vm11, %v3458_v23  ;;  %2188 = vst.msk [vmem:[#allocation4 + $0x18] sm:$0xff] (!%p298_p2), %vm2186_vm11, %v3458_v23  ;;  %vm2232_vm13 = vcmask (!%p298_p2), 868024   ;;  %vm2224_vm14 = vcmask (!%p298_p2), 1047704  }
   0xd   : > { %s4289_s10 = smov (!%p338_p3, %s2984_s10), 1 }
   0xe   : > { %s3299_s11 = smul.u32 72, %s4289_s10  ;;  %s3118_s19 = sshll.u32 %s4289_s10, 5 }
   0xf   : > { %s3970_s28 = scalar_lea.vmem %s4282_s4, %s3118_s19 }
  0x10   : > { %s3527_s14 = scalar_lea.vmem %s4278_s0, %s3299_s11 }
  0x11   : > { %v3530_v0 = vld [vmem:[%s3527_s14 + $0x4] ss:$12 sps:$4 sm:$0xff]   ;;  %v3533_v1 = vld [vmem:[%s3527_s14] ss:$12 sps:$4 sm:$0xff]   ;;  %v3324_v2 = vld [vmem:[%s3527_s14 + $0x8] ss:$12 sps:$4 sm:$0xff]  }
  0x12   : > { %477 = vrot.lane.b32.xlu0 %v3530_v0, %s3453_s15  ;;  %1362 = vmatprep.subr.bf16.mxu0 %v3530_v0  ;;  %v3542_v3 = vld [vmem:[%s3527_s14 + $0x1c] ss:$12 sps:$4 sm:$0xff]   ;;  %v3546_v4 = vld [vmem:[%s3527_s14 + $0x18] ss:$12 sps:$4 sm:$0xff]   ;;  %v3549_v5 = vld [vmem:[%s3527_s14 + $0x34] ss:$12 sps:$4 sm:$0xff]  }
  0x13   : > { %475 = vrot.lane.b32.xlu1 %v3533_v1, %s3453_s15  ;;  %1363 = vmatpush1.bf16.msra.mxu0 %v3533_v1  ;;  %v3327_v6 = vld [vmem:[%s3527_s14 + $0x20] ss:$12 sps:$4 sm:$0xff]   ;;  %v3555_v7 = vld [vmem:[%s3527_s14 + $0x30] ss:$12 sps:$4 sm:$0xff]   ;;  %v3331_v8 = vld [vmem:[%s3527_s14 + $0x38] ss:$12 sps:$4 sm:$0xff]  }
  0x14   : > { %1364 = vmatprep.subr.bf16.mxu0 %v3542_v3  ;;  %v3333_v9 = vld [vmem:[%s3527_s14 + $0x8] ss:$12 sps:$4 sm:$0xff]   ;;  %v3334_v10 = vld [vmem:[%s3527_s14 + $0x20] ss:$12 sps:$4 sm:$0xff]   ;;  %v3335_v11 = vld [vmem:[%s3527_s14 + $0x38] ss:$12 sps:$4 sm:$0xff]  }
  0x15   : > { %v3354_v12 = vld [vmem:[%s3527_s14 + $0x8] ss:$12 sps:$4 sm:$0xff]   ;;  %v3355_v13 = vld [vmem:[%s3527_s14 + $0x20] ss:$12 sps:$4 sm:$0xff]   ;;  %v3356_v14 = vld [vmem:[%s3527_s14 + $0x38] ss:$12 sps:$4 sm:$0xff]  }
  0x16   : > { %479 = vrot.lane.b32.xlu0 %v3324_v2, %s3453_s15  ;;  %417 = vst.msk [vmem:[#allocation2 + $0x10] sm:$0xff] %vm416_vm0, %v3354_v12  ;;  %420 = vst.msk [vmem:[#allocation2 + $0x28] sm:$0xff] %vm416_vm0, %v3355_v13  ;;  %v3336_v15 = vld [vmem:[%s3527_s14 + $0x8] ss:$12 sps:$4 sm:$0xff]   ;;  %v3337_v16 = vld [vmem:[%s3527_s14 + $0x20] ss:$12 sps:$4 sm:$0xff]  }
  0x17   : > { %483 = vrot.lane.b32.xlu1 %v3542_v3, %s3453_s15  ;;  %1365 = vmatpush1.bf16.msra.mxu0 %v3546_v4  ;;  %423 = vst.msk [vmem:[#allocation2 + $0x40] sm:$0xff] %vm416_vm0, %v3356_v14  ;;  %v3338_v17 = vld [vmem:[%s3527_s14 + $0x38] ss:$12 sps:$4 sm:$0xff]   ;;  %v3339_v18 = vld [vmem:[%s3527_s14 + $0x8] ss:$12 sps:$4 sm:$0xff]  }
  0x18   : > { %1366 = vmatprep.subr.bf16.mxu0 %v3549_v5  ;;  %v3340_v19 = vld [vmem:[%s3527_s14 + $0x20] ss:$12 sps:$4 sm:$0xff]   ;;  %v3341_v20 = vld [vmem:[%s3527_s14 + $0x38] ss:$12 sps:$4 sm:$0xff]   ;;  %v3342_v22 = vld [vmem:[%s3527_s14 + $0x8] ss:$12 sps:$4 sm:$0xff]  }
  0x19   : > { %v3343_v24 = vld [vmem:[%s3527_s14 + $0x20] ss:$12 sps:$4 sm:$0xff]   ;;  %v3344_v25 = vld [vmem:[%s3527_s14 + $0x38] ss:$12 sps:$4 sm:$0xff]   ;;  %v3345_v26 = vld [vmem:[%s3527_s14 + $0x8] ss:$12 sps:$4 sm:$0xff]  }
  0x1a   : > { %485 = vrot.lane.b32.xlu0 %v3327_v6, %s3453_s15  ;;  %v3346_v27 = vld [vmem:[%s3527_s14 + $0x20] ss:$12 sps:$4 sm:$0xff]   ;;  %v3347_v28 = vld [vmem:[%s3527_s14 + $0x38] ss:$12 sps:$4 sm:$0xff]   ;;  %v3348_v29 = vld [vmem:[%s3527_s14 + $0x8] ss:$12 sps:$4 sm:$0xff]  }
  0x1b   : > { %481 = vrot.lane.b32.xlu1 %v3546_v4, %s3453_s15  ;;  %1367 = vmatpush1.bf16.msra.mxu0 %v3555_v7  ;;  %v3349_v30 = vld [vmem:[%s3527_s14 + $0x20] ss:$12 sps:$4 sm:$0xff]   ;;  %v3350_v34 = vld [vmem:[%s3527_s14 + $0x38] ss:$12 sps:$4 sm:$0xff]   ;;  %v3351_v42 = vld [vmem:[%s3527_s14 + $0x8] ss:$12 sps:$4 sm:$0xff]  }
  0x1c   : > { %v3352_v46 = vld [vmem:[%s3527_s14 + $0x20] ss:$12 sps:$4 sm:$0xff]   ;;  %v3353_v54 = vld [vmem:[%s3527_s14 + $0x38] ss:$12 sps:$4 sm:$0xff]  }
  0x1e   : > { %489 = vrot.lane.b32.xlu0 %v3549_v5, %s3453_s15  ;;  %v1200_v21 = vld [vmem:[#allocation2 + $0x40] sm:$0xff] }
  0x1f   : > { %491 = vrot.lane.b32.xlu1 %v3331_v8, %s3453_s15 }
  0x22   : > { %487 = vrot.lane.b32.xlu0 %v3555_v7, %s3453_s15 }
  0x23   : > { %571 = vrot.lane.b32.xlu1 %v3530_v0, %s3454_s16 }
  0x26   : > { %573 = vrot.lane.b32.xlu0 %v3333_v9, %s3454_s16 }
  0x27   : > { %569 = vrot.lane.b32.xlu1 %v3533_v1, %s3454_s16 }
  0x2a   : > { %577 = vrot.lane.b32.xlu0 %v3542_v3, %s3454_s16 }
  0x2b   : > { %579 = vrot.lane.b32.xlu1 %v3334_v10, %s3454_s16  ;;  %v1197_v10 = vld [vmem:[#allocation2 + $0x28] sm:$0xff] }
  0x2e   : > { %575 = vrot.lane.b32.xlu0 %v3546_v4, %s3454_s16 }
  0x2f   : > { %583 = vrot.lane.b32.xlu1 %v3549_v5, %s3454_s16 }
  0x32   : > { %585 = vrot.lane.b32.xlu0 %v3335_v11, %s3454_s16 }
  0x33   : > { %581 = vrot.lane.b32.xlu1 %v3555_v7, %s3454_s16 }
  0x36   : > { %665 = vrot.lane.b32.xlu0 %v3530_v0, %s3455_s17 }
  0x37   : > { %667 = vrot.lane.b32.xlu1 %v3336_v15, %s3455_s17 }
  0x3a   : > { %663 = vrot.lane.b32.xlu0 %v3533_v1, %s3455_s17 }
  0x3b   : > { %671 = vrot.lane.b32.xlu1 %v3542_v3, %s3455_s17 }
  0x3e   : > { %673 = vrot.lane.b32.xlu0 %v3337_v16, %s3455_s17  ;;  %v1638_v16 = vld [vmem:[%s4280_s2] sm:$0xff] }
  0x3f   : > { %669 = vrot.lane.b32.xlu1 %v3546_v4, %s3455_s17 }
  0x42   : > { %677 = vrot.lane.b32.xlu0 %v3549_v5, %s3455_s17 }
  0x43   : > { %679 = vrot.lane.b32.xlu1 %v3338_v17, %s3455_s17  ;;  %v1639_v17 = vld [vmem:[%s4280_s2 + $0x8] sm:$0xff] }
  0x46   : > { %675 = vrot.lane.b32.xlu0 %v3555_v7, %s3455_s17 }
  0x47   : > { %759 = vrot.lane.b32.xlu1 %v3530_v0, %s3456_s18 }
  0x4a   : > { %761 = vrot.lane.b32.xlu0 %v3339_v18, %s3456_s18 }
  0x4b   : > { %757 = vrot.lane.b32.xlu1 %v3533_v1, %s3456_s18 }
  0x4e   : > { %765 = vrot.lane.b32.xlu0 %v3542_v3, %s3456_s18 }
  0x4f   : > { %767 = vrot.lane.b32.xlu1 %v3340_v19, %s3456_s18 }
  0x52   : > { %763 = vrot.lane.b32.xlu0 %v3546_v4, %s3456_s18 }
  0x53   : > { %771 = vrot.lane.b32.xlu1 %v3549_v5, %s3456_s18 }
  0x56   : > { %773 = vrot.lane.b32.xlu0 %v3341_v20, %s3456_s18  ;;  %v1641_v20 = vld [vmem:[%s4280_s2 + $0x18] sm:$0xff] }
  0x57   : > { %769 = vrot.lane.b32.xlu1 %v3555_v7, %s3456_s18 }
  0x5a   : > { %853 = vrot.lane.b32.xlu0 %v3530_v0, %s3457_s21 }
  0x5b   : > { %855 = vrot.lane.b32.xlu1 %v3342_v22, %s3457_s21 }
  0x5e   : > { %851 = vrot.lane.b32.xlu0 %v3533_v1, %s3457_s21 }
  0x5f   : > { %859 = vrot.lane.b32.xlu1 %v3542_v3, %s3457_s21 }
  0x62   : > { %861 = vrot.lane.b32.xlu0 %v3343_v24, %s3457_s21 }
  0x63   : > { %857 = vrot.lane.b32.xlu1 %v3546_v4, %s3457_s21 }
  0x66   : > { %865 = vrot.lane.b32.xlu0 %v3549_v5, %s3457_s21 }
  0x67   : > { %867 = vrot.lane.b32.xlu1 %v3344_v25, %s3457_s21  ;;  %v1640_v25 = vld [vmem:[%s4280_s2 + $0x10] sm:$0xff] }
  0x6a   : > { %863 = vrot.lane.b32.xlu0 %v3555_v7, %s3457_s21 }
  0x6b   : > { %947 = vrot.lane.b32.xlu1 %v3530_v0, %s3459_s22 }
  0x6e   : > { %949 = vrot.lane.b32.xlu0 %v3345_v26, %s3459_s22 }
  0x6f   : > { %945 = vrot.lane.b32.xlu1 %v3533_v1, %s3459_s22 }
  0x72   : > { %953 = vrot.lane.b32.xlu0 %v3542_v3, %s3459_s22 }
  0x73   : > { %955 = vrot.lane.b32.xlu1 %v3346_v27, %s3459_s22 }
  0x76   : > { %951 = vrot.lane.b32.xlu0 %v3546_v4, %s3459_s22 }
  0x77   : > { %959 = vrot.lane.b32.xlu1 %v3549_v5, %s3459_s22 }
  0x7a   : > { %961 = vrot.lane.b32.xlu0 %v3347_v28, %s3459_s22 }
  0x7b   : > { %957 = vrot.lane.b32.xlu1 %v3555_v7, %s3459_s22 }
  0x7e   : > { %1041 = vrot.lane.b32.xlu0 %v3530_v0, %s3460_s23 }
  0x7f   : > { %1043 = vrot.lane.b32.xlu1 %v3348_v29, %s3460_s23 }
  0x82   : > { %1039 = vrot.lane.b32.xlu0 %v3533_v1, %s3460_s23 }
  0x83   : > { %1047 = vrot.lane.b32.xlu1 %v3542_v3, %s3460_s23 }
  0x84   : > { %v478_v31 = vpop.permute.xlu0 %477 }
  0x85   : > { %v476_v32 = vpop.permute.xlu1 %475 }
  0x86   : > { %v494_v33 = vsel %vm493_vm1, %v476_v32, %v478_v31  ;;  %1049 = vrot.lane.b32.xlu0 %v3349_v30, %s3460_s23 }
  0x87   : > { %1045 = vrot.lane.b32.xlu1 %v3546_v4, %s3460_s23 }
  0x88   : > { %v480_v35 = vpop.permute.xlu0 %479 }
  0x89   : > { %v495_v36 = vsel %vm493_vm1, %v478_v31, %v480_v35  ;;  %511 = vst.msk [vmem:[#allocation2 + $0x58] sm:$0xff] %vm416_vm0, %v480_v35  ;;  %v484_v37 = vpop.permute.xlu1 %483 }
  0x8a   : > { %1053 = vrot.lane.b32.xlu0 %v3549_v5, %s3460_s23  ;;  %1368 = vmatprep.subr.bf16.mxu0 %v495_v36 }
  0x8b   : > { %1055 = vrot.lane.b32.xlu1 %v3350_v34, %s3460_s23  ;;  %1369 = vmatpush1.bf16.msra.mxu0 %v494_v33 }
  0x8c   : > { %v486_v38 = vpop.permute.xlu0 %485 }
  0x8d   : > { %v497_v39 = vsel %vm493_vm1, %v484_v37, %v486_v38  ;;  %514 = vst.msk [vmem:[#allocation2 + $0x70] sm:$0xff] %vm416_vm0, %v486_v38  ;;  %v482_v40 = vpop.permute.xlu1 %481 }
  0x8e   : > { %v496_v41 = vsel %vm493_vm1, %v482_v40, %v484_v37  ;;  %1051 = vrot.lane.b32.xlu0 %v3555_v7, %s3460_s23  ;;  %1370 = vmatprep.subr.bf16.mxu0 %v497_v39 }
  0x8f   : > { %1135 = vrot.lane.b32.xlu1 %v3530_v0, %s3461_s24  ;;  %1371 = vmatpush1.bf16.msra.mxu0 %v496_v41 }
  0x90   : > { %v490_v43 = vpop.permute.xlu0 %489  ;;  %v1203_v33 = vld [vmem:[#allocation2 + $0x58] sm:$0xff] }
  0x91   : > { %v492_v44 = vpop.permute.xlu1 %491 }
  0x92   : > { %v499_v45 = vsel %vm493_vm1, %v490_v43, %v492_v44  ;;  %517 = vst.msk [vmem:[#allocation2 + $0x88] sm:$0xff] %vm416_vm0, %v492_v44  ;;  %1137 = vrot.lane.b32.xlu0 %v3351_v42, %s3461_s24 }
  0x93   : > { %1133 = vrot.lane.b32.xlu1 %v3533_v1, %s3461_s24  ;;  %1372 = vmatprep.subr.bf16.mxu0 %v499_v45 }
  0x94   : > { %v488_v47 = vpop.permute.xlu0 %487  ;;  %v1206_v41 = vld [vmem:[#allocation2 + $0x70] sm:$0xff] }
  0x95   : > { %v498_v48 = vsel %vm493_vm1, %v488_v47, %v490_v43  ;;  %v572_v49 = vpop.permute.xlu1 %571 }
  0x96   : > { %1141 = vrot.lane.b32.xlu0 %v3542_v3, %s3461_s24  ;;  %1373 = vmatpush1.bf16.msra.mxu0 %v498_v48 }
  0x97   : > { %1143 = vrot.lane.b32.xlu1 %v3352_v46, %s3461_s24 }
  0x98   : > { %v574_v50 = vpop.permute.xlu0 %573 }
  0x99   : > { %v589_v51 = vsel %vm587_vm2, %v572_v49, %v574_v50  ;;  %605 = vst.msk [vmem:[#allocation2 + $0xa0] sm:$0xff] %vm416_vm0, %v574_v50  ;;  %v570_v52 = vpop.permute.xlu1 %569  ;;  %v1209_v47 = vld [vmem:[#allocation2 + $0x88] sm:$0xff] }
  0x9a   : > { %v588_v53 = vsel %vm587_vm2, %v570_v52, %v572_v49  ;;  %1139 = vrot.lane.b32.xlu0 %v3546_v4, %s3461_s24  ;;  %1374 = vmatprep.subr.bf16.mxu0 %v589_v51  ;;  %v1194_v4 = vld [vmem:[#allocation2 + $0x10] sm:$0xff] }
  0x9b   : > { %1147 = vrot.lane.b32.xlu1 %v3549_v5, %s3461_s24  ;;  %1375 = vmatpush1.bf16.msra.mxu0 %v588_v53 }
  0x9c   : > { %v578_v55 = vpop.permute.xlu0 %577 }
  0x9d   : > { %v580_v56 = vpop.permute.xlu1 %579 }
  0x9e   : > { %v591_v57 = vsel %vm587_vm2, %v578_v55, %v580_v56  ;;  %608 = vst.msk [vmem:[#allocation2 + $0xb8] sm:$0xff] %vm416_vm0, %v580_v56  ;;  %1149 = vrot.lane.b32.xlu0 %v3353_v54, %s3461_s24  ;;  %v3357_v56 = vld [vmem:[%s4279_s1] ss:$16 sps:$4 sm:$0xff]  }
  0x9f   : > { %1145 = vrot.lane.b32.xlu1 %v3555_v7, %s3461_s24  ;;  %1376 = vmatprep.subr.bf16.mxu0 %v591_v57 }
  0xa0   : > { %v576_v58 = vpop.permute.xlu0 %575 }
  0xa1   : > { %v590_v59 = vsel %vm587_vm2, %v576_v58, %v578_v55  ;;  %v584_v60 = vpop.permute.xlu1 %583  ;;  %v1212_v55 = vld [vmem:[#allocation2 + $0xa0] sm:$0xff] }
  0xa2   : > { %1377 = vmatpush1.bf16.msra.mxu0 %v590_v59  ;;  %1644 = vperm.xlu0 %3319, %v1638_v16   ;;  %v3360_v58 = vld [vmem:[%s4279_s1 + $0x24] ss:$16 sps:$4 sm:$0xff]  }
  0xa3   : > { %1649 = vperm.xlu1 %3320, %v1639_v17  }
  0xa4   : > { %v586_v61 = vpop.permute.xlu0 %585 }
  0xa5   : > { %v593_v62 = vsel %vm587_vm2, %v584_v60, %v586_v61  ;;  %611 = vst.msk [vmem:[#allocation2 + $0xd0] sm:$0xff] %vm416_vm0, %v586_v61  ;;  %v582_v63 = vpop.permute.xlu1 %581 }
  0xa6   : > { %v592_v0 = vsel %vm587_vm2, %v582_v63, %v584_v60  ;;  %1378 = vmatprep.subr.bf16.mxu0 %v593_v62  ;;  %1659 = vperm.xlu0 %3319, %v1641_v20   ;;  %v1215_v63 = vld [vmem:[#allocation2 + $0xb8] sm:$0xff] }
  0xa7   : > { %1379 = vmatpush1.bf16.msra.mxu0 %v592_v0  ;;  %1654 = vperm.xlu1 %3320, %v1640_v25  }
  0xa8   : > { %v666_v1 = vpop.permute.xlu0 %665 }
  0xa9   : > { %v668_v2 = vpop.permute.xlu1 %667 }
  0xaa   : > { %v683_v3 = vsel %vm681_vm3, %v666_v1, %v668_v2  ;;  %699 = vst.msk [vmem:[#allocation2 + $0xe8] sm:$0xff] %vm416_vm0, %v668_v2  ;;  %v3362_v2 = vld [vmem:[%s4279_s1 + $0x20] ss:$16 sps:$4 sm:$0xff]  }
  0xab   : > { %1380 = vmatprep.subr.bf16.mxu0 %v683_v3 }
  0xac   : > { %v664_v5 = vpop.permute.xlu0 %663  ;;  %v1218_v6 = vld [vmem:[#allocation2 + $0xd0] sm:$0xff] }
  0xad   : > { %v682_v7 = vsel %vm681_vm3, %v664_v5, %v666_v1  ;;  %v672_v8 = vpop.permute.xlu1 %671  ;;  %3119 = vmatprep.subr.bf16.mxu1 %v1218_v6 }
  0xae   : > { %3120 = vmatpush3.bf16.msra.mxu1 %v1194_v4  ;;  %1381 = vmatpush1.bf16.msra.mxu0 %v682_v7  ;;  %v3363_v4 = vld [vmem:[%s4279_s1 + $0x44] ss:$16 sps:$4 sm:$0xff]  }
  0xb0   : > { %v674_v9 = vpop.permute.xlu0 %673 }
  0xb1   : > { %v685_v11 = vsel %vm681_vm3, %v672_v8, %v674_v9  ;;  %702 = vst.msk [vmem:[#allocation2 + $0x100] sm:$0xff] %vm416_vm0, %v674_v9  ;;  %v670_v12 = vpop.permute.xlu1 %669  ;;  %v1221_v13 = vld [vmem:[#allocation2 + $0xe8] sm:$0xff] }
  0xb2   : > { %v684_v14 = vsel %vm681_vm3, %v670_v12, %v672_v8  ;;  %3121 = vmatprep.subr.bf16.mxu1 %v1221_v13  ;;  %1382 = vmatprep.subr.bf16.mxu0 %v685_v11  ;;  %v3365_v13 = vld [vmem:[%s4279_s1 + $0x40] ss:$16 sps:$4 sm:$0xff]  }
  0xb3   : > { %3122 = vmatpush3.bf16.msra.mxu1 %v1197_v10  ;;  %1383 = vmatpush1.bf16.msra.mxu0 %v684_v14 }
  0xb4   : > { %v678_v15 = vpop.permute.xlu0 %677 }
  0xb5   : > { %v680_v18 = vpop.permute.xlu1 %679 }
  0xb6   : > { %v687_v19 = vsel %vm681_vm3, %v678_v15, %v680_v18  ;;  %705 = vst.msk [vmem:[#allocation2 + $0x118] sm:$0xff] %vm416_vm0, %v680_v18 }
  0xb7   : > { %1384 = vmatprep.subr.bf16.mxu0 %v687_v19 }
  0xb8   : > { %v676_v22 = vpop.permute.xlu0 %675  ;;  %v1224_v24 = vld [vmem:[#allocation2 + $0x100] sm:$0xff] }
  0xb9   : > { %v686_v26 = vsel %vm681_vm3, %v676_v22, %v678_v15  ;;  %v760_v27 = vpop.permute.xlu1 %759  ;;  %3123 = vmatprep.subr.bf16.mxu1 %v1224_v24  ;;  %v3366_v15 = vld [vmem:[%s4279_s1 + $0x64] ss:$16 sps:$4 sm:$0xff]   ;;  %v3368_v24 = vld [vmem:[%s4279_s1 + $0x60] ss:$16 sps:$4 sm:$0xff]  }
  0xba   : > { %3124 = vmatpush3.bf16.msra.mxu1 %v1200_v21  ;;  %1385 = vmatpush1.bf16.msra.mxu0 %v686_v26  ;;  %v3371_v26 = vld [vmem:[%s4279_s1 + $0xc] ss:$16 sps:$4 sm:$0xff]  }
  0xbc   : > { %v762_v28 = vpop.permute.xlu0 %761 }
  0xbd   : > { %v777_v29 = vsel %vm775_vm4, %v760_v27, %v762_v28  ;;  %793 = vst.msk [vmem:[#allocation2 + $0x130] sm:$0xff] %vm416_vm0, %v762_v28  ;;  %v758_v30 = vpop.permute.xlu1 %757  ;;  %v1227_v31 = vld [vmem:[#allocation2 + $0x118] sm:$0xff] }
  0xbe   : > { %v776_v32 = vsel %vm775_vm4, %v758_v30, %v760_v27  ;;  %3125 = vmatprep.subr.bf16.mxu1 %v1227_v31  ;;  %1386 = vmatprep.subr.bf16.mxu0 %v777_v29 }
  0xbf   : > { %3126 = vmatpush3.bf16.msra.mxu1 %v1203_v33  ;;  %1387 = vmatpush1.bf16.msra.mxu0 %v776_v32 }
  0xc0   : > { %v766_v34 = vpop.permute.xlu0 %765 }
  0xc1   : > { %v768_v35 = vpop.permute.xlu1 %767 }
  0xc2   : > { %v779_v36 = vsel %vm775_vm4, %v766_v34, %v768_v35  ;;  %796 = vst.msk [vmem:[#allocation2 + $0x148] sm:$0xff] %vm416_vm0, %v768_v35 }
  0xc3   : > { %1388 = vmatprep.subr.bf16.mxu0 %v779_v36 }
  0xc4   : > { %v764_v37 = vpop.permute.xlu0 %763  ;;  %v1230_v38 = vld [vmem:[#allocation2 + $0x130] sm:$0xff] }
  0xc5   : > { %v778_v39 = vsel %vm775_vm4, %v764_v37, %v766_v34  ;;  %v772_v40 = vpop.permute.xlu1 %771  ;;  %3127 = vmatprep.subr.bf16.mxu1 %v1230_v38 }
  0xc6   : > { %3128 = vmatpush3.bf16.msra.mxu1 %v1206_v41  ;;  %1389 = vmatpush1.bf16.msra.mxu0 %v778_v39 }
  0xc8   : > { %v774_v42 = vpop.permute.xlu0 %773 }
  0xc9   : > { %v781_v43 = vsel %vm775_vm4, %v772_v40, %v774_v42  ;;  %799 = vst.msk [vmem:[#allocation2 + $0x160] sm:$0xff] %vm416_vm0, %v774_v42  ;;  %v770_v44 = vpop.permute.xlu1 %769  ;;  %v1233_v45 = vld [vmem:[#allocation2 + $0x148] sm:$0xff] }
  0xca   : > { %v780_v46 = vsel %vm775_vm4, %v770_v44, %v772_v40  ;;  %3129 = vmatprep.subr.bf16.mxu1 %v1233_v45  ;;  %1390 = vmatprep.subr.bf16.mxu0 %v781_v43 }
  0xcb   : > { %3130 = vmatpush3.bf16.msra.mxu1 %v1209_v47  ;;  %1391 = vmatpush1.bf16.msra.mxu0 %v780_v46 }
  0xcc   : > { %v854_v48 = vpop.permute.xlu0 %853 }
  0xcd   : > { %v856_v49 = vpop.permute.xlu1 %855 }
  0xce   : > { %v871_v50 = vsel %vm869_vm5, %v854_v48, %v856_v49  ;;  %887 = vst.msk [vmem:[#allocation2 + $0x178] sm:$0xff] %vm416_vm0, %v856_v49 }
  0xcf   : > { %1392 = vmatprep.subr.bf16.mxu0 %v871_v50 }
  0xd0   : > { %v852_v51 = vpop.permute.xlu0 %851  ;;  %v1236_v52 = vld [vmem:[#allocation2 + $0x160] sm:$0xff] }
  0xd1   : > { %v870_v53 = vsel %vm869_vm5, %v852_v51, %v854_v48  ;;  %v860_v54 = vpop.permute.xlu1 %859  ;;  %3131 = vmatprep.subr.bf16.mxu1 %v1236_v52 }
  0xd2   : > { %3132 = vmatpush3.bf16.msra.mxu1 %v1212_v55  ;;  %1393 = vmatpush1.bf16.msra.mxu0 %v870_v53 }
  0xd4   : > { %v862_v57 = vpop.permute.xlu0 %861 }
  0xd5   : > { %v873_v59 = vsel %vm869_vm5, %v860_v54, %v862_v57  ;;  %890 = vst.msk [vmem:[#allocation2 + $0x190] sm:$0xff] %vm416_vm0, %v862_v57  ;;  %v858_v60 = vpop.permute.xlu1 %857  ;;  %v1239_v61 = vld [vmem:[#allocation2 + $0x178] sm:$0xff]  ;;  %1395 = vmatmul.mubr.bf16.vlgmr.msra.gmra.mrb[0].mxu0 %v3357_v56 }
  0xd6   : > { %v872_v62 = vsel %vm869_vm5, %v858_v60, %v860_v54  ;;  %3133 = vmatprep.subr.bf16.mxu1 %v1239_v61  ;;  %1435 = vmatprep.subr.bf16.mxu0 %v873_v59 }
  0xd7   : > { %3134 = vmatpush3.bf16.msra.mxu1 %v1215_v63  ;;  %1436 = vmatpush1.bf16.msra.mxu0 %v872_v62 }
  0xd8   : > { %v866_v0 = vpop.permute.xlu0 %865  ;;  %1573 = vmatprep.subr.bf16.mxu1 %v3458_v23  ;;  %1404 = vmatprep.mubr.bf16.mxu0 %v3360_v58 }
  0xd9   : > { %v868_v1 = vpop.permute.xlu1 %867 }
  0xda   : > { %v875_v3 = vsel %vm869_vm5, %v866_v0, %v868_v1  ;;  %893 = vst.msk [vmem:[#allocation2 + $0x1a8] sm:$0xff] %vm416_vm0, %v868_v1  ;;  %1541 = vmatmul.mubr.bf16.vlgmr.msra.gmra.mrb[0].mxu1 %v3357_v56 }
  0xdb   : > { %1437 = vmatprep.subr.bf16.mxu0 %v875_v3  ;;  %1548 = vmatprep.mubr.bf16.mxu1 %v3360_v58  ;;  %v3369_v3 = vld [vmem:[%s4279_s1 + $0x8] ss:$16 sps:$4 sm:$0xff]  }
  0xdc   : > { %v864_v5 = vpop.permute.xlu0 %863  ;;  %v1242_v6 = vld [vmem:[#allocation2 + $0x190] sm:$0xff] }
  0xdd   : > { %v874_v7 = vsel %vm869_vm5, %v864_v5, %v866_v0  ;;  %v948_v8 = vpop.permute.xlu1 %947  ;;  %1574 = vmatpush1.bf16.msra.mxu1 %v1242_v6  ;;  %1405 = vmatmul.mubr.bf16.gmra.mrb[4].mxu0 %v3362_v2  ;;  %v3374_v6 = vld [vmem:[%s4279_s1 + $0x28] ss:$16 sps:$4 sm:$0xff]  }
  0xde   : > { %1575 = vmatprep.subr.bf16.mxu1 %v3458_v23  ;;  %1438 = vmatpush1.bf16.msra.mxu0 %v874_v7  ;;  %v3375_v7 = vld [vmem:[%s4279_s1 + $0x4c] ss:$16 sps:$4 sm:$0xff]  }
  0xdf   : > { %1414 = vmatprep.mubr.bf16.mxu0 %v3363_v4 }
  0xe0   : > { %v950_v9 = vpop.permute.xlu0 %949 }
  0xe1   : > { %v965_v10 = vsel %vm963_vm6, %v948_v8, %v950_v9  ;;  %981 = vst.msk [vmem:[#allocation2 + $0x1c0] sm:$0xff] %vm416_vm0, %v950_v9  ;;  %v946_v11 = vpop.permute.xlu1 %945  ;;  %v1245_v12 = vld [vmem:[#allocation2 + $0x1a8] sm:$0xff] }
  0xe2   : > { %v964_v14 = vsel %vm963_vm6, %v946_v11, %v948_v8  ;;  %1576 = vmatpush1.bf16.msra.mxu1 %v1245_v12  ;;  %1439 = vmatprep.subr.bf16.mxu0 %v965_v10  ;;  %v3377_v8 = vld [vmem:[%s4279_s1 + $0x48] ss:$16 sps:$4 sm:$0xff]   ;;  %v3378_v9 = vld [vmem:[%s4279_s1 + $0x6c] ss:$16 sps:$4 sm:$0xff]  }
  0xe3   : > { %1577 = vmatprep.subr.bf16.mxu1 %v3458_v23  ;;  %1440 = vmatpush1.bf16.msra.mxu0 %v964_v14  ;;  %v3380_v10 = vld [vmem:[%s4279_s1 + $0x68] ss:$16 sps:$4 sm:$0xff]  }
  0xe4   : > { %v954_v16 = vpop.permute.xlu0 %953  ;;  %1549 = vmatmul.mubr.bf16.gmra.mrb[4].mxu1 %v3362_v2 }
  0xe5   : > { %v956_v17 = vpop.permute.xlu1 %955  ;;  %1556 = vmatprep.mubr.bf16.mxu1 %v3363_v4  ;;  %1415 = vmatmul.mubr.bf16.gmra.mrb[8].mxu0 %v3365_v13  ;;  %v3372_v4 = vld [vmem:[%s4279_s1 + $0x2c] ss:$16 sps:$4 sm:$0xff]  }
  0xe6   : > { %v967_v18 = vsel %vm963_vm6, %v954_v16, %v956_v17  ;;  %984 = vst.msk [vmem:[#allocation2 + $0x1d8] sm:$0xff] %vm416_vm0, %v956_v17  ;;  %1424 = vmatprep.mubr.bf16.mxu0 %v3366_v15 }
  0xe7   : > { %1441 = vmatprep.subr.bf16.mxu0 %v967_v18 }
  0xe8   : > { %v952_v19 = vpop.permute.xlu0 %951  ;;  %v1248_v20 = vld [vmem:[#allocation2 + $0x1c0] sm:$0xff] }
  0xe9   : > { %v966_v21 = vsel %vm963_vm6, %v952_v19, %v954_v16  ;;  %v960_v22 = vpop.permute.xlu1 %959  ;;  %1578 = vmatpush1.bf16.msra.mxu1 %v1248_v20 }
  0xea   : > { %1579 = vmatprep.subr.bf16.mxu1 %v3458_v23  ;;  %1442 = vmatpush1.bf16.msra.mxu0 %v966_v21 }
  0xec   : > { %v962_v25 = vpop.permute.xlu0 %961  ;;  %1557 = vmatmul.mubr.bf16.gmra.mrb[8].mxu1 %v3365_v13 }
  0xed   : > { %v969_v27 = vsel %vm963_vm6, %v960_v22, %v962_v25  ;;  %987 = vst.msk [vmem:[#allocation2 + $0x1f0] sm:$0xff] %vm416_vm0, %v962_v25  ;;  %v958_v28 = vpop.permute.xlu1 %957  ;;  %v1251_v29 = vld [vmem:[#allocation2 + $0x1d8] sm:$0xff]  ;;  %1564 = vmatprep.mubr.bf16.mxu1 %v3366_v15  ;;  %1425 = vmatmul.mubr.bf16.gmra.mrb[12].mxu0 %v3368_v24 }
  0xee   : > { %v968_v30 = vsel %vm963_vm6, %v958_v28, %v960_v22  ;;  %1580 = vmatpush1.bf16.msra.mxu1 %v1251_v29  ;;  %1443 = vmatprep.subr.bf16.mxu0 %v969_v27 }
  0xef   : > { %1581 = vmatprep.subr.bf16.mxu1 %v3458_v23  ;;  %1444 = vmatpush1.bf16.msra.mxu0 %v968_v30 }
  0xf0   : > { %v1042_v31 = vpop.permute.xlu0 %1041  ;;  %3090 = vmatprep.mubr.msk.bf16.mxu0 %vm1349_vm7, %v3371_v26 }
  0xf1   : > { %v1044_v32 = vpop.permute.xlu1 %1043 }
  0xf2   : > { %v1059_v33 = vsel %vm1057_vm8, %v1042_v31, %v1044_v32  ;;  %1075 = vst.msk [vmem:[#allocation2 + $0x208] sm:$0xff] %vm416_vm0, %v1044_v32 }
  0xf3   : > { %1445 = vmatprep.subr.bf16.mxu0 %v1059_v33 }
  0xf4   : > { %v1040_v34 = vpop.permute.xlu0 %1039  ;;  %v1254_v35 = vld [vmem:[#allocation2 + $0x1f0] sm:$0xff]  ;;  %1565 = vmatmul.mubr.bf16.gmra.mrb[12].mxu1 %v3368_v24 }
  0xf5   : > { %v1058_v36 = vsel %vm1057_vm8, %v1040_v34, %v1042_v31  ;;  %v1048_v37 = vpop.permute.xlu1 %1047  ;;  %1582 = vmatpush1.bf16.msra.mxu1 %v1254_v35  ;;  %3094 = vmatprep.mubr.msk.bf16.mxu1 %vm1349_vm7, %v3371_v26 }
  0xf6   : > { %1583 = vmatprep.subr.bf16.mxu1 %v3458_v23  ;;  %1446 = vmatpush1.bf16.msra.mxu0 %v1058_v36  ;;  %v1676_v36 = vlaneseq }
  0xf8   : > { %v1050_v38 = vpop.permute.xlu0 %1049 }
  0xf9   : > { %v1061_v39 = vsel %vm1057_vm8, %v1048_v37, %v1050_v38  ;;  %1078 = vst.msk [vmem:[#allocation2 + $0x220] sm:$0xff] %vm416_vm0, %v1050_v38  ;;  %v1046_v40 = vpop.permute.xlu1 %1045  ;;  %v1257_v41 = vld [vmem:[#allocation2 + $0x208] sm:$0xff] }
  0xfa   : > { %v1060_v42 = vsel %vm1057_vm8, %v1046_v40, %v1048_v37  ;;  %1584 = vmatpush1.bf16.msra.mxu1 %v1257_v41  ;;  %1447 = vmatprep.subr.bf16.mxu0 %v1061_v39  ;;  %v1677_v37 = vshrl.u32 %v1676_v36, 7 }
  0xfb   : > { %1585 = vmatprep.subr.bf16.mxu1 %v3458_v23  ;;  %1448 = vmatpush1.bf16.msra.mxu0 %v1060_v42  ;;  %v1674_v42 = vld [vmem:[%s4286_s8] sm:$0x7] }
  0xfc   : > { %v1054_v43 = vpop.permute.xlu0 %1053  ;;  %v1678_v39 = vsub.s32 0, %v1677_v37  ;;  %v1682_v40 = vsub.s32 1, %v1677_v37 }
  0xfd   : > { %v1056_v44 = vpop.permute.xlu1 %1055 }
  0xfe   : > { %v1063_v45 = vsel %vm1057_vm8, %v1054_v43, %v1056_v44  ;;  %1081 = vst.msk [vmem:[#allocation2 + $0x238] sm:$0xff] %vm416_vm0, %v1056_v44 }
  0xff   : > { %1449 = vmatprep.subr.bf16.mxu0 %v1063_v45 }
 0x100   : > { %v1052_v46 = vpop.permute.xlu0 %1051  ;;  %v1260_v47 = vld [vmem:[#allocation2 + $0x220] sm:$0xff] }
 0x101   : > { %v1062_v48 = vsel %vm1057_vm8, %v1052_v46, %v1054_v43  ;;  %v1136_v49 = vpop.permute.xlu1 %1135  ;;  %1586 = vmatpush1.bf16.msra.mxu1 %v1260_v47  ;;  %v1686_v47 = vsub.s32 2, %v1677_v37 }
 0x102   : > { %1587 = vmatprep.subr.bf16.mxu1 %v3458_v23  ;;  %1450 = vmatpush1.bf16.msra.mxu0 %v1062_v48 }
 0x104   : > { %v1138_v50 = vpop.permute.xlu0 %1137 }
 0x105   : > { %v1153_v51 = vsel %vm1151_vm9, %v1136_v49, %v1138_v50  ;;  %1169 = vst.msk [vmem:[#allocation2 + $0x250] sm:$0xff] %vm416_vm0, %v1138_v50  ;;  %v1134_v52 = vpop.permute.xlu1 %1133  ;;  %v1263_v53 = vld [vmem:[#allocation2 + $0x238] sm:$0xff] }
 0x106   : > { %v1152_v54 = vsel %vm1151_vm9, %v1134_v52, %v1136_v49  ;;  %1588 = vmatpush1.bf16.msra.mxu1 %v1263_v53  ;;  %1451 = vmatprep.subr.bf16.mxu0 %v1153_v51  ;;  %v3873_v49 = vrot.slane %v1674_v42, %v1678_v39  ;;  %v3877_v51 = vrot.slane %v1674_v42, %v1682_v40 }
 0x107   : > { %1589 = vmatprep.subr.bf16.mxu1 %v3458_v23  ;;  %1452 = vmatpush1.bf16.msra.mxu0 %v1152_v54 }
 0x108   : > { %v1142_v55 = vpop.permute.xlu0 %1141 }
 0x109   : > { %v1144_v56 = vpop.permute.xlu1 %1143 }
 0x10a   : > { %v1155_v57 = vsel %vm1151_vm9, %v1142_v55, %v1144_v56  ;;  %1172 = vst.msk [vmem:[#allocation2 + $0x268] sm:$0xff] %vm416_vm0, %v1144_v56 }
 0x10b   : > { %1453 = vmatprep.subr.bf16.mxu0 %v1155_v57 }
 0x10c   : > { %v1140_v58 = vpop.permute.xlu0 %1139  ;;  %v1266_v59 = vld [vmem:[#allocation2 + $0x250] sm:$0xff] }
 0x10d   : > { %v1154_v60 = vsel %vm1151_vm9, %v1140_v58, %v1142_v55  ;;  %v1148_v61 = vpop.permute.xlu1 %1147  ;;  %1590 = vmatpush1.bf16.msra.mxu1 %v1266_v59  ;;  %v3883_v58 = vrot.slane %v1674_v42, %v1686_v47 }
 0x10e   : > { %1591 = vmatprep.subr.bf16.mxu1 %v3458_v23  ;;  %1454 = vmatpush1.bf16.msra.mxu0 %v1154_v60 }
 0x110   : > { %v1150_v62 = vpop.permute.xlu0 %1149 }
 0x111   : > { %v1157_v63 = vsel %vm1151_vm9, %v1148_v61, %v1150_v62  ;;  %1175 = vst.msk [vmem:[#allocation2 + $0x280] sm:$0xff] %vm416_vm0, %v1150_v62  ;;  %v1146_v0 = vpop.permute.xlu1 %1145  ;;  %v1269_v1 = vld [vmem:[#allocation2 + $0x268] sm:$0xff] }
 0x112   : > { %v1156_v2 = vsel %vm1151_vm9, %v1146_v0, %v1148_v61  ;;  %1592 = vmatpush1.bf16.msra.mxu1 %v1269_v1  ;;  %1455 = vmatprep.subr.bf16.mxu0 %v1157_v63 }
 0x113   : > { %1593 = vmatprep.subr.bf16.mxu1 %v3458_v23  ;;  %1456 = vmatpush1.bf16.msra.mxu0 %v1156_v2 }
 0x116   : > { %1468 = vmatmul.mubr.bf16.vlgmr.msra.gmra.mrb[0].mxu0 %v3369_v3 }
 0x117   : > { %3091 = vmatprep.mubr.msk.bf16.mxu0 %vm1349_vm7, %v3372_v4 }
 0x118   : > { %v1272_v5 = vld [vmem:[#allocation2 + $0x280] sm:$0xff] }
 0x119   : > { %1594 = vmatpush1.bf16.msra.mxu1 %v1272_v5 }
 0x11c   : > { %1606 = vmatmul.mubr.bf16.vlgmr.msra.gmra.mrb[16].mxu1 %v3369_v3 }
 0x11d   : > { %3095 = vmatprep.mubr.msk.bf16.mxu1 %vm1349_vm7, %v3372_v4 }
 0x11e   : > { %1478 = vmatmul.mubr.bf16.gmra.mrb[4].mxu0 %v3374_v6 }
 0x11f   : > { %3092 = vmatprep.mubr.msk.bf16.mxu0 %vm1349_vm7, %v3375_v7 }
 0x121   : > { %v1645_v41 = vpop.permute.xlu0 %1644 }
 0x122   : > { %v1650_v45 = vpop.permute.xlu1 %1649 }
 0x124   : > { %1614 = vmatmul.mubr.bf16.gmra.mrb[20].mxu1 %v3374_v6 }
 0x125   : > { %3096 = vmatprep.mubr.msk.bf16.mxu1 %vm1349_vm7, %v3375_v7  ;;  %v1660_v7 = vpop.permute.xlu0 %1659 }
 0x126   : > { %1488 = vmatmul.mubr.bf16.gmra.mrb[8].mxu0 %v3377_v8  ;;  %v1655_v57 = vpop.permute.xlu1 %1654 }
 0x127   : > { %3093 = vmatprep.mubr.msk.bf16.mxu0 %vm1349_vm7, %v3378_v9 }
 0x12c   : > { %1622 = vmatmul.mubr.bf16.gmra.mrb[24].mxu1 %v3377_v8 }
 0x12d   : > { %3097 = vmatprep.mubr.msk.bf16.mxu1 %vm1349_vm7, %v3378_v9 }
 0x12e   : > { %1498 = vmatmul.mubr.bf16.gmra.mrb[12].mxu0 %v3380_v10 }
 0x134   : > { %1630 = vmatmul.mubr.bf16.gmra.mrb[28].mxu1 %v3380_v10 }
 0x1ad   : > { %v3135_v11 = vpop.f32.mrb[0].mxu1 }
 0x1ae   : > { %v3136_v12 = vpop.f32.mrb[1].mxu1 }
 0x1af   : > { %v3137_v13 = vadd.f32 %v3136_v12, %v3135_v11  ;;  %v3138_v14 = vpop.f32.mrb[2].mxu1 }
 0x1b0   : > { %v3139_v15 = vpop.f32.mrb[3].mxu1 }
 0x1b1   : > { %v3140_v16 = vadd.f32 %v3139_v15, %v3138_v14 }
 0x1b7   : > { %v3141_v17 = vpop.f32.mrb[4].mxu1 }
 0x1b8   : > { %v3142_v18 = vpop.f32.mrb[5].mxu1 }
 0x1b9   : > { %v3856_v19 = vadd.f32 %v3142_v18, %v3141_v17  ;;  %v3144_v20 = vpop.f32.mrb[6].mxu1 }
 0x1ba   : > { %v3145_v21 = vpop.f32.mrb[7].mxu1 }
 0x1bb   : > { %v3858_v22 = vadd.f32 %v3145_v21, %v3144_v20 }
 0x1bf   : > { %v3147_v24 = vpop.f32.mrb[8].mxu1 }
 0x1c0   : > { %v3148_v25 = vpop.f32.mrb[9].mxu1 }
 0x1c1   : > { %v3860_v26 = vadd.f32 %v3148_v25, %v3147_v24  ;;  %v3150_v27 = vpop.f32.mrb[10].mxu1 }
 0x1c2   : > { %v3151_v28 = vpop.f32.mrb[11].mxu1 }
 0x1c3   : > { %v3862_v29 = vadd.f32 %v3151_v28, %v3150_v27 }
 0x1c7   : > { %v3153_v30 = vpop.f32.mrb[12].mxu1 }
 0x1c8   : > { %v3154_v31 = vpop.f32.mrb[13].mxu1 }
 0x1c9   : > { %v3864_v32 = vadd.f32 %v3154_v31, %v3153_v30  ;;  %v3156_v33 = vpop.f32.mrb[14].mxu1 }
 0x1ca   : > { %v3157_v34 = vpop.f32.mrb[15].mxu1 }
 0x1cb   : > { %v3866_v35 = vadd.f32 %v3157_v34, %v3156_v33 }
 0x1e9   : > { %v1469_v38 = vpop.f32.mrb[0].mxu0 }
 0x1ea   : > { %v1471_v43 = vpop.f32.mrb[1].mxu0  ;;  %v3871_v48 = vadd.f32 %v1645_v41, %v1469_v38 }
 0x1eb   : > { %v1473_v44 = vpop.f32.mrb[2].mxu0  ;;  %v3875_v50 = vadd.f32 %v1645_v41, %v1471_v43 }
 0x1ec   : > { %v1475_v46 = vpop.f32.mrb[3].mxu0  ;;  %v3879_v53 = vadd.f32 %v1650_v45, %v1473_v44  ;;  %v1691_v59 = vmul.f32 %v3873_v49, %v3871_v48 }
 0x1ed   : > { %v3881_v54 = vadd.f32 %v1650_v45, %v1475_v46  ;;  %v1692_v61 = vmul.f32 %v3877_v51, %v3875_v50 }
 0x1ee   : > { %v1694_v3 = vmul.f32 %v3873_v49, %v3879_v53 }
 0x1ef   : > { %v1607_v52 = vpop.f32.mrb[16].mxu1  ;;  %v1695_v4 = vmul.f32 %v3877_v51, %v3881_v54  ;;  %v1703_v12 = vadd.f32 %v1692_v61, %v1691_v59  ;;  %v1724_v42 = vmul.f32 %v1692_v61, %v3875_v50 }
 0x1f0   : > { %v1608_v55 = vadd.f32 %v3137_v13, %v1607_v52  ;;  %v1609_v56 = vpop.f32.mrb[17].mxu1  ;;  %v1726_v46 = vmul.f32 %v1694_v3, %v3879_v53 }
 0x1f1   : > { %v1610_v60 = vpop.f32.mrb[18].mxu1  ;;  %v1479_v62 = vpop.f32.mrb[4].mxu0  ;;  %v1708_v20 = vadd.f32 %v1695_v4, %v1694_v3  ;;  %v1727_v47 = vmul.f32 %v1695_v4, %v3881_v54 }
 0x1f2   : > { %v3889_v63 = vadd.f32 %v1645_v41, %v1608_v55  ;;  %v1611_v0 = vadd.f32 %v3140_v16, %v1610_v60  ;;  %v1612_v1 = vpop.f32.mrb[19].mxu1  ;;  %v1481_v2 = vpop.f32.mrb[5].mxu0  ;;  %v3899_v10 = vadd.f32 %v1655_v57, %v1479_v62  ;;  %v1723_v41 = vmul.f32 %v1691_v59, %v3871_v48 }
 0x1f3   : > { %v1483_v5 = vpop.f32.mrb[6].mxu0  ;;  %v3901_v11 = vadd.f32 %v1655_v57, %v1481_v2 }
 0x1f4   : > { %v3895_v6 = vadd.f32 %v1650_v45, %v1611_v0  ;;  %v1693_v8 = vmul.f32 %v3883_v58, %v3889_v63  ;;  %v1485_v9 = vpop.f32.mrb[7].mxu0  ;;  %v3906_v17 = vadd.f32 %v1660_v7, %v1483_v5  ;;  %v1697_v27 = vmul.f32 %v3873_v49, %v3899_v10 }
 0x1f5   : > { %v3908_v18 = vadd.f32 %v1660_v7, %v1485_v9  ;;  %v1698_v30 = vmul.f32 %v3877_v51, %v3901_v11  ;;  %v1735_v4 = vadd.f32 %v1724_v42, %v1723_v41  ;;  %v2033_v41 = vld [vmem:[%s4281_s3 + $0x18] sm:$0xff] }
 0x1f6   : > { %v1704_v13 = vsel %vm416_vm0, %v1693_v8, 0.0  ;;  %v1696_v14 = vmul.f32 %v3883_v58, %v3895_v6  ;;  %v1725_v40 = vmul.f32 %v1693_v8, %v3889_v63  ;;  %v1729_v0 = vmul.f32 %v1697_v27, %v3899_v10 }
 0x1f7   : > { %v1615_v15 = vpop.f32.mrb[20].mxu1  ;;  %v1705_v16 = vadd.f32 %v1704_v13, %v1703_v12  ;;  %v1701_v37 = vmul.f32 %v3877_v51, %v3908_v18  ;;  %v1730_v1 = vmul.f32 %v1698_v30, %v3901_v11 }
 0x1f8   : > { %v1616_v21 = vadd.f32 %v3856_v19, %v1615_v15  ;;  %v1617_v24 = vpop.f32.mrb[21].mxu1  ;;  %v1709_v25 = vsel %vm416_vm0, %v1696_v14, 0.0  ;;  %v1700_v19 = vmul.f32 %v3873_v49, %v3906_v17  ;;  %v1728_v45 = vmul.f32 %v1696_v14, %v3895_v6 }
 0x1f9   : > { %v1618_v28 = vpop.f32.mrb[22].mxu1  ;;  %1706 = vadd.xlane.f32.xlu1 %v1705_v16  ;;  %v1710_v31 = vadd.f32 %v1709_v25, %v1708_v20  ;;  %v1736_v61 = vsel %vm416_vm0, %v1725_v40, 0.0  ;;  %v1733_v12 = vmul.f32 %v1701_v37, %v3908_v18  ;;  %v1740_v14 = vadd.f32 %v1727_v47, %v1726_v46  ;;  %v2032_v40 = vld [vmem:[%s4281_s3 + $0x10] sm:$0xff] }
 0x1fa   : > { %v3916_v33 = vadd.f32 %v1655_v57, %v1616_v21  ;;  %v1619_v34 = vadd.f32 %v3858_v22, %v1618_v28  ;;  %v1620_v36 = vpop.f32.mrb[23].mxu1  ;;  %v1713_v22 = vadd.f32 %v1698_v30, %v1697_v27  ;;  %v1718_v56 = vadd.f32 %v1701_v37, %v1700_v19  ;;  %v2066_v37 = vld [vmem:[%s3970_s28] sm:$0xff] }
 0x1fb   : > { %1711 = vadd.xlane.f32.xlu0 %v1710_v31  ;;  %v1732_v9 = vmul.f32 %v1700_v19, %v3906_v17  ;;  %v1737_v13 = vadd.f32 %v1736_v61, %v1735_v4  ;;  %v1745_v20 = vadd.f32 %v1730_v1, %v1729_v0  ;;  %v1755_v19 = vld [vmem:[%s4285_s7] sm:$0xff] }
 0x1fc   : > { %v3923_v38 = vadd.f32 %v1660_v7, %v1619_v34  ;;  %v1699_v39 = vmul.f32 %v3883_v58, %v3916_v33  ;;  %v1741_v7 = vsel %vm416_vm0, %v1728_v45, 0.0  ;;  %3215 = vmatprep.mubr.msk.f32.mxu1 %vm1759_vm10, %v1755_v19 }
 0x1fd   : > { %v1742_v16 = vadd.f32 %v1741_v7, %v1740_v14  ;;  %v1750_v25 = vadd.f32 %v1733_v12, %v1732_v9 }
 0x1fe   : > { %v1714_v43 = vsel %vm416_vm0, %v1699_v39, 0.0  ;;  %v1702_v44 = vmul.f32 %v3883_v58, %v3923_v38  ;;  %v1731_v62 = vmul.f32 %v1699_v39, %v3916_v33  ;;  %v2067_v39 = vld [vmem:[%s3970_s28 + $0x8] sm:$0xff] }
 0x1ff   : > { %v1623_v52 = vpop.f32.mrb[24].mxu1  ;;  %v1715_v55 = vadd.f32 %v1714_v43, %v1713_v22 }
 0x200   : > { %v3937_v57 = vadd.f32 %v3860_v26, %v1623_v52  ;;  %v1625_v59 = vpop.f32.mrb[25].mxu1  ;;  %v1719_v60 = vsel %vm416_vm0, %v1702_v44, 0.0  ;;  %v1734_v8 = vmul.f32 %v1702_v44, %v3923_v38  ;;  %v1746_v15 = vsel %vm416_vm0, %v1731_v62, 0.0  ;;  %v1758_v62 = vld [vmem:[%s4285_s7 + $0x18] sm:$0xff] }
 0x201   : > { %v1626_v2 = vpop.f32.mrb[26].mxu1  ;;  %1716 = vadd.xlane.f32.xlu0 %v1715_v55  ;;  %v1720_v3 = vadd.f32 %v1719_v60, %v1718_v56  ;;  %v1747_v24 = vadd.f32 %v1746_v15, %v1745_v20  ;;  %v1756_v55 = vld [vmem:[%s4285_s7 + $0x8] sm:$0xff]  ;;  %v1757_v59 = vld [vmem:[%s4285_s7 + $0x10] sm:$0xff] }
 0x202   : > { %v3945_v5 = vadd.f32 %v3862_v29, %v1626_v2  ;;  %v1628_v26 = vpop.f32.mrb[27].mxu1  ;;  %v1751_v29 = vsel %vm416_vm0, %v1734_v8, 0.0 }
 0x203   : > { %1721 = vadd.xlane.f32.xlu1 %v1720_v3  ;;  %v1752_v31 = vadd.f32 %v1751_v29, %v1750_v25 }
 0x205   : > { %1738 = vadd.xlane.f32.xlu0 %v1737_v13 }
 0x207   : > { %v1631_v21 = vpop.f32.mrb[28].mxu1  ;;  %1743 = vadd.xlane.f32.xlu1 %v1742_v16 }
 0x208   : > { %v3954_v27 = vadd.f32 %v3864_v32, %v1631_v21  ;;  %v1633_v28 = vpop.f32.mrb[29].mxu1  ;;  %v2030_v32 = vld [vmem:[%s4281_s3] sm:$0xff] }
 0x209   : > { %v1634_v30 = vpop.f32.mrb[30].mxu1  ;;  %1748 = vadd.xlane.f32.xlu0 %v1747_v24 }
 0x20a   : > { %v3957_v34 = vadd.f32 %v3866_v35, %v1634_v30  ;;  %v1636_v36 = vpop.f32.mrb[31].mxu1  ;;  %v2031_v35 = vld [vmem:[%s4281_s3 + $0x8] sm:$0xff] }
 0x20b   : > { %1753 = vadd.xlane.f32.xlu1 %v1752_v31 }
 0x21c   : > { %2036 = vperm.xlu1 %3320, %v2030_v32  }
 0x21f   : > { %2041 = vperm.xlu0 %3319, %v2031_v35  }
 0x220   : > { %2072 = vperm.xlu1 %3320, %v2066_v37  }
 0x223   : > { %2077 = vperm.xlu0 %3319, %v2067_v39  }
 0x224   : > { %2046 = vperm.xlu1 %3320, %v2032_v40  }
 0x227   : > { %2051 = vperm.xlu0 %3319, %v2033_v41  }
 0x286   : > { %v1707_v42 = vpop.xlane.xlu1 %1706 }
 0x288   : > { %v1712_v22 = vpop.xlane.xlu0 %1711 }
 0x289   : > { %v3243_v43 = vpack.c.bf16 %v1712_v22, %v1707_v42 }
 0x28b   : > { %3244 = vmatprep.subr.bf16.mxu1 %v3243_v43 }
 0x28c   : > { %3246 = vmatpush3.bf16.msra.mxu1 %v3243_v43 }
 0x28e   : > { %v1717_v44 = vpop.xlane.xlu0 %1716 }
 0x290   : > { %v1722_v45 = vpop.xlane.xlu1 %1721 }
 0x291   : > { %v3247_v46 = vpack.c.bf16 %v1722_v45, %v1717_v44  ;;  %v2069_v44 = vld [vmem:[%s3970_s28 + $0x18] sm:$0xff]  ;;  %v2068_v45 = vld [vmem:[%s3970_s28 + $0x10] sm:$0xff]  ;;  %s3462_s28 = smov 19  }
 0x292   : > { %v1739_v47 = vpop.xlane.xlu0 %1738 }
 0x293   : > { %3248 = vmatprep.subr.bf16.mxu1 %v3247_v46 }
 0x294   : > { %3250 = vmatpush3.bf16.msra.mxu1 %v3247_v46  ;;  %v1744_v52 = vpop.xlane.xlu1 %1743 }
 0x295   : > { %v3251_v56 = vpack.c.bf16 %v1744_v52, %v1739_v47 }
 0x296   : > { %v1749_v60 = vpop.xlane.xlu0 %1748 }
 0x297   : > { %3216 = vmatmul.mubr.msk.f32.vlgmr.msra.gmra.mrb[32].mxu1 %vm1759_vm10, %v1756_v55  ;;  %3252 = vmatprep.subr.bf16.mxu1 %v3251_v56 }
 0x298   : > { %3254 = vmatpush3.bf16.msra.mxu1 %v3251_v56  ;;  %v1754_v61 = vpop.xlane.xlu1 %1753  ;;  %3218 = vmatprep.mubr.msk.f32.mxu1 %vm1759_vm10, %v1757_v59 }
 0x299   : > { %v3255_v0 = vpack.c.bf16 %v1754_v61, %v1749_v60 }
 0x29b   : > { %3219 = vmatmul.mubr.msk.f32.gmra.mrb[34].mxu1 %vm1759_vm10, %v1758_v62  ;;  %3256 = vmatprep.subr.bf16.mxu1 %v3255_v0 }
 0x29c   : > { %3258 = vmatpush3.bf16.msra.mxu1 %v3255_v0  ;;  %3229 = vmatprep.mubr.msk.f32.mxu1 %vm1759_vm10, %v1755_v19  ;;  %v2037_v47 = vpop.permute.xlu1 %2036 }
 0x29e   : > { %v2042_v46 = vpop.permute.xlu0 %2041 }
 0x29f   : > { %3230 = vmatmul.mubr.msk.f32.vlgmr.msra.gmra.mrb[36].mxu1 %vm1759_vm10, %v1756_v55 }
 0x2a0   : > { %3232 = vmatprep.mubr.msk.f32.mxu1 %vm1759_vm10, %v1757_v59  ;;  %v2073_v55 = vpop.permute.xlu1 %2072 }
 0x2a2   : > { %v2078_v52 = vpop.permute.xlu0 %2077 }
 0x2a3   : > { %3233 = vmatmul.mubr.msk.f32.gmra.mrb[38].mxu1 %vm1759_vm10, %v1758_v62 }
 0x2a4   : > { %2774 = vmatprep.mubr.bf16.mxu1 %v3458_v23  ;;  %v4002_v59 = vpop.permute.xlu1 %2046 }
 0x2a6   : > { %v2052_v56 = vpop.permute.xlu0 %2051 }
 0x36a   : > { %v3217_v1 = vpop.f32.mrb[32].mxu1 }
 0x36b   : > { %v1858_v2 = vmul.f32 0.001953125, %v3217_v1  ;;  %v1838_v3 = vpop.f32.mrb[33].mxu1 }
 0x36c   : > { %v1857_v4 = vmul.f32 0.001953125, %v1838_v3 }
 0x36d   : > { %1973 = vperm.xlu1 %3320, %v1858_v2   ;;  %v1951_v13 = vmul.f32 %v1858_v2, %v1858_v2 }
 0x36e   : > { %1968 = vperm.xlu0 %3319, %v1857_v4   ;;  %v3220_v26 = vpop.f32.mrb[34].mxu1  ;;  %v1950_v16 = vmul.f32 %v1857_v4, %v1857_v4 }
 0x36f   : > { %v1860_v7 = vmul.f32 0.001953125, %v3220_v26  ;;  %v1848_v8 = vpop.f32.mrb[35].mxu1 }
 0x370   : > { %v1859_v9 = vmul.f32 0.001953125, %v1848_v8 }
 0x371   : > { %v1953_v25 = vmul.f32 %v1860_v7, %v1860_v7 }
 0x372   : > { %1983 = vperm.xlu0 %3319, %v1860_v7   ;;  %1978 = vperm.xlu1 %3320, %v1859_v9   ;;  %v3231_v12 = vpop.f32.mrb[36].mxu1  ;;  %v1952_v36 = vmul.f32 %v1859_v9, %v1859_v9 }
 0x373   : > { %v1947_v14 = vmul.f32 0.001953125, %v3231_v12  ;;  %v1927_v15 = vpop.f32.mrb[37].mxu1 }
 0x374   : > { %v1946_v20 = vmul.f32 0.001953125, %v1927_v15 }
 0x375   : > { %v1955_v29 = vsub.f32 %v1947_v14, %v1951_v13 }
 0x376   : > { %v1954_v21 = vsub.f32 %v1946_v20, %v1950_v16  ;;  %v3234_v24 = vpop.f32.mrb[38].mxu1 }
 0x377   : > { %v1959_v28 = vadd.f32 1e-06, %v1955_v29  ;;  %v1949_v30 = vmul.f32 0.001953125, %v3234_v24  ;;  %v1937_v31 = vpop.f32.mrb[39].mxu1 }
 0x378   : > { %v1958_v19 = vadd.f32 1e-06, %v1954_v21  ;;  %v1948_v32 = vmul.f32 0.001953125, %v1937_v31 }
 0x379   : > { %3389 = vrsqrt.f32 %v1959_v28  ;;  %v1957_v35 = vsub.f32 %v1949_v30, %v1953_v25 }
 0x37a   : > { %3391 = vrsqrt.f32 %v1958_v19  ;;  %v1956_v37 = vsub.f32 %v1948_v32, %v1952_v36 }
 0x37b   : > { %v1961_v39 = vadd.f32 1e-06, %v1957_v35 }
 0x37c   : > { %v1960_v40 = vadd.f32 1e-06, %v1956_v37 }
 0x37d   : > { %3393 = vrsqrt.f32 %v1961_v39 }
 0x37e   : > { %3395 = vrsqrt.f32 %v1960_v40 }
 0x383   : > { %v3390_v41 = vpop.eup %3389 }
 0x384   : > { %v3392_v42 = vpop.eup %3391  ;;  %2005 = vperm.xlu0 %3319, %v3390_v41  }
 0x385   : > { %2000 = vperm.xlu1 %3320, %v3392_v42  }
 0x387   : > { %v3394_v22 = vpop.eup %3393 }
 0x388   : > { %v3396_v43 = vpop.eup %3395  ;;  %2015 = vperm.xlu0 %3319, %v3394_v22  }
 0x389   : > { %2010 = vperm.xlu1 %3320, %v3396_v43  }
 0x38c   : > { %2087 = vperm.xlu0 %3319, %v2069_v44  }
 0x38d   : > { %2082 = vperm.xlu1 %3320, %v2068_v45  }
 0x3ec   : > { %v1974_v61 = vpop.permute.xlu1 %1973 }
 0x3ed   : > { %v1969_v60 = vpop.permute.xlu0 %1968  ;;  %v1989_v1 = vsub.f32 %v3879_v53, %v1974_v61  ;;  %v1990_v2 = vsub.f32 %v3881_v54, %v1974_v61  ;;  %v1991_v3 = vsub.f32 %v3895_v6, %v1974_v61 }
 0x3ee   : > { %v1986_v4 = vsub.f32 %v3871_v48, %v1969_v60  ;;  %v1987_v26 = vsub.f32 %v3875_v50, %v1969_v60  ;;  %v1988_v7 = vsub.f32 %v3889_v63, %v1969_v60 }
 0x3f1   : > { %v1984_v62 = vpop.permute.xlu0 %1983  ;;  %v1979_v0 = vpop.permute.xlu1 %1978 }
 0x3f2   : > { %v1995_v8 = vsub.f32 %v3906_v17, %v1984_v62  ;;  %v1996_v9 = vsub.f32 %v3908_v18, %v1984_v62  ;;  %v1997_v13 = vsub.f32 %v3923_v38, %v1984_v62  ;;  %v1992_v54 = vsub.f32 %v3899_v10, %v1979_v0 }
 0x3f3   : > { %v1993_v50 = vsub.f32 %v3901_v11, %v1979_v0  ;;  %v1994_v17 = vsub.f32 %v3916_v33, %v1979_v0 }
 0x403   : > { %v2006_v12 = vpop.permute.xlu0 %2005 }
 0x404   : > { %v2021_v14 = vmul.f32 %v2006_v12, %v1989_v1  ;;  %v2022_v15 = vmul.f32 %v2006_v12, %v1990_v2  ;;  %v2023_v53 = vmul.f32 %v2006_v12, %v1991_v3  ;;  %v2001_v16 = vpop.permute.xlu1 %2000 }
 0x405   : > { %v2018_v6 = vmul.f32 %v2001_v16, %v1986_v4  ;;  %v2019_v20 = vmul.f32 %v2001_v16, %v1987_v26  ;;  %v2020_v48 = vmul.f32 %v2001_v16, %v1988_v7 }
 0x406   : > { %v2057_v29 = vmul.f32 %v2042_v46, %v2021_v14  ;;  %v2058_v63 = vmul.f32 %v2042_v46, %v2022_v15  ;;  %v2059_v21 = vmul.f32 %v2042_v46, %v2023_v53 }
 0x407   : > { %v2054_v18 = vmul.f32 %v2037_v47, %v2018_v6  ;;  %v2055_v24 = vmul.f32 %v2037_v47, %v2019_v20  ;;  %v2056_v25 = vmul.f32 %v2037_v47, %v2020_v48  ;;  %v2016_v38 = vpop.permute.xlu0 %2015 }
 0x408   : > { %v4016_v28 = vadd.f32 %v2078_v52, %v2057_v29  ;;  %v4018_v30 = vadd.f32 %v2078_v52, %v2058_v63  ;;  %v4020_v31 = vadd.f32 %v2078_v52, %v2059_v21  ;;  %v2027_v10 = vmul.f32 %v2016_v38, %v1995_v8  ;;  %v2011_v36 = vpop.permute.xlu1 %2010 }
 0x409   : > { %v4022_v19 = vadd.f32 %v2073_v55, %v2054_v18  ;;  %v4024_v11 = vadd.f32 %v2073_v55, %v2055_v24  ;;  %v4026_v32 = vadd.f32 %v2073_v55, %v2056_v25  ;;  %v2028_v35 = vmul.f32 %v2016_v38, %v1996_v9 }
 0x40a   : > { %v2105_v33 = vsub.f32 0.0, %v4016_v28  ;;  %v2106_v37 = vsub.f32 0.0, %v4018_v30  ;;  %v2107_v39 = vsub.f32 0.0, %v4020_v31  ;;  %v2029_v40 = vmul.f32 %v2016_v38, %v1997_v13 }
 0x40b   : > { %v2102_v41 = vsub.f32 0.0, %v4022_v19  ;;  %v2103_v42 = vsub.f32 0.0, %v4024_v11  ;;  %v2104_v22 = vsub.f32 0.0, %v4026_v32  ;;  %v2024_v43 = vmul.f32 %v2011_v36, %v1992_v54  ;;  %v2088_v61 = vpop.permute.xlu0 %2087 }
 0x40c   : > { %v2120_v44 = vmul.f32 1.442695, %v2105_v33  ;;  %v2122_v45 = vmul.f32 1.442695, %v2106_v37  ;;  %v2124_v46 = vmul.f32 1.442695, %v2107_v39  ;;  %v2025_v47 = vmul.f32 %v2011_v36, %v1993_v50  ;;  %v2083_v2 = vpop.permute.xlu1 %2082 }
 0x40d   : > { %v2114_v52 = vmul.f32 1.442695, %v2102_v41  ;;  %v2116_v55 = vmul.f32 1.442695, %v2103_v42  ;;  %v2026_v60 = vmul.f32 %v2011_v36, %v1994_v17  ;;  %v2063_v62 = vmul.f32 %v2052_v56, %v2027_v10 }
 0x40e   : > { %3397 = vpow2.f32 %v2120_v44  ;;  %v2064_v0 = vmul.f32 %v2052_v56, %v2028_v35  ;;  %v2065_v1 = vmul.f32 %v2052_v56, %v2029_v40  ;;  %v2118_v3 = vmul.f32 1.442695, %v2104_v22 }
 0x40f   : > { %3399 = vpow2.f32 %v2122_v45  ;;  %v2060_v4 = vmul.f32 %v4002_v59, %v2024_v43  ;;  %v2061_v26 = vmul.f32 %v4002_v59, %v2025_v47  ;;  %v4036_v7 = vadd.f32 %v2088_v61, %v2063_v62 }
 0x410   : > { %3401 = vpow2.f32 %v2124_v46  ;;  %v4038_v8 = vadd.f32 %v2088_v61, %v2064_v0  ;;  %v4040_v9 = vadd.f32 %v2088_v61, %v2065_v1  ;;  %v2062_v12 = vmul.f32 %v4002_v59, %v2026_v60 }
 0x411   : > { %3403 = vpow2.f32 %v2114_v52  ;;  %v4043_v13 = vadd.f32 %v2083_v2, %v2060_v4  ;;  %v4045_v56 = vadd.f32 %v2083_v2, %v2061_v26  ;;  %v2111_v14 = vsub.f32 0.0, %v4036_v7 }
 0x412   : > { %3405 = vpow2.f32 %v2116_v55  ;;  %v2112_v15 = vsub.f32 0.0, %v4038_v8  ;;  %v2113_v53 = vsub.f32 0.0, %v4040_v9  ;;  %v4052_v59 = vadd.f32 %v2083_v2, %v2062_v12 }
 0x413   : > { %3407 = vpow2.f32 %v2118_v3  ;;  %v2108_v16 = vsub.f32 0.0, %v4043_v13  ;;  %v2109_v54 = vsub.f32 0.0, %v4045_v56  ;;  %v2132_v6 = vmul.f32 1.442695, %v2111_v14 }
 0x414   : > { %v2134_v20 = vmul.f32 1.442695, %v2112_v15  ;;  %v2136_v48 = vmul.f32 1.442695, %v2113_v53  ;;  %v2110_v18 = vsub.f32 0.0, %v4052_v59 }
 0x415   : > { %v2126_v50 = vmul.f32 1.442695, %v2108_v16  ;;  %3409 = vpow2.f32 %v2132_v6  ;;  %v2128_v29 = vmul.f32 1.442695, %v2109_v54 }
 0x416   : > { %3411 = vpow2.f32 %v2134_v20  ;;  %v2130_v39 = vmul.f32 1.442695, %v2110_v18 }
 0x417   : > { %3413 = vpow2.f32 %v2136_v48 }
 0x418   : > { %v3398_v63 = vpop.eup %3397  ;;  %3415 = vpow2.f32 %v2126_v50 }
 0x419   : > { %v3400_v21 = vpop.eup %3399  ;;  %v2141_v17 = vadd.f32 1.0, %v3398_v63  ;;  %3417 = vpow2.f32 %v2128_v29 }
 0x41a   : > { %v3402_v24 = vpop.eup %3401  ;;  %v2142_v25 = vadd.f32 1.0, %v3400_v21 }
 0x41b   : > { %v3404_v38 = vpop.eup %3403  ;;  %v2143_v10 = vadd.f32 1.0, %v3402_v24  ;;  %3419 = vrcp.f32 %v2141_v17 }
 0x41c   : > { %v3406_v36 = vpop.eup %3405  ;;  %3421 = vrcp.f32 %v2142_v25  ;;  %v2138_v35 = vadd.f32 1.0, %v3404_v38 }
 0x41d   : > { %v3408_v33 = vpop.eup %3407  ;;  %3423 = vrcp.f32 %v2143_v10  ;;  %v2139_v37 = vadd.f32 1.0, %v3406_v36 }
 0x41e   : > { %v2140_v40 = vadd.f32 1.0, %v3408_v33  ;;  %3425 = vrcp.f32 %v2138_v35 }
 0x41f   : > { %3427 = vrcp.f32 %v2139_v37  ;;  %v3410_v41 = vpop.eup %3409 }
 0x420   : > { %3429 = vrcp.f32 %v2140_v40  ;;  %v3412_v42 = vpop.eup %3411  ;;  %v2147_v22 = vadd.f32 1.0, %v3410_v41 }
 0x421   : > { %3431 = vpow2.f32 %v2130_v39  ;;  %v3414_v43 = vpop.eup %3413  ;;  %v2148_v44 = vadd.f32 1.0, %v3412_v42 }
 0x422   : > { %v3416_v45 = vpop.eup %3415  ;;  %v2149_v47 = vadd.f32 1.0, %v3414_v43 }
 0x423   : > { %v3418_v46 = vpop.eup %3417  ;;  %3433 = vrcp.f32 %v2148_v44  ;;  %v2144_v52 = vadd.f32 1.0, %v3416_v45 }
 0x424   : > { %3435 = vrcp.f32 %v2147_v22  ;;  %v2145_v60 = vadd.f32 1.0, %v3418_v46 }
 0x425   : > { %v3420_v55 = vpop.eup %3419  ;;  %3437 = vrcp.f32 %v2144_v52 }
 0x426   : > { %v3422_v61 = vpop.eup %3421  ;;  %3439 = vrcp.f32 %v2145_v60  ;;  %v2165_v4 = vmul.f32 %v3420_v55, %v4016_v28  ;;  %v4150_v55 = vld [vmem:[%s4283_s5 + $0x4] ss:$12 sps:$4 sm:$0xff]   ;;  %v2630_v60 = vld [vmem:[%s4284_s6 + $0x8] sm:$0xff] }
 0x427   : > { %v3424_v62 = vpop.eup %3423  ;;  %v2166_v0 = vmul.f32 %v3422_v61, %v4018_v30  ;;  %3441 = vrcp.f32 %v2149_v47  ;;  %2721 = vmatprep.mubr.bf16.mxu0 %v4150_v55  ;;  %v2629_v61 = vld [vmem:[%s4284_s6] sm:$0xff] }
 0x428   : > { %v3426_v1 = vpop.eup %3425  ;;  %v2167_v2 = vmul.f32 %v3424_v62, %v4020_v31  ;;  %v2177_v28 = vmul.f32 %v2165_v4, %v3873_v49  ;;  %v2632_v62 = vld [vmem:[%s4284_s6 + $0x18] sm:$0xff] }
 0x429   : > { %v3428_v3 = vpop.eup %3427  ;;  %v2162_v26 = vmul.f32 %v3426_v1, %v4022_v19  ;;  %v2178_v15 = vmul.f32 %v2166_v0, %v3877_v51  ;;  %v2631_v0 = vld [vmem:[%s4284_s6 + $0x10] sm:$0xff] }
 0x42a   : > { %v3430_v12 = vpop.eup %3429  ;;  %v2163_v14 = vmul.f32 %v3428_v3, %v4024_v11  ;;  %v2179_v30 = vmul.f32 %v2167_v2, %v3883_v58 }
 0x42b   : > { %v3432_v53 = vpop.eup %3431  ;;  %v2164_v16 = vmul.f32 %v3430_v12, %v4026_v32  ;;  %v2174_v20 = vmul.f32 %v2162_v26, %v3873_v49 }
 0x42c   : > { %v2146_v54 = vadd.f32 1.0, %v3432_v53  ;;  %v2175_v6 = vmul.f32 %v2163_v14, %v3877_v51 }
 0x42d   : > { %v2176_v31 = vmul.f32 %v2164_v16, %v3883_v58  ;;  %v3434_v19 = vpop.eup %3433  ;;  %v2189_v21 = vpack.c.bf16 %v2177_v28, %v2174_v20 }
 0x42e   : > { %3443 = vrcp.f32 %v2146_v54  ;;  %v2190_v48 = vpack.c.bf16 %v2178_v15, %v2175_v6  ;;  %v3436_v11 = vpop.eup %3435  ;;  %v2172_v50 = vmul.f32 %v3434_v19, %v4038_v8 }
 0x42f   : > { %v2191_v29 = vpack.c.bf16 %v2179_v30, %v2176_v31  ;;  %v3438_v63 = vpop.eup %3437  ;;  %v2171_v18 = vmul.f32 %v3436_v11, %v4036_v7 }
 0x430   : > { %2203 = vrot.lane.b32.xlu1 %v2190_v48, %s3462_s28  ;;  %v3440_v32 = vpop.eup %3439  ;;  %v2184_v24 = vmul.f32 %v2172_v50, %v3877_v51  ;;  %v2168_v25 = vmul.f32 %v3438_v63, %v4043_v13 }
 0x431   : > { %2205 = vrot.lane.b32.xlu0 %v2191_v29, %s3462_s28  ;;  %v3442_v17 = vpop.eup %3441  ;;  %v2169_v38 = vmul.f32 %v3440_v32, %v4045_v56  ;;  %v2183_v36 = vmul.f32 %v2171_v18, %v3873_v49 }
 0x432   : > { %v2173_v8 = vmul.f32 %v3442_v17, %v4040_v9  ;;  %v2180_v35 = vmul.f32 %v2168_v25, %v3873_v49 }
 0x433   : > { %v2181_v10 = vmul.f32 %v2169_v38, %v3877_v51 }
 0x434   : > { %2201 = vrot.lane.b32.xlu1 %v2189_v21, %s3462_s28  ;;  %v2185_v7 = vmul.f32 %v2173_v8, %v3883_v58  ;;  %v2192_v40 = vpack.c.bf16 %v2183_v36, %v2180_v35 }
 0x435   : > { %v2193_v33 = vpack.c.bf16 %v2184_v24, %v2181_v10 }
 0x437   : > { %2209 = vrot.lane.b32.xlu0 %v2193_v33, %s3462_s28 }
 0x438   : > { %v3444_v37 = vpop.eup %3443 }
 0x439   : > { %v2170_v39 = vmul.f32 %v3444_v37, %v4052_v59 }
 0x43b   : > { %v2182_v13 = vmul.f32 %v2170_v39, %v3883_v58  ;;  %2207 = vrot.lane.b32.xlu0 %v2192_v40, %s3462_s28 }
 0x43d   : > { %v2194_v56 = vpack.c.bf16 %v2185_v7, %v2182_v13 }
 0x43f   : > { %2211 = vrot.lane.b32.xlu1 %v2194_v56, %s3462_s28 }
 0x4a2   : > { %v2204_v51 = vpop.permute.xlu1 %2203 }
 0x4a3   : > { %v2206_v9 = vpop.permute.xlu0 %2205 }
 0x4a4   : > { %v2215_v41 = vsel %vm2186_vm11, %v2204_v51, %v2206_v9  ;;  %v4198_v9 = vld [vmem:[%s4283_s5 + $0x8] ss:$12 sps:$4 sm:$0xff]  }
 0x4a5   : > { %2228 = vst.msk [vmem:[#allocation4 + $0x10] sm:$0xff] %vm2227_vm12, %v2215_v41 }
 0x4a6   : > { %2233 = vst.msk [vmem:[#allocation4 + $0x10] sm:$0xff] %vm2232_vm13, %v3458_v23  ;;  %v2202_v49 = vpop.permute.xlu1 %2201 }
 0x4a7   : > { %v4088_v59 = vsel %vm2186_vm11, %v2202_v49, %v2204_v51  ;;  %2225 = vst.msk [vmem:[#allocation4] sm:$0xff] %vm2224_vm14, %v2202_v49 }
 0x4a8   : > { %2689 = vmatprep.subr.bf16.mxu0 %v4088_v59 }
 0x4a9   : > { %v2210_v58 = vpop.permute.xlu0 %2209 }
 0x4ad   : > { %v2249_v42 = vld [vmem:[#allocation4 + $0x10] sm:$0xff]  ;;  %v2208_v43 = vpop.permute.xlu0 %2207 }
 0x4ae   : > { %v2235_v22 = vld [vmem:[#allocation4] sm:$0xff]  ;;  %2243 = vst.msk [vmem:[#allocation3 + $0x10] sm:$0xff] %vm416_vm0, %v2249_v42  ;;  %v2216_v44 = vsel %vm2186_vm11, %v2208_v43, %v2210_v58 }
 0x4af   : > { %2229 = vst.msk [vmem:[#allocation4 + $0x18] sm:$0xff] %vm2224_vm14, %v2208_v43  ;;  %2539 = vrot.lane.b32.xlu0 %v2235_v22, %s3461_s24  ;;  %2259 = vrot.lane.b32.xlu1 %v2235_v22, %s3453_s15 }
 0x4b0   : > { %2690 = vmatpush1.bf16.msra.mxu0 %v2235_v22 }
 0x4b1   : > { %v2212_v45 = vpop.permute.xlu1 %2211  ;;  %2691 = vmatprep.subr.bf16.mxu0 %v2216_v44 }
 0x4b2   : > { %v2217_v46 = vsel %vm2186_vm11, %v2210_v58, %v2212_v45 }
 0x4b3   : > { %2231 = vst.msk [vmem:[#allocation4 + $0x28] sm:$0xff] %vm2227_vm12, %v2217_v46  ;;  %2263 = vrot.lane.b32.xlu0 %v2249_v42, %s3453_s15  ;;  %2299 = vrot.lane.b32.xlu1 %v2235_v22, %s3454_s16  ;;  %v4211_v46 = vld [vmem:[%s4283_s5 + $0x20] ss:$12 sps:$4 sm:$0xff]  }
 0x4b4   : > { %2234 = vst.msk [vmem:[#allocation4 + $0x28] sm:$0xff] %vm2232_vm13, %v3458_v23 }
 0x4b5   : > { %v2577_v58 = vld [vmem:[#allocation3 + $0x10] sm:$0xff] }
 0x4b6   : > { %v2238_v47 = vld [vmem:[#allocation4 + $0x18] sm:$0xff] }
 0x4b7   : > { %2303 = vrot.lane.b32.xlu0 %v2249_v42, %s3454_s16  ;;  %2339 = vrot.lane.b32.xlu1 %v2235_v22, %s3455_s17 }
 0x4b8   : > { %2692 = vmatpush1.bf16.msra.mxu0 %v2238_v47 }
 0x4bb   : > { %2543 = vrot.lane.b32.xlu0 %v2249_v42, %s3461_s24  ;;  %2261 = vrot.lane.b32.xlu1 %v4088_v59, %s3453_s15  ;;  %v2292_v52 = vld [vmem:[#allocation4 + $0x28] sm:$0xff] }
 0x4bc   : > { %2246 = vst.msk [vmem:[#allocation3 + $0x28] sm:$0xff] %vm416_vm0, %v2292_v52 }
 0x4bf   : > { %2343 = vrot.lane.b32.xlu0 %v2249_v42, %s3455_s17  ;;  %2301 = vrot.lane.b32.xlu1 %v4088_v59, %s3454_s16 }
 0x4c3   : > { %2383 = vrot.lane.b32.xlu0 %v2249_v42, %s3456_s18  ;;  %2541 = vrot.lane.b32.xlu1 %v4088_v59, %s3461_s24 }
 0x4c7   : > { %2265 = vrot.lane.b32.xlu0 %v2238_v47, %s3453_s15  ;;  %2341 = vrot.lane.b32.xlu1 %v4088_v59, %s3455_s17 }
 0x4cb   : > { %2545 = vrot.lane.b32.xlu0 %v2238_v47, %s3461_s24  ;;  %2305 = vrot.lane.b32.xlu1 %v2238_v47, %s3454_s16 }
 0x4cf   : > { %2267 = vrot.lane.b32.xlu0 %v2216_v44, %s3453_s15  ;;  %2307 = vrot.lane.b32.xlu1 %v2216_v44, %s3454_s16 }
 0x4d3   : > { %2379 = vrot.lane.b32.xlu0 %v2235_v22, %s3456_s18  ;;  %2547 = vrot.lane.b32.xlu1 %v2216_v44, %s3461_s24 }
 0x4d7   : > { %2387 = vrot.lane.b32.xlu0 %v2216_v44, %s3456_s18  ;;  %2347 = vrot.lane.b32.xlu1 %v2216_v44, %s3455_s17 }
 0x4db   : > { %2309 = vrot.lane.b32.xlu0 %v2292_v52, %s3454_s16  ;;  %2269 = vrot.lane.b32.xlu1 %v2292_v52, %s3453_s15  ;;  %s3300_s16 = smul.u32 96, %s4289_s10 }
 0x4df   : > { %2549 = vrot.lane.b32.xlu0 %v2292_v52, %s3461_s24  ;;  %2345 = vrot.lane.b32.xlu1 %v2238_v47, %s3455_s17 }
 0x4e3   : > { %2419 = vrot.lane.b32.xlu0 %v2235_v22, %s3457_s21  ;;  %2381 = vrot.lane.b32.xlu1 %v4088_v59, %s3456_s18 }
 0x4e7   : > { %2349 = vrot.lane.b32.xlu0 %v2292_v52, %s3455_s17  ;;  %2423 = vrot.lane.b32.xlu1 %v2249_v42, %s3457_s21 }
 0x4eb   : > { %2389 = vrot.lane.b32.xlu0 %v2292_v52, %s3456_s18  ;;  %2385 = vrot.lane.b32.xlu1 %v2238_v47, %s3456_s18 }
 0x4ef   : > { %2427 = vrot.lane.b32.xlu0 %v2216_v44, %s3457_s21  ;;  %2421 = vrot.lane.b32.xlu1 %v4088_v59, %s3457_s21 }
 0x4f3   : > { %2429 = vrot.lane.b32.xlu0 %v2292_v52, %s3457_s21  ;;  %2463 = vrot.lane.b32.xlu1 %v2249_v42, %s3459_s22 }
 0x4f7   : > { %2459 = vrot.lane.b32.xlu0 %v2235_v22, %s3459_s22  ;;  %2425 = vrot.lane.b32.xlu1 %v2238_v47, %s3457_s21  ;;  %s4253_s21 = scalar_lea.vmem %s4287_s9, %s3300_s16 }
 0x4fb   : > { %2469 = vrot.lane.b32.xlu0 %v2292_v52, %s3459_s22  ;;  %2461 = vrot.lane.b32.xlu1 %v4088_v59, %s3459_s22 }
 0x4ff   : > { %2467 = vrot.lane.b32.xlu0 %v2216_v44, %s3459_s22  ;;  %2503 = vrot.lane.b32.xlu1 %v2249_v42, %s3460_s23 }
 0x503   : > { %2509 = vrot.lane.b32.xlu0 %v2292_v52, %s3460_s23  ;;  %2465 = vrot.lane.b32.xlu1 %v2238_v47, %s3459_s22 }
 0x507   : > { %2499 = vrot.lane.b32.xlu0 %v2235_v22, %s3460_s23  ;;  %2501 = vrot.lane.b32.xlu1 %v4088_v59, %s3460_s23 }
 0x50b   : > { %2505 = vrot.lane.b32.xlu0 %v2238_v47, %s3460_s23  ;;  %2507 = vrot.lane.b32.xlu1 %v2216_v44, %s3460_s23 }
 0x50f   : > { %2640 = vperm.xlu0 %3319, %v2630_v60   ;;  %2635 = vperm.xlu1 %3320, %v2629_v61  }
 0x513   : > { %2650 = vperm.xlu0 %3319, %v2632_v62   ;;  %2645 = vperm.xlu1 %3320, %v2631_v0  }
 0x521   : > { %v2540_v1 = vpop.permute.xlu0 %2539  ;;  %v2260_v2 = vpop.permute.xlu1 %2259 }
 0x525   : > { %v2264_v3 = vpop.permute.xlu0 %2263  ;;  %v2300_v4 = vpop.permute.xlu1 %2299 }
 0x526   : > { %2283 = vst.msk [vmem:[#allocation3 + $0x40] sm:$0xff] %vm416_vm0, %v2264_v3 }
 0x529   : > { %v2304_v26 = vpop.permute.xlu0 %2303  ;;  %v2340_v12 = vpop.permute.xlu1 %2339 }
 0x52a   : > { %2323 = vst.msk [vmem:[#allocation3 + $0x70] sm:$0xff] %vm416_vm0, %v2304_v26 }
 0x52d   : > { %v2544_v14 = vpop.permute.xlu0 %2543  ;;  %v2262_v15 = vpop.permute.xlu1 %2261 }
 0x52e   : > { %2563 = vst.msk [vmem:[#allocation3 + $0x190] sm:$0xff] %vm416_vm0, %v2544_v14  ;;  %v2271_v53 = vsel %vm493_vm1, %v2260_v2, %v2262_v15  ;;  %v2272_v16 = vsel %vm493_vm1, %v2262_v15, %v2264_v3  ;;  %v2580_v2 = vld [vmem:[#allocation3 + $0x28] sm:$0xff] }
 0x52f   : > { %2693 = vmatprep.subr.bf16.mxu0 %v2272_v16  ;;  %v2583_v16 = vld [vmem:[#allocation3 + $0x40] sm:$0xff] }
 0x530   : > { %2694 = vmatpush1.bf16.msra.mxu0 %v2271_v53 }
 0x531   : > { %v2344_v30 = vpop.permute.xlu0 %2343  ;;  %v2302_v54 = vpop.permute.xlu1 %2301 }
 0x532   : > { %2363 = vst.msk [vmem:[#allocation3 + $0xa0] sm:$0xff] %vm416_vm0, %v2344_v30  ;;  %v2311_v6 = vsel %vm587_vm2, %v2300_v4, %v2302_v54  ;;  %v2312_v31 = vsel %vm587_vm2, %v2302_v54, %v2304_v26 }
 0x535   : > { %v2384_v20 = vpop.permute.xlu0 %2383  ;;  %v2542_v28 = vpop.permute.xlu1 %2541 }
 0x536   : > { %2403 = vst.msk [vmem:[#allocation3 + $0xd0] sm:$0xff] %vm416_vm0, %v2384_v20  ;;  %v2551_v19 = vsel %vm1151_vm9, %v2540_v1, %v2542_v28  ;;  %v2552_v48 = vsel %vm1151_vm9, %v2542_v28, %v2544_v14 }
 0x537   : > { %2742 = vmatprep.subr.bf16.mxu1 %v2552_v48 }
 0x538   : > { %2743 = vmatpush1.bf16.msra.mxu1 %v2551_v19 }
 0x539   : > { %v2266_v11 = vpop.permute.xlu0 %2265  ;;  %v2342_v50 = vpop.permute.xlu1 %2341 }
 0x53a   : > { %v2351_v29 = vsel %vm681_vm3, %v2340_v12, %v2342_v50  ;;  %v2352_v63 = vsel %vm681_vm3, %v2342_v50, %v2344_v30 }
 0x53d   : > { %v2546_v32 = vpop.permute.xlu0 %2545  ;;  %v2306_v21 = vpop.permute.xlu1 %2305  ;;  %v2601_v41 = vld [vmem:[#allocation3 + $0xd0] sm:$0xff] }
 0x541   : > { %v2268_v17 = vpop.permute.xlu0 %2267  ;;  %v2308_v18 = vpop.permute.xlu1 %2307 }
 0x542   : > { %v2273_v24 = vsel %vm493_vm1, %v2266_v11, %v2268_v17  ;;  %v2313_v25 = vsel %vm587_vm2, %v2306_v21, %v2308_v18 }
 0x545   : > { %v2380_v38 = vpop.permute.xlu0 %2379  ;;  %v2548_v10 = vpop.permute.xlu1 %2547 }
 0x546   : > { %v2553_v8 = vsel %vm1151_vm9, %v2546_v32, %v2548_v10 }
 0x549   : > { %v2388_v36 = vpop.permute.xlu0 %2387  ;;  %v2348_v35 = vpop.permute.xlu1 %2347 }
 0x54d   : > { %v2310_v33 = vpop.permute.xlu0 %2309  ;;  %v2270_v37 = vpop.permute.xlu1 %2269 }
 0x54e   : > { %v2314_v7 = vsel %vm587_vm2, %v2308_v18, %v2310_v33  ;;  %2326 = vst.msk [vmem:[#allocation3 + $0x88] sm:$0xff] %vm416_vm0, %v2310_v33  ;;  %v2274_v39 = vsel %vm493_vm1, %v2268_v17, %v2270_v37  ;;  %2286 = vst.msk [vmem:[#allocation3 + $0x58] sm:$0xff] %vm416_vm0, %v2270_v37 }
 0x54f   : > { %2695 = vmatprep.subr.bf16.mxu0 %v2274_v39 }
 0x550   : > { %2696 = vmatpush1.bf16.msra.mxu0 %v2273_v24 }
 0x551   : > { %v2550_v40 = vpop.permute.xlu0 %2549  ;;  %v2346_v13 = vpop.permute.xlu1 %2345  ;;  %2697 = vmatprep.subr.bf16.mxu0 %v2312_v31 }
 0x552   : > { %v2554_v56 = vsel %vm1151_vm9, %v2548_v10, %v2550_v40  ;;  %2566 = vst.msk [vmem:[#allocation3 + $0x1a8] sm:$0xff] %vm416_vm0, %v2550_v40  ;;  %v2353_v51 = vsel %vm681_vm3, %v2346_v13, %v2348_v35  ;;  %v3383_v13 = vld [vmem:[%s4283_s5] ss:$12 sps:$4 sm:$0xff]  }
 0x553   : > { %2744 = vmatprep.subr.bf16.mxu1 %v2554_v56  ;;  %v2625_v56 = vld [vmem:[#allocation3 + $0x190] sm:$0xff] }
 0x554   : > { %2698 = vmatpush1.bf16.msra.mxu0 %v2311_v6  ;;  %2745 = vmatpush1.bf16.msra.mxu1 %v2553_v8 }
 0x555   : > { %v2420_v49 = vpop.permute.xlu0 %2419  ;;  %v2382_v59 = vpop.permute.xlu1 %2381  ;;  %2699 = vmatprep.subr.bf16.mxu0 %v2314_v7  ;;  %3175 = vmatprep.subr.bf16.mxu1 %v2601_v41  ;;  %v2586_v28 = vld [vmem:[#allocation3 + $0x58] sm:$0xff]  ;;  %v2592_v18 = vld [vmem:[#allocation3 + $0x88] sm:$0xff] }
 0x556   : > { %v2391_v42 = vsel %vm775_vm4, %v2380_v38, %v2382_v59  ;;  %v2392_v22 = vsel %vm775_vm4, %v2382_v59, %v2384_v20 }
 0x557   : > { %3112 = vmatmul.mubr.msk.bf16.vlgmr.msra.gmra.mrb[40].mxu1 %vm1759_vm10, %v4198_v9 }
 0x558   : > { %2700 = vmatpush1.bf16.msra.mxu0 %v2313_v25  ;;  %3176 = vmatpush3.bf16.msra.mxu1 %v2577_v58 }
 0x559   : > { %v2350_v43 = vpop.permute.xlu0 %2349  ;;  %v2424_v44 = vpop.permute.xlu1 %2423  ;;  %2701 = vmatprep.subr.bf16.mxu0 %v2352_v63  ;;  %2784 = vmatprep.mubr.bf16.mxu1 %v3458_v23  ;;  %v2628_v41 = vld [vmem:[#allocation3 + $0x1a8] sm:$0xff] }
 0x55a   : > { %v2354_v45 = vsel %vm681_vm3, %v2348_v35, %v2350_v43  ;;  %2366 = vst.msk [vmem:[#allocation3 + $0xb8] sm:$0xff] %vm416_vm0, %v2350_v43  ;;  %2443 = vst.msk [vmem:[#allocation3 + $0x100] sm:$0xff] %vm416_vm0, %v2424_v44 }
 0x55c   : > { %2702 = vmatpush1.bf16.msra.mxu0 %v2351_v29  ;;  %v2589_v29 = vld [vmem:[#allocation3 + $0x70] sm:$0xff] }
 0x55d   : > { %v2390_v47 = vpop.permute.xlu0 %2389  ;;  %v2386_v52 = vpop.permute.xlu1 %2385  ;;  %2703 = vmatprep.subr.bf16.mxu0 %v2354_v45 }
 0x55e   : > { %v2394_v60 = vsel %vm775_vm4, %v2388_v36, %v2390_v47  ;;  %2406 = vst.msk [vmem:[#allocation3 + $0xe8] sm:$0xff] %vm416_vm0, %v2390_v47  ;;  %v2393_v23 = vsel %vm775_vm4, %v2386_v52, %v2388_v36  ;;  %v2595_v36 = vld [vmem:[#allocation3 + $0xa0] sm:$0xff] }
 0x55f   : > { %3113 = vmatmul.mubr.msk.bf16.gmra.mrb[44].mxu1 %vm1759_vm10, %v4211_v46 }
 0x560   : > { %2704 = vmatpush1.bf16.msra.mxu0 %v2353_v51  ;;  %2827 = vmatprep.mubr.bf16.mxu1 %v4150_v55  ;;  %v3386_v51 = vld [vmem:[%s4283_s5 + $0x1c] ss:$12 sps:$4 sm:$0xff]  }
 0x561   : > { %v2428_v61 = vpop.permute.xlu0 %2427  ;;  %v2422_v62 = vpop.permute.xlu1 %2421  ;;  %2705 = vmatprep.subr.bf16.mxu0 %v2392_v22  ;;  %v2607_v55 = vld [vmem:[#allocation3 + $0x100] sm:$0xff]  ;;  %v2598_v40 = vld [vmem:[#allocation3 + $0xb8] sm:$0xff] }
 0x562   : > { %v2431_v0 = vsel %vm869_vm5, %v2420_v49, %v2422_v62  ;;  %v2432_v1 = vsel %vm869_vm5, %v2422_v62, %v2424_v44  ;;  %v3388_v49 = vld [vmem:[%s4283_s5 + $0x18] ss:$12 sps:$4 sm:$0xff]  }
 0x564   : > { %2706 = vmatpush1.bf16.msra.mxu0 %v2391_v42 }
 0x565   : > { %v2430_v3 = vpop.permute.xlu0 %2429  ;;  %v2464_v4 = vpop.permute.xlu1 %2463  ;;  %v2604_v26 = vld [vmem:[#allocation3 + $0xe8] sm:$0xff]  ;;  %2707 = vmatprep.subr.bf16.mxu0 %v2394_v60 }
 0x566   : > { %v2434_v12 = vsel %vm869_vm5, %v2428_v61, %v2430_v3  ;;  %2446 = vst.msk [vmem:[#allocation3 + $0x118] sm:$0xff] %vm416_vm0, %v2430_v3  ;;  %2483 = vst.msk [vmem:[#allocation3 + $0x130] sm:$0xff] %vm416_vm0, %v2464_v4  ;;  %3177 = vmatprep.subr.bf16.mxu1 %v2604_v26 }
 0x567   : > { %3178 = vmatpush3.bf16.msra.mxu1 %v2580_v2 }
 0x568   : > { %3179 = vmatprep.subr.bf16.mxu1 %v2607_v55  ;;  %2708 = vmatpush1.bf16.msra.mxu0 %v2393_v23 }
 0x569   : > { %v2460_v14 = vpop.permute.xlu0 %2459  ;;  %v2426_v15 = vpop.permute.xlu1 %2425  ;;  %2709 = vmatprep.subr.bf16.mxu0 %v2432_v1 }
 0x56a   : > { %v2433_v53 = vsel %vm869_vm5, %v2426_v15, %v2428_v61 }
 0x56b   : > { %3180 = vmatpush3.bf16.msra.mxu1 %v2583_v16 }
 0x56c   : > { %2710 = vmatpush1.bf16.msra.mxu0 %v2431_v0 }
 0x56d   : > { %v2470_v30 = vpop.permute.xlu0 %2469  ;;  %v2462_v54 = vpop.permute.xlu1 %2461  ;;  %v2610_v6 = vld [vmem:[#allocation3 + $0x118] sm:$0xff]  ;;  %2711 = vmatprep.subr.bf16.mxu0 %v2434_v12  ;;  %v2613_v19 = vld [vmem:[#allocation3 + $0x130] sm:$0xff] }
 0x56e   : > { %2486 = vst.msk [vmem:[#allocation3 + $0x148] sm:$0xff] %vm416_vm0, %v2470_v30  ;;  %v2471_v31 = vsel %vm963_vm6, %v2460_v14, %v2462_v54  ;;  %v2472_v20 = vsel %vm963_vm6, %v2462_v54, %v2464_v4  ;;  %3181 = vmatprep.subr.bf16.mxu1 %v2610_v6 }
 0x56f   : > { %3182 = vmatpush3.bf16.msra.mxu1 %v2586_v28 }
 0x570   : > { %3183 = vmatprep.subr.bf16.mxu1 %v2613_v19  ;;  %2712 = vmatpush1.bf16.msra.mxu0 %v2433_v53 }
 0x571   : > { %v2468_v48 = vpop.permute.xlu0 %2467  ;;  %v2504_v11 = vpop.permute.xlu1 %2503  ;;  %2713 = vmatprep.subr.bf16.mxu0 %v2472_v20 }
 0x572   : > { %v2474_v50 = vsel %vm963_vm6, %v2468_v48, %v2470_v30  ;;  %2523 = vst.msk [vmem:[#allocation3 + $0x160] sm:$0xff] %vm416_vm0, %v2504_v11 }
 0x573   : > { %3184 = vmatpush3.bf16.msra.mxu1 %v2589_v29 }
 0x574   : > { %2714 = vmatpush1.bf16.msra.mxu0 %v2471_v31 }
 0x575   : > { %v2510_v63 = vpop.permute.xlu0 %2509  ;;  %v2466_v32 = vpop.permute.xlu1 %2465  ;;  %v2616_v21 = vld [vmem:[#allocation3 + $0x148] sm:$0xff]  ;;  %2715 = vmatprep.subr.bf16.mxu0 %v2474_v50 }
 0x576   : > { %2526 = vst.msk [vmem:[#allocation3 + $0x178] sm:$0xff] %vm416_vm0, %v2510_v63  ;;  %v2473_v17 = vsel %vm963_vm6, %v2466_v32, %v2468_v48  ;;  %3185 = vmatprep.subr.bf16.mxu1 %v2616_v21 }
 0x577   : > { %3186 = vmatpush3.bf16.msra.mxu1 %v2592_v18 }
 0x578   : > { %2716 = vmatpush1.bf16.msra.mxu0 %v2473_v17 }
 0x579   : > { %v2500_v24 = vpop.permute.xlu0 %2499  ;;  %v2502_v25 = vpop.permute.xlu1 %2501  ;;  %v2619_v38 = vld [vmem:[#allocation3 + $0x160] sm:$0xff] }
 0x57a   : > { %v2511_v10 = vsel %vm1057_vm8, %v2500_v24, %v2502_v25  ;;  %v2512_v8 = vsel %vm1057_vm8, %v2502_v25, %v2504_v11  ;;  %3187 = vmatprep.subr.bf16.mxu1 %v2619_v38 }
 0x57b   : > { %3188 = vmatpush3.bf16.msra.mxu1 %v2595_v36  ;;  %2717 = vmatprep.subr.bf16.mxu0 %v2512_v8 }
 0x57c   : > { %2718 = vmatpush1.bf16.msra.mxu0 %v2511_v10 }
 0x57d   : > { %v2506_v35 = vpop.permute.xlu0 %2505  ;;  %v2508_v33 = vpop.permute.xlu1 %2507  ;;  %v2622_v37 = vld [vmem:[#allocation3 + $0x178] sm:$0xff] }
 0x57e   : > { %v2513_v7 = vsel %vm1057_vm8, %v2506_v35, %v2508_v33  ;;  %v2514_v39 = vsel %vm1057_vm8, %v2508_v33, %v2510_v63  ;;  %3189 = vmatprep.subr.bf16.mxu1 %v2622_v37 }
 0x57f   : > { %3190 = vmatpush3.bf16.msra.mxu1 %v2598_v40  ;;  %2719 = vmatprep.subr.bf16.mxu0 %v2514_v39 }
 0x580   : > { %3235 = vmatprep.subr.bf16.mxu1 %v2625_v56  ;;  %2720 = vmatpush1.bf16.msra.mxu0 %v2513_v7 }
 0x582   : > { %2828 = vmatmul.mubr.bf16.vlgmr.msra.gmra.mrb[48].mxu1 %v3383_v13 }
 0x583   : > { %3236 = vmatpush3.bf16.msra.mxu1 %v2625_v56  ;;  %2835 = vmatprep.mubr.bf16.mxu1 %v3386_v51 }
 0x584   : > { %3237 = vmatprep.subr.bf16.mxu1 %v2628_v41  ;;  %2722 = vmatmul.mubr.bf16.vlgmr.msra.gmra.mrb[8].mxu0 %v3383_v13 }
 0x585   : > { %2731 = vmatprep.mubr.bf16.mxu0 %v3386_v51 }
 0x587   : > { %3238 = vmatpush3.bf16.msra.mxu1 %v2628_v41 }
 0x58a   : > { %2836 = vmatmul.mubr.bf16.gmra.mrb[52].mxu1 %v3388_v49 }
 0x58b   : > { %3239 = vmatprep.mubr.msk.bf16.mxu1 %vm1759_vm10, %v4198_v9 }
 0x58c   : > { %2732 = vmatmul.mubr.bf16.gmra.mrb[12].mxu0 %v3388_v49 }
 0x58e   : > { %v2636_v60 = vpop.permute.xlu1 %2635  ;;  %v2641_v3 = vpop.permute.xlu0 %2640 }
 0x592   : > { %3240 = vmatmul.mubr.msk.bf16.vlgmr.msra.gmra.mrb[56].mxu1 %vm1759_vm10, %v4211_v46  ;;  %v2646_v6 = vpop.permute.xlu1 %2645  ;;  %v2651_v29 = vpop.permute.xlu0 %2650 }
 0x62a   : > { %v2776_v59 = vpop.f32.mrb[40].mxu1 }
 0x62b   : > { %v2778_v58 = vpop.f32.mrb[41].mxu1 }
 0x62c   : > { %v2780_v42 = vpop.f32.mrb[42].mxu1 }
 0x62d   : > { %v2782_v22 = vpop.f32.mrb[43].mxu1 }
 0x632   : > { %v2786_v43 = vpop.f32.mrb[44].mxu1 }
 0x633   : > { %v2788_v44 = vpop.f32.mrb[45].mxu1 }
 0x634   : > { %v2790_v45 = vpop.f32.mrb[46].mxu1 }
 0x635   : > { %v2792_v47 = vpop.f32.mrb[47].mxu1 }
 0x655   : > { %v3191_v52 = vpop.f32.mrb[48].mxu1 }
 0x656   : > { %v3192_v23 = vpop.f32.mrb[49].mxu1 }
 0x657   : > { %v3193_v61 = vadd.f32 %v3192_v23, %v3191_v52  ;;  %v3194_v62 = vpop.f32.mrb[50].mxu1  ;;  %v2723_v0 = vpop.f32.mrb[8].mxu0 }
 0x658   : > { %v3195_v9 = vpop.f32.mrb[51].mxu1  ;;  %v2724_v1 = vadd.f32 %v2723_v0, %v2636_v60  ;;  %v2725_v2 = vpop.f32.mrb[9].mxu0 }
 0x659   : > { %v3196_v46 = vadd.f32 %v3195_v9, %v3194_v62  ;;  %v2726_v4 = vadd.f32 %v2725_v2, %v2636_v60  ;;  %v2727_v26 = vpop.f32.mrb[10].mxu0  ;;  %v2830_v35 = vadd.f32 %v3193_v61, %v2636_v60 }
 0x65a   : > { %v2777_v12 = vadd.f32 %v2776_v59, %v2724_v1  ;;  %v2728_v55 = vadd.f32 %v2727_v26, %v2641_v3  ;;  %v2729_v14 = vpop.f32.mrb[11].mxu0 }
 0x65b   : > { %v2779_v15 = vadd.f32 %v2778_v58, %v2726_v4  ;;  %v2730_v53 = vadd.f32 %v2729_v14, %v2641_v3  ;;  %v2833_v56 = vadd.f32 %v3196_v46, %v2641_v3 }
 0x65c   : > { %2905 = vst [vmem:[%s4253_s21] sm:$0xff] %v2777_v12  ;;  %v2781_v16 = vadd.f32 %v2780_v42, %v2728_v55 }
 0x65d   : > { %v3197_v30 = vpop.f32.mrb[52].mxu1  ;;  %2906 = vst [vmem:[%s4253_s21 + $0x8] sm:$0xff] %v2779_v15  ;;  %v2783_v54 = vadd.f32 %v2782_v22, %v2730_v53 }
 0x65e   : > { %v3198_v31 = vpop.f32.mrb[53].mxu1  ;;  %2908 = vst [vmem:[%s4253_s21 + $0x18] sm:$0xff] %v2781_v16 }
 0x65f   : > { %v3199_v20 = vadd.f32 %v3198_v31, %v3197_v30  ;;  %v3200_v28 = vpop.f32.mrb[54].mxu1  ;;  %2909 = vst [vmem:[%s4253_s21 + $0x20] sm:$0xff] %v2783_v54  ;;  %v2733_v19 = vpop.f32.mrb[12].mxu0 }
 0x660   : > { %v3201_v48 = vpop.f32.mrb[55].mxu1  ;;  %v2734_v11 = vadd.f32 %v2733_v19, %v2646_v6  ;;  %v2735_v50 = vpop.f32.mrb[13].mxu0 }
 0x661   : > { %v3202_v63 = vadd.f32 %v3201_v48, %v3200_v28  ;;  %v2736_v32 = vadd.f32 %v2735_v50, %v2646_v6  ;;  %v2737_v21 = vpop.f32.mrb[14].mxu0  ;;  %v2838_v10 = vadd.f32 %v3199_v20, %v2646_v6 }
 0x662   : > { %v2787_v17 = vadd.f32 %v2786_v43, %v2734_v11  ;;  %v2738_v18 = vadd.f32 %v2737_v21, %v2651_v29  ;;  %v2739_v24 = vpop.f32.mrb[15].mxu0 }
 0x663   : > { %v2789_v25 = vadd.f32 %v2788_v44, %v2736_v32  ;;  %v2740_v38 = vadd.f32 %v2739_v24, %v2651_v29  ;;  %v2841_v39 = vadd.f32 %v3202_v63, %v2651_v29 }
 0x664   : > { %2911 = vst [vmem:[%s4253_s21 + $0x30] sm:$0xff] %v2787_v17  ;;  %v2791_v8 = vadd.f32 %v2790_v45, %v2738_v18 }
 0x665   : > { %v3241_v36 = vpop.f32.mrb[56].mxu1  ;;  %2912 = vst [vmem:[%s4253_s21 + $0x38] sm:$0xff] %v2789_v25  ;;  %v2793_v33 = vadd.f32 %v2792_v47, %v2740_v38 }
 0x666   : > { %v2887_v37 = vadd.f32 %v3241_v36, %v2838_v10  ;;  %v2878_v7 = vpop.f32.mrb[57].mxu1  ;;  %2914 = vst [vmem:[%s4253_s21 + $0x48] sm:$0xff] %v2791_v8 }
 0x667   : > { %v2879_v40 = vadd.f32 %v2878_v7, %v2830_v35  ;;  %v3242_v13 = vpop.f32.mrb[58].mxu1  ;;  %2915 = vst [vmem:[%s4253_s21 + $0x50] sm:$0xff] %v2793_v33 }
 0x668   : > { %v2901_v51 = vadd.f32 %v2887_v37, %v3954_v27  ;;  %v2890_v41 = vadd.f32 %v3242_v13, %v2841_v39  ;;  %v2881_v49 = vpop.f32.mrb[59].mxu1 }
 0x669   : > { %v2895_v59 = vadd.f32 %v2879_v40, %v3937_v57  ;;  %v2882_v58 = vadd.f32 %v2881_v49, %v2833_v56 }
 0x66a   : > { %2913 = vst.msk [vmem:[%s4253_s21 + $0x40] sm:$0xff] %vm416_vm0, %v2901_v51  ;;  %v2904_v42 = vadd.f32 %v2890_v41, %v3957_v34 }
 0x66b   : > { %2907 = vst.msk [vmem:[%s4253_s21 + $0x10] sm:$0xff] %vm416_vm0, %v2895_v59  ;;  %v2898_v22 = vadd.f32 %v2882_v58, %v3945_v5 }
 0x66c   : > { %2916 = vst.msk [vmem:[%s4253_s21 + $0x58] sm:$0xff] %vm416_vm0, %v2904_v42 }
 0x66d   : > { %2910 = vst.msk [vmem:[%s4253_s21 + $0x28] sm:$0xff] %vm416_vm0, %v2898_v22 }
 0x66e PF: > { %s19_s30 = sadd.s32 1, %s3451_s30  }
 0x66f   : > { %p16_p4 = scmp.ge.s32.totalorder %s19_s30, 4  }
 0x671   :  { %18 = sbr.rel (!%p16_p4) target bundleno = 1 (0x1), region = 89 }

</bundles_post_ra>
